<compile_context>
chip_gen: v5e
topology: v5e:2x2
jax: 0.10.0
libtpu: 0.0.40
codegen_flags: <defaults>
</compile_context>

<pallas_src>
import numpy as np

import jax
import jax.numpy as jnp
from jax.experimental import pallas as pl
from jax.experimental.pallas import tpu as pltpu

BN_EPS = 1e-5          # PyTorch BatchNorm2d default
IMAGE_CHANNEL = 1
INITIAL_CHANNEL = 4
Z_DIM = 16
IMG = 28
H_DIM = 8 * 7 * 7      # 392


# --------------------------- fused Pallas kernel ---------------------------

def _vae_fused_kernel(x_ref, eps_ref, u1_ref, u2_ref, u3_ref, u4_ref,
                      fc12w_ref, fc12b_ref, fc3w_ref, fc3b_ref, b4_ref,
                      pa_ref, pat_ref, pb_ref, pbt_ref,
                      g1_ref, be1_ref, g2_ref, be2_ref, g3_ref, be3_ref,
                      recon_ref, ml_ref):
    f32 = jnp.float32
    bf16 = jnp.bfloat16
    n = x_ref.shape[0]

    def bn_relu(y, pool_ref, poolt_ref, g_ref, b_ref, hw):
        # Training-mode BatchNorm2d (batch stats, biased var) + ReLU.
        # Per-channel sums of y and y^2 in ONE (2,F)@(F,C) pooling matmul;
        # scale/shift broadcast back in ONE (2,C)@(C,F) matmul.
        cnt = float(n * hw)
        stat = jnp.concatenate([jnp.sum(y, axis=0, keepdims=True),
                                jnp.sum(y * y, axis=0, keepdims=True)], axis=0)
        s12 = jnp.dot(stat, pool_ref[...], preferred_element_type=f32)     # (2, C)
        mean = s12[0:1, :] / cnt
        var = s12[1:2, :] / cnt - mean * mean
        scale = g_ref[...] * jax.lax.rsqrt(var + BN_EPS)                   # (1, C)
        shift = b_ref[...] - mean * scale                                  # (1, C)
        maps = jnp.dot(jnp.concatenate([scale, shift], axis=0),
                       poolt_ref[...], preferred_element_type=f32)         # (2, F)
        return jnp.maximum(y * maps[0:1, :] + maps[1:2, :], 0.0)

    # ---------------- encoder ----------------
    # Conv2d(1,4,4,2,1) + BN(4) + ReLU   (conv bias dropped: cancelled by BN)
    y1 = jnp.dot(x_ref[...].astype(bf16), u1_ref[...],
                 preferred_element_type=f32)                                # (N, 784)
    a1 = bn_relu(y1, pa_ref, pat_ref, g1_ref, be1_ref, 14 * 14)

    # Conv2d(4,8,4,2,1) + BN(8) + ReLU + Flatten (channel-major == torch.view)
    y2 = jnp.dot(a1.astype(bf16), u2_ref[...],
                 preferred_element_type=f32)                                # (N, 392)
    h = bn_relu(y2, pb_ref, pbt_ref, g2_ref, be2_ref, 7 * 7)

    # ---------------- bottleneck ----------------
    # fc1 | fc2 merged; clamp logvar (as in the PyTorch reference);
    # reparameterize with external eps.
    ml = jnp.dot(h.astype(bf16), fc12w_ref[...],
                 preferred_element_type=f32) + fc12b_ref[...]               # (N, 32)
    zd = eps_ref.shape[1]
    mu = ml[:, :zd]
    lv = jnp.clip(ml[:, zd:2 * zd], -4.0, 4.0)
    z = mu + jnp.exp(0.5 * lv) * eps_ref[...]
    ml_ref[...] = jnp.concatenate([mu, lv], axis=1)                         # (N, 32)

    # ---------------- decoder ----------------
    # ReLU(fc3(z)); UnFlatten is implicit in the channel-major flat layout.
    d = jnp.maximum(jnp.dot(z.astype(bf16), fc3w_ref[...],
                            preferred_element_type=f32) + fc3b_ref[...],
                    0.0)                                                    # (N, 392)

    # ConvTranspose2d(8,4,4,2,1) + BN(4) + ReLU  (bias dropped: cancelled by BN)
    y3 = jnp.dot(d.astype(bf16), u3_ref[...],
                 preferred_element_type=f32)                                # (N, 784)
    a3 = bn_relu(y3, pa_ref, pat_ref, g3_ref, be3_ref, 14 * 14)

    # ConvTranspose2d(4,1,4,2,1) + bias + Sigmoid
    y4 = jnp.dot(a3.astype(bf16), u4_ref[...],
                 preferred_element_type=f32) + b4_ref[...]
    recon_ref[...] = jax.nn.sigmoid(y4)                                     # (N, 784)


# ------------------------- weight packing (one-time) -------------------------

def _conv_unrolled(w, hin, win, stride, pad):
    """PyTorch Conv2d weight (Cout,Cin,k,k) -> dense U with
    flat_out = flat_in @ U, both flattened channel-major (c, h, w)."""
    cout, cin, k, _ = w.shape
    ho = (hin + 2 * pad - k) // stride + 1
    wo = (win + 2 * pad - k) // stride + 1
    sel = np.zeros((hin, win, ho, wo, k, k), np.float32)
    for oi in range(ho):
        for oj in range(wo):
            for kr in range(k):
                for kc in range(k):
                    ii = stride * oi + kr - pad
                    ij = stride * oj + kc - pad
                    if 0 <= ii < hin and 0 <= ij < win:
                        sel[ii, ij, oi, oj, kr, kc] = 1.0
    u = jnp.einsum("hwijuv,ocuv->chwoij", jnp.asarray(sel), w)
    return u.reshape(cin * hin * win, cout * ho * wo)


def _convT_unrolled(w, hin, win, stride, pad):
    """PyTorch ConvTranspose2d weight (Cin,Cout,k,k) -> dense U (adjoint conv)."""
    cin, cout, k, _ = w.shape
    ho = stride * (hin - 1) + k - 2 * pad
    wo = stride * (win - 1) + k - 2 * pad
    sel = np.zeros((hin, win, ho, wo, k, k), np.float32)
    for ii in range(hin):
        for ij in range(win):
            for kr in range(k):
                for kc in range(k):
                    oi = stride * ii + kr - pad
                    oj = stride * ij + kc - pad
                    if 0 <= oi < ho and 0 <= oj < wo:
                        sel[ii, ij, oi, oj, kr, kc] = 1.0
    u = jnp.einsum("hwijuv,cduv->chwdij", jnp.asarray(sel), w)
    return u.reshape(cin * hin * win, cout * ho * wo)


def pack_params(params):
    """One-time repacking of PyTorch-layout weights into fused-kernel operands.
    Heavy matmul operands are stored in bfloat16 (halves the weight DMA, which
    dominates this kernel); BN/pooling/bias operands stay f32 for elementwise
    precision.  enc1_b / enc2_b / dec1_b are intentionally omitted: they feed
    training-mode BatchNorm and are exactly cancelled by the batch mean."""
    bf16 = jnp.bfloat16
    c1, c2 = INITIAL_CHANNEL, 2 * INITIAL_CHANNEL
    u1 = _conv_unrolled(params["enc1_w"], 28, 28, 2, 1)    # (784, 784)
    u2 = _conv_unrolled(params["enc2_w"], 14, 14, 2, 1)    # (784, 392)
    u3 = _convT_unrolled(params["dec1_w"], 7, 7, 2, 1)     # (392, 784)
    u4 = _convT_unrolled(params["dec2_w"], 14, 14, 2, 1)   # (784, 784)
    pool_a = jnp.asarray(np.kron(np.eye(c1, dtype=np.float32),
                                 np.ones((14 * 14, 1), np.float32)))  # (784, 4)
    pool_b = jnp.asarray(np.kron(np.eye(c2, dtype=np.float32),
                                 np.ones((7 * 7, 1), np.float32)))    # (392, 8)
    return {
        "u1": u1.astype(bf16), "u2": u2.astype(bf16),
        "u3": u3.astype(bf16), "u4": u4.astype(bf16),
        "fc12_w": jnp.concatenate([params["fc1_w"].T, params["fc2_w"].T],
                                  axis=1).astype(bf16),
        "fc12_b": jnp.concatenate([params["fc1_b"], params["fc2_b"]]).reshape(1, -1),
        "fc3_w": params["fc3_w"].T.astype(bf16),
        "fc3_b": params["fc3_b"].reshape(1, -1),
        "dec2_bmap": jnp.repeat(params["dec2_b"], 28 * 28).reshape(1, -1),
        "pool_a": pool_a, "pool_at": pool_a.T,
        "pool_b": pool_b, "pool_bt": pool_b.T,
        "bn1_g": params["bn1_g"].reshape(1, -1), "bn1_b": params["bn1_b"].reshape(1, -1),
        "bn2_g": params["bn2_g"].reshape(1, -1), "bn2_b": params["bn2_b"].reshape(1, -1),
        "bn3_g": params["bn3_g"].reshape(1, -1), "bn3_b": params["bn3_b"].reshape(1, -1),
    }


# ------------------------------ parameters --------------------------------

def init_params(key):
    ks = jax.random.split(key, 8)

    def winit(k, shape, fan_in):
        return jax.random.normal(k, shape, jnp.float32) / jnp.sqrt(float(fan_in))

    p = {}
    # encoder
    p["enc1_w"] = winit(ks[0], (4, 1, 4, 4), 1 * 16)        # Conv2d(1, 4, 4, 2, 1)
    p["enc1_b"] = jnp.zeros((4,), jnp.float32)
    p["bn1_g"], p["bn1_b"] = jnp.ones((4,), jnp.float32), jnp.zeros((4,), jnp.float32)
    p["enc2_w"] = winit(ks[1], (8, 4, 4, 4), 4 * 16)        # Conv2d(4, 8, 4, 2, 1)
    p["enc2_b"] = jnp.zeros((8,), jnp.float32)
    p["bn2_g"], p["bn2_b"] = jnp.ones((8,), jnp.float32), jnp.zeros((8,), jnp.float32)
    # bottleneck (PyTorch Linear weights are (out, in))
    p["fc1_w"] = winit(ks[2], (Z_DIM, H_DIM), H_DIM)
    p["fc1_b"] = jnp.zeros((Z_DIM,), jnp.float32)
    p["fc2_w"] = winit(ks[3], (Z_DIM, H_DIM), H_DIM)
    p["fc2_b"] = jnp.zeros((Z_DIM,), jnp.float32)
    p["fc3_w"] = winit(ks[4], (H_DIM, Z_DIM), Z_DIM)
    p["fc3_b"] = jnp.zeros((H_DIM,), jnp.float32)
    # decoder (ConvTranspose2d weights are (Cin, Cout, k, k))
    p["dec1_w"] = winit(ks[5], (8, 4, 4, 4), 8 * 16)
    p["dec1_b"] = jnp.zeros((4,), jnp.float32)
    p["bn3_g"], p["bn3_b"] = jnp.ones((4,), jnp.float32), jnp.zeros((4,), jnp.float32)
    p["dec2_w"] = winit(ks[6], (4, 1, 4, 4), 4 * 16)
    p["dec2_b"] = jnp.zeros((1,), jnp.float32)
    return p


# ------------------------------ forward -----------------------------------

def vae_forward(packed, x, eps):
    n = x.shape[0]
    feat = IMAGE_CHANNEL * IMG * IMG
    # NCHW flatten == channel-major flat order used by every packed matrix.
    x2d = x.reshape(n, feat)

    vmem = [pl.BlockSpec(memory_space=pltpu.MemorySpace.VMEM) for _ in range(21)]
    out_shape = (jax.ShapeDtypeStruct((n, feat), jnp.float32),
                 jax.ShapeDtypeStruct((n, 2 * Z_DIM), jnp.float32))
    out_specs = tuple(pl.BlockSpec(memory_space=pltpu.MemorySpace.VMEM)
                      for _ in range(2))

    recon2d, ml = pl.pallas_call(
        _vae_fused_kernel,
        out_shape=out_shape,
        in_specs=vmem,
        out_specs=out_specs,
        compiler_params=pltpu.CompilerParams(vmem_limit_bytes=16 * 1024 * 1024),
    )(x2d, eps,
      packed["u1"], packed["u2"], packed["u3"], packed["u4"],
      packed["fc12_w"], packed["fc12_b"], packed["fc3_w"], packed["fc3_b"],
      packed["dec2_bmap"],
      packed["pool_a"], packed["pool_at"], packed["pool_b"], packed["pool_bt"],
      packed["bn1_g"], packed["bn1_b"],
      packed["bn2_g"], packed["bn2_b"],
      packed["bn3_g"], packed["bn3_b"])

    recon = recon2d.reshape(n, IMAGE_CHANNEL, IMG, IMG)
    mu = ml[:, :Z_DIM]
    logvar = ml[:, Z_DIM:]
    return recon, mu, logvar


# ------------------------------ driver -------------------------------------

if __name__ == "__main__":
    key = jax.random.PRNGKey(0)
    k_param, k_x, k_eps = jax.random.split(key, 3)

    params = init_params(k_param)
    packed = pack_params(params)          # one-time weight repacking (not timed)

    x = jax.random.uniform(k_x, (2, IMAGE_CHANNEL, IMG, IMG), jnp.float32)  # NCHW
    eps = jax.random.normal(k_eps, (2, Z_DIM), jnp.float32)  # torch.randn noise

    fwd = jax.jit(vae_forward)
    recon, mu, logvar = fwd(packed, x, eps)
    jax.block_until_ready((recon, mu, logvar))

    assert recon.shape == (2, IMAGE_CHANNEL, IMG, IMG)
    assert mu.shape == (2, Z_DIM) and logvar.shape == (2, Z_DIM)
    assert bool(jnp.all(jnp.isfinite(recon)))
    assert bool(jnp.all(jnp.isfinite(mu))) and bool(jnp.all(jnp.isfinite(logvar)))
    print("KERNEL_OK")
</pallas_src>

<mosaic_0001>
module attributes {stable_mosaic.version = 11 : i64} {
  func.func @_vae_fused_kernel(%arg0: memref<2x784xf32, #tpu.memory_space<vmem>>, %arg1: memref<2x16xf32, #tpu.memory_space<vmem>>, %arg2: memref<784x784xbf16, #tpu.memory_space<vmem>>, %arg3: memref<784x392xbf16, #tpu.memory_space<vmem>>, %arg4: memref<392x784xbf16, #tpu.memory_space<vmem>>, %arg5: memref<784x784xbf16, #tpu.memory_space<vmem>>, %arg6: memref<392x32xbf16, #tpu.memory_space<vmem>>, %arg7: memref<1x32xf32, #tpu.memory_space<vmem>>, %arg8: memref<16x392xbf16, #tpu.memory_space<vmem>>, %arg9: memref<1x392xf32, #tpu.memory_space<vmem>>, %arg10: memref<1x784xf32, #tpu.memory_space<vmem>>, %arg11: memref<784x4xf32, #tpu.memory_space<vmem>>, %arg12: memref<4x784xf32, #tpu.memory_space<vmem>>, %arg13: memref<392x8xf32, #tpu.memory_space<vmem>>, %arg14: memref<8x392xf32, #tpu.memory_space<vmem>>, %arg15: memref<1x4xf32, #tpu.memory_space<vmem>>, %arg16: memref<1x4xf32, #tpu.memory_space<vmem>>, %arg17: memref<1x8xf32, #tpu.memory_space<vmem>>, %arg18: memref<1x8xf32, #tpu.memory_space<vmem>>, %arg19: memref<1x4xf32, #tpu.memory_space<vmem>>, %arg20: memref<1x4xf32, #tpu.memory_space<vmem>>, %arg21: memref<2x784xf32, #tpu.memory_space<vmem>>, %arg22: memref<2x32xf32, #tpu.memory_space<vmem>>) attributes {dimension_semantics = [], scalar_prefetch = 0 : i64, scratch_operands = 0 : i64, tpu.core_type = #tpu.core_type<tc>} {
    %c0 = arith.constant 0 : index
    %c0_0 = arith.constant 0 : index
    %0 = vector.load %arg0[%c0, %c0_0] : memref<2x784xf32, #tpu.memory_space<vmem>>, vector<2x784xf32>
    %1 = arith.truncf %0 : vector<2x784xf32> to vector<2x784xbf16>
    %c0_1 = arith.constant 0 : index
    %c0_2 = arith.constant 0 : index
    %2 = vector.load %arg2[%c0_1, %c0_2] : memref<784x784xbf16, #tpu.memory_space<vmem>>, vector<784x784xbf16>
    %cst = arith.constant dense<0.000000e+00> : vector<2x784xf32>
    %3 = tpu.matmul %1, %2, %cst {dimension_numbers = #tpu.dot_dimension_numbers<[1], [0], [0], [1], [0, 0, 1, 1], [], []>} : vector<2x784xbf16>, vector<784x784xbf16>, vector<2x784xf32> -> vector<2x784xf32>
    %cst_3 = arith.constant dense<0.000000e+00> : vector<784xf32>
    %4 = vector.multi_reduction <add>, %3, %cst_3 [0] : vector<2x784xf32> to vector<784xf32>
    %5 = vector.shape_cast %4 : vector<784xf32> to vector<1x784xf32>
    %6 = arith.mulf %3, %3 : vector<2x784xf32>
    %cst_4 = arith.constant dense<0.000000e+00> : vector<784xf32>
    %7 = vector.multi_reduction <add>, %6, %cst_4 [0] : vector<2x784xf32> to vector<784xf32>
    %8 = vector.shape_cast %7 : vector<784xf32> to vector<1x784xf32>
    %9 = tpu.concatenate %5, %8 in 0 : vector<1x784xf32>, vector<1x784xf32> -> vector<2x784xf32>
    %c0_5 = arith.constant 0 : index
    %c0_6 = arith.constant 0 : index
    %10 = vector.load %arg11[%c0_5, %c0_6] : memref<784x4xf32, #tpu.memory_space<vmem>>, vector<784x4xf32>
    %cst_7 = arith.constant dense<0.000000e+00> : vector<2x4xf32>
    %11 = tpu.matmul %9, %10, %cst_7 {dimension_numbers = #tpu.dot_dimension_numbers<[1], [0], [0], [1], [0, 0, 1, 1], [], []>} : vector<2x784xf32>, vector<784x4xf32>, vector<2x4xf32> -> vector<2x4xf32>
    %12 = vector.extract_strided_slice %11 {offsets = [0, 0], sizes = [1, 4], strides = [1, 1]} : vector<2x4xf32> to vector<1x4xf32>
    %cst_8 = arith.constant 3.920000e+02 : f32
    %13 = vector.broadcast %cst_8 : f32 to vector<1x4xf32>
    %14 = arith.divf %12, %13 : vector<1x4xf32>
    %15 = vector.extract_strided_slice %11 {offsets = [1, 0], sizes = [1, 4], strides = [1, 1]} : vector<2x4xf32> to vector<1x4xf32>
    %cst_9 = arith.constant 3.920000e+02 : f32
    %16 = vector.broadcast %cst_9 : f32 to vector<1x4xf32>
    %17 = arith.divf %15, %16 : vector<1x4xf32>
    %18 = arith.mulf %14, %14 : vector<1x4xf32>
    %19 = arith.subf %17, %18 : vector<1x4xf32>
    %c0_10 = arith.constant 0 : index
    %c0_11 = arith.constant 0 : index
    %20 = vector.load %arg15[%c0_10, %c0_11] : memref<1x4xf32, #tpu.memory_space<vmem>>, vector<1x4xf32>
    %cst_12 = arith.constant 9.99999974E-6 : f32
    %21 = vector.broadcast %cst_12 : f32 to vector<1x4xf32>
    %22 = arith.addf %19, %21 : vector<1x4xf32>
    %23 = math.rsqrt %22 : vector<1x4xf32>
    %24 = arith.mulf %20, %23 : vector<1x4xf32>
    %c0_13 = arith.constant 0 : index
    %c0_14 = arith.constant 0 : index
    %25 = vector.load %arg16[%c0_13, %c0_14] : memref<1x4xf32, #tpu.memory_space<vmem>>, vector<1x4xf32>
    %26 = arith.mulf %14, %24 : vector<1x4xf32>
    %27 = arith.subf %25, %26 : vector<1x4xf32>
    %28 = tpu.concatenate %24, %27 in 0 : vector<1x4xf32>, vector<1x4xf32> -> vector<2x4xf32>
    %c0_15 = arith.constant 0 : index
    %c0_16 = arith.constant 0 : index
    %29 = vector.load %arg12[%c0_15, %c0_16] : memref<4x784xf32, #tpu.memory_space<vmem>>, vector<4x784xf32>
    %cst_17 = arith.constant dense<0.000000e+00> : vector<2x784xf32>
    %30 = tpu.matmul %28, %29, %cst_17 {dimension_numbers = #tpu.dot_dimension_numbers<[1], [0], [0], [1], [0, 0, 1, 1], [], []>} : vector<2x4xf32>, vector<4x784xf32>, vector<2x784xf32> -> vector<2x784xf32>
    %31 = vector.extract_strided_slice %30 {offsets = [0, 0], sizes = [1, 784], strides = [1, 1]} : vector<2x784xf32> to vector<1x784xf32>
    %32 = vector.broadcast %31 : vector<1x784xf32> to vector<2x784xf32>
    %33 = arith.mulf %3, %32 : vector<2x784xf32>
    %34 = vector.extract_strided_slice %30 {offsets = [1, 0], sizes = [1, 784], strides = [1, 1]} : vector<2x784xf32> to vector<1x784xf32>
    %35 = vector.broadcast %34 : vector<1x784xf32> to vector<2x784xf32>
    %36 = arith.addf %33, %35 : vector<2x784xf32>
    %cst_18 = arith.constant 0.000000e+00 : f32
    %37 = vector.broadcast %cst_18 : f32 to vector<2x784xf32>
    %38 = arith.maximumf %36, %37 : vector<2x784xf32>
    %39 = arith.truncf %38 : vector<2x784xf32> to vector<2x784xbf16>
    %c0_19 = arith.constant 0 : index
    %c0_20 = arith.constant 0 : index
    %40 = vector.load %arg3[%c0_19, %c0_20] : memref<784x392xbf16, #tpu.memory_space<vmem>>, vector<784x392xbf16>
    %cst_21 = arith.constant dense<0.000000e+00> : vector<2x392xf32>
    %41 = tpu.matmul %39, %40, %cst_21 {dimension_numbers = #tpu.dot_dimension_numbers<[1], [0], [0], [1], [0, 0, 1, 1], [], []>} : vector<2x784xbf16>, vector<784x392xbf16>, vector<2x392xf32> -> vector<2x392xf32>
    %cst_22 = arith.constant dense<0.000000e+00> : vector<392xf32>
    %42 = vector.multi_reduction <add>, %41, %cst_22 [0] : vector<2x392xf32> to vector<392xf32>
    %43 = vector.shape_cast %42 : vector<392xf32> to vector<1x392xf32>
    %44 = arith.mulf %41, %41 : vector<2x392xf32>
    %cst_23 = arith.constant dense<0.000000e+00> : vector<392xf32>
    %45 = vector.multi_reduction <add>, %44, %cst_23 [0] : vector<2x392xf32> to vector<392xf32>
    %46 = vector.shape_cast %45 : vector<392xf32> to vector<1x392xf32>
    %47 = tpu.concatenate %43, %46 in 0 : vector<1x392xf32>, vector<1x392xf32> -> vector<2x392xf32>
    %c0_24 = arith.constant 0 : index
    %c0_25 = arith.constant 0 : index
    %48 = vector.load %arg13[%c0_24, %c0_25] : memref<392x8xf32, #tpu.memory_space<vmem>>, vector<392x8xf32>
    %cst_26 = arith.constant dense<0.000000e+00> : vector<2x8xf32>
    %49 = tpu.matmul %47, %48, %cst_26 {dimension_numbers = #tpu.dot_dimension_numbers<[1], [0], [0], [1], [0, 0, 1, 1], [], []>} : vector<2x392xf32>, vector<392x8xf32>, vector<2x8xf32> -> vector<2x8xf32>
    %50 = vector.extract_strided_slice %49 {offsets = [0, 0], sizes = [1, 8], strides = [1, 1]} : vector<2x8xf32> to vector<1x8xf32>
    %cst_27 = arith.constant 9.800000e+01 : f32
    %51 = vector.broadcast %cst_27 : f32 to vector<1x8xf32>
    %52 = arith.divf %50, %51 : vector<1x8xf32>
    %53 = vector.extract_strided_slice %49 {offsets = [1, 0], sizes = [1, 8], strides = [1, 1]} : vector<2x8xf32> to vector<1x8xf32>
    %cst_28 = arith.constant 9.800000e+01 : f32
    %54 = vector.broadcast %cst_28 : f32 to vector<1x8xf32>
    %55 = arith.divf %53, %54 : vector<1x8xf32>
    %56 = arith.mulf %52, %52 : vector<1x8xf32>
    %57 = arith.subf %55, %56 : vector<1x8xf32>
    %c0_29 = arith.constant 0 : index
    %c0_30 = arith.constant 0 : index
    %58 = vector.load %arg17[%c0_29, %c0_30] : memref<1x8xf32, #tpu.memory_space<vmem>>, vector<1x8xf32>
    %cst_31 = arith.constant 9.99999974E-6 : f32
    %59 = vector.broadcast %cst_31 : f32 to vector<1x8xf32>
    %60 = arith.addf %57, %59 : vector<1x8xf32>
    %61 = math.rsqrt %60 : vector<1x8xf32>
    %62 = arith.mulf %58, %61 : vector<1x8xf32>
    %c0_32 = arith.constant 0 : index
    %c0_33 = arith.constant 0 : index
    %63 = vector.load %arg18[%c0_32, %c0_33] : memref<1x8xf32, #tpu.memory_space<vmem>>, vector<1x8xf32>
    %64 = arith.mulf %52, %62 : vector<1x8xf32>
    %65 = arith.subf %63, %64 : vector<1x8xf32>
    %66 = tpu.concatenate %62, %65 in 0 : vector<1x8xf32>, vector<1x8xf32> -> vector<2x8xf32>
    %c0_34 = arith.constant 0 : index
    %c0_35 = arith.constant 0 : index
    %67 = vector.load %arg14[%c0_34, %c0_35] : memref<8x392xf32, #tpu.memory_space<vmem>>, vector<8x392xf32>
    %cst_36 = arith.constant dense<0.000000e+00> : vector<2x392xf32>
    %68 = tpu.matmul %66, %67, %cst_36 {dimension_numbers = #tpu.dot_dimension_numbers<[1], [0], [0], [1], [0, 0, 1, 1], [], []>} : vector<2x8xf32>, vector<8x392xf32>, vector<2x392xf32> -> vector<2x392xf32>
    %69 = vector.extract_strided_slice %68 {offsets = [0, 0], sizes = [1, 392], strides = [1, 1]} : vector<2x392xf32> to vector<1x392xf32>
    %70 = vector.broadcast %69 : vector<1x392xf32> to vector<2x392xf32>
    %71 = arith.mulf %41, %70 : vector<2x392xf32>
    %72 = vector.extract_strided_slice %68 {offsets = [1, 0], sizes = [1, 392], strides = [1, 1]} : vector<2x392xf32> to vector<1x392xf32>
    %73 = vector.broadcast %72 : vector<1x392xf32> to vector<2x392xf32>
    %74 = arith.addf %71, %73 : vector<2x392xf32>
    %cst_37 = arith.constant 0.000000e+00 : f32
    %75 = vector.broadcast %cst_37 : f32 to vector<2x392xf32>
    %76 = arith.maximumf %74, %75 : vector<2x392xf32>
    %77 = arith.truncf %76 : vector<2x392xf32> to vector<2x392xbf16>
    %c0_38 = arith.constant 0 : index
    %c0_39 = arith.constant 0 : index
    %78 = vector.load %arg6[%c0_38, %c0_39] : memref<392x32xbf16, #tpu.memory_space<vmem>>, vector<392x32xbf16>
    %cst_40 = arith.constant dense<0.000000e+00> : vector<2x32xf32>
    %79 = tpu.matmul %77, %78, %cst_40 {dimension_numbers = #tpu.dot_dimension_numbers<[1], [0], [0], [1], [0, 0, 1, 1], [], []>} : vector<2x392xbf16>, vector<392x32xbf16>, vector<2x32xf32> -> vector<2x32xf32>
    %c0_41 = arith.constant 0 : index
    %c0_42 = arith.constant 0 : index
    %80 = vector.load %arg7[%c0_41, %c0_42] : memref<1x32xf32, #tpu.memory_space<vmem>>, vector<1x32xf32>
    %81 = vector.broadcast %80 : vector<1x32xf32> to vector<2x32xf32>
    %82 = arith.addf %79, %81 : vector<2x32xf32>
    %83 = vector.extract_strided_slice %82 {offsets = [0, 0], sizes = [2, 16], strides = [1, 1]} : vector<2x32xf32> to vector<2x16xf32>
    %84 = vector.extract_strided_slice %82 {offsets = [0, 16], sizes = [2, 16], strides = [1, 1]} : vector<2x32xf32> to vector<2x16xf32>
    %cst_43 = arith.constant -4.000000e+00 : f32
    %cst_44 = arith.constant 4.000000e+00 : f32
    %85 = vector.broadcast %cst_43 : f32 to vector<2x16xf32>
    %86 = arith.maximumf %85, %84 : vector<2x16xf32>
    %87 = vector.broadcast %cst_44 : f32 to vector<2x16xf32>
    %88 = arith.minimumf %87, %86 : vector<2x16xf32>
    %cst_45 = arith.constant 5.000000e-01 : f32
    %89 = vector.broadcast %cst_45 : f32 to vector<2x16xf32>
    %90 = arith.mulf %89, %88 : vector<2x16xf32>
    %91 = math.exp %90 : vector<2x16xf32>
    %c0_46 = arith.constant 0 : index
    %c0_47 = arith.constant 0 : index
    %92 = vector.load %arg1[%c0_46, %c0_47] : memref<2x16xf32, #tpu.memory_space<vmem>>, vector<2x16xf32>
    %93 = arith.mulf %91, %92 : vector<2x16xf32>
    %94 = arith.addf %83, %93 : vector<2x16xf32>
    %95 = tpu.concatenate %83, %88 in 1 : vector<2x16xf32>, vector<2x16xf32> -> vector<2x32xf32>
    %c0_48 = arith.constant 0 : index
    %c0_49 = arith.constant 0 : index
    %96 = vector.load %arg22[%c0_48, %c0_49] : memref<2x32xf32, #tpu.memory_space<vmem>>, vector<2x32xf32>
    tpu.vector_store %arg22[%c0_48, %c0_49], %95 {strides = array<i32>} : memref<2x32xf32, #tpu.memory_space<vmem>>, vector<2x32xf32>,
    %97 = arith.truncf %94 : vector<2x16xf32> to vector<2x16xbf16>
    %c0_50 = arith.constant 0 : index
    %c0_51 = arith.constant 0 : index
    %98 = vector.load %arg8[%c0_50, %c0_51] : memref<16x392xbf16, #tpu.memory_space<vmem>>, vector<16x392xbf16>
    %cst_52 = arith.constant dense<0.000000e+00> : vector<2x392xf32>
    %99 = tpu.matmul %97, %98, %cst_52 {dimension_numbers = #tpu.dot_dimension_numbers<[1], [0], [0], [1], [0, 0, 1, 1], [], []>} : vector<2x16xbf16>, vector<16x392xbf16>, vector<2x392xf32> -> vector<2x392xf32>
    %c0_53 = arith.constant 0 : index
    %c0_54 = arith.constant 0 : index
    %100 = vector.load %arg9[%c0_53, %c0_54] : memref<1x392xf32, #tpu.memory_space<vmem>>, vector<1x392xf32>
    %101 = vector.broadcast %100 : vector<1x392xf32> to vector<2x392xf32>
    %102 = arith.addf %99, %101 : vector<2x392xf32>
    %cst_55 = arith.constant 0.000000e+00 : f32
    %103 = vector.broadcast %cst_55 : f32 to vector<2x392xf32>
    %104 = arith.maximumf %102, %103 : vector<2x392xf32>
    %105 = arith.truncf %104 : vector<2x392xf32> to vector<2x392xbf16>
    %c0_56 = arith.constant 0 : index
    %c0_57 = arith.constant 0 : index
    %106 = vector.load %arg4[%c0_56, %c0_57] : memref<392x784xbf16, #tpu.memory_space<vmem>>, vector<392x784xbf16>
    %cst_58 = arith.constant dense<0.000000e+00> : vector<2x784xf32>
    %107 = tpu.matmul %105, %106, %cst_58 {dimension_numbers = #tpu.dot_dimension_numbers<[1], [0], [0], [1], [0, 0, 1, 1], [], []>} : vector<2x392xbf16>, vector<392x784xbf16>, vector<2x784xf32> -> vector<2x784xf32>
    %cst_59 = arith.constant dense<0.000000e+00> : vector<784xf32>
    %108 = vector.multi_reduction <add>, %107, %cst_59 [0] : vector<2x784xf32> to vector<784xf32>
    %109 = vector.shape_cast %108 : vector<784xf32> to vector<1x784xf32>
    %110 = arith.mulf %107, %107 : vector<2x784xf32>
    %cst_60 = arith.constant dense<0.000000e+00> : vector<784xf32>
    %111 = vector.multi_reduction <add>, %110, %cst_60 [0] : vector<2x784xf32> to vector<784xf32>
    %112 = vector.shape_cast %111 : vector<784xf32> to vector<1x784xf32>
    %113 = tpu.concatenate %109, %112 in 0 : vector<1x784xf32>, vector<1x784xf32> -> vector<2x784xf32>
    %c0_61 = arith.constant 0 : index
    %c0_62 = arith.constant 0 : index
    %114 = vector.load %arg11[%c0_61, %c0_62] : memref<784x4xf32, #tpu.memory_space<vmem>>, vector<784x4xf32>
    %cst_63 = arith.constant dense<0.000000e+00> : vector<2x4xf32>
    %115 = tpu.matmul %113, %114, %cst_63 {dimension_numbers = #tpu.dot_dimension_numbers<[1], [0], [0], [1], [0, 0, 1, 1], [], []>} : vector<2x784xf32>, vector<784x4xf32>, vector<2x4xf32> -> vector<2x4xf32>
    %116 = vector.extract_strided_slice %115 {offsets = [0, 0], sizes = [1, 4], strides = [1, 1]} : vector<2x4xf32> to vector<1x4xf32>
    %cst_64 = arith.constant 3.920000e+02 : f32
    %117 = vector.broadcast %cst_64 : f32 to vector<1x4xf32>
    %118 = arith.divf %116, %117 : vector<1x4xf32>
    %119 = vector.extract_strided_slice %115 {offsets = [1, 0], sizes = [1, 4], strides = [1, 1]} : vector<2x4xf32> to vector<1x4xf32>
    %cst_65 = arith.constant 3.920000e+02 : f32
    %120 = vector.broadcast %cst_65 : f32 to vector<1x4xf32>
    %121 = arith.divf %119, %120 : vector<1x4xf32>
    %122 = arith.mulf %118, %118 : vector<1x4xf32>
    %123 = arith.subf %121, %122 : vector<1x4xf32>
    %c0_66 = arith.constant 0 : index
    %c0_67 = arith.constant 0 : index
    %124 = vector.load %arg19[%c0_66, %c0_67] : memref<1x4xf32, #tpu.memory_space<vmem>>, vector<1x4xf32>
    %cst_68 = arith.constant 9.99999974E-6 : f32
    %125 = vector.broadcast %cst_68 : f32 to vector<1x4xf32>
    %126 = arith.addf %123, %125 : vector<1x4xf32>
    %127 = math.rsqrt %126 : vector<1x4xf32>
    %128 = arith.mulf %124, %127 : vector<1x4xf32>
    %c0_69 = arith.constant 0 : index
    %c0_70 = arith.constant 0 : index
    %129 = vector.load %arg20[%c0_69, %c0_70] : memref<1x4xf32, #tpu.memory_space<vmem>>, vector<1x4xf32>
    %130 = arith.mulf %118, %128 : vector<1x4xf32>
    %131 = arith.subf %129, %130 : vector<1x4xf32>
    %132 = tpu.concatenate %128, %131 in 0 : vector<1x4xf32>, vector<1x4xf32> -> vector<2x4xf32>
    %c0_71 = arith.constant 0 : index
    %c0_72 = arith.constant 0 : index
    %133 = vector.load %arg12[%c0_71, %c0_72] : memref<4x784xf32, #tpu.memory_space<vmem>>, vector<4x784xf32>
    %cst_73 = arith.constant dense<0.000000e+00> : vector<2x784xf32>
    %134 = tpu.matmul %132, %133, %cst_73 {dimension_numbers = #tpu.dot_dimension_numbers<[1], [0], [0], [1], [0, 0, 1, 1], [], []>} : vector<2x4xf32>, vector<4x784xf32>, vector<2x784xf32> -> vector<2x784xf32>
    %135 = vector.extract_strided_slice %134 {offsets = [0, 0], sizes = [1, 784], strides = [1, 1]} : vector<2x784xf32> to vector<1x784xf32>
    %136 = vector.broadcast %135 : vector<1x784xf32> to vector<2x784xf32>
    %137 = arith.mulf %107, %136 : vector<2x784xf32>
    %138 = vector.extract_strided_slice %134 {offsets = [1, 0], sizes = [1, 784], strides = [1, 1]} : vector<2x784xf32> to vector<1x784xf32>
    %139 = vector.broadcast %138 : vector<1x784xf32> to vector<2x784xf32>
    %140 = arith.addf %137, %139 : vector<2x784xf32>
    %cst_74 = arith.constant 0.000000e+00 : f32
    %141 = vector.broadcast %cst_74 : f32 to vector<2x784xf32>
    %142 = arith.maximumf %140, %141 : vector<2x784xf32>
    %143 = arith.truncf %142 : vector<2x784xf32> to vector<2x784xbf16>
    %c0_75 = arith.constant 0 : index
    %c0_76 = arith.constant 0 : index
    %144 = vector.load %arg5[%c0_75, %c0_76] : memref<784x784xbf16, #tpu.memory_space<vmem>>, vector<784x784xbf16>
    %cst_77 = arith.constant dense<0.000000e+00> : vector<2x784xf32>
    %145 = tpu.matmul %143, %144, %cst_77 {dimension_numbers = #tpu.dot_dimension_numbers<[1], [0], [0], [1], [0, 0, 1, 1], [], []>} : vector<2x784xbf16>, vector<784x784xbf16>, vector<2x784xf32> -> vector<2x784xf32>
    %c0_78 = arith.constant 0 : index
    %c0_79 = arith.constant 0 : index
    %146 = vector.load %arg10[%c0_78, %c0_79] : memref<1x784xf32, #tpu.memory_space<vmem>>, vector<1x784xf32>
    %147 = vector.broadcast %146 : vector<1x784xf32> to vector<2x784xf32>
    %148 = arith.addf %145, %147 : vector<2x784xf32>
    %149 = arith.negf %148 : vector<2x784xf32>
    %150 = math.exp %149 : vector<2x784xf32>
    %cst_80 = arith.constant 1.000000e+00 : f32
    %151 = vector.broadcast %cst_80 : f32 to vector<2x784xf32>
    %152 = arith.addf %151, %150 : vector<2x784xf32>
    %153 = arith.divf %151, %152 : vector<2x784xf32>
    %c0_81 = arith.constant 0 : index
    %c0_82 = arith.constant 0 : index
    %154 = vector.load %arg21[%c0_81, %c0_82] : memref<2x784xf32, #tpu.memory_space<vmem>>, vector<2x784xf32>
    tpu.vector_store %arg21[%c0_81, %c0_82], %153 {strides = array<i32>} : memref<2x784xf32, #tpu.memory_space<vmem>>, vector<2x784xf32>,
    return
  }
}

</mosaic_0001>

<bundles_post_ra>
// kernel: vae_forward.1
= control target key start
LH: loop header
LB: loop body
LE: loop exit
PB: predicated region body
PF: predicated region fallthrough
CT: control target
= control target key end

     0   :  { %s21385_s0 = inlined_call_operand.vmem [shape: f32[2,784], index: 0, kind: input, shape index: {}]   ;;  %s21386_s1 = inlined_call_operand.vmem [shape: f32[2,16], index: 1, kind: input, shape index: {}]   ;;  %s21387_s2 = inlined_call_operand.vmem [shape: bf16[784,784], index: 2, kind: input, shape index: {}]   ;;  %s21388_s3 = inlined_call_operand.vmem [shape: bf16[784,392], index: 3, kind: input, shape index: {}]   ;;  %s21389_s4 = inlined_call_operand.hbm [shape: bf16[392,784], index: 4, kind: input, shape index: {}]   ;;  %s21390_s5 = inlined_call_operand.hbm [shape: bf16[784,784], index: 5, kind: input, shape index: {}]   ;;  %s21391_s6 = inlined_call_operand.vmem [shape: bf16[392,32], index: 6, kind: input, shape index: {}]   ;;  %s21392_s7 = inlined_call_operand.vmem [shape: f32[1,32], index: 7, kind: input, shape index: {}]   ;;  %s21393_s8 = inlined_call_operand.vmem [shape: bf16[16,392], index: 8, kind: input, shape index: {}]   ;;  %s21394_s9 = inlined_call_operand.vmem [shape: f32[1,392], index: 9, kind: input, shape index: {}]   ;;  %s21395_s10 = inlined_call_operand.vmem [shape: f32[1,784], index: 10, kind: input, shape index: {}]   ;;  %s21396_s11 = inlined_call_operand.vmem [shape: f32[784,4], index: 11, kind: input, shape index: {}]   ;;  %s21397_s12 = inlined_call_operand.vmem [shape: f32[4,784], index: 12, kind: input, shape index: {}]   ;;  %s21398_s13 = inlined_call_operand.vmem [shape: f32[392,8], index: 13, kind: input, shape index: {}]   ;;  %s21399_s14 = inlined_call_operand.vmem [shape: f32[8,392], index: 14, kind: input, shape index: {}]   ;;  %s21400_s15 = inlined_call_operand.vmem [shape: f32[1,4], index: 15, kind: input, shape index: {}]   ;;  %s21401_s16 = inlined_call_operand.vmem [shape: f32[1,4], index: 16, kind: input, shape index: {}]   ;;  %s21402_s17 = inlined_call_operand.vmem [shape: f32[1,8], index: 17, kind: input, shape index: {}]   ;;  %s21403_s18 = inlined_call_operand.vmem [shape: f32[1,8], index: 18, kind: input, shape index: {}]   ;;  %s21404_s19 = inlined_call_operand.vmem [shape: f32[1,4], index: 19, kind: input, shape index: {}]   ;;  %s21405_s20 = inlined_call_operand.vmem [shape: f32[1,4], index: 20, kind: input, shape index: {}]   ;;  %s21406_s21 = inlined_call_operand.vmem [shape: f32[2,784], index: 21, kind: output, shape index: {0}]   ;;  %s21407_s22 = inlined_call_operand.vmem [shape: f32[2,32], index: 22, kind: output, shape index: {1}]  }
   0x1   :  { %21413 = sst [smem:[#allocation8_spill]] %s21385_s0 }
   0x2   :  { %21414 = sst [smem:[#allocation9_spill]] %s21386_s1 }
   0x3   :  { %21415 = sst [smem:[#allocation10_spill]] %s21387_s2 }
   0x4   :  { %21416 = sst [smem:[#allocation11_spill]] %s21388_s3 }
   0x5   :  { %21417 = sst [smem:[#allocation12_spill]] %s21389_s4 }
   0x6   :  { %21418 = sst [smem:[#allocation13_spill]] %s21390_s5 }
   0x7   :  { %21419 = sst [smem:[#allocation14_spill]] %s21391_s6 }
   0x8   :  { %21420 = sst [smem:[#allocation15_spill]] %s21395_s10 }
   0x9   :  { %28 = vsyncpa [#allocation3], 0  ;;  %s21421_s29 = sld [smem:[#allocation12_spill]] }
   0xf   :  { %s42_s30 = sshll.u32 %s21421_s29, 4  ;;  %s43_s30 = int_to_ptr.hbm [resolvable:$true] %s42_s30 }
  0x10   :  { %29 = vsyncpa [#allocation5], 0  ;;  %s16427_s4 = smov [#allocation2]   ;;  %s21422_s5 = sld [smem:[#allocation13_spill]] }
  0x11   :  { %s44_s0 = sshll.u32 %s16427_s4, 4  ;;  %s16428_s6 = smov 448   ;;  %s45_s0 = int_to_ptr.vmem [resolvable:$true] %s44_s0 }
  0x12   :  { %s16429_s10 = smov 28   ;;  %s16430_s25 = smov [#allocation4]  }
  0x13   :  { %50 = dma.hbm_to_vmem [thread:$0]  %s43_s30, 21952, %s45_s0, [#allocation3], %s16428_s6, %s16428_s6, %s16429_s10  }
  0x14   :  { %s57_s26 = sshll.u32 %s16430_s25, 4  ;;  %s58_s26 = int_to_ptr.vmem [resolvable:$true] %s57_s26 }
  0x16   :  { %s55_s24 = sshll.u32 %s21422_s5, 4  ;;  %s56_s24 = int_to_ptr.hbm [resolvable:$true] %s55_s24 }
  0x17   :  { %63 = dma.hbm_to_vmem [thread:$0]  %s56_s24, 43904, %s58_s26, [#allocation5], %s16428_s6, %s16428_s6, %s16429_s10  }
  0x18   :  { %16423 = dma.done.wait [#allocation3], 21952  }
  0x19   :  { %16424 = vsyncadd [#allocation3], 4294945344 }
  0x1a   :  { %16425 = dma.done.wait [#allocation5], 43904  }
  0x1b   :  { %16426 = vsyncadd [#allocation5], 4294923392  ;;  %s21423_s3 = sld [smem:[#allocation10_spill]]  ;;  %vm2287_vm0 = vcmask 130048   ;;  %vm2928_vm1 = vcmask 1041408   ;;  %vm3035_vm2 = vcmask 1040384  }
  0x1c   :  { %s21424_s30 = sld [smem:[#allocation8_spill]]  ;;  %vm2971_vm3 = vcmask 123904   ;;  %vm3348_vm8 = vcmask 1043456   ;;  %vm3344_vm9 = vcmask 31744   ;;  %vm5109_vm10 = vcmask 58368   ;;  %s16433_s4 = smov 16  }
  0x1d   :  { %s21425_s1 = sld [smem:[#allocation11_spill]]  ;;  %vm5202_vm11 = vcmask 64512  }
  0x1e   :  { %s21426_s5 = sld [smem:[#allocation14_spill]] }
  0x21   :  { %v11060_v0 = vld [vmem:[%s21423_s3 + $0x188] sm:$0xf]  ;;  %v15299_v1 = vld [vmem:[%s21423_s3 + $0x1a0] sm:$0xf0]  ;;  %v11032_v11 = vld [vmem:[%s21423_s3 + $0x150] sm:$0xf] }
  0x22   :  { %v11284_v2 = vld [vmem:[%s21423_s3 + $0x348] sm:$0xf]  ;;  %v11061_v3 = vor.u32 %v15299_v1, %v11060_v0  ;;  %v15355_v4 = vld [vmem:[%s21423_s3 + $0x360] sm:$0xf0]  ;;  %v15292_v13 = vld [vmem:[%s21423_s3 + $0x168] sm:$0xf0] }
  0x23   :  { %v11508_v5 = vld [vmem:[%s21423_s3 + $0x508] sm:$0xf]  ;;  %v15411_v6 = vld [vmem:[%s21423_s3 + $0x520] sm:$0xf0]  ;;  %v11285_v7 = vor.u32 %v15355_v4, %v11284_v2  ;;  %v11256_v14 = vld [vmem:[%s21423_s3 + $0x310] sm:$0xf]  ;;  %v11033_v16 = vor.u32 %v15292_v13, %v11032_v11 }
  0x24   :  { %v11509_v8 = vor.u32 %v15411_v6, %v11508_v5  ;;  %v11732_v9 = vld [vmem:[%s21423_s3 + $0x6c8] sm:$0xf]  ;;  %v15467_v10 = vld [vmem:[%s21423_s3 + $0x6e0] sm:$0xf0]  ;;  %2291 = vmatpush.bf16.msra.mxu0 %v11061_v3  ;;  %v15348_v15 = vld [vmem:[%s21423_s3 + $0x328] sm:$0xf0] }
  0x25   :  { %v11733_v12 = vor.u32 %v15467_v10, %v11732_v9  ;;  %2304 = vmatpush.bf16.msra.mxu1 %v11285_v7  ;;  %v11257_v17 = vor.u32 %v15348_v15, %v11256_v14  ;;  %v11480_v18 = vld [vmem:[%s21423_s3 + $0x4d0] sm:$0xf]  ;;  %v15404_v19 = vld [vmem:[%s21423_s3 + $0x4e8] sm:$0xf0]  ;;  %v11004_v23 = vld [vmem:[%s21423_s3 + $0x118] sm:$0xf] }
  0x26   :  { %2317 = vmatpush.bf16.msra.mxu2 %v11509_v8  ;;  %v11704_v20 = vld [vmem:[%s21423_s3 + $0x690] sm:$0xf]  ;;  %v11481_v21 = vor.u32 %v15404_v19, %v11480_v18  ;;  %v15460_v22 = vld [vmem:[%s21423_s3 + $0x6a8] sm:$0xf0]  ;;  %v15285_v24 = vld [vmem:[%s21423_s3 + $0x130] sm:$0xf0] }
  0x27   :  { %2330 = vmatpush.bf16.msra.mxu3 %v11733_v12  ;;  %v11705_v25 = vor.u32 %v15460_v22, %v11704_v20  ;;  %v11228_v26 = vld [vmem:[%s21423_s3 + $0x2d8] sm:$0xf]  ;;  %v15341_v27 = vld [vmem:[%s21423_s3 + $0x2f0] sm:$0xf0]  ;;  %v11005_v29 = vor.u32 %v15285_v24, %v11004_v23  ;;  %v10976_v35 = vld [vmem:[%s21423_s3 + $0xe0] sm:$0xf] }
  0x28   :  { %v11452_v28 = vld [vmem:[%s21423_s3 + $0x498] sm:$0xf]  ;;  %2292 = vmatpush.bf16.msra.mxu0 %v11033_v16  ;;  %v15397_v30 = vld [vmem:[%s21423_s3 + $0x4b0] sm:$0xf0]  ;;  %v11229_v33 = vor.u32 %v15341_v27, %v11228_v26  ;;  %v15278_v36 = vld [vmem:[%s21423_s3 + $0xf8] sm:$0xf0] }
  0x29   :  { %v11676_v31 = vld [vmem:[%s21423_s3 + $0x658] sm:$0xf]  ;;  %v15453_v32 = vld [vmem:[%s21423_s3 + $0x670] sm:$0xf0]  ;;  %2305 = vmatpush.bf16.msra.mxu1 %v11257_v17  ;;  %v11453_v34 = vor.u32 %v15397_v30, %v11452_v28  ;;  %v11200_v37 = vld [vmem:[%s21423_s3 + $0x2a0] sm:$0xf]  ;;  %v10977_v44 = vor.u32 %v15278_v36, %v10976_v35 }
  0x2a   :  { %2318 = vmatpush.bf16.msra.mxu2 %v11481_v21  ;;  %v11677_v38 = vor.u32 %v15453_v32, %v11676_v31  ;;  %v15334_v39 = vld [vmem:[%s21423_s3 + $0x2b8] sm:$0xf0]  ;;  %v11424_v40 = vld [vmem:[%s21423_s3 + $0x460] sm:$0xf]  ;;  %v10948_v47 = vld [vmem:[%s21423_s3 + $0xa8] sm:$0xf] }
  0x2b   :  { %2331 = vmatpush.bf16.msra.mxu3 %v11705_v25  ;;  %v15390_v41 = vld [vmem:[%s21423_s3 + $0x478] sm:$0xf0]  ;;  %v11648_v42 = vld [vmem:[%s21423_s3 + $0x620] sm:$0xf]  ;;  %v11201_v45 = vor.u32 %v15334_v39, %v11200_v37  ;;  %v15271_v48 = vld [vmem:[%s21423_s3 + $0xc0] sm:$0xf0] }
  0x2c   :  { %v15446_v43 = vld [vmem:[%s21423_s3 + $0x638] sm:$0xf0]  ;;  %2293 = vmatpush.bf16.msra.mxu0 %v11005_v29  ;;  %v11425_v46 = vor.u32 %v15390_v41, %v11424_v40  ;;  %v11172_v49 = vld [vmem:[%s21423_s3 + $0x268] sm:$0xf]  ;;  %v15327_v51 = vld [vmem:[%s21423_s3 + $0x280] sm:$0xf0]  ;;  %v10949_v56 = vor.u32 %v15271_v48, %v10948_v47 }
  0x2d   :  { %2306 = vmatpush.bf16.msra.mxu1 %v11229_v33  ;;  %v11649_v50 = vor.u32 %v15446_v43, %v11648_v42  ;;  %v11396_v52 = vld [vmem:[%s21423_s3 + $0x428] sm:$0xf]  ;;  %v15383_v53 = vld [vmem:[%s21423_s3 + $0x440] sm:$0xf0]  ;;  %v11173_v57 = vor.u32 %v15327_v51, %v11172_v49  ;;  %v10920_v59 = vld [vmem:[%s21423_s3 + $0x70] sm:$0xf] }
  0x2e   :  { %2319 = vmatpush.bf16.msra.mxu2 %v11453_v34  ;;  %v11620_v54 = vld [vmem:[%s21423_s3 + $0x5e8] sm:$0xf]  ;;  %v15439_v55 = vld [vmem:[%s21423_s3 + $0x600] sm:$0xf0]  ;;  %v11397_v58 = vor.u32 %v15383_v53, %v11396_v52  ;;  %v15264_v60 = vld [vmem:[%s21423_s3 + $0x88] sm:$0xf0] }
  0x2f   :  { %2332 = vmatpush.bf16.msra.mxu3 %v11677_v38  ;;  %v11144_v61 = vld [vmem:[%s21423_s3 + $0x230] sm:$0xf]  ;;  %v11621_v62 = vor.u32 %v15439_v55, %v11620_v54  ;;  %v15320_v63 = vld [vmem:[%s21423_s3 + $0x248] sm:$0xf0]  ;;  %v10921_v4 = vor.u32 %v15264_v60, %v10920_v59  ;;  %v10892_v7 = vld [vmem:[%s21423_s3 + $0x38] sm:$0xf] }
  0x30   :  { %2294 = vmatpush.bf16.msra.mxu0 %v10977_v44  ;;  %v11368_v0 = vld [vmem:[%s21423_s3 + $0x3f0] sm:$0xf]  ;;  %v15376_v1 = vld [vmem:[%s21423_s3 + $0x408] sm:$0xf0]  ;;  %v11145_v5 = vor.u32 %v15320_v63, %v11144_v61  ;;  %v15257_v8 = vld [vmem:[%s21423_s3 + $0x50] sm:$0xf0] }
  0x31   :  { %2307 = vmatpush.bf16.msra.mxu1 %v11201_v45  ;;  %v11592_v2 = vld [vmem:[%s21423_s3 + $0x5b0] sm:$0xf]  ;;  %v15432_v3 = vld [vmem:[%s21423_s3 + $0x5c8] sm:$0xf0]  ;;  %v11369_v6 = vor.u32 %v15376_v1, %v11368_v0  ;;  %v11116_v9 = vld [vmem:[%s21423_s3 + $0x1f8] sm:$0xf]  ;;  %v10893_v17 = vor.u32 %v15257_v8, %v10892_v7 }
  0x32   :  { %2320 = vmatpush.bf16.msra.mxu2 %v11425_v46  ;;  %v11593_v10 = vor.u32 %v15432_v3, %v11592_v2  ;;  %v15313_v11 = vld [vmem:[%s21423_s3 + $0x210] sm:$0xf0]  ;;  %v11340_v12 = vld [vmem:[%s21423_s3 + $0x3b8] sm:$0xf]  ;;  %v10864_v16 = vld [vmem:[%s21423_s3] sm:$0xf] }
  0x33   :  { %2333 = vmatpush.bf16.msra.mxu3 %v11649_v50  ;;  %v15369_v13 = vld [vmem:[%s21423_s3 + $0x3d0] sm:$0xf0]  ;;  %v11564_v14 = vld [vmem:[%s21423_s3 + $0x578] sm:$0xf]  ;;  %v15250_v18 = vld [vmem:[%s21423_s3 + $0x18] sm:$0xf0]  ;;  %v11117_v21 = vor.u32 %v15313_v11, %v11116_v9 }
  0x34   :  { %2295 = vmatpush.bf16.msra.mxu0 %v10949_v56  ;;  %v15425_v15 = vld [vmem:[%s21423_s3 + $0x590] sm:$0xf0]  ;;  %v11088_v19 = vld [vmem:[%s21423_s3 + $0x1c0] sm:$0xf]  ;;  %v15306_v20 = vld [vmem:[%s21423_s3 + $0x1d8] sm:$0xf0]  ;;  %v11341_v22 = vor.u32 %v15369_v13, %v11340_v12  ;;  %v10865_v32 = vor.u32 %v15250_v18, %v10864_v16 }
  0x35   :  { %2308 = vmatpush.bf16.msra.mxu1 %v11173_v57  ;;  %v11312_v23 = vld [vmem:[%s21423_s3 + $0x380] sm:$0xf]  ;;  %v15362_v24 = vld [vmem:[%s21423_s3 + $0x398] sm:$0xf0]  ;;  %v11565_v26 = vor.u32 %v15425_v15, %v11564_v14  ;;  %v11956_v29 = vld [vmem:[%s21423_s3 + $0x888] sm:$0xf]  ;;  %v11089_v36 = vor.u32 %v15306_v20, %v11088_v19 }
  0x36   :  { %2321 = vmatpush.bf16.msra.mxu2 %v11397_v58  ;;  %v103_v25 = vld [vmem:[%s21424_s30] sm:$0xff]  ;;  %v15418_v28 = vld [vmem:[%s21423_s3 + $0x558] sm:$0xf0]  ;;  %v12180_v31 = vld [vmem:[%s21423_s3 + $0xa48] sm:$0xf]  ;;  %v11313_v37 = vor.u32 %v15362_v24, %v11312_v23 }
  0x37   :  { %2334 = vmatpush.bf16.msra.mxu3 %v11621_v62  ;;  %v11536_v27 = vld [vmem:[%s21423_s3 + $0x540] sm:$0xf]  ;;  %107 = vst [vmem:[#allocation1] ss:$4 sm:$0xff] %v103_v25  ;;  %v15523_v30 = vld [vmem:[%s21423_s3 + $0x8a0] sm:$0xf0] }
  0x38   :  { %2296 = vmatpush.bf16.msra.mxu0 %v10921_v4  ;;  %v15579_v33 = vld [vmem:[%s21423_s3 + $0xa60] sm:$0xf0]  ;;  %v15296_v34 = vld [vmem:[%s21423_s3 + $0x18c] sm:$0xf]  ;;  %v11062_v35 = vld [vmem:[%s21423_s3 + $0x1a4] sm:$0xf0]  ;;  %v11537_v40 = vor.u32 %v15418_v28, %v11536_v27  ;;  %v11957_v41 = vor.u32 %v15523_v30, %v11956_v29 }
  0x39   :  { %2309 = vmatpush.bf16.msra.mxu1 %v11145_v5  ;;  %v12208_v38 = vld [vmem:[%s21423_s3 + $0xa80] sm:$0xf]  ;;  %v15586_v39 = vld [vmem:[%s21423_s3 + $0xa98] sm:$0xf0]  ;;  %v15352_v42 = vld [vmem:[%s21423_s3 + $0x34c] sm:$0xf]  ;;  %v12181_v44 = vor.u32 %v15579_v33, %v12180_v31  ;;  %v11065_v45 = vor.u32 %v15296_v34, %v11062_v35 }
  0x3a   :  { %2322 = vmatpush.bf16.msra.mxu2 %v11369_v6  ;;  %v11286_v43 = vld [vmem:[%s21423_s3 + $0x364] sm:$0xf0]  ;;  %v11928_v46 = vld [vmem:[%s21423_s3 + $0x850] sm:$0xf]  ;;  %v15516_v47 = vld [vmem:[%s21423_s3 + $0x868] sm:$0xf0]  ;;  %v12209_v49 = vor.u32 %v15586_v39, %v12208_v38 }
  0x3b   :  { %2335 = vmatpush.bf16.msra.mxu3 %v11593_v10  ;;  %v12152_v48 = vld [vmem:[%s21423_s3 + $0xa10] sm:$0xf]  ;;  %v15572_v50 = vld [vmem:[%s21423_s3 + $0xa28] sm:$0xf0]  ;;  %v15289_v51 = vld [vmem:[%s21423_s3 + $0x154] sm:$0xf]  ;;  %v11289_v56 = vor.u32 %v15352_v42, %v11286_v43  ;;  %v11929_v57 = vor.u32 %v15516_v47, %v11928_v46 }
  0x3c   :  { %2297 = vmatpush.bf16.msra.mxu0 %v10893_v17  ;;  %v11034_v52 = vld [vmem:[%s21423_s3 + $0x16c] sm:$0xf0]  ;;  %v15345_v54 = vld [vmem:[%s21423_s3 + $0x314] sm:$0xf]  ;;  %v12153_v60 = vor.u32 %v15572_v50, %v12152_v48  ;;  %v11900_v62 = vld [vmem:[%s21423_s3 + $0x818] sm:$0xf] }
  0x3d   :  { %2310 = vmatpush.bf16.msra.mxu1 %v11117_v21  ;;  %v11258_v58 = vld [vmem:[%s21423_s3 + $0x32c] sm:$0xf0]  ;;  %v11037_v61 = vor.u32 %v15289_v51, %v11034_v52  ;;  %v15509_v63 = vld [vmem:[%s21423_s3 + $0x830] sm:$0xf0]  ;;  %v12124_v0 = vld [vmem:[%s21423_s3 + $0x9d8] sm:$0xf] }
  0x3e   :  { %2323 = vmatpush.bf16.msra.mxu2 %v11341_v22  ;;  %v112_v53 = vld.sshfl [vmem:[#allocation1 + $0x10] sm:$0xff pattern:$0x73625140]  ;;  %v110_v59 = vld.sshfl [vmem:[#allocation1] sm:$0xff pattern:$0x73625140]  ;;  %v11261_v6 = vor.u32 %v15345_v54, %v11258_v58  ;;  %v11901_v7 = vor.u32 %v15509_v63, %v11900_v62 }
  0x3f   :  { %2336 = vmatpush.bf16.msra.mxu3 %v11565_v26  ;;  %v16802_v55 = vpack.c.bf16 %v112_v53, %v112_v53  ;;  %v16816_v1 = vpack.c.bf16 %v110_v59, %v110_v59  ;;  %v15565_v2 = vld [vmem:[%s21423_s3 + $0x9f0] sm:$0xf0]  ;;  %v15282_v3 = vld [vmem:[%s21423_s3 + $0x11c] sm:$0xf]  ;;  %v11006_v4 = vld [vmem:[%s21423_s3 + $0x134] sm:$0xf0] }
  0x40   :  { %2298 = vmatpush.bf16.msra.mxu0 %v10865_v32  ;;  %v15338_v5 = vld [vmem:[%s21423_s3 + $0x2dc] sm:$0xf]  ;;  %v11230_v8 = vld [vmem:[%s21423_s3 + $0x2f4] sm:$0xf0]  ;;  %v12125_v10 = vor.u32 %v15565_v2, %v12124_v0  ;;  %v11009_v11 = vor.u32 %v15282_v3, %v11006_v4  ;;  %v11872_v12 = vld [vmem:[%s21423_s3 + $0x7e0] sm:$0xf] }
  0x41   :  { %2311 = vmatpush.bf16.msra.mxu1 %v11089_v36  ;;  %v111_v9 = vld.sshfl [vmem:[#allocation1 + $0x8] sm:$0xff pattern:$0x73625140]  ;;  %v15502_v13 = vld [vmem:[%s21423_s3 + $0x7f8] sm:$0xf0]  ;;  %v11233_v20 = vor.u32 %v15338_v5, %v11230_v8 }
  0x42   :  { %2324 = vmatpush.bf16.msra.mxu2 %v11313_v37  ;;  %v12096_v14 = vld [vmem:[%s21423_s3 + $0x9a0] sm:$0xf]  ;;  %v16844_v15 = vpack.c.bf16 %v111_v9, %v111_v9  ;;  %v15558_v16 = vld [vmem:[%s21423_s3 + $0x9b8] sm:$0xf0]  ;;  %v15275_v17 = vld [vmem:[%s21423_s3 + $0xe4] sm:$0xf]  ;;  %v11873_v21 = vor.u32 %v15502_v13, %v11872_v12 }
  0x43   :  { %2337 = vmatpush.bf16.msra.mxu3 %v11537_v40  ;;  %2299 = vmatmul.bf16.vlgmr.msra.gmra.mxu0 %v16816_v1  ;;  %v10978_v18 = vld [vmem:[%s21423_s3 + $0xfc] sm:$0xf0]  ;;  %v113_v19 = vld.sshfl [vmem:[#allocation1 + $0x18] sm:$0xff pattern:$0x73625140]  ;;  %v12097_v25 = vor.u32 %v15558_v16, %v12096_v14 }
  0x44   :  { %2343 = vmatpush.bf16.msrb.mxu0 %v11957_v41  ;;  %2312 = vmatmul.bf16.vlgmr.msra.gmra.mxu1 %v16844_v15  ;;  %v15331_v22 = vld [vmem:[%s21423_s3 + $0x2a4] sm:$0xf]  ;;  %v11202_v23 = vld [vmem:[%s21423_s3 + $0x2bc] sm:$0xf0]  ;;  %v16862_v24 = vpack.c.bf16 %v113_v19, %v113_v19  ;;  %v10981_v26 = vor.u32 %v15275_v17, %v10978_v18  ;;  %v11844_v27 = vld [vmem:[%s21423_s3 + $0x7a8] sm:$0xf] }
  0x45   :  { %2356 = vmatpush.bf16.msrb.mxu1 %v12181_v44  ;;  %2325 = vmatmul.bf16.vlgmr.msra.gmra.mxu2 %v16802_v55  ;;  %v15495_v28 = vld [vmem:[%s21423_s3 + $0x7c0] sm:$0xf0]  ;;  %v12068_v29 = vld [vmem:[%s21423_s3 + $0x968] sm:$0xf]  ;;  %v15268_v31 = vld [vmem:[%s21423_s3 + $0xac] sm:$0xf]  ;;  %v11205_v34 = vor.u32 %v15331_v22, %v11202_v23 }
  0x46   :  { %2376 = vmatpush.bf16.msrb.mxu2 %v12209_v49  ;;  %v15551_v30 = vld [vmem:[%s21423_s3 + $0x980] sm:$0xf0]  ;;  %v10950_v32 = vld [vmem:[%s21423_s3 + $0xc4] sm:$0xf0]  ;;  %2338 = vmatmul.bf16.vlgmr.msra.gmra.mxu3 %v16862_v24  ;;  %v15324_v33 = vld [vmem:[%s21423_s3 + $0x26c] sm:$0xf]  ;;  %v11845_v35 = vor.u32 %v15495_v28, %v11844_v27 }
  0x47   :  { %2382 = vmatpush.bf16.msrb.mxu3 %v11065_v45  ;;  %v11174_v36 = vld [vmem:[%s21423_s3 + $0x284] sm:$0xf0]  ;;  %v11816_v37 = vld [vmem:[%s21423_s3 + $0x770] sm:$0xf]  ;;  %v15488_v38 = vld [vmem:[%s21423_s3 + $0x788] sm:$0xf0]  ;;  %v12069_v39 = vor.u32 %v15551_v30, %v12068_v29  ;;  %v10953_v40 = vor.u32 %v15268_v31, %v10950_v32 }
  0x48   :  { %2344 = vmatpush.bf16.msrb.mxu0 %v11929_v57  ;;  %v12040_v41 = vld [vmem:[%s21423_s3 + $0x930] sm:$0xf]  ;;  %v15544_v42 = vld [vmem:[%s21423_s3 + $0x948] sm:$0xf0]  ;;  %v15261_v44 = vld [vmem:[%s21423_s3 + $0x74] sm:$0xf]  ;;  %v11177_v46 = vor.u32 %v15324_v33, %v11174_v36  ;;  %v11817_v47 = vor.u32 %v15488_v38, %v11816_v37 }
  0x49   :  { %2357 = vmatpush.bf16.msrb.mxu1 %v12153_v60  ;;  %v104_v43 = vld [vmem:[%s21424_s30 + $0x8] sm:$0x3f]  ;;  %v10922_v45 = vld [vmem:[%s21423_s3 + $0x8c] sm:$0xf0]  ;;  %v15317_v48 = vld [vmem:[%s21423_s3 + $0x234] sm:$0xf]  ;;  %v12041_v50 = vor.u32 %v15544_v42, %v12040_v41 }
  0x4a   :  { %2395 = vmatpush.bf16.msra.mxu2 %v11289_v56  ;;  %109 = vst [vmem:[#allocation1 + $0x20] ss:$4 sm:$0xff] %v104_v43  ;;  %v11146_v49 = vld [vmem:[%s21423_s3 + $0x24c] sm:$0xf0]  ;;  %v10925_v51 = vor.u32 %v15261_v44, %v10922_v45  ;;  %v11788_v52 = vld [vmem:[%s21423_s3 + $0x738] sm:$0xf] }
  0x4b   :  { %2383 = vmatpush.bf16.msrb.mxu3 %v11037_v61  ;;  %v15481_v53 = vld [vmem:[%s21423_s3 + $0x750] sm:$0xf0]  ;;  %v12012_v54 = vld [vmem:[%s21423_s3 + $0x8f8] sm:$0xf]  ;;  %v15254_v57 = vld [vmem:[%s21423_s3 + $0x3c] sm:$0xf]  ;;  %v11149_v63 = vor.u32 %v15317_v48, %v11146_v49 }
  0x4c   :  { %2345 = vmatpush.bf16.msrb.mxu0 %v11901_v7  ;;  %v15537_v56 = vld [vmem:[%s21423_s3 + $0x910] sm:$0xf0]  ;;  %v10894_v58 = vld [vmem:[%s21423_s3 + $0x54] sm:$0xf0]  ;;  %v15310_v59 = vld [vmem:[%s21423_s3 + $0x1fc] sm:$0xf]  ;;  %v11789_v0 = vor.u32 %v15481_v53, %v11788_v52 }
  0x4d   :  { %2358 = vmatpush.bf16.msrb.mxu1 %v12125_v10  ;;  %v11118_v60 = vld [vmem:[%s21423_s3 + $0x214] sm:$0xf0]  ;;  %v11760_v61 = vld [vmem:[%s21423_s3 + $0x700] sm:$0xf]  ;;  %v15474_v62 = vld [vmem:[%s21423_s3 + $0x718] sm:$0xf0]  ;;  %v12013_v5 = vor.u32 %v15537_v56, %v12012_v54 }
  0x4e   :  { %2396 = vmatpush.bf16.msra.mxu2 %v11261_v6  ;;  %v11984_v2 = vld [vmem:[%s21423_s3 + $0x8c0] sm:$0xf]  ;;  %v15530_v3 = vld [vmem:[%s21423_s3 + $0x8d8] sm:$0xf0]  ;;  %v15247_v4 = vld [vmem:[%s21423_s3 + $0x4] sm:$0xf]  ;;  %v10897_v6 = vor.u32 %v15254_v57, %v10894_v58  ;;  %v11121_v17 = vor.u32 %v15310_v59, %v11118_v60  ;;  %v11761_v18 = vor.u32 %v15474_v62, %v11760_v61 }
  0x4f   :  { %2384 = vmatpush.bf16.msrb.mxu3 %v11009_v11  ;;  %v10866_v7 = vld [vmem:[%s21423_s3 + $0x1c] sm:$0xf0]  ;;  %v15408_v10 = vld [vmem:[%s21423_s3 + $0x50c] sm:$0xf]  ;;  %v11510_v11 = vld [vmem:[%s21423_s3 + $0x524] sm:$0xf0] }
  0x50   :  { %2346 = vmatpush.bf16.msrb.mxu0 %v11873_v21  ;;  %v15464_v12 = vld [vmem:[%s21423_s3 + $0x6cc] sm:$0xf]  ;;  %v11734_v13 = vld [vmem:[%s21423_s3 + $0x6e4] sm:$0xf0]  ;;  %v11985_v21 = vor.u32 %v15530_v3, %v11984_v2  ;;  %v10869_v22 = vor.u32 %v15247_v4, %v10866_v7  ;;  %v11090_v23 = vld [vmem:[%s21423_s3 + $0x1dc] sm:$0xf0] }
  0x51   :  { %2359 = vmatpush.bf16.msrb.mxu1 %v12097_v25  ;;  %v116_v8 = vld.sshfl [vmem:[#allocation1 + $0x30] sm:$0xff pattern:$0x73625140]  ;;  %v15520_v14 = vld [vmem:[%s21423_s3 + $0x88c] sm:$0xf]  ;;  %v11737_v27 = vor.u32 %v15464_v12, %v11734_v13 }
  0x52   :  { %2397 = vmatpush.bf16.msra.mxu2 %v11233_v20  ;;  %v16958_v9 = vpack.c.bf16 %v116_v8, %v116_v8  ;;  %v11958_v16 = vld [vmem:[%s21423_s3 + $0x8a4] sm:$0xf0]  ;;  %v114_v19 = vld.sshfl [vmem:[#allocation1 + $0x20] sm:$0xff pattern:$0x73625140] }
  0x53   :  { %2385 = vmatpush.bf16.msrb.mxu3 %v10981_v26  ;;  %v15303_v20 = vld [vmem:[%s21423_s3 + $0x1c4] sm:$0xf]  ;;  %v115_v25 = vld.sshfl [vmem:[#allocation1 + $0x28] sm:$0xff pattern:$0x73625140]  ;;  %v11513_v26 = vor.u32 %v15408_v10, %v11510_v11  ;;  %v11961_v31 = vor.u32 %v15520_v14, %v11958_v16  ;;  %v16995_v32 = vpack.c.bf16 %v114_v19, %v114_v19 }
  0x54   :  { %2347 = vmatpush.bf16.msrb.mxu0 %v11845_v35  ;;  %v15576_v28 = vld [vmem:[%s21423_s3 + $0xa4c] sm:$0xf]  ;;  %v12182_v29 = vld [vmem:[%s21423_s3 + $0xa64] sm:$0xf0]  ;;  %v15401_v30 = vld [vmem:[%s21423_s3 + $0x4d4] sm:$0xf]  ;;  %v11093_v36 = vor.u32 %v15303_v20, %v11090_v23  ;;  %v17006_v37 = vpack.c.bf16 %v115_v25, %v115_v25 }
  0x55   :  { %2360 = vmatpush.bf16.msrb.mxu1 %v12069_v39  ;;  %12234 = vmatmul.msk.bf16.vlgmr.msrb.gmra.mxu2 %vm2287_vm0, %v16958_v9  ;;  %v11482_v33 = vld [vmem:[%s21423_s3 + $0x4ec] sm:$0xf0]  ;;  %v15513_v38 = vld [vmem:[%s21423_s3 + $0x854] sm:$0xf]  ;;  %v15394_v45 = vld [vmem:[%s21423_s3 + $0x49c] sm:$0xf] }
  0x56   :  { %2398 = vmatpush.bf16.msra.mxu2 %v11205_v34  ;;  %v15457_v34 = vld [vmem:[%s21423_s3 + $0x694] sm:$0xf]  ;;  %v11706_v35 = vld [vmem:[%s21423_s3 + $0x6ac] sm:$0xf0]  ;;  %v11485_v41 = vor.u32 %v15401_v30, %v11482_v33  ;;  %v15450_v48 = vld [vmem:[%s21423_s3 + $0x65c] sm:$0xf] }
  0x57   :  { %2386 = vmatpush.bf16.msrb.mxu3 %v10953_v40  ;;  %v11930_v39 = vld [vmem:[%s21423_s3 + $0x86c] sm:$0xf0]  ;;  %v12185_v40 = vor.u32 %v15576_v28, %v12182_v29  ;;  %v11709_v42 = vor.u32 %v15457_v34, %v11706_v35  ;;  %v15569_v43 = vld [vmem:[%s21423_s3 + $0xa14] sm:$0xf]  ;;  %v11678_v49 = vld [vmem:[%s21423_s3 + $0x674] sm:$0xf0] }
  0x58   :  { %2348 = vmatpush.bf16.msrb.mxu0 %v11817_v47  ;;  %v12154_v44 = vld [vmem:[%s21423_s3 + $0xa2c] sm:$0xf0]  ;;  %v11454_v47 = vld [vmem:[%s21423_s3 + $0x4b4] sm:$0xf0]  ;;  %v11681_v54 = vor.u32 %v15450_v48, %v11678_v49  ;;  %v15562_v56 = vld [vmem:[%s21423_s3 + $0x9dc] sm:$0xf] }
  0x59   :  { %2361 = vmatpush.bf16.msrb.mxu1 %v12041_v50  ;;  %v15506_v50 = vld [vmem:[%s21423_s3 + $0x81c] sm:$0xf]  ;;  %v12157_v52 = vor.u32 %v15569_v43, %v12154_v44  ;;  %v11457_v53 = vor.u32 %v15394_v45, %v11454_v47  ;;  %v12126_v57 = vld [vmem:[%s21423_s3 + $0x9f4] sm:$0xf0]  ;;  %v15387_v58 = vld [vmem:[%s21423_s3 + $0x464] sm:$0xf] }
  0x5a   :  { %2399 = vmatpush.bf16.msra.mxu2 %v11177_v46  ;;  %v11933_v46 = vor.u32 %v15513_v38, %v11930_v39  ;;  %v11426_v60 = vld [vmem:[%s21423_s3 + $0x47c] sm:$0xf0]  ;;  %v15443_v61 = vld [vmem:[%s21423_s3 + $0x624] sm:$0xf]  ;;  %v12129_v2 = vor.u32 %v15562_v56, %v12126_v57  ;;  %v15380_v7 = vld [vmem:[%s21423_s3 + $0x42c] sm:$0xf] }
  0x5b   :  { %2387 = vmatpush.bf16.msrb.mxu3 %v10925_v51  ;;  %v11902_v51 = vld [vmem:[%s21423_s3 + $0x834] sm:$0xf0]  ;;  %v11650_v62 = vld [vmem:[%s21423_s3 + $0x63c] sm:$0xf0]  ;;  %v11429_v3 = vor.u32 %v15387_v58, %v11426_v60  ;;  %v11398_v10 = vld [vmem:[%s21423_s3 + $0x444] sm:$0xf0] }
  0x5c   :  { %2349 = vmatpush.bf16.msrb.mxu0 %v11789_v0  ;;  %v11905_v59 = vor.u32 %v15506_v50, %v11902_v51  ;;  %v11874_v0 = vld [vmem:[%s21423_s3 + $0x7fc] sm:$0xf0]  ;;  %v11653_v4 = vor.u32 %v15443_v61, %v11650_v62  ;;  %v15436_v11 = vld [vmem:[%s21423_s3 + $0x5ec] sm:$0xf]  ;;  %v11622_v12 = vld [vmem:[%s21423_s3 + $0x604] sm:$0xf0] }
  0x5d   :  { %2362 = vmatpush.bf16.msrb.mxu1 %v12013_v5  ;;  %v15555_v5 = vld [vmem:[%s21423_s3 + $0x9a4] sm:$0xf]  ;;  %v15492_v13 = vld [vmem:[%s21423_s3 + $0x7ac] sm:$0xf]  ;;  %v11846_v14 = vld [vmem:[%s21423_s3 + $0x7c4] sm:$0xf0] }
  0x5e   :  { %2400 = vmatpush.bf16.msra.mxu2 %v11149_v63  ;;  %v15499_v63 = vld [vmem:[%s21423_s3 + $0x7e4] sm:$0xf]  ;;  %v15548_v19 = vld [vmem:[%s21423_s3 + $0x96c] sm:$0xf]  ;;  %v12070_v20 = vld [vmem:[%s21423_s3 + $0x984] sm:$0xf0] }
  0x5f   :  { %2388 = vmatpush.bf16.msrb.mxu3 %v10897_v6  ;;  %v12098_v6 = vld [vmem:[%s21423_s3 + $0x9bc] sm:$0xf0]  ;;  %v11877_v8 = vor.u32 %v15499_v63, %v11874_v0  ;;  %v11370_v23 = vld [vmem:[%s21423_s3 + $0x40c] sm:$0xf0]  ;;  %v15429_v25 = vld [vmem:[%s21423_s3 + $0x5b4] sm:$0xf]  ;;  %v12073_v29 = vor.u32 %v15548_v19, %v12070_v20 }
  0x60   :  { %2350 = vmatpush.bf16.msrb.mxu0 %v11761_v18  ;;  %v12101_v16 = vor.u32 %v15555_v5, %v12098_v6  ;;  %v11625_v18 = vor.u32 %v15436_v11, %v11622_v12  ;;  %v11818_v28 = vld [vmem:[%s21423_s3 + $0x78c] sm:$0xf0]  ;;  %v15541_v33 = vld [vmem:[%s21423_s3 + $0x934] sm:$0xf]  ;;  %v15366_v35 = vld [vmem:[%s21423_s3 + $0x3bc] sm:$0xf] }
  0x61   :  { %2363 = vmatpush.bf16.msrb.mxu1 %v11985_v21  ;;  %v15373_v21 = vld [vmem:[%s21423_s3 + $0x3f4] sm:$0xf]  ;;  %v12042_v34 = vld [vmem:[%s21423_s3 + $0x94c] sm:$0xf0]  ;;  %v11342_v38 = vld [vmem:[%s21423_s3 + $0x3d4] sm:$0xf0] }
  0x62   :  { %2401 = vmatpush.bf16.msra.mxu2 %v11121_v17  ;;  %v11401_v17 = vor.u32 %v15380_v7, %v11398_v10  ;;  %v11373_v30 = vor.u32 %v15373_v21, %v11370_v23  ;;  %v15422_v39 = vld [vmem:[%s21423_s3 + $0x57c] sm:$0xf]  ;;  %v12045_v43 = vor.u32 %v15541_v33, %v12042_v34  ;;  %v12014_v45 = vld [vmem:[%s21423_s3 + $0x914] sm:$0xf0]  ;;  %v15359_v48 = vld [vmem:[%s21423_s3 + $0x384] sm:$0xf] }
  0x63   :  { %2389 = vmatpush.bf16.msrb.mxu3 %v10869_v22  ;;  %2351 = vmatmul.bf16.vlgmr.msrb.gmra.mxu0 %v16995_v32  ;;  %v11849_v22 = vor.u32 %v15492_v13, %v11846_v14  ;;  %v15534_v44 = vld [vmem:[%s21423_s3 + $0x8fc] sm:$0xf]  ;;  %v11314_v49 = vld [vmem:[%s21423_s3 + $0x39c] sm:$0xf0]  ;;  %v15415_v50 = vld [vmem:[%s21423_s3 + $0x544] sm:$0xf] }
  0x64   :  { %2408 = vmatpush.bf16.msra.mxu0 %v11513_v26  ;;  %2364 = vmatmul.bf16.vlgmr.msrb.gmra.mxu1 %v17006_v37  ;;  %v11594_v26 = vld [vmem:[%s21423_s3 + $0x5cc] sm:$0xf0]  ;;  %v15300_v57 = vld [vmem:[%s21423_s3 + $0x1a8] sm:$0xf0]  ;;  %v15583_v61 = vld [vmem:[%s21423_s3 + $0xa84] sm:$0xf]  ;;  %v11317_v63 = vor.u32 %v15359_v48, %v11314_v49 }
  0x65   :  { %2421 = vmatpush.bf16.msra.mxu1 %v11737_v27  ;;  %v15485_v27 = vld [vmem:[%s21423_s3 + $0x774] sm:$0xf]  ;;  %v11068_v56 = vld [vmem:[%s21423_s3 + $0x190] sm:$0xf]  ;;  %v15356_v60 = vld [vmem:[%s21423_s3 + $0x368] sm:$0xf0] }
  0x66   :  { %2402 = vmatpush.bf16.msra.mxu2 %v11093_v36  ;;  %2390 = vmatmul.bf16.vlgmr.msrb.gmra.mxu3 %v16816_v1  ;;  %v11821_v36 = vor.u32 %v15485_v27, %v11818_v28  ;;  %v11292_v58 = vld [vmem:[%s21423_s3 + $0x350] sm:$0xf]  ;;  %v12210_v62 = vld [vmem:[%s21423_s3 + $0xa9c] sm:$0xf0]  ;;  %v11069_v6 = vor.u32 %v15300_v57, %v11068_v56  ;;  %v15412_v7 = vld [vmem:[%s21423_s3 + $0x528] sm:$0xf0] }
  0x67   :  { %2434 = vmatpush.bf16.msra.mxu3 %v11961_v31  ;;  %v11597_v31 = vor.u32 %v15429_v25, %v11594_v26  ;;  %v15468_v10 = vld [vmem:[%s21423_s3 + $0x6e8] sm:$0xf0]  ;;  %v11293_v11 = vor.u32 %v15356_v60, %v11292_v58  ;;  %v12213_v12 = vor.u32 %v15583_v61, %v12210_v62  ;;  %v11040_v13 = vld [vmem:[%s21423_s3 + $0x158] sm:$0xf]  ;;  %v15293_v14 = vld [vmem:[%s21423_s3 + $0x170] sm:$0xf0] }
  0x68   :  { %2409 = vmatpush.bf16.msra.mxu0 %v11485_v41  ;;  %v15478_v41 = vld [vmem:[%s21423_s3 + $0x73c] sm:$0xf]  ;;  %v11488_v21 = vld [vmem:[%s21423_s3 + $0x4d8] sm:$0xf]  ;;  %v15405_v23 = vld [vmem:[%s21423_s3 + $0x4f0] sm:$0xf0] }
  0x69   :  { %2422 = vmatpush.bf16.msra.mxu1 %v11709_v42  ;;  %2403 = vmatmul.bf16.vlgmr.msra.gmra.mxu2 %v16844_v15  ;;  %v11790_v42 = vld [vmem:[%s21423_s3 + $0x754] sm:$0xf0]  ;;  %v15461_v26 = vld [vmem:[%s21423_s3 + $0x6b0] sm:$0xf0]  ;;  %v11012_v28 = vld [vmem:[%s21423_s3 + $0x120] sm:$0xf]  ;;  %v11489_v33 = vor.u32 %v15405_v23, %v11488_v21 }
  0x6a   :  { %2447 = vmatpush.bf16.msrb.mxu2 %v12185_v40  ;;  %v11566_v40 = vld [vmem:[%s21423_s3 + $0x594] sm:$0xf0]  ;;  %v11793_v51 = vor.u32 %v15478_v41, %v11790_v42  ;;  %v10984_v42 = vld [vmem:[%s21423_s3 + $0xe8] sm:$0xf]  ;;  %v15272_v56 = vld [vmem:[%s21423_s3 + $0xc8] sm:$0xf0] }
  0x6b   :  { %2435 = vmatpush.bf16.msra.mxu3 %v11933_v46  ;;  %v11345_v46 = vor.u32 %v15366_v35, %v11342_v38  ;;  %v11569_v47 = vor.u32 %v15422_v39, %v11566_v40  ;;  %v11712_v25 = vld [vmem:[%s21423_s3 + $0x698] sm:$0xf]  ;;  %v11460_v35 = vld [vmem:[%s21423_s3 + $0x4a0] sm:$0xf]  ;;  %v15398_v38 = vld [vmem:[%s21423_s3 + $0x4b8] sm:$0xf0] }
  0x6c   :  { %2410 = vmatpush.bf16.msra.mxu0 %v11457_v53  ;;  %v15471_v53 = vld [vmem:[%s21423_s3 + $0x704] sm:$0xf]  ;;  %v11713_v34 = vor.u32 %v15461_v26, %v11712_v25  ;;  %v11684_v39 = vld [vmem:[%s21423_s3 + $0x660] sm:$0xf]  ;;  %v15454_v40 = vld [vmem:[%s21423_s3 + $0x678] sm:$0xf0] }
  0x6d   :  { %2423 = vmatpush.bf16.msra.mxu1 %v11681_v54  ;;  %v11762_v54 = vld [vmem:[%s21423_s3 + $0x71c] sm:$0xf0]  ;;  %v11432_v48 = vld [vmem:[%s21423_s3 + $0x468] sm:$0xf]  ;;  %v11180_v57 = vld [vmem:[%s21423_s3 + $0x270] sm:$0xf] }
  0x6e   :  { %2448 = vmatpush.bf16.msrb.mxu2 %v12157_v52  ;;  %v11538_v52 = vld [vmem:[%s21423_s3 + $0x55c] sm:$0xf0]  ;;  %v11765_v5 = vor.u32 %v15471_v53, %v11762_v54  ;;  %v10956_v54 = vld [vmem:[%s21423_s3 + $0xb0] sm:$0xf]  ;;  %v15328_v58 = vld [vmem:[%s21423_s3 + $0x288] sm:$0xf0] }
  0x6f   :  { %2436 = vmatpush.bf16.msra.mxu3 %v11905_v59  ;;  %v12017_v59 = vor.u32 %v15534_v44, %v12014_v45  ;;  %v11541_v0 = vor.u32 %v15415_v50, %v11538_v52  ;;  %v11208_v44 = vld [vmem:[%s21423_s3 + $0x2a8] sm:$0xf]  ;;  %v15335_v45 = vld [vmem:[%s21423_s3 + $0x2c0] sm:$0xf0]  ;;  %v11404_v61 = vld [vmem:[%s21423_s3 + $0x430] sm:$0xf] }
  0x70   :  { %2411 = vmatpush.bf16.msra.mxu0 %v11429_v3  ;;  %v11986_v3 = vld [vmem:[%s21423_s3 + $0x8dc] sm:$0xf0]  ;;  %v15391_v50 = vld [vmem:[%s21423_s3 + $0x480] sm:$0xf0]  ;;  %v11209_v53 = vor.u32 %v15335_v45, %v11208_v44  ;;  %v15384_v62 = vld [vmem:[%s21423_s3 + $0x448] sm:$0xf0] }
  0x71   :  { %2424 = vmatpush.bf16.msra.mxu1 %v11653_v4  ;;  %v11516_v4 = vld [vmem:[%s21423_s3 + $0x510] sm:$0xf]  ;;  %v15447_v52 = vld [vmem:[%s21423_s3 + $0x640] sm:$0xf0]  ;;  %v15314_v21 = vld [vmem:[%s21423_s3 + $0x218] sm:$0xf0] }
  0x72   :  { %2449 = vmatpush.bf16.msrb.mxu2 %v12129_v2  ;;  %v15527_v2 = vld [vmem:[%s21423_s3 + $0x8c4] sm:$0xf]  ;;  %v11517_v19 = vor.u32 %v15412_v7, %v11516_v4  ;;  %v10928_v4 = vld [vmem:[%s21423_s3 + $0x78] sm:$0xf]  ;;  %v15321_v7 = vld [vmem:[%s21423_s3 + $0x250] sm:$0xf0] }
  0x73   :  { %2437 = vmatpush.bf16.msra.mxu3 %v11877_v8  ;;  %v11740_v8 = vld [vmem:[%s21423_s3 + $0x6d0] sm:$0xf]  ;;  %v11348_v25 = vld [vmem:[%s21423_s3 + $0x3c0] sm:$0xf]  ;;  %v15370_v26 = vld [vmem:[%s21423_s3 + $0x3d8] sm:$0xf0] }
  0x74   :  { %2412 = vmatpush.bf16.msra.mxu0 %v11401_v17  ;;  %v11264_v17 = vld [vmem:[%s21423_s3 + $0x318] sm:$0xf]  ;;  %v11741_v20 = vor.u32 %v15468_v10, %v11740_v8  ;;  %v11405_v8 = vor.u32 %v15384_v62, %v11404_v61  ;;  %v15363_v44 = vld [vmem:[%s21423_s3 + $0x3a0] sm:$0xf0]  ;;  %v15573_v61 = vld [vmem:[%s21423_s3 + $0xa30] sm:$0xf0] }
  0x75   :  { %2425 = vmatpush.bf16.msra.mxu1 %v11625_v18  ;;  %v15349_v18 = vld [vmem:[%s21423_s3 + $0x330] sm:$0xf0] }
  0x76   :  { %2450 = vmatpush.bf16.msrb.mxu2 %v12101_v16  ;;  %v11989_v16 = vor.u32 %v15527_v2, %v11986_v3  ;;  %v11265_v27 = vor.u32 %v15349_v18, %v11264_v17  ;;  %v15440_v2 = vld [vmem:[%s21423_s3 + $0x608] sm:$0xf0]  ;;  %v11181_v3 = vor.u32 %v15328_v58, %v11180_v57  ;;  %v10900_v18 = vld [vmem:[%s21423_s3 + $0x40] sm:$0xf]  ;;  %v15517_v57 = vld [vmem:[%s21423_s3 + $0x870] sm:$0xf0] }
  0x77   :  { %2438 = vmatpush.bf16.msra.mxu3 %v11849_v22  ;;  %v11041_v22 = vor.u32 %v15293_v14, %v11040_v13  ;;  %v15377_v13 = vld [vmem:[%s21423_s3 + $0x410] sm:$0xf0]  ;;  %v11600_v14 = vld [vmem:[%s21423_s3 + $0x5b8] sm:$0xf] }
  0x78   :  { %2413 = vmatpush.bf16.msra.mxu0 %v11373_v30  ;;  %v11236_v30 = vld [vmem:[%s21423_s3 + $0x2e0] sm:$0xf] }
  0x79   :  { %2426 = vmatpush.bf16.msra.mxu1 %v11597_v31  ;;  %v15342_v31 = vld [vmem:[%s21423_s3 + $0x2f8] sm:$0xf0] }
  0x7a   :  { %2451 = vmatpush.bf16.msrb.mxu2 %v12073_v29  ;;  %v15286_v29 = vld [vmem:[%s21423_s3 + $0x138] sm:$0xf0]  ;;  %v11237_v41 = vor.u32 %v15342_v31, %v11236_v30  ;;  %v10872_v30 = vld [vmem:[%s21423_s3 + $0x8] sm:$0xf] }
  0x7b   :  { %2439 = vmatpush.bf16.msra.mxu3 %v11821_v36  ;;  %v11013_v36 = vor.u32 %v15286_v29, %v11012_v28  ;;  %v11572_v28 = vld [vmem:[%s21423_s3 + $0x580] sm:$0xf]  ;;  %v15426_v29 = vld [vmem:[%s21423_s3 + $0x598] sm:$0xf0] }
  0x7c   :  { %2414 = vmatpush.bf16.msra.mxu0 %v11345_v46  ;;  %v11461_v46 = vor.u32 %v15398_v38, %v11460_v35  ;;  %v15307_v35 = vld [vmem:[%s21423_s3 + $0x1e0] sm:$0xf0]  ;;  %v15524_v38 = vld [vmem:[%s21423_s3 + $0x8a8] sm:$0xf0] }
  0x7d   :  { %2427 = vmatpush.bf16.msra.mxu1 %v11569_v47  ;;  %v11685_v47 = vor.u32 %v15454_v40, %v11684_v39  ;;  %v12188_v39 = vld [vmem:[%s21423_s3 + $0xa50] sm:$0xf]  ;;  %v11349_v40 = vor.u32 %v15370_v26, %v11348_v25  ;;  %v12104_v25 = vld [vmem:[%s21423_s3 + $0x9a8] sm:$0xf]  ;;  %v15559_v26 = vld [vmem:[%s21423_s3 + $0x9c0] sm:$0xf0] }
  0x7e   :  { %2452 = vmatpush.bf16.msrb.mxu2 %v12045_v43  ;;  %v15279_v43 = vld [vmem:[%s21423_s3 + $0x100] sm:$0xf0] }
  0x7f   :  { %2440 = vmatpush.bf16.msra.mxu3 %v11793_v51  ;;  %v10985_v49 = vor.u32 %v15279_v43, %v10984_v42  ;;  %v11656_v51 = vld [vmem:[%s21423_s3 + $0x628] sm:$0xf]  ;;  %v15580_v42 = vld [vmem:[%s21423_s3 + $0xa68] sm:$0xf0] }
  0x80   :  { %2415 = vmatpush.bf16.msra.mxu0 %v11317_v63  ;;  %v11657_v60 = vor.u32 %v15447_v52, %v11656_v51  ;;  %v10957_v63 = vor.u32 %v15272_v56, %v10956_v54  ;;  %v11320_v43 = vld [vmem:[%s21423_s3 + $0x388] sm:$0xf]  ;;  %v11070_v51 = vld [vmem:[%s21423_s3 + $0x1ac] sm:$0xf0]  ;;  %v12189_v54 = vor.u32 %v15580_v42, %v12188_v39  ;;  %v11936_v56 = vld [vmem:[%s21423_s3 + $0x858] sm:$0xf] }
  0x81   :  { %2428 = vmatpush.bf16.msra.mxu1 %v11541_v0  ;;  %v11628_v0 = vld [vmem:[%s21423_s3 + $0x5f0] sm:$0xf]  ;;  %v12216_v52 = vld [vmem:[%s21423_s3 + $0xa88] sm:$0xf]  ;;  %v11321_v58 = vor.u32 %v15363_v44, %v11320_v43  ;;  %v15332_v42 = vld [vmem:[%s21423_s3 + $0x2ac] sm:$0xf] }
  0x82   :  { %2453 = vmatpush.bf16.msrb.mxu2 %v12017_v59  ;;  %v11433_v59 = vor.u32 %v15391_v50, %v11432_v48  ;;  %v11629_v10 = vor.u32 %v15440_v2, %v11628_v0  ;;  %v15297_v48 = vld [vmem:[%s21423_s3 + $0x194] sm:$0xf]  ;;  %v11294_v2 = vld [vmem:[%s21423_s3 + $0x36c] sm:$0xf0]  ;;  %v11210_v43 = vld [vmem:[%s21423_s3 + $0x2c4] sm:$0xf0] }
  0x83   :  { %2441 = vmatpush.bf16.msra.mxu3 %v11765_v5  ;;  %2416 = vmatmul.bf16.vlgmr.msra.gmra.mxu0 %v16802_v55  ;;  %v15265_v5 = vld [vmem:[%s21423_s3 + $0x90] sm:$0xf0]  ;;  %v11073_v62 = vor.u32 %v15297_v48, %v11070_v51  ;;  %v12076_v39 = vld [vmem:[%s21423_s3 + $0x970] sm:$0xf]  ;;  %v11824_v48 = vld [vmem:[%s21423_s3 + $0x778] sm:$0xf] }
  0x84   :  { %2467 = vmatpush.bf16.msrb.mxu0 %v12213_v12  ;;  %2429 = vmatmul.bf16.vlgmr.msra.gmra.mxu1 %v16862_v24  ;;  %v10929_v12 = vor.u32 %v15265_v5, %v10928_v4  ;;  %v15353_v0 = vld [vmem:[%s21423_s3 + $0x354] sm:$0xf]  ;;  %v15290_v4 = vld [vmem:[%s21423_s3 + $0x15c] sm:$0xf]  ;;  %v11042_v5 = vld [vmem:[%s21423_s3 + $0x174] sm:$0xf0] }
  0x85   :  { %2473 = vmatpush.bf16.msrb.mxu1 %v11069_v6  ;;  %v11152_v6 = vld [vmem:[%s21423_s3 + $0x238] sm:$0xf] }
  0x86   :  { %2454 = vmatpush.bf16.msrb.mxu2 %v11989_v16  ;;  %2442 = vmatmul.bf16.vlgmr.msra.gmra.mxu3 %v16995_v32  ;;  %v15433_v16 = vld [vmem:[%s21423_s3 + $0x5d0] sm:$0xf0]  ;;  %v11153_v17 = vor.u32 %v15321_v7, %v11152_v6  ;;  %v11908_v7 = vld [vmem:[%s21423_s3 + $0x820] sm:$0xf]  ;;  %v12048_v51 = vld [vmem:[%s21423_s3 + $0x938] sm:$0xf] }
  0x87   :  { %2486 = vmatpush.bf16.msrb.mxu3 %v11293_v11  ;;  %v11376_v11 = vld [vmem:[%s21423_s3 + $0x3f8] sm:$0xf]  ;;  %v11601_v23 = vor.u32 %v15433_v16, %v11600_v14  ;;  %v15346_v14 = vld [vmem:[%s21423_s3 + $0x31c] sm:$0xf] }
  0x88   :  { %2499 = vmatpush.bf16.msra.mxu0 %v11517_v19  ;;  %v15258_v19 = vld [vmem:[%s21423_s3 + $0x58] sm:$0xf0]  ;;  %v11266_v16 = vld [vmem:[%s21423_s3 + $0x334] sm:$0xf0] }
  0x89   :  { %2474 = vmatpush.bf16.msrb.mxu1 %v11041_v22  ;;  %2455 = vmatmul.bf16.vlgmr.msrb.gmra.mxu2 %v17006_v37  ;;  %v11377_v22 = vor.u32 %v15377_v13, %v11376_v11  ;;  %v12132_v11 = vld [vmem:[%s21423_s3 + $0x9e0] sm:$0xf]  ;;  %v11045_v13 = vor.u32 %v15290_v4, %v11042_v5  ;;  %v15318_v4 = vld [vmem:[%s21423_s3 + $0x23c] sm:$0xf]  ;;  %v11154_v5 = vld [vmem:[%s21423_s3 + $0x254] sm:$0xf0] }
  0x8a   :  { %2512 = vmatpush.bf16.msra.mxu2 %v11741_v20  ;;  %v11124_v20 = vld [vmem:[%s21423_s3 + $0x200] sm:$0xf] }
  0x8b   :  { %2487 = vmatpush.bf16.msrb.mxu3 %v11265_v27  ;;  %v10901_v27 = vor.u32 %v15258_v19, %v10900_v18  ;;  %v11125_v31 = vor.u32 %v15314_v21, %v11124_v20  ;;  %v15283_v18 = vld [vmem:[%s21423_s3 + $0x124] sm:$0xf]  ;;  %v11014_v19 = vld [vmem:[%s21423_s3 + $0x13c] sm:$0xf0]  ;;  %v11880_v21 = vld [vmem:[%s21423_s3 + $0x7e8] sm:$0xf] }
  0x8c   :  { %2500 = vmatpush.bf16.msra.mxu0 %v11489_v33  ;;  %v15251_v33 = vld [vmem:[%s21423_s3 + $0x20] sm:$0xf0] }
  0x8d   :  { %2475 = vmatpush.bf16.msrb.mxu1 %v11013_v36  ;;  %v11964_v36 = vld [vmem:[%s21423_s3 + $0x890] sm:$0xf]  ;;  %v10873_v45 = vor.u32 %v15251_v33, %v10872_v30  ;;  %v10986_v33 = vld [vmem:[%s21423_s3 + $0x104] sm:$0xf0] }
  0x8e   :  { %2513 = vmatpush.bf16.msra.mxu2 %v11713_v34  ;;  %v11096_v34 = vld [vmem:[%s21423_s3 + $0x1c8] sm:$0xf]  ;;  %v11965_v50 = vor.u32 %v15524_v38, %v11964_v36  ;;  %v15496_v36 = vld [vmem:[%s21423_s3 + $0x7c8] sm:$0xf0] }
  0x8f   :  { %2488 = vmatpush.bf16.msrb.mxu3 %v11237_v41  ;;  %v11573_v41 = vor.u32 %v15426_v29, %v11572_v28  ;;  %v15339_v28 = vld [vmem:[%s21423_s3 + $0x2e4] sm:$0xf]  ;;  %v11238_v29 = vld [vmem:[%s21423_s3 + $0x2fc] sm:$0xf0] }
  0x90   :  { %2501 = vmatpush.bf16.msra.mxu0 %v11461_v46  ;;  %v11544_v46 = vld [vmem:[%s21423_s3 + $0x548] sm:$0xf]  ;;  %v11241_v38 = vor.u32 %v15339_v28, %v11238_v29 }
  0x91   :  { %2476 = vmatpush.bf16.msrb.mxu1 %v10985_v49  ;;  %v11097_v49 = vor.u32 %v15307_v35, %v11096_v34  ;;  %v12105_v34 = vor.u32 %v15559_v26, %v12104_v25  ;;  %v11852_v35 = vld [vmem:[%s21423_s3 + $0x7b0] sm:$0xf]  ;;  %v15248_v26 = vld [vmem:[%s21423_s3 + $0xc] sm:$0xf] }
  0x92   :  { %2514 = vmatpush.bf16.msra.mxu2 %v11685_v47  ;;  %v15419_v47 = vld [vmem:[%s21423_s3 + $0x560] sm:$0xf0]  ;;  %v11853_v44 = vor.u32 %v15496_v36, %v11852_v35  ;;  %v15402_v35 = vld [vmem:[%s21423_s3 + $0x4dc] sm:$0xf]  ;;  %v11490_v36 = vld [vmem:[%s21423_s3 + $0x4f4] sm:$0xf0] }
  0x93   :  { %2489 = vmatpush.bf16.msrb.mxu3 %v11209_v53  ;;  %12235 = vmatmul.msk.bf16.vlgmr.msrb.gmra.mxu0 %vm2287_vm0, %v16958_v9  ;;  %v15587_v53 = vld [vmem:[%s21423_s3 + $0xaa0] sm:$0xf0] }
  0x94   :  { %2502 = vmatpush.bf16.msra.mxu0 %v11433_v59  ;;  %v11545_v59 = vor.u32 %v15419_v47, %v11544_v46  ;;  %v10958_v46 = vld [vmem:[%s21423_s3 + $0xcc] sm:$0xf0] }
  0x95   :  { %2477 = vmatpush.bf16.msrb.mxu1 %v10957_v63  ;;  %v12217_v63 = vor.u32 %v15587_v53, %v12216_v52  ;;  %v15545_v52 = vld [vmem:[%s21423_s3 + $0x950] sm:$0xf0] }
  0x96   :  { %2515 = vmatpush.bf16.msra.mxu2 %v11657_v60  ;;  %v12160_v60 = vld [vmem:[%s21423_s3 + $0xa18] sm:$0xf] }
  0x97   :  { %2490 = vmatpush.bf16.msrb.mxu3 %v11181_v3  ;;  %v11937_v3 = vor.u32 %v15517_v57, %v11936_v56  ;;  %v12161_v6 = vor.u32 %v15573_v61, %v12160_v60  ;;  %v11182_v56 = vld [vmem:[%s21423_s3 + $0x28c] sm:$0xf0]  ;;  %v12049_v60 = vor.u32 %v15545_v52, %v12048_v51  ;;  %v11796_v61 = vld [vmem:[%s21423_s3 + $0x740] sm:$0xf]  ;;  %v15395_v51 = vld [vmem:[%s21423_s3 + $0x4a4] sm:$0xf] }
  0x98   :  { %2503 = vmatpush.bf16.msra.mxu0 %v11405_v8  ;;  %v15510_v8 = vld [vmem:[%s21423_s3 + $0x838] sm:$0xf0]  ;;  %v11462_v52 = vld [vmem:[%s21423_s3 + $0x4bc] sm:$0xf0] }
  0x99   :  { %2478 = vmatpush.bf16.msrb.mxu1 %v10929_v12  ;;  %v15566_v12 = vld [vmem:[%s21423_s3 + $0x9f8] sm:$0xf0] }
  0x9a   :  { %2516 = vmatpush.bf16.msra.mxu2 %v11629_v10  ;;  %v11297_v10 = vor.u32 %v15353_v0, %v11294_v2  ;;  %v12133_v20 = vor.u32 %v15566_v12, %v12132_v11  ;;  %v12020_v0 = vld [vmem:[%s21423_s3 + $0x900] sm:$0xf]  ;;  %v15538_v2 = vld [vmem:[%s21423_s3 + $0x918] sm:$0xf0]  ;;  %v15475_v12 = vld [vmem:[%s21423_s3 + $0x720] sm:$0xf0] }
  0x9b   :  { %2491 = vmatpush.bf16.msrb.mxu3 %v11153_v17  ;;  %v11909_v17 = vor.u32 %v15510_v8, %v11908_v7  ;;  %v15255_v7 = vld [vmem:[%s21423_s3 + $0x44] sm:$0xf]  ;;  %v10902_v8 = vld [vmem:[%s21423_s3 + $0x5c] sm:$0xf0]  ;;  %v12021_v11 = vor.u32 %v15538_v2, %v12020_v0  ;;  %v15388_v0 = vld [vmem:[%s21423_s3 + $0x46c] sm:$0xf] }
  0x9c   :  { %2504 = vmatpush.bf16.msra.mxu0 %v11377_v22  ;;  %v15503_v22 = vld [vmem:[%s21423_s3 + $0x800] sm:$0xf0]  ;;  %v11434_v2 = vld [vmem:[%s21423_s3 + $0x484] sm:$0xf0] }
  0x9d   :  { %2479 = vmatpush.bf16.msrb.mxu1 %v10901_v27  ;;  %v11017_v27 = vor.u32 %v15283_v18, %v11014_v19  ;;  %v11881_v30 = vor.u32 %v15503_v22, %v11880_v21  ;;  %v11518_v18 = vld [vmem:[%s21423_s3 + $0x52c] sm:$0xf0]  ;;  %v15465_v19 = vld [vmem:[%s21423_s3 + $0x6d4] sm:$0xf]  ;;  %v15311_v22 = vld [vmem:[%s21423_s3 + $0x204] sm:$0xf] }
  0x9e   :  { %2517 = vmatpush.bf16.msra.mxu2 %v11601_v23  ;;  %v11269_v23 = vor.u32 %v15346_v14, %v11266_v16  ;;  %v15531_v14 = vld [vmem:[%s21423_s3 + $0x8e0] sm:$0xf0]  ;;  %v11157_v16 = vor.u32 %v15318_v4, %v11154_v5  ;;  %v11742_v21 = vld [vmem:[%s21423_s3 + $0x6ec] sm:$0xf0]  ;;  %v15444_v4 = vld [vmem:[%s21423_s3 + $0x62c] sm:$0xf] }
  0x9f   :  { %2492 = vmatpush.bf16.msrb.mxu3 %v11125_v31  ;;  %v15276_v31 = vld [vmem:[%s21423_s3 + $0xec] sm:$0xf]  ;;  %v11658_v5 = vld [vmem:[%s21423_s3 + $0x644] sm:$0xf0] }
  0xa0   :  { %2505 = vmatpush.bf16.msra.mxu0 %v11349_v40  ;;  %v15552_v40 = vld [vmem:[%s21423_s3 + $0x988] sm:$0xf0] }
  0xa1   :  { %2480 = vmatpush.bf16.msrb.mxu1 %v10873_v45  ;;  %v15269_v45 = vld [vmem:[%s21423_s3 + $0xb4] sm:$0xf]  ;;  %v12077_v47 = vor.u32 %v15552_v40, %v12076_v39  ;;  %v11714_v40 = vld [vmem:[%s21423_s3 + $0x6b4] sm:$0xf0] }
  0xa2   :  { %2518 = vmatpush.bf16.msra.mxu2 %v11573_v41  ;;  %v10989_v41 = vor.u32 %v15276_v31, %v10986_v33  ;;  %v10961_v53 = vor.u32 %v15269_v45, %v10958_v46  ;;  %v11966_v31 = vld [vmem:[%s21423_s3 + $0x8ac] sm:$0xf0]  ;;  %v11745_v33 = vor.u32 %v15465_v19, %v11742_v21  ;;  %v11493_v46 = vor.u32 %v15402_v35, %v11490_v36  ;;  %v15556_v21 = vld [vmem:[%s21423_s3 + $0x9ac] sm:$0xf]  ;;  %v15549_v36 = vld [vmem:[%s21423_s3 + $0x974] sm:$0xf] }
  0xa3   :  { %2493 = vmatpush.bf16.msrb.mxu3 %v11097_v49  ;;  %v15489_v49 = vld [vmem:[%s21423_s3 + $0x790] sm:$0xf0]  ;;  %v12190_v45 = vld [vmem:[%s21423_s3 + $0xa6c] sm:$0xf0] }
  0xa4   :  { %2506 = vmatpush.bf16.msra.mxu0 %v11321_v58  ;;  %2481 = vmatmul.bf16.vlgmr.msrb.gmra.mxu1 %v16816_v1  ;;  %v11825_v57 = vor.u32 %v15489_v49, %v11824_v48  ;;  %v15262_v58 = vld [vmem:[%s21423_s3 + $0x7c] sm:$0xf]  ;;  %v11938_v48 = vld [vmem:[%s21423_s3 + $0x874] sm:$0xf0]  ;;  %v11630_v19 = vld [vmem:[%s21423_s3 + $0x60c] sm:$0xf0] }
  0xa5   :  { %2525 = vmatpush.bf16.msra.mxu1 %v11965_v50  ;;  %v11213_v50 = vor.u32 %v15332_v42, %v11210_v43  ;;  %v11098_v42 = vld [vmem:[%s21423_s3 + $0x1e4] sm:$0xf0] }
  0xa6   :  { %2519 = vmatpush.bf16.msra.mxu2 %v11545_v59  ;;  %2494 = vmatmul.bf16.vlgmr.msrb.gmra.mxu3 %v16844_v15  ;;  %v10930_v59 = vld [vmem:[%s21423_s3 + $0x94] sm:$0xf0] }
  0xa7   :  { %2538 = vmatpush.bf16.msra.mxu3 %v12189_v54  ;;  %2507 = vmatmul.bf16.vlgmr.msra.gmra.mxu0 %v16802_v55  ;;  %v15325_v54 = vld [vmem:[%s21423_s3 + $0x274] sm:$0xf] }
  0xa8   :  { %2558 = vmatpush.bf16.msrb.mxu0 %v12217_v63  ;;  %v11185_v63 = vor.u32 %v15325_v54, %v11182_v56  ;;  %v15451_v54 = vld [vmem:[%s21423_s3 + $0x664] sm:$0xf]  ;;  %v11686_v56 = vld [vmem:[%s21423_s3 + $0x67c] sm:$0xf0] }
  0xa9   :  { %2526 = vmatpush.bf16.msra.mxu1 %v11937_v3  ;;  %2520 = vmatmul.bf16.vlgmr.msra.gmra.mxu2 %v16862_v24  ;;  %v10933_v3 = vor.u32 %v15262_v58, %v10930_v59  ;;  %v15570_v58 = vld [vmem:[%s21423_s3 + $0xa1c] sm:$0xf]  ;;  %v12162_v59 = vld [vmem:[%s21423_s3 + $0xa34] sm:$0xf0] }
  0xaa   :  { %2564 = vmatpush.bf16.msrb.mxu2 %v11073_v62  ;;  %v15482_v62 = vld [vmem:[%s21423_s3 + $0x758] sm:$0xf0] }
  0xab   :  { %2539 = vmatpush.bf16.msra.mxu3 %v12161_v6  ;;  %v11797_v6 = vor.u32 %v15482_v62, %v11796_v61  ;;  %v15507_v61 = vld [vmem:[%s21423_s3 + $0x824] sm:$0xf]  ;;  %v11910_v62 = vld [vmem:[%s21423_s3 + $0x83c] sm:$0xf0] }
  0xac   :  { %2577 = vmatpush.bf16.msra.mxu0 %v11297_v10  ;;  %v11768_v10 = vld [vmem:[%s21423_s3 + $0x708] sm:$0xf] }
  0xad   :  { %2527 = vmatpush.bf16.msra.mxu1 %v11909_v17  ;;  %v15409_v17 = vld [vmem:[%s21423_s3 + $0x514] sm:$0xf]  ;;  %v11769_v25 = vor.u32 %v15475_v12, %v11768_v10  ;;  %v11437_v10 = vor.u32 %v15388_v0, %v11434_v2  ;;  %v11882_v12 = vld [vmem:[%s21423_s3 + $0x804] sm:$0xf0]  ;;  %v11076_v0 = vld [vmem:[%s21423_s3 + $0x198] sm:$0xf] }
  0xae   :  { %2565 = vmatpush.bf16.msrb.mxu2 %v11045_v13  ;;  %v11992_v13 = vld [vmem:[%s21423_s3 + $0x8c8] sm:$0xf]  ;;  %v11521_v29 = vor.u32 %v15409_v17, %v11518_v18  ;;  %v15437_v18 = vld [vmem:[%s21423_s3 + $0x5f4] sm:$0xf]  ;;  %v15584_v2 = vld [vmem:[%s21423_s3 + $0xa8c] sm:$0xf] }
  0xaf   :  { %2540 = vmatpush.bf16.msra.mxu3 %v12133_v20  ;;  %v10905_v20 = vor.u32 %v15255_v7, %v10902_v8  ;;  %v11993_v28 = vor.u32 %v15531_v14, %v11992_v13  ;;  %v15563_v7 = vld [vmem:[%s21423_s3 + $0x9e4] sm:$0xf]  ;;  %v12134_v8 = vld [vmem:[%s21423_s3 + $0x9fc] sm:$0xf0]  ;;  %v11661_v13 = vor.u32 %v15444_v4, %v11658_v5  ;;  %v15381_v14 = vld [vmem:[%s21423_s3 + $0x434] sm:$0xf] }
  0xb0   :  { %2578 = vmatpush.bf16.msra.mxu0 %v11269_v23  ;;  %v11126_v23 = vld [vmem:[%s21423_s3 + $0x21c] sm:$0xf0]  ;;  %v12137_v17 = vor.u32 %v15563_v7, %v12134_v8  ;;  %v15301_v5 = vld [vmem:[%s21423_s3 + $0x1b0] sm:$0xf0] }
  0xb1   :  { %2528 = vmatpush.bf16.msra.mxu1 %v11881_v30  ;;  %v15521_v30 = vld [vmem:[%s21423_s3 + $0x894] sm:$0xf]  ;;  %v12022_v7 = vld [vmem:[%s21423_s3 + $0x91c] sm:$0xf0] }
  0xb2   :  { %2566 = vmatpush.bf16.msrb.mxu2 %v11017_v27  ;;  %v10874_v27 = vld [vmem:[%s21423_s3 + $0x24] sm:$0xf0]  ;;  %v11969_v43 = vor.u32 %v15521_v30, %v11966_v31  ;;  %v11378_v30 = vld [vmem:[%s21423_s3 + $0x414] sm:$0xf0] }
  0xb3   :  { %2541 = vmatpush.bf16.msra.mxu3 %v12105_v34  ;;  %v11129_v34 = vor.u32 %v15311_v22, %v11126_v23  ;;  %v10877_v39 = vor.u32 %v15248_v26, %v10874_v27  ;;  %v12106_v22 = vld [vmem:[%s21423_s3 + $0x9c4] sm:$0xf0]  ;;  %v15493_v26 = vld [vmem:[%s21423_s3 + $0x7b4] sm:$0xf]  ;;  %v11854_v27 = vld [vmem:[%s21423_s3 + $0x7cc] sm:$0xf0] }
  0xb4   :  { %2579 = vmatpush.bf16.msra.mxu0 %v11241_v38  ;;  %v15458_v38 = vld [vmem:[%s21423_s3 + $0x69c] sm:$0xf]  ;;  %v12109_v31 = vor.u32 %v15556_v21, %v12106_v22  ;;  %v11857_v35 = vor.u32 %v15493_v26, %v11854_v27  ;;  %v11524_v22 = vld [vmem:[%s21423_s3 + $0x518] sm:$0xf]  ;;  %v11048_v27 = vld [vmem:[%s21423_s3 + $0x160] sm:$0xf] }
  0xb5   :  { %2529 = vmatpush.bf16.msra.mxu1 %v11853_v44  ;;  %v15577_v44 = vld [vmem:[%s21423_s3 + $0xa54] sm:$0xf]  ;;  %v11717_v49 = vor.u32 %v15458_v38, %v11714_v40  ;;  %v12078_v38 = vld [vmem:[%s21423_s3 + $0x98c] sm:$0xf0] }
  0xb6   :  { %2567 = vmatpush.bf16.msrb.mxu2 %v10989_v41  ;;  %v15304_v41 = vld [vmem:[%s21423_s3 + $0x1cc] sm:$0xf] }
  0xb7   :  { %2542 = vmatpush.bf16.msra.mxu3 %v12077_v47  ;;  %12236 = vmatmul.msk.bf16.vlgmr.msrb.gmra.mxu0 %vm2287_vm0, %v16958_v9  ;;  %v15514_v47 = vld [vmem:[%s21423_s3 + $0x85c] sm:$0xf] }
  0xb8   :  { %2580 = vmatpush.bf16.msra.mxu0 %v11213_v50  ;;  %v11101_v50 = vor.u32 %v15304_v41, %v11098_v42  ;;  %v15486_v41 = vld [vmem:[%s21423_s3 + $0x77c] sm:$0xf]  ;;  %v11826_v42 = vld [vmem:[%s21423_s3 + $0x794] sm:$0xf0] }
  0xb9   :  { %2530 = vmatpush.bf16.msra.mxu1 %v11825_v57  ;;  %v11941_v57 = vor.u32 %v15514_v47, %v11938_v48  ;;  %v12081_v47 = vor.u32 %v15549_v36, %v12078_v38  ;;  %v15423_v48 = vld [vmem:[%s21423_s3 + $0x584] sm:$0xf]  ;;  %v11272_v36 = vld [vmem:[%s21423_s3 + $0x320] sm:$0xf]  ;;  %v15350_v38 = vld [vmem:[%s21423_s3 + $0x338] sm:$0xf0] }
  0xba   :  { %2568 = vmatpush.bf16.msrb.mxu2 %v10961_v53  ;;  %v12193_v53 = vor.u32 %v15577_v44, %v12190_v45  ;;  %v15367_v44 = vld [vmem:[%s21423_s3 + $0x3c4] sm:$0xf]  ;;  %v11350_v45 = vld [vmem:[%s21423_s3 + $0x3dc] sm:$0xf0] }
  0xbb   :  { %2543 = vmatpush.bf16.msra.mxu3 %v12049_v60  ;;  %v11465_v60 = vor.u32 %v15395_v51, %v11462_v52  ;;  %v15542_v51 = vld [vmem:[%s21423_s3 + $0x93c] sm:$0xf]  ;;  %v12050_v52 = vld [vmem:[%s21423_s3 + $0x954] sm:$0xf0] }
  0xbc   :  { %2581 = vmatpush.bf16.msra.mxu0 %v11185_v63  ;;  %v11689_v63 = vor.u32 %v15451_v54, %v11686_v56  ;;  %v11353_v54 = vor.u32 %v15367_v44, %v11350_v45  ;;  %v15479_v56 = vld [vmem:[%s21423_s3 + $0x744] sm:$0xf]  ;;  %v11020_v44 = vld [vmem:[%s21423_s3 + $0x128] sm:$0xf] }
  0xbd   :  { %2531 = vmatpush.bf16.msra.mxu1 %v11797_v6  ;;  %v11913_v6 = vor.u32 %v15507_v61, %v11910_v62  ;;  %v15416_v61 = vld [vmem:[%s21423_s3 + $0x54c] sm:$0xf]  ;;  %v11546_v62 = vld [vmem:[%s21423_s3 + $0x564] sm:$0xf0]  ;;  %v15287_v45 = vld [vmem:[%s21423_s3 + $0x140] sm:$0xf0] }
  0xbe   :  { %2569 = vmatpush.bf16.msrb.mxu2 %v10933_v3  ;;  %v12165_v3 = vor.u32 %v15570_v58, %v12162_v59  ;;  %v15360_v58 = vld [vmem:[%s21423_s3 + $0x38c] sm:$0xf] }
  0xbf   :  { %2544 = vmatpush.bf16.msra.mxu3 %v12021_v11  ;;  %v15500_v11 = vld [vmem:[%s21423_s3 + $0x7ec] sm:$0xf] }
  0xc0   :  { %2582 = vmatpush.bf16.msra.mxu0 %v11157_v16  ;;  %v11406_v16 = vld [vmem:[%s21423_s3 + $0x44c] sm:$0xf0]  ;;  %v17688_v23 = vpop.f32.mrf.mxu0 }
  0xc1   :  { %2532 = vmatpush.bf16.msra.mxu1 %v11769_v25  ;;  %v11409_v25 = vor.u32 %v15381_v14, %v11406_v16  ;;  %v11549_v14 = vor.u32 %v15416_v61, %v11546_v62 }
  0xc2   :  { %2570 = vmatpush.bf16.msrb.mxu2 %v10905_v20  ;;  %v11885_v20 = vor.u32 %v15500_v11, %v11882_v12  ;;  %v15472_v11 = vld [vmem:[%s21423_s3 + $0x70c] sm:$0xf]  ;;  %v11770_v12 = vld [vmem:[%s21423_s3 + $0x724] sm:$0xf0] }
  0xc3   :  { %2545 = vmatpush.bf16.msra.mxu3 %v11993_v28  ;;  %v11633_v28 = vor.u32 %v15437_v18, %v11630_v19  ;;  %v15357_v18 = vld [vmem:[%s21423_s3 + $0x370] sm:$0xf0]  ;;  %v11773_v26 = vor.u32 %v15472_v11, %v11770_v12 }
  0xc4   :  { %2583 = vmatpush.bf16.msra.mxu0 %v11129_v34  ;;  %2533 = vmatmul.bf16.vlgmr.msra.gmra.mxu1 %v16995_v32  ;;  %v11602_v34 = vld [vmem:[%s21423_s3 + $0x5d4] sm:$0xf0]  ;;  %v15273_v11 = vld [vmem:[%s21423_s3 + $0xd0] sm:$0xf0] }
  0xc5   :  { %2590 = vmatpush.bf16.msrb.mxu1 %v11521_v29  ;;  %v15374_v29 = vld [vmem:[%s21423_s3 + $0x3fc] sm:$0xf] }
  0xc6   :  { %2571 = vmatpush.bf16.msrb.mxu2 %v10877_v39  ;;  %2546 = vmatmul.bf16.vlgmr.msra.gmra.mxu3 %v17006_v37  ;;  %v17714_v39 = vpop.f32.mrf.mxu1  ;;  %v11381_v40 = vor.u32 %v15374_v29, %v11378_v30  ;;  %v15528_v30 = vld [vmem:[%s21423_s3 + $0x8cc] sm:$0xf] }
  0xc7   :  { %2603 = vmatpush.bf16.msrb.mxu3 %v11745_v33  ;;  %v15430_v33 = vld [vmem:[%s21423_s3 + $0x5bc] sm:$0xf] }
  0xc8   :  { %2584 = vmatpush.bf16.msra.mxu0 %v11101_v50  ;;  %v11829_v50 = vor.u32 %v15486_v41, %v11826_v42  ;;  %v11496_v41 = vld [vmem:[%s21423_s3 + $0x4e0] sm:$0xf]  ;;  %v15406_v42 = vld [vmem:[%s21423_s3 + $0x4f8] sm:$0xf0] }
  0xc9   :  { %2591 = vmatpush.bf16.msrb.mxu1 %v11493_v46  ;;  %2572 = vmatmul.bf16.vlgmr.msrb.gmra.mxu2 %v16816_v1  ;;  %v17728_v46 = vpop.f32.mrf.mxu2 }
  0xca   :  { %2616 = vmatpush.bf16.msra.mxu2 %v11969_v43  ;;  %v11605_v43 = vor.u32 %v15430_v33, %v11602_v34  ;;  %v11748_v33 = vld [vmem:[%s21423_s3 + $0x6d8] sm:$0xf] }
  0xcb   :  { %2604 = vmatpush.bf16.msrb.mxu3 %v11717_v49  ;;  %2585 = vmatmul.bf16.vlgmr.msra.gmra.mxu0 %v16844_v15  ;;  %v11574_v49 = vld [vmem:[%s21423_s3 + $0x59c] sm:$0xf0] }
  0xcc   :  { %2629 = vmatpush.bf16.msrb.mxu0 %v12193_v53  ;;  %v2302_v53 = vpop.f32.mrf.mxu0  ;;  %v11577_v59 = vor.u32 %v15423_v48, %v11574_v49  ;;  %v11273_v48 = vor.u32 %v15350_v38, %v11272_v36  ;;  %v11720_v49 = vld [vmem:[%s21423_s3 + $0x6a0] sm:$0xf]  ;;  %v15322_v38 = vld [vmem:[%s21423_s3 + $0x258] sm:$0xf0] }
  0xcd   :  { %2592 = vmatpush.bf16.msrb.mxu1 %v11465_v60  ;;  %v11322_v60 = vld [vmem:[%s21423_s3 + $0x3a4] sm:$0xf0]  ;;  %v11160_v36 = vld [vmem:[%s21423_s3 + $0x240] sm:$0xf] }
  0xce   :  { %2617 = vmatpush.bf16.msra.mxu2 %v11941_v57  ;;  %v11798_v57 = vld [vmem:[%s21423_s3 + $0x75c] sm:$0xf0]  ;;  %v2315_v8 = vpop.f32.mrf.mxu1  ;;  %v11244_v53 = vld [vmem:[%s21423_s3 + $0x2e8] sm:$0xf] }
  0xcf   :  { %2605 = vmatpush.bf16.msrb.mxu3 %v11689_v63  ;;  %v12053_v63 = vor.u32 %v15542_v51, %v12050_v52  ;;  %v11801_v4 = vor.u32 %v15479_v56, %v11798_v57  ;;  %v11497_v51 = vor.u32 %v15406_v42, %v11496_v41  ;;  %v15462_v52 = vld [vmem:[%s21423_s3 + $0x6b8] sm:$0xf0]  ;;  %v11021_v56 = vor.u32 %v15287_v45, %v11020_v44  ;;  %v11468_v57 = vld [vmem:[%s21423_s3 + $0x4a8] sm:$0xf]  ;;  %v11384_v41 = vld [vmem:[%s21423_s3 + $0x400] sm:$0xf] }
  0xd0   :  { %2630 = vmatpush.bf16.msrb.mxu0 %v12165_v3  ;;  %v12218_v3 = vld [vmem:[%s21423_s3 + $0xaa4] sm:$0xf0]  ;;  %v11721_v61 = vor.u32 %v15462_v52, %v11720_v49  ;;  %v15378_v42 = vld [vmem:[%s21423_s3 + $0x418] sm:$0xf0]  ;;  %v15259_v44 = vld [vmem:[%s21423_s3 + $0x60] sm:$0xf0]  ;;  %v11161_v49 = vor.u32 %v15322_v38, %v11160_v36 }
  0xd1   :  { %2593 = vmatpush.bf16.msrb.mxu1 %v11437_v10  ;;  %v11325_v10 = vor.u32 %v15360_v58, %v11322_v60  ;;  %v12221_v16 = vor.u32 %v15584_v2, %v12218_v3  ;;  %v2328_v19 = vpop.f32.mrf.mxu2  ;;  %v15399_v58 = vld [vmem:[%s21423_s3 + $0x4c0] sm:$0xf0]  ;;  %v15280_v60 = vld [vmem:[%s21423_s3 + $0x108] sm:$0xf0]  ;;  %v11216_v3 = vld [vmem:[%s21423_s3 + $0x2b0] sm:$0xf] }
  0xd2   :  { %2618 = vmatpush.bf16.msra.mxu2 %v11913_v6  ;;  %v15535_v6 = vld [vmem:[%s21423_s3 + $0x904] sm:$0xf] }
  0xd3   :  { %2606 = vmatpush.bf16.msrb.mxu3 %v11661_v13  ;;  %v17784_v13 = vpop.f32.mrf.mxu3  ;;  %v12025_v21 = vor.u32 %v15535_v6, %v12022_v7  ;;  %v15455_v2 = vld [vmem:[%s21423_s3 + $0x680] sm:$0xf0]  ;;  %v11440_v6 = vld [vmem:[%s21423_s3 + $0x470] sm:$0xf]  ;;  %v15392_v7 = vld [vmem:[%s21423_s3 + $0x488] sm:$0xf0] }
  0xd4   :  { %2631 = vmatpush.bf16.msrb.mxu0 %v12137_v17  ;;  %v11300_v17 = vld [vmem:[%s21423_s3 + $0x358] sm:$0xf]  ;;  %v11441_v19 = vor.u32 %v15392_v7, %v11440_v6  ;;  %v11104_v7 = vld [vmem:[%s21423_s3 + $0x1d0] sm:$0xf] }
  0xd5   :  { %2594 = vmatpush.bf16.msrb.mxu1 %v11409_v25  ;;  %v15413_v25 = vld [vmem:[%s21423_s3 + $0x530] sm:$0xf0]  ;;  %v11301_v29 = vor.u32 %v15357_v18, %v11300_v17  ;;  %v11664_v18 = vld [vmem:[%s21423_s3 + $0x630] sm:$0xf] }
  0xd6   :  { %2619 = vmatpush.bf16.msra.mxu2 %v11885_v20  ;;  %v11077_v20 = vor.u32 %v15301_v5, %v11076_v0  ;;  %v11525_v34 = vor.u32 %v15413_v25, %v11524_v22  ;;  %v11469_v0 = vor.u32 %v15399_v58, %v11468_v57  ;;  %v15329_v22 = vld [vmem:[%s21423_s3 + $0x290] sm:$0xf0]  ;;  %v15315_v57 = vld [vmem:[%s21423_s3 + $0x220] sm:$0xf0] }
  0xd7   :  { %2607 = vmatpush.bf16.msrb.mxu3 %v11633_v28  ;;  %v15294_v28 = vld [vmem:[%s21423_s3 + $0x178] sm:$0xf0] }
  0xd8   :  { %2632 = vmatpush.bf16.msrb.mxu0 %v12109_v31  ;;  %v11994_v31 = vld [vmem:[%s21423_s3 + $0x8e4] sm:$0xf0] }
  0xd9   :  { %2595 = vmatpush.bf16.msrb.mxu1 %v11381_v40  ;;  %v11049_v40 = vor.u32 %v15294_v28, %v11048_v27  ;;  %v15385_v27 = vld [vmem:[%s21423_s3 + $0x450] sm:$0xf0]  ;;  %v10936_v28 = vld [vmem:[%s21423_s3 + $0x80] sm:$0xf] }
  0xda   :  { %2620 = vmatpush.bf16.msra.mxu2 %v11857_v35  ;;  %v15469_v35 = vld [vmem:[%s21423_s3 + $0x6f0] sm:$0xf0] }
  0xdb   :  { %2608 = vmatpush.bf16.msrb.mxu3 %v11605_v43  ;;  %v11997_v43 = vor.u32 %v15528_v30, %v11994_v31 }
  0xdc   :  { %2633 = vmatpush.bf16.msrb.mxu0 %v12081_v47  ;;  %v11749_v47 = vor.u32 %v15469_v35, %v11748_v33  ;;  %v11636_v33 = vld [vmem:[%s21423_s3 + $0x5f8] sm:$0xf]  ;;  %v15441_v35 = vld [vmem:[%s21423_s3 + $0x610] sm:$0xf0] }
  0xdd   :  { %2596 = vmatpush.bf16.msrb.mxu1 %v11353_v54  ;;  %v15343_v54 = vld [vmem:[%s21423_s3 + $0x300] sm:$0xf0] }
  0xde   :  { %2621 = vmatpush.bf16.msra.mxu2 %v11829_v50  ;;  %v2341_v50 = vpop.f32.mrf.mxu3  ;;  %v11245_v62 = vor.u32 %v15343_v54, %v11244_v53  ;;  %v11385_v53 = vor.u32 %v15378_v42, %v11384_v41  ;;  %v15434_v54 = vld [vmem:[%s21423_s3 + $0x5d8] sm:$0xf0]  ;;  %v11302_v42 = vld [vmem:[%s21423_s3 + $0x374] sm:$0xf0] }
  0xdf   :  { %2609 = vmatpush.bf16.msrb.mxu3 %v11577_v59  ;;  %v10992_v59 = vld [vmem:[%s21423_s3 + $0xf0] sm:$0xf]  ;;  %v11608_v50 = vld [vmem:[%s21423_s3 + $0x5c0] sm:$0xf]  ;;  %v15354_v41 = vld [vmem:[%s21423_s3 + $0x35c] sm:$0xf] }
  0xe0   :  { %2634 = vmatpush.bf16.msrb.mxu0 %v12053_v63  ;;  %v11692_v63 = vld [vmem:[%s21423_s3 + $0x668] sm:$0xf]  ;;  %v10993_v5 = vor.u32 %v15280_v60, %v10992_v59  ;;  %v17880_v8 = vpop.f32.mrf.mxu0  ;;  %v15371_v60 = vld [vmem:[%s21423_s3 + $0x3e0] sm:$0xf0] }
  0xe1   :  { %2597 = vmatpush.bf16.msrb.mxu1 %v11325_v10  ;;  %v10964_v10 = vld [vmem:[%s21423_s3 + $0xb8] sm:$0xf]  ;;  %v17888_v12 = vpop.f32.mrf.mxu1  ;;  %v11356_v59 = vld [vmem:[%s21423_s3 + $0x3c8] sm:$0xf] }
  0xe2   :  { %2622 = vmatpush.bf16.msra.mxu2 %v11801_v4  ;;  %v15336_v4 = vld [vmem:[%s21423_s3 + $0x2c8] sm:$0xf0]  ;;  %v10965_v25 = vor.u32 %v15273_v11, %v10964_v10  ;;  %v11357_v6 = vor.u32 %v15371_v60, %v11356_v59  ;;  %v11328_v11 = vld [vmem:[%s21423_s3 + $0x390] sm:$0xf]  ;;  %v12140_v60 = vld [vmem:[%s21423_s3 + $0x9e8] sm:$0xf] }
  0xe3   :  { %2610 = vmatpush.bf16.msrb.mxu3 %v11549_v14  ;;  %v11693_v14 = vor.u32 %v15455_v2, %v11692_v63  ;;  %v11217_v17 = vor.u32 %v15336_v4, %v11216_v3  ;;  %v11972_v63 = vld [vmem:[%s21423_s3 + $0x898] sm:$0xf]  ;;  %v15525_v3 = vld [vmem:[%s21423_s3 + $0x8b0] sm:$0xf0]  ;;  %v11580_v4 = vld [vmem:[%s21423_s3 + $0x588] sm:$0xf] }
  0xe4   :  { %2635 = vmatpush.bf16.msrb.mxu0 %v12025_v21  ;;  %2598 = vmatmul.bf16.vlgmr.msrb.gmra.mxu1 %v16802_v55  ;;  %v11188_v21 = vld [vmem:[%s21423_s3 + $0x278] sm:$0xf]  ;;  %v15308_v10 = vld [vmem:[%s21423_s3 + $0x1e8] sm:$0xf0] }
  0xe5   :  { %2649 = vmatpush.bf16.msra.mxu1 %v12221_v16  ;;  %v17890_v16 = vpop.f32.mrf.mxu2  ;;  %v11189_v31 = vor.u32 %v15329_v22, %v11188_v21  ;;  %v12224_v21 = vld [vmem:[%s21423_s3 + $0xa90] sm:$0xf]  ;;  %v15588_v22 = vld [vmem:[%s21423_s3 + $0xaa8] sm:$0xf0] }
  0xe6   :  { %2623 = vmatpush.bf16.msra.mxu2 %v11773_v26  ;;  %2611 = vmatmul.bf16.vlgmr.msrb.gmra.mxu3 %v16862_v24  ;;  %v11412_v26 = vld [vmem:[%s21423_s3 + $0x438] sm:$0xf]  ;;  %v12225_v38 = vor.u32 %v15588_v22, %v12224_v21 }
  0xe7   :  { %2655 = vmatpush.bf16.msra.mxu3 %v11077_v20  ;;  %v15448_v20 = vld [vmem:[%s21423_s3 + $0x648] sm:$0xf0] }
  0xe8   :  { %2636 = vmatpush.bf16.msrb.mxu0 %v11997_v43  ;;  %v11665_v30 = vor.u32 %v15448_v20, %v11664_v18  ;;  %v10908_v43 = vld [vmem:[%s21423_s3 + $0x48] sm:$0xf]  ;;  %v2354_v45 = vpop.f32.mrf.mxu0  ;;  %v12196_v18 = vld [vmem:[%s21423_s3 + $0xa58] sm:$0xf]  ;;  %v11973_v20 = vor.u32 %v15525_v3, %v11972_v63  ;;  %v15504_v63 = vld [vmem:[%s21423_s3 + $0x808] sm:$0xf0] }
  0xe9   :  { %2668 = vmatpush.bf16.msrb.mxu1 %v11301_v29  ;;  %2624 = vmatmul.bf16.vlgmr.msra.gmra.mxu2 %v16995_v32  ;;  %v15266_v29 = vld [vmem:[%s21423_s3 + $0x98] sm:$0xf0]  ;;  %v2367_v52 = vpop.f32.mrf.mxu1  ;;  %v10909_v58 = vor.u32 %v15259_v44, %v10908_v43  ;;  %v12168_v44 = vld [vmem:[%s21423_s3 + $0xa20] sm:$0xf]  ;;  %v15284_v3 = vld [vmem:[%s21423_s3 + $0x12c] sm:$0xf] }
  0xea   :  { %2681 = vmatpush.bf16.msrb.mxu2 %v11525_v34  ;;  %v11413_v34 = vor.u32 %v15385_v27, %v11412_v26  ;;  %v11105_v27 = vor.u32 %v15308_v10, %v11104_v7  ;;  %v15574_v45 = vld [vmem:[%s21423_s3 + $0xa38] sm:$0xf0]  ;;  %v11305_v52 = vor.u32 %v15354_v41, %v11302_v42  ;;  %v11022_v7 = vld [vmem:[%s21423_s3 + $0x144] sm:$0xf0]  ;;  %v15340_v10 = vld [vmem:[%s21423_s3 + $0x2ec] sm:$0xf] }
  0xeb   :  { %2656 = vmatpush.bf16.msra.mxu3 %v11049_v40  ;;  %2637 = vmatmul.bf16.vlgmr.msrb.gmra.mxu0 %v17006_v37  ;;  %v10937_v40 = vor.u32 %v15266_v29, %v10936_v28  ;;  %v11944_v28 = vld [vmem:[%s21423_s3 + $0x860] sm:$0xf]  ;;  %v15518_v29 = vld [vmem:[%s21423_s3 + $0x878] sm:$0xf0]  ;;  %v11025_v21 = vor.u32 %v15284_v3, %v11022_v7  ;;  %v11776_v7 = vld [vmem:[%s21423_s3 + $0x710] sm:$0xf] }
  0xec   :  { %2694 = vmatpush.bf16.msra.mxu0 %v11749_v47  ;;  %v17942_v47 = vpop.f32.mrf.mxu3  ;;  %v11945_v43 = vor.u32 %v15518_v29, %v11944_v28  ;;  %v10994_v28 = vld [vmem:[%s21423_s3 + $0x10c] sm:$0xf0]  ;;  %v15333_v29 = vld [vmem:[%s21423_s3 + $0x2b4] sm:$0xf]  ;;  %v15270_v42 = vld [vmem:[%s21423_s3 + $0xbc] sm:$0xf] }
  0xed   :  { %2669 = vmatpush.bf16.msrb.mxu1 %v11273_v48  ;;  %v11637_v48 = vor.u32 %v15441_v35, %v11636_v33  ;;  %v11552_v33 = vld [vmem:[%s21423_s3 + $0x550] sm:$0xf]  ;;  %v15298_v35 = vld [vmem:[%s21423_s3 + $0x19c] sm:$0xf]  ;;  %v11162_v3 = vld [vmem:[%s21423_s3 + $0x25c] sm:$0xf0] }
  0xee   :  { %2682 = vmatpush.bf16.msrb.mxu2 %v11497_v51  ;;  %v2380_v51 = vpop.f32.mrf.mxu2 }
  0xef   :  { %2657 = vmatpush.bf16.msra.mxu3 %v11021_v56  ;;  %v11132_v56 = vld [vmem:[%s21423_s3 + $0x208] sm:$0xf] }
  0xf0   :  { %2695 = vmatpush.bf16.msra.mxu0 %v11721_v61  ;;  %v10880_v61 = vld [vmem:[%s21423_s3 + $0x10] sm:$0xf]  ;;  %v11133_v2 = vor.u32 %v15315_v57, %v11132_v56  ;;  %v11050_v56 = vld [vmem:[%s21423_s3 + $0x17c] sm:$0xf0]  ;;  %v15347_v57 = vld [vmem:[%s21423_s3 + $0x324] sm:$0xf] }
  0xf1   :  { %2670 = vmatpush.bf16.msrb.mxu1 %v11245_v62  ;;  %v15252_v62 = vld [vmem:[%s21423_s3 + $0x28] sm:$0xf0] }
  0xf2   :  { %2683 = vmatpush.bf16.msrb.mxu2 %v11469_v0  ;;  %v11609_v0 = vor.u32 %v15434_v54, %v11608_v50  ;;  %v15511_v50 = vld [vmem:[%s21423_s3 + $0x840] sm:$0xf0]  ;;  %v12169_v54 = vor.u32 %v15574_v45, %v12168_v44  ;;  %v10966_v45 = vld [vmem:[%s21423_s3 + $0xd4] sm:$0xf0] }
  0xf3   :  { %2658 = vmatpush.bf16.msra.mxu3 %v10993_v5  ;;  %v15427_v5 = vld [vmem:[%s21423_s3 + $0x5a0] sm:$0xf0] }
  0xf4   :  { %2696 = vmatpush.bf16.msra.mxu0 %v11693_v14  ;;  %12237 = vmatmul.msk.bf16.vlgmr.msra.gmra.mxu1 %vm2287_vm0, %v16958_v9  ;;  %v10881_v14 = vor.u32 %v15252_v62, %v10880_v61  ;;  %v11581_v26 = vor.u32 %v15427_v5, %v11580_v4  ;;  %v15567_v61 = vld [vmem:[%s21423_s3 + $0xa00] sm:$0xf0]  ;;  %v11888_v62 = vld [vmem:[%s21423_s3 + $0x7f0] sm:$0xf] }
  0xf5   :  { %2671 = vmatpush.bf16.msrb.mxu1 %v11217_v17  ;;  %v15364_v17 = vld [vmem:[%s21423_s3 + $0x3a8] sm:$0xf0] }
  0xf6   :  { %2684 = vmatpush.bf16.msrb.mxu2 %v11441_v19  ;;  %v15581_v19 = vld [vmem:[%s21423_s3 + $0xa70] sm:$0xf0]  ;;  %v2404_v36 = vpop.f32.mrf.mxu2 }
  0xf7   :  { %2659 = vmatpush.bf16.msra.mxu3 %v10965_v25  ;;  %v2393_v25 = vpop.f32.mrf.mxu3  ;;  %v2405_v5 = vadd.f32 %v2404_v36, %v17942_v47  ;;  %v12112_v47 = vld [vmem:[%s21423_s3 + $0x9b0] sm:$0xf]  ;;  %v15490_v36 = vld [vmem:[%s21423_s3 + $0x798] sm:$0xf0] }
  0xf8   :  { %2697 = vmatpush.bf16.msra.mxu0 %v11665_v30  ;;  %v11329_v30 = vor.u32 %v15364_v17, %v11328_v11  ;;  %v11246_v11 = vld [vmem:[%s21423_s3 + $0x304] sm:$0xf0]  ;;  %v15560_v17 = vld [vmem:[%s21423_s3 + $0x9c8] sm:$0xf0]  ;;  %v15277_v25 = vld [vmem:[%s21423_s3 + $0xf4] sm:$0xf] }
  0xf9   :  { %2672 = vmatpush.bf16.msrb.mxu1 %v11189_v31  ;;  %v12197_v31 = vor.u32 %v15581_v19, %v12196_v18  ;;  %v11860_v18 = vld [vmem:[%s21423_s3 + $0x7b8] sm:$0xf]  ;;  %v15497_v19 = vld [vmem:[%s21423_s3 + $0x7d0] sm:$0xf0]  ;;  %v11249_v22 = vor.u32 %v15340_v10, %v11246_v11  ;;  %v15476_v10 = vld [vmem:[%s21423_s3 + $0x728] sm:$0xf0] }
  0xfa   :  { %2685 = vmatpush.bf16.msrb.mxu2 %v11413_v34  ;;  %v15420_v34 = vld [vmem:[%s21423_s3 + $0x568] sm:$0xf0] }
  0xfb   :  { %2660 = vmatpush.bf16.msra.mxu3 %v10937_v40  ;;  %v11078_v40 = vld [vmem:[%s21423_s3 + $0x1b4] sm:$0xf0] }
  0xfc   :  { %2698 = vmatpush.bf16.msra.mxu0 %v11637_v48  ;;  %v11553_v48 = vor.u32 %v15420_v34, %v11552_v33  ;;  %v11081_v51 = vor.u32 %v15298_v35, %v11078_v40  ;;  %v12084_v33 = vld [vmem:[%s21423_s3 + $0x978] sm:$0xf]  ;;  %v15553_v34 = vld [vmem:[%s21423_s3 + $0x990] sm:$0xf0]  ;;  %v11832_v35 = vld [vmem:[%s21423_s3 + $0x780] sm:$0xf] }
  0xfd   :  { %2673 = vmatpush.bf16.msrb.mxu1 %v11161_v49  ;;  %v11916_v49 = vld [vmem:[%s21423_s3 + $0x828] sm:$0xf]  ;;  %v12085_v44 = vor.u32 %v15553_v34, %v12084_v33  ;;  %v11750_v33 = vld [vmem:[%s21423_s3 + $0x6f4] sm:$0xf0]  ;;  %v15403_v34 = vld [vmem:[%s21423_s3 + $0x4e4] sm:$0xf] }
  0xfe   :  { %2686 = vmatpush.bf16.msrb.mxu2 %v11385_v53  ;;  %v15291_v53 = vld [vmem:[%s21423_s3 + $0x164] sm:$0xf]  ;;  %v11917_v59 = vor.u32 %v15511_v50, %v11916_v49  ;;  %v2406_v4 = vpop.f32.mrf.mxu2  ;;  %v11190_v49 = vld [vmem:[%s21423_s3 + $0x294] sm:$0xf0]  ;;  %v11833_v50 = vor.u32 %v15490_v36, %v11832_v35 }
  0xff   :  { %2661 = vmatpush.bf16.msra.mxu3 %v10909_v58  ;;  %v11274_v58 = vld [vmem:[%s21423_s3 + $0x33c] sm:$0xf0] }
 0x100   :  { %2699 = vmatpush.bf16.msra.mxu0 %v11609_v0  ;;  %v11053_v0 = vor.u32 %v15291_v53, %v11050_v56  ;;  %v11804_v53 = vld [vmem:[%s21423_s3 + $0x748] sm:$0xf] }
 0x101   :  { %2674 = vmatpush.bf16.msrb.mxu1 %v11133_v2  ;;  %v11277_v2 = vor.u32 %v15347_v57, %v11274_v58  ;;  %v2430_v41 = vpop.f32.mrf.mxu1  ;;  %v10969_v58 = vor.u32 %v15270_v42, %v10966_v45  ;;  %v10882_v42 = vld [vmem:[%s21423_s3 + $0x2c] sm:$0xf0] }
 0x102   :  { %2687 = vmatpush.bf16.msrb.mxu2 %v11357_v6  ;;  %v12141_v6 = vor.u32 %v15567_v61, %v12140_v60  ;;  %v15263_v60 = vld [vmem:[%s21423_s3 + $0x84] sm:$0xf] }
 0x103   :  { %2662 = vmatpush.bf16.msra.mxu3 %v10881_v14  ;;  %v11889_v14 = vor.u32 %v15504_v63, %v11888_v62 }
 0x104   :  { %2700 = vmatpush.bf16.msra.mxu0 %v11581_v26 }
 0x105   :  { %2675 = vmatpush.bf16.msrb.mxu1 %v11105_v27  ;;  %v12113_v27 = vor.u32 %v15560_v17, %v12112_v47  ;;  %v15410_v47 = vld [vmem:[%s21423_s3 + $0x51c] sm:$0xf]  ;;  %v11526_v17 = vld [vmem:[%s21423_s3 + $0x534] sm:$0xf0] }
 0x106   :  { %2688 = vmatpush.bf16.msrb.mxu2 %v11329_v30  ;;  %2663 = vmatmul.bf16.vlgmr.msra.gmra.mxu3 %v16816_v1  ;;  %v11218_v30 = vld [vmem:[%s21423_s3 + $0x2cc] sm:$0xf0] }
 0x107   :  { %2707 = vmatpush.bf16.msrb.mxu3 %v11973_v20  ;;  %v2417_v20 = vpop.f32.mrf.mxu0  ;;  %v11221_v40 = vor.u32 %v15333_v29, %v11218_v30  ;;  %v11529_v30 = vor.u32 %v15410_v47, %v11526_v17  ;;  %v15389_v47 = vld [vmem:[%s21423_s3 + $0x474] sm:$0xf]  ;;  %v11442_v17 = vld [vmem:[%s21423_s3 + $0x48c] sm:$0xf0] }
 0x108   :  { %2676 = vmatmul.bf16.vlgmr.msrb.gmra.mxu1 %v16844_v15  ;;  %2701 = vmatpush.bf16.msra.mxu0 %v11553_v48  ;;  %v2418_v26 = vadd.f32 %v2417_v20, %v2405_v5  ;;  %v15326_v48 = vld [vmem:[%s21423_s3 + $0x27c] sm:$0xf]  ;;  %v12028_v5 = vld [vmem:[%s21423_s3 + $0x908] sm:$0xf] }
 0x109   :  { %2720 = vmatpush.bf16.msra.mxu1 %v12197_v31  ;;  %2689 = vmatmul.bf16.vlgmr.msrb.gmra.mxu2 %v16802_v55  ;;  %v11861_v31 = vor.u32 %v15497_v19, %v11860_v18  ;;  %v2443_v57 = vpop.f32.mrf.mxu3  ;;  %v15256_v18 = vld [vmem:[%s21423_s3 + $0x4c] sm:$0xf]  ;;  %v2432_v19 = vpop.f32.mrf.mxu1 }
 0x10a   :  { %2740 = vmatpush.bf16.msra.mxu2 %v12225_v38  ;;  %v10997_v38 = vor.u32 %v15277_v25, %v10994_v28  ;;  %v11134_v25 = vld [vmem:[%s21423_s3 + $0x224] sm:$0xf0]  ;;  %v15532_v28 = vld [vmem:[%s21423_s3 + $0x8e8] sm:$0xf0] }
 0x10b   :  { %2708 = vmatpush.bf16.msrb.mxu3 %v11945_v43  ;;  %2702 = vmatmul.bf16.vlgmr.msra.gmra.mxu0 %v16862_v24  ;;  %v2431_v43 = vadd.f32 %v2430_v41, %v2418_v26  ;;  %v11777_v26 = vor.u32 %v15476_v10, %v11776_v7  ;;  %v15249_v41 = vld [vmem:[%s21423_s3 + $0x14] sm:$0xf]  ;;  %v12170_v7 = vld [vmem:[%s21423_s3 + $0xa3c] sm:$0xf0] }
 0x10c   :  { %2746 = vmatpush.bf16.msrb.mxu0 %v11081_v51  ;;  %v12056_v51 = vld [vmem:[%s21423_s3 + $0x940] sm:$0xf]  ;;  %v2456_v62 = vpop.f32.mrf.mxu2 }
 0x10d   :  { %2721 = vmatpush.bf16.msra.mxu1 %v12169_v54  ;;  %v15483_v54 = vld [vmem:[%s21423_s3 + $0x760] sm:$0xf0]  ;;  %v2444_v61 = vadd.f32 %v2443_v57, %v2431_v43 }
 0x10e   :  { %2759 = vmatpush.bf16.msrb.mxu2 %v11305_v52  ;;  %v15546_v52 = vld [vmem:[%s21423_s3 + $0x958] sm:$0xf0]  ;;  %v11805_v4 = vor.u32 %v15483_v54, %v11804_v53  ;;  %v11974_v53 = vld [vmem:[%s21423_s3 + $0x8b4] sm:$0xf0] }
 0x10f   :  { %2709 = vmatpush.bf16.msrb.mxu3 %v11917_v59  ;;  %v2419_v56 = vpop.f32.mrf.mxu0  ;;  %v11193_v59 = vor.u32 %v15326_v48, %v11190_v49  ;;  %v12057_v63 = vor.u32 %v15546_v52, %v12056_v51  ;;  %v2457_v29 = vadd.f32 %v2456_v62, %v2444_v61  ;;  %v15305_v48 = vld [vmem:[%s21423_s3 + $0x1d4] sm:$0xf]  ;;  %v11106_v49 = vld [vmem:[%s21423_s3 + $0x1ec] sm:$0xf0]  ;;  %v15578_v54 = vld [vmem:[%s21423_s3 + $0xa5c] sm:$0xf] }
 0x110   :  { %2747 = vmatpush.bf16.msrb.mxu0 %v11053_v0  ;;  %v10938_v0 = vld [vmem:[%s21423_s3 + $0x9c] sm:$0xf0]  ;;  %v12198_v56 = vld [vmem:[%s21423_s3 + $0xa74] sm:$0xf0]  ;;  %v11109_v61 = vor.u32 %v15305_v48, %v11106_v49  ;;  %v15396_v62 = vld [vmem:[%s21423_s3 + $0x4ac] sm:$0xf] }
 0x111   :  { %2722 = vmatpush.bf16.msra.mxu1 %v12141_v6  ;;  %v15539_v6 = vld [vmem:[%s21423_s3 + $0x920] sm:$0xf0]  ;;  %v10941_v11 = vor.u32 %v15263_v60, %v10938_v0  ;;  %v2445_v43 = vpop.f32.mrf.mxu3  ;;  %v10885_v60 = vor.u32 %v15249_v41, %v10882_v42  ;;  %v15557_v41 = vld [vmem:[%s21423_s3 + $0x9b4] sm:$0xf]  ;;  %v12114_v42 = vld [vmem:[%s21423_s3 + $0x9cc] sm:$0xf0] }
 0x112   :  { %2760 = vmatpush.bf16.msrb.mxu2 %v11277_v2  ;;  %v15319_v2 = vld [vmem:[%s21423_s3 + $0x244] sm:$0xf]  ;;  %v12029_v20 = vor.u32 %v15539_v6, %v12028_v5  ;;  %v11946_v5 = vld [vmem:[%s21423_s3 + $0x87c] sm:$0xf0]  ;;  %v11638_v48 = vld [vmem:[%s21423_s3 + $0x614] sm:$0xf0] }
 0x113   :  { %2710 = vmatpush.bf16.msrb.mxu3 %v11889_v14  ;;  %v11165_v14 = vor.u32 %v15319_v2, %v11162_v3  ;;  %v12201_v2 = vor.u32 %v15578_v54, %v12198_v56  ;;  %v15515_v3 = vld [vmem:[%s21423_s3 + $0x864] sm:$0xf]  ;;  %v15494_v54 = vld [vmem:[%s21423_s3 + $0x7bc] sm:$0xf] }
 0x114   :  { %2748 = vmatpush.bf16.msrb.mxu0 %v11025_v21  ;;  %v10910_v21 = vld [vmem:[%s21423_s3 + $0x64] sm:$0xf0]  ;;  %v2458_v51 = vpop.f32.mrf.mxu2  ;;  %v15571_v6 = vld [vmem:[%s21423_s3 + $0xa24] sm:$0xf]  ;;  %v11949_v19 = vor.u32 %v15515_v3, %v11946_v5 }
 0x115   :  { %2723 = vmatpush.bf16.msra.mxu1 %v12113_v27  ;;  %v12000_v27 = vld [vmem:[%s21423_s3 + $0x8d0] sm:$0xf]  ;;  %v10913_v36 = vor.u32 %v15256_v18, %v10910_v21  ;;  %v15508_v21 = vld [vmem:[%s21423_s3 + $0x82c] sm:$0xf]  ;;  %v15375_v49 = vld [vmem:[%s21423_s3 + $0x404] sm:$0xf] }
 0x116   :  { %2761 = vmatpush.bf16.msrb.mxu2 %v11249_v22  ;;  %v15312_v22 = vld [vmem:[%s21423_s3 + $0x20c] sm:$0xf]  ;;  %v12001_v45 = vor.u32 %v15532_v28, %v12000_v27  ;;  %v12142_v27 = vld [vmem:[%s21423_s3 + $0xa04] sm:$0xf0]  ;;  %v11445_v28 = vor.u32 %v15389_v47, %v11442_v17  ;;  %v15487_v5 = vld [vmem:[%s21423_s3 + $0x784] sm:$0xf] }
 0x117   :  { %2711 = vmatpush.bf16.msrb.mxu3 %v11861_v31  ;;  %v15466_v31 = vld [vmem:[%s21423_s3 + $0x6dc] sm:$0xf]  ;;  %v2469_v35 = vpop.f32.mrf.mxu0 }
 0x118   :  { %2749 = vmatpush.bf16.msrb.mxu0 %v10997_v38  ;;  %v11137_v38 = vor.u32 %v15312_v22, %v11134_v25  ;;  %v11753_v52 = vor.u32 %v15466_v31, %v11750_v33  ;;  %v11918_v25 = vld [vmem:[%s21423_s3 + $0x844] sm:$0xf0]  ;;  %v15382_v31 = vld [vmem:[%s21423_s3 + $0x43c] sm:$0xf]  ;;  %v11414_v33 = vld [vmem:[%s21423_s3 + $0x454] sm:$0xf0] }
 0x119   :  { %2724 = vmatpush.bf16.msra.mxu1 %v12085_v44  ;;  %12238 = vmatmul.msk.bf16.vlgmr.msra.gmra.mxu2 %vm2287_vm0, %v16958_v9  ;;  %v18209_v44 = vadd.f32 %v2469_v35, %v2457_v29  ;;  %v15445_v29 = vld [vmem:[%s21423_s3 + $0x634] sm:$0xf]  ;;  %v11417_v43 = vor.u32 %v15382_v31, %v11414_v33 }
 0x11a   :  { %2762 = vmatpush.bf16.msrb.mxu2 %v11221_v40  ;;  %v11498_v40 = vld [vmem:[%s21423_s3 + $0x4fc] sm:$0xf0] }
 0x11b   :  { %2712 = vmatpush.bf16.msrb.mxu3 %v11833_v50  ;;  %v15522_v50 = vld [vmem:[%s21423_s3 + $0x89c] sm:$0xf]  ;;  %v11501_v57 = vor.u32 %v15403_v34, %v11498_v40  ;;  %v11921_v34 = vor.u32 %v15508_v21, %v11918_v25  ;;  %v11890_v40 = vld [vmem:[%s21423_s3 + $0x80c] sm:$0xf0] }
 0x11c   :  { %2750 = vmatpush.bf16.msrb.mxu0 %v10969_v58  ;;  %v15459_v58 = vld [vmem:[%s21423_s3 + $0x6a4] sm:$0xf]  ;;  %v11977_v0 = vor.u32 %v15522_v50, %v11974_v53  ;;  %v11386_v50 = vld [vmem:[%s21423_s3 + $0x41c] sm:$0xf0]  ;;  %v12117_v53 = vor.u32 %v15557_v41, %v12114_v42  ;;  %v11330_v21 = vld [vmem:[%s21423_s3 + $0x3ac] sm:$0xf0] }
 0x11d   :  { %2725 = vmatpush.bf16.msra.mxu1 %v12057_v63  ;;  %v11470_v63 = vld [vmem:[%s21423_s3 + $0x4c4] sm:$0xf0]  ;;  %v15417_v41 = vld [vmem:[%s21423_s3 + $0x554] sm:$0xf]  ;;  %v11554_v42 = vld [vmem:[%s21423_s3 + $0x56c] sm:$0xf0] }
 0x11e   :  { %2763 = vmatpush.bf16.msrb.mxu2 %v11193_v59  ;;  %v11722_v59 = vld [vmem:[%s21423_s3 + $0x6bc] sm:$0xf0]  ;;  %v11473_v10 = vor.u32 %v15396_v62, %v11470_v63  ;;  %v15431_v62 = vld [vmem:[%s21423_s3 + $0x5c4] sm:$0xf] }
 0x11f   :  { %2713 = vmatpush.bf16.msrb.mxu3 %v11805_v4  ;;  %v11725_v4 = vor.u32 %v15459_v58, %v11722_v59  ;;  %v2471_v18 = vpop.f32.mrf.mxu0  ;;  %v11862_v58 = vld [vmem:[%s21423_s3 + $0x7d4] sm:$0xf0]  ;;  %v15550_v59 = vld [vmem:[%s21423_s3 + $0x97c] sm:$0xf]  ;;  %v11610_v63 = vld [vmem:[%s21423_s3 + $0x5dc] sm:$0xf0] }
 0x120   :  { %2751 = vmatpush.bf16.msrb.mxu0 %v10941_v11  ;;  %v15452_v11 = vld [vmem:[%s21423_s3 + $0x66c] sm:$0xf]  ;;  %v11865_v3 = vor.u32 %v15494_v54, %v11862_v58  ;;  %v11778_v54 = vld [vmem:[%s21423_s3 + $0x72c] sm:$0xf0]  ;;  %v11557_v58 = vor.u32 %v15417_v41, %v11554_v42 }
 0x121   :  { %2726 = vmatpush.bf16.msra.mxu1 %v12029_v20  ;;  %v12173_v20 = vor.u32 %v15571_v6, %v12170_v7  ;;  %v2482_v56 = vpop.f32.mrf.mxu1  ;;  %v11613_v7 = vor.u32 %v15431_v62, %v11610_v63  ;;  %v15424_v18 = vld [vmem:[%s21423_s3 + $0x58c] sm:$0xf]  ;;  %v11700_v41 = vld [vmem:[%s21423_s3 + $0x670] sm:$0xf] }
 0x122   :  { %2764 = vmatpush.bf16.msrb.mxu2 %v11165_v14  ;;  %v11694_v14 = vld [vmem:[%s21423_s3 + $0x684] sm:$0xf0]  ;;  %v15456_v42 = vld [vmem:[%s21423_s3 + $0x688] sm:$0xf0] }
 0x123   :  { %2714 = vmatpush.bf16.msrb.mxu3 %v11777_v26  ;;  %v11697_v22 = vor.u32 %v15452_v11, %v11694_v14  ;;  %v15564_v26 = vld [vmem:[%s21423_s3 + $0x9ec] sm:$0xf]  ;;  %v15543_v11 = vld [vmem:[%s21423_s3 + $0x944] sm:$0xf]  ;;  %v12058_v14 = vld [vmem:[%s21423_s3 + $0x95c] sm:$0xf0] }
 0x124   :  { %2752 = vmatpush.bf16.msrb.mxu0 %v10913_v36  ;;  %v12145_v35 = vor.u32 %v15564_v26, %v12142_v27  ;;  %v15501_v36 = vld [vmem:[%s21423_s3 + $0x7f4] sm:$0xf]  ;;  %v12061_v27 = vor.u32 %v15543_v11, %v12058_v14 }
 0x125   :  { %2727 = vmatpush.bf16.msra.mxu1 %v12001_v45  ;;  %v15438_v45 = vld [vmem:[%s21423_s3 + $0x5fc] sm:$0xf] }
 0x126   :  { %2765 = vmatpush.bf16.msrb.mxu2 %v11137_v38  ;;  %2715 = vmatmul.bf16.vlgmr.msrb.gmra.mxu3 %v16995_v32 }
 0x127   :  { %2772 = vmatpush.bf16.msra.mxu3 %v11529_v30  ;;  %v11666_v30 = vld [vmem:[%s21423_s3 + $0x64c] sm:$0xf0]  ;;  %v2508_v51 = vpop.f32.mrf.mxu0 }
 0x128   :  { %2753 = vmatpush.bf16.msrb.mxu0 %v10885_v60  ;;  %2728 = vmatmul.bf16.vlgmr.msra.gmra.mxu1 %v17006_v37  ;;  %v11669_v38 = vor.u32 %v15445_v29, %v11666_v30  ;;  %v12086_v60 = vld [vmem:[%s21423_s3 + $0x994] sm:$0xf0]  ;;  %v15585_v29 = vld [vmem:[%s21423_s3 + $0xa94] sm:$0xf]  ;;  %v12226_v30 = vld [vmem:[%s21423_s3 + $0xaac] sm:$0xf0] }
 0x129   :  { %2785 = vmatpush.bf16.msrb.mxu1 %v11753_v52  ;;  %v11893_v52 = vor.u32 %v15501_v36, %v11890_v40  ;;  %v2495_v6 = vpop.f32.mrf.mxu3  ;;  %v2484_v31 = vpop.f32.mrf.mxu1  ;;  %v15536_v36 = vld [vmem:[%s21423_s3 + $0x90c] sm:$0xf] }
 0x12a   :  { %2766 = vmatpush.bf16.msrb.mxu2 %v11109_v61  ;;  %v11389_v61 = vor.u32 %v15375_v49, %v11386_v50  ;;  %v2496_v47 = vadd.f32 %v2495_v6, %v2482_v56  ;;  %v11308_v49 = vld [vmem:[%s21423_s3 + $0x360] sm:$0xf]  ;;  %v15358_v50 = vld [vmem:[%s21423_s3 + $0x378] sm:$0xf0]  ;;  %v15529_v56 = vld [vmem:[%s21423_s3 + $0x8d4] sm:$0xf] }
 0x12b   :  { %2773 = vmatpush.bf16.msra.mxu3 %v11501_v57  ;;  %2754 = vmatmul.bf16.vlgmr.msrb.gmra.mxu0 %v16816_v1  ;;  %v11641_v57 = vor.u32 %v15438_v45, %v11638_v48  ;;  %v12229_v45 = vor.u32 %v15585_v29, %v12226_v30  ;;  %v15302_v48 = vld [vmem:[%s21423_s3 + $0x1b8] sm:$0xf0]  ;;  %v11309_v63 = vor.u32 %v15358_v50, %v11308_v49  ;;  %v15351_v6 = vld [vmem:[%s21423_s3 + $0x340] sm:$0xf0]  ;;  %v11252_v29 = vld [vmem:[%s21423_s3 + $0x2f0] sm:$0xf] }
 0x12c   :  { %2798 = vmatpush.bf16.msra.mxu0 %v11977_v0  ;;  %v15368_v0 = vld [vmem:[%s21423_s3 + $0x3cc] sm:$0xf]  ;;  %v18376_v33 = vpop.f32.mrf.mxu2  ;;  %v15337_v49 = vld [vmem:[%s21423_s3 + $0x2d0] sm:$0xf0] }
 0x12d   :  { %2786 = vmatpush.bf16.msrb.mxu1 %v11725_v4  ;;  %2767 = vmatmul.bf16.vlgmr.msrb.gmra.mxu2 %v16844_v15  ;;  %v12089_v4 = vor.u32 %v15550_v59, %v12086_v60  ;;  %v12002_v59 = vld [vmem:[%s21423_s3 + $0x8ec] sm:$0xf0]  ;;  %v11532_v60 = vld [vmem:[%s21423_s3 + $0x520] sm:$0xf]  ;;  %v15344_v30 = vld [vmem:[%s21423_s3 + $0x308] sm:$0xf0] }
 0x12e   :  { %2811 = vmatpush.bf16.msra.mxu2 %v12201_v2  ;;  %v11358_v2 = vld [vmem:[%s21423_s3 + $0x3e4] sm:$0xf0]  ;;  %v12005_v11 = vor.u32 %v15529_v56, %v12002_v59  ;;  %v11672_v59 = vld [vmem:[%s21423_s3 + $0x638] sm:$0xf] }
 0x12f   :  { %2774 = vmatpush.bf16.msra.mxu3 %v11473_v10  ;;  %v11834_v10 = vld [vmem:[%s21423_s3 + $0x79c] sm:$0xf0]  ;;  %v11361_v17 = vor.u32 %v15368_v0, %v11358_v2  ;;  %v2510_v25 = vpop.f32.mrf.mxu0  ;;  %v15470_v2 = vld [vmem:[%s21423_s3 + $0x6f8] sm:$0xf0] }
 0x130   :  { %2799 = vmatpush.bf16.msra.mxu0 %v11949_v19  ;;  %v11582_v19 = vld [vmem:[%s21423_s3 + $0x5a4] sm:$0xf0]  ;;  %v11837_v26 = vor.u32 %v15487_v5, %v11834_v10  ;;  %v11756_v0 = vld [vmem:[%s21423_s3 + $0x6e0] sm:$0xf] }
 0x131   :  { %2787 = vmatpush.bf16.msrb.mxu1 %v11697_v22  ;;  %v18365_v22 = vadd.f32 %v2508_v51, %v2496_v47  ;;  %v11280_v5 = vld [vmem:[%s21423_s3 + $0x328] sm:$0xf] }
 0x132   :  { %2812 = vmatpush.bf16.msra.mxu2 %v12173_v20  ;;  %v15361_v20 = vld [vmem:[%s21423_s3 + $0x394] sm:$0xf]  ;;  %v11728_v25 = vld [vmem:[%s21423_s3 + $0x6a8] sm:$0xf] }
 0x133   :  { %2775 = vmatpush.bf16.msra.mxu3 %v11445_v28  ;;  %v15480_v28 = vld [vmem:[%s21423_s3 + $0x74c] sm:$0xf]  ;;  %v11333_v40 = vor.u32 %v15361_v20, %v11330_v21  ;;  %v11281_v21 = vor.u32 %v15351_v6, %v11280_v5  ;;  %v11420_v5 = vld [vmem:[%s21423_s3 + $0x440] sm:$0xf]  ;;  %v15386_v6 = vld [vmem:[%s21423_s3 + $0x458] sm:$0xf0] }
 0x134   :  { %2800 = vmatpush.bf16.msra.mxu0 %v11921_v34  ;;  %v11585_v34 = vor.u32 %v15424_v18, %v11582_v19  ;;  %v2523_v14 = vpop.f32.mrf.mxu2  ;;  %v11504_v18 = vld [vmem:[%s21423_s3 + $0x4e8] sm:$0xf]  ;;  %v15407_v19 = vld [vmem:[%s21423_s3 + $0x500] sm:$0xf0] }
 0x135   :  { %2788 = vmatpush.bf16.msrb.mxu1 %v11669_v38  ;;  %v12030_v38 = vld [vmem:[%s21423_s3 + $0x924] sm:$0xf0]  ;;  %v11505_v31 = vor.u32 %v15407_v19, %v11504_v18  ;;  %v15442_v14 = vld [vmem:[%s21423_s3 + $0x618] sm:$0xf0] }
 0x136   :  { %2813 = vmatpush.bf16.msra.mxu2 %v12145_v35  ;;  %v11806_v35 = vld [vmem:[%s21423_s3 + $0x764] sm:$0xf0] }
 0x137   :  { %2776 = vmatpush.bf16.msra.mxu3 %v11417_v43  ;;  %v11084_v43 = vld [vmem:[%s21423_s3 + $0x1a0] sm:$0xf]  ;;  %v11809_v51 = vor.u32 %v15480_v28, %v11806_v35  ;;  %v15288_v28 = vld [vmem:[%s21423_s3 + $0x148] sm:$0xf0]  ;;  %v11476_v35 = vld [vmem:[%s21423_s3 + $0x4b0] sm:$0xf] }
 0x138   :  { %2801 = vmatpush.bf16.msra.mxu0 %v11893_v52  ;;  %v12033_v52 = vor.u32 %v15536_v36, %v12030_v38  ;;  %v11085_v62 = vor.u32 %v15302_v48, %v11084_v43  ;;  %v15400_v36 = vld [vmem:[%s21423_s3 + $0x4c8] sm:$0xf0]  ;;  %v11000_v43 = vld [vmem:[%s21423_s3 + $0xf8] sm:$0xf] }
 0x139   :  { %2789 = vmatpush.bf16.msrb.mxu1 %v11641_v57  ;;  %v2497_v57 = vpop.f32.mrf.mxu3  ;;  %v11224_v48 = vld [vmem:[%s21423_s3 + $0x2b8] sm:$0xf] }
 0x13a   :  { %2814 = vmatpush.bf16.msra.mxu2 %v12117_v53  ;;  %v15473_v53 = vld [vmem:[%s21423_s3 + $0x714] sm:$0xf]  ;;  %v11225_v56 = vor.u32 %v15337_v49, %v11224_v48  ;;  %v11448_v57 = vld [vmem:[%s21423_s3 + $0x478] sm:$0xf] }
 0x13b   :  { %2777 = vmatpush.bf16.msra.mxu3 %v11389_v61  ;;  %v15414_v61 = vld [vmem:[%s21423_s3 + $0x538] sm:$0xf0]  ;;  %v11781_v10 = vor.u32 %v15473_v53, %v11778_v54  ;;  %v11701_v53 = vor.u32 %v15456_v42, %v11700_v41  ;;  %v15260_v41 = vld [vmem:[%s21423_s3 + $0x68] sm:$0xf0] }
 0x13c   :  { %2802 = vmatpush.bf16.msra.mxu0 %v11865_v3  ;;  %v11056_v3 = vld [vmem:[%s21423_s3 + $0x168] sm:$0xf]  ;;  %v11533_v47 = vor.u32 %v15414_v61, %v11532_v60  ;;  %v2314_v60 = vadd.f32 %v17714_v39, %v17688_v23  ;;  %v15449_v61 = vld [vmem:[%s21423_s3 + $0x650] sm:$0xf0]  ;;  %v15330_v23 = vld [vmem:[%s21423_s3 + $0x298] sm:$0xf0]  ;;  %v2522_v39 = vadd.f32 %v18376_v33, %v18365_v22 }
 0x13d   :  { %2790 = vmatpush.bf16.msrb.mxu1 %v11613_v7  ;;  %v18441_v7 = vpop.f32.mrf.mxu0 }
 0x13e   :  { %2815 = vmatpush.bf16.msra.mxu2 %v12089_v4  ;;  %v15295_v4 = vld [vmem:[%s21423_s3 + $0x180] sm:$0xf0]  ;;  %v2327_v22 = vadd.f32 %v17728_v46, %v2314_v60  ;;  %v11168_v46 = vld [vmem:[%s21423_s3 + $0x248] sm:$0xf]  ;;  %v15309_v60 = vld [vmem:[%s21423_s3 + $0x1f0] sm:$0xf0] }
 0x13f   :  { %2778 = vmatpush.bf16.msra.mxu3 %v11361_v17  ;;  %v11757_v17 = vor.u32 %v15470_v2, %v11756_v0  ;;  %v11057_v20 = vor.u32 %v15295_v4, %v11056_v3  ;;  %v11196_v0 = vld [vmem:[%s21423_s3 + $0x280] sm:$0xf]  ;;  %v11673_v3 = vor.u32 %v15449_v61, %v11672_v59  ;;  %v15526_v61 = vld [vmem:[%s21423_s3 + $0x8b8] sm:$0xf0] }
 0x140   :  { %2803 = vmatpush.bf16.msra.mxu0 %v11837_v26  ;;  %v15463_v26 = vld [vmem:[%s21423_s3 + $0x6c0] sm:$0xf0] }
 0x141   :  { %2791 = vmatpush.bf16.msrb.mxu1 %v11585_v34  ;;  %v11729_v34 = vor.u32 %v15463_v26, %v11728_v25  ;;  %v11421_v25 = vor.u32 %v15386_v6, %v11420_v5  ;;  %v11560_v5 = vld [vmem:[%s21423_s3 + $0x558] sm:$0xf] }
 0x142   :  { %2816 = vmatpush.bf16.msra.mxu2 %v12061_v27  ;;  %v11028_v27 = vld [vmem:[%s21423_s3 + $0x130] sm:$0xf] }
 0x143   :  { %2779 = vmatpush.bf16.msra.mxu3 %v11333_v40  ;;  %v11029_v38 = vor.u32 %v15288_v28, %v11028_v27  ;;  %v11253_v40 = vor.u32 %v15344_v30, %v11252_v29  ;;  %v11392_v29 = vld [vmem:[%s21423_s3 + $0x408] sm:$0xf]  ;;  %v15379_v30 = vld [vmem:[%s21423_s3 + $0x420] sm:$0xf0] }
 0x144   :  { %2804 = vmatpush.bf16.msra.mxu0 %v11809_v51  ;;  %v2534_v51 = vpop.f32.mrf.mxu1 }
 0x145   :  { %2792 = vmatpush.bf16.msrb.mxu1 %v11557_v58  ;;  %v2562_v50 = vpop.f32.mrf.mxu0  ;;  %v15393_v58 = vld [vmem:[%s21423_s3 + $0x490] sm:$0xf0]  ;;  %v2535_v33 = vadd.f32 %v2534_v51, %v2522_v39  ;;  %v11588_v51 = vld [vmem:[%s21423_s3 + $0x590] sm:$0xf] }
 0x146   :  { %2817 = vmatpush.bf16.msra.mxu2 %v12033_v52  ;;  %2780 = vmatmul.bf16.vlgmr.msra.gmra.mxu3 %v16802_v55  ;;  %v11477_v52 = vor.u32 %v15400_v36, %v11476_v35  ;;  %v11449_v2 = vor.u32 %v15393_v58, %v11448_v57  ;;  %v15372_v50 = vld [vmem:[%s21423_s3 + $0x3e8] sm:$0xf0]  ;;  %v15253_v57 = vld [vmem:[%s21423_s3 + $0x30] sm:$0xf0]  ;;  %v11112_v58 = vld [vmem:[%s21423_s3 + $0x1d8] sm:$0xf] }
 0x147   :  { %2831 = vmatpush.bf16.msrb.mxu3 %v12229_v45  ;;  %v15281_v45 = vld [vmem:[%s21423_s3 + $0x110] sm:$0xf0] }
 0x148   :  { %2805 = vmatpush.bf16.msra.mxu0 %v11781_v10  ;;  %2793 = vmatmul.bf16.vlgmr.msrb.gmra.mxu1 %v16862_v24  ;;  %v11001_v54 = vor.u32 %v15281_v45, %v11000_v43  ;;  %v11644_v10 = vld [vmem:[%s21423_s3 + $0x600] sm:$0xf]  ;;  %v11393_v43 = vor.u32 %v15379_v30, %v11392_v29  ;;  %v11364_v45 = vld [vmem:[%s21423_s3 + $0x3d0] sm:$0xf]  ;;  %v3058_v29 = vld [vmem:[%s21396_s11 + $0x78] sm:$0xff] }
 0x149   :  { %2837 = vmatpush.bf16.msra.mxu1 %v11085_v62  ;;  %v10972_v62 = vld [vmem:[%s21423_s3 + $0xc0] sm:$0xf]  ;;  %v2547_v19 = vpop.f32.mrf.mxu3  ;;  %v11645_v27 = vor.u32 %v15442_v14, %v11644_v10  ;;  %v11113_v10 = vor.u32 %v15309_v60, %v11112_v58  ;;  %v15589_v14 = vld [vmem:[%s21423_s3 + $0xab0] sm:$0xf0] }
 0x14a   :  { %2818 = vmatpush.bf16.msra.mxu2 %v12005_v11  ;;  %v11197_v11 = vor.u32 %v15330_v23, %v11196_v0  ;;  %v12204_v0 = vld [vmem:[%s21423_s3 + $0xa60] sm:$0xf]  ;;  %v15582_v23 = vld [vmem:[%s21423_s3 + $0xa78] sm:$0xf0] }
 0x14b   :  { %2850 = vmatpush.bf16.msra.mxu3 %v11309_v63  ;;  %2806 = vmatmul.bf16.vlgmr.msra.gmra.mxu0 %v16995_v32  ;;  %v15274_v63 = vld [vmem:[%s21423_s3 + $0xd8] sm:$0xf0]  ;;  %v11868_v58 = vld [vmem:[%s21423_s3 + $0x7c0] sm:$0xf] }
 0x14c   :  { %2863 = vmatpush.bf16.msrb.mxu0 %v11533_v47  ;;  %v10973_v4 = vor.u32 %v15274_v63, %v10972_v62  ;;  %v10944_v47 = vld [vmem:[%s21423_s3 + $0x88] sm:$0xf]  ;;  %v2536_v26 = vpop.f32.mrf.mxu1  ;;  %v18574_v42 = vpop.f32.mrf.mxu2  ;;  %v11365_v63 = vor.u32 %v15372_v50, %v11364_v45  ;;  %v15505_v45 = vld [vmem:[%s21423_s3 + $0x810] sm:$0xf0] }
 0x14d   :  { %2838 = vmatpush.bf16.msra.mxu1 %v11057_v20  ;;  %2819 = vmatmul.bf16.vlgmr.msra.gmra.mxu2 %v17006_v37  ;;  %v18542_v18 = vpop.f32.mrf.mxu0  ;;  %v15323_v20 = vld [vmem:[%s21423_s3 + $0x260] sm:$0xf0] }
 0x14e   :  { %2876 = vmatpush.bf16.msrb.mxu2 %v11757_v17  ;;  %v15267_v17 = vld [vmem:[%s21423_s3 + $0xa0] sm:$0xf0]  ;;  %v11169_v36 = vor.u32 %v15323_v20, %v11168_v46  ;;  %v12176_v20 = vld [vmem:[%s21423_s3 + $0xa28] sm:$0xf] }
 0x14f   :  { %2851 = vmatpush.bf16.msra.mxu3 %v11281_v21  ;;  %v2548_v21 = vadd.f32 %v2547_v19, %v2535_v33  ;;  %v10945_v28 = vor.u32 %v15267_v17, %v10944_v47  ;;  %v15421_v33 = vld [vmem:[%s21423_s3 + $0x570] sm:$0xf0]  ;;  %v12205_v17 = vor.u32 %v15582_v23, %v12204_v0  ;;  %v15519_v19 = vld [vmem:[%s21423_s3 + $0x880] sm:$0xf0]  ;;  %v3070_v0 = vld [vmem:[%s21396_s11 + $0xd8] sm:$0xff] }
 0x150   :  { %2864 = vmatpush.bf16.msrb.mxu0 %v11505_v31  ;;  %v11616_v31 = vld [vmem:[%s21423_s3 + $0x5c8] sm:$0xf] }
 0x151   :  { %2839 = vmatpush.bf16.msra.mxu1 %v11029_v38  ;;  %v18563_v35 = vadd.f32 %v18441_v7, %v2548_v21  ;;  %v15435_v38 = vld [vmem:[%s21423_s3 + $0x5e0] sm:$0xf0]  ;;  %v15316_v7 = vld [vmem:[%s21423_s3 + $0x228] sm:$0xf0]  ;;  %v2549_v62 = vpop.f32.mrf.mxu3 }
 0x152   :  { %2877 = vmatpush.bf16.msrb.mxu2 %v11729_v34  ;;  %v2340_v34 = vadd.f32 %v17784_v13, %v2327_v22  ;;  %v11140_v13 = vld [vmem:[%s21423_s3 + $0x210] sm:$0xf]  ;;  %v11617_v48 = vor.u32 %v15435_v38, %v11616_v31  ;;  %v15575_v21 = vld [vmem:[%s21423_s3 + $0xa40] sm:$0xf0] }
 0x153   :  { %2852 = vmatpush.bf16.msra.mxu3 %v11253_v40  ;;  %v10916_v40 = vld [vmem:[%s21423_s3 + $0x50] sm:$0xf]  ;;  %v12177_v30 = vor.u32 %v15575_v21, %v12176_v20  ;;  %v3068_v21 = vld [vmem:[%s21396_s11 + $0xc8] sm:$0xff] }
 0x154   :  { %2865 = vmatpush.bf16.msrb.mxu0 %v11477_v52  ;;  %v10917_v49 = vor.u32 %v15260_v41, %v10916_v40  ;;  %v15428_v52 = vld [vmem:[%s21423_s3 + $0x5a8] sm:$0xf0]  ;;  %v2575_v47 = vpop.f32.mrf.mxu2  ;;  %v11924_v31 = vld [vmem:[%s21423_s3 + $0x830] sm:$0xf]  ;;  %v3074_v40 = vld [vmem:[%s21396_s11 + $0xf8] sm:$0xff] }
 0x155   :  { %2840 = vmatpush.bf16.msra.mxu1 %v11001_v54  ;;  %v11141_v54 = vor.u32 %v15316_v7, %v11140_v13  ;;  %v2588_v59 = vpop.f32.mrf.mxu0  ;;  %v11589_v39 = vor.u32 %v15428_v52, %v11588_v51  ;;  %v3057_v38 = vld [vmem:[%s21396_s11 + $0x70] sm:$0xff]  ;;  %v3055_v51 = vld [vmem:[%s21396_s11 + $0x60] sm:$0xff] }
 0x156   :  { %2878 = vmatpush.bf16.msrb.mxu2 %v11701_v53  ;;  %12239 = vmatmul.msk.bf16.vlgmr.msrb.gmra.mxu3 %vm2287_vm0, %v16958_v9  ;;  %v2353_v53 = vadd.f32 %v17880_v8, %v2340_v34  ;;  %v11980_v8 = vld [vmem:[%s21423_s3 + $0x8a0] sm:$0xf]  ;;  %v15512_v34 = vld [vmem:[%s21423_s3 + $0x848] sm:$0xf0]  ;;  %v15498_v59 = vld [vmem:[%s21423_s3 + $0x7d8] sm:$0xf0] }
 0x157   :  { %2853 = vmatpush.bf16.msra.mxu3 %v11225_v56  ;;  %v10888_v56 = vld [vmem:[%s21423_s3 + $0x18] sm:$0xf]  ;;  %v11981_v22 = vor.u32 %v15526_v61, %v11980_v8  ;;  %v11925_v13 = vor.u32 %v15512_v34, %v11924_v31  ;;  %v15554_v8 = vld [vmem:[%s21423_s3 + $0x998] sm:$0xf0]  ;;  %v3053_v62 = vld [vmem:[%s21396_s11 + $0x50] sm:$0xff]  ;;  %v11869_v23 = vor.u32 %v15498_v59, %v11868_v58 }
 0x158   :  { %2866 = vmatpush.bf16.msrb.mxu0 %v11449_v2  ;;  %v10889_v2 = vor.u32 %v15253_v57, %v10888_v56  ;;  %v2366_v6 = vadd.f32 %v17888_v12, %v2353_v53  ;;  %v11952_v12 = vld [vmem:[%s21423_s3 + $0x868] sm:$0xf]  ;;  %v2980_v53 = vmul.f32 %v18209_v44, %v18209_v44  ;;  %v15547_v47 = vld [vmem:[%s21423_s3 + $0x960] sm:$0xf0]  ;;  %v11812_v34 = vld [vmem:[%s21423_s3 + $0x750] sm:$0xf] }
 0x159   :  { %2841 = vmatpush.bf16.msra.mxu1 %v10973_v4  ;;  %v15365_v4 = vld [vmem:[%s21423_s3 + $0x3b0] sm:$0xf0] }
 0x15a   :  { %2879 = vmatpush.bf16.msrb.mxu2 %v11673_v3  ;;  %v11336_v3 = vld [vmem:[%s21423_s3 + $0x398] sm:$0xf] }
 0x15b   :  { %2854 = vmatpush.bf16.msra.mxu3 %v11197_v11  ;;  %v12232_v11 = vld [vmem:[%s21423_s3 + $0xa98] sm:$0xf]  ;;  %v11337_v46 = vor.u32 %v15365_v4, %v11336_v3  ;;  %v3052_v3 = vld [vmem:[%s21396_s11 + $0x48] sm:$0xff] }
 0x15c   :  { %2867 = vmatpush.bf16.msrb.mxu0 %v11421_v25  ;;  %v11561_v25 = vor.u32 %v15421_v33, %v11560_v5  ;;  %v12233_v26 = vor.u32 %v15589_v14, %v12232_v11  ;;  %v11840_v5 = vld [vmem:[%s21423_s3 + $0x788] sm:$0xf]  ;;  %v3069_v33 = vld [vmem:[%s21396_s11 + $0xd0] sm:$0xff] }
 0x15d   :  { %2842 = vmatpush.bf16.msra.mxu1 %v10945_v28  ;;  %v11953_v28 = vor.u32 %v15519_v19, %v11952_v12  ;;  %v12064_v14 = vld [vmem:[%s21423_s3 + $0x948] sm:$0xf] }
 0x15e   :  { %2880 = vmatpush.bf16.msrb.mxu2 %v11645_v27  ;;  %v18651_v27 = vadd.f32 %v17890_v16, %v2366_v6  ;;  %v12148_v16 = vld [vmem:[%s21423_s3 + $0x9f0] sm:$0xf]  ;;  %v15491_v6 = vld [vmem:[%s21423_s3 + $0x7a0] sm:$0xf0]  ;;  %v12065_v31 = vor.u32 %v15547_v47, %v12064_v14  ;;  %v3044_v14 = vld [vmem:[%s21396_s11 + $0x8] sm:$0xff] }
 0x15f   :  { %2855 = vmatpush.bf16.msra.mxu3 %v11169_v36  ;;  %v15568_v36 = vld [vmem:[%s21423_s3 + $0xa08] sm:$0xf0]  ;;  %v3089_v47 = vld [vmem:[%s21396_s11 + $0x170] sm:$0xff] }
 0x160   :  { %2868 = vmatpush.bf16.msrb.mxu0 %v11393_v43  ;;  %v2979_v41 = vmul.f32 %v18651_v27, %v18651_v27  ;;  %v12149_v7 = vor.u32 %v15568_v36, %v12148_v16  ;;  %v11896_v43 = vld [vmem:[%s21423_s3 + $0x7f8] sm:$0xf]  ;;  %v2929_v60 = vsel %vm2928_vm1, %v18651_v27, 0.0  ;;  %v15484_v16 = vld [vmem:[%s21423_s3 + $0x768] sm:$0xf0]  ;;  %v3067_v36 = vld [vmem:[%s21396_s11 + $0xc0] sm:$0xff] }
 0x161   :  { %2843 = vmatpush.bf16.msra.mxu1 %v10917_v49  ;;  %v15561_v49 = vld [vmem:[%s21423_s3 + $0x9d0] sm:$0xf0]  ;;  %v2599_v50 = vpop.f32.mrf.mxu1  ;;  %v11897_v56 = vor.u32 %v15505_v45, %v11896_v43  ;;  %v11813_v43 = vor.u32 %v15484_v16, %v11812_v34 }
 0x162   :  { %2881 = vmatpush.bf16.msrb.mxu2 %v11617_v48  ;;  %v3073_v48 = vld [vmem:[%s21396_s11 + $0xf0] sm:$0xff]  ;;  %v2986_v52 = vsel %vm2928_vm1, %v2979_v41, 0.0 }
 0x163   :  { %2856 = vmatpush.bf16.msra.mxu3 %v11141_v54  ;;  %v3072_v54 = vld [vmem:[%s21396_s11 + $0xe8] sm:$0xff]  ;;  %v2987_v61 = vrot.slane %v2986_v52, 4 }
 0x164   :  { %2869 = vmatpush.bf16.msrb.mxu0 %v11365_v63  ;;  %v2993_v63 = vsel %vm2928_vm1, %v2980_v53, 0.0  ;;  %v3065_v53 = vld [vmem:[%s21396_s11 + $0xb0] sm:$0xff] }
 0x165   :  { %2844 = vmatpush.bf16.msra.mxu1 %v10889_v2  ;;  %v2994_v12 = vrot.slane %v2993_v63, 4 }
 0x166   :  { %2882 = vmatpush.bf16.msrb.mxu2 %v11589_v39  ;;  %v2930_v39 = vrot.slane %v2929_v60, 4 }
 0x167   :  { %2857 = vmatpush.bf16.msra.mxu3 %v11113_v10  ;;  %v2936_v10 = vsel %vm2928_vm1, %v18209_v44, 0.0 }
 0x168   :  { %2870 = vmatpush.bf16.msrb.mxu0 %v11337_v46  ;;  %2845 = vmatmul.bf16.vlgmr.msra.gmra.mxu1 %v16816_v1  ;;  %v3056_v1 = vld [vmem:[%s21396_s11 + $0x68] sm:$0xff]  ;;  %v2638_v11 = vpop.f32.mrf.mxu0  ;;  %v3051_v46 = vld [vmem:[%s21396_s11 + $0x40] sm:$0xff] }
 0x169   :  { %2889 = vmatpush.bf16.msrb.mxu1 %v11981_v22  ;;  %v2612_v22 = vpop.f32.mrf.mxu3  ;;  %v2601_v19 = vpop.f32.mrf.mxu1 }
 0x16a   :  { %2883 = vmatpush.bf16.msrb.mxu2 %v11561_v25  ;;  %2858 = vmatmul.bf16.vlgmr.msra.gmra.mxu3 %v16844_v15  ;;  %v2587_v15 = vadd.f32 %v18542_v18, %v18574_v42  ;;  %v3071_v18 = vld [vmem:[%s21396_s11 + $0xe0] sm:$0xff]  ;;  %v11841_v25 = vor.u32 %v15491_v6, %v11840_v5  ;;  %v3106_v6 = vld [vmem:[%s21396_s11 + $0x1f8] sm:$0xff]  ;;  %v3105_v19 = vld [vmem:[%s21396_s11 + $0x1f0] sm:$0xff] }
 0x16b   :  { %2902 = vmatpush.bf16.msrb.mxu3 %v12205_v17  ;;  %2871 = vmatmul.bf16.vlgmr.msrb.gmra.mxu0 %v16802_v55  ;;  %v12120_v55 = vld [vmem:[%s21423_s3 + $0x9b8] sm:$0xf]  ;;  %v12092_v42 = vld [vmem:[%s21423_s3 + $0x980] sm:$0xf]  ;;  %v2988_v17 = vadd.f32 %v2987_v61, %v2986_v52  ;;  %v15477_v52 = vld [vmem:[%s21423_s3 + $0x730] sm:$0xf0] }
 0x16c   :  { %2922 = vmatpush.bf16.msra.mxu0 %v12233_v26  ;;  %v12121_v57 = vor.u32 %v15561_v49, %v12120_v55  ;;  %v2600_v2 = vadd.f32 %v2599_v50, %v2587_v15  ;;  %v12093_v4 = vor.u32 %v15554_v8, %v12092_v42  ;;  %v2625_v20 = vpop.f32.mrf.mxu2  ;;  %v2931_v26 = vadd.f32 %v2930_v39, %v2929_v60  ;;  %v3048_v49 = vld [vmem:[%s21396_s11 + $0x28] sm:$0xff] }
 0x16d   :  { %2890 = vmatpush.bf16.msrb.mxu1 %v11953_v28  ;;  %2884 = vmatmul.bf16.vlgmr.msrb.gmra.mxu2 %v16862_v24  ;;  %v3054_v24 = vld [vmem:[%s21396_s11 + $0x58] sm:$0xff]  ;;  %v2937_v28 = vrot.slane %v2936_v10, 4  ;;  %v2989_v41 = vrot.slane %v2988_v17, 2  ;;  %v3064_v60 = vld [vmem:[%s21396_s11 + $0xa8] sm:$0xff] }
 0x16e   :  { %3144 = vmatpush.msra.mxu2 %v3058_v29  ;;  %v2613_v29 = vadd.f32 %v2612_v22, %v2600_v2  ;;  %v2932_v45 = vrot.slane %v2931_v26, 2 }
 0x16f   :  { %2903 = vmatpush.bf16.msrb.mxu3 %v12177_v30  ;;  %v3050_v30 = vld [vmem:[%s21396_s11 + $0x38] sm:$0xff] }
 0x170   :  { %3145 = vmatpush.msra.mxu2 %v3057_v38  ;;  %3164 = vmatpush.msrb.mxu0 %v3074_v40  ;;  %v12036_v38 = vld [vmem:[%s21423_s3 + $0x910] sm:$0xf]  ;;  %v15540_v40 = vld [vmem:[%s21423_s3 + $0x928] sm:$0xf0]  ;;  %v2626_v55 = vadd.f32 %v2625_v20, %v2613_v29  ;;  %v2933_v8 = vadd.f32 %v2932_v45, %v2931_v26 }
 0x171   :  { %2891 = vmatpush.bf16.msrb.mxu1 %v11925_v13  ;;  %v2995_v13 = vadd.f32 %v2994_v12, %v2993_v63  ;;  %v12037_v50 = vor.u32 %v15540_v40, %v12036_v38  ;;  %v2614_v15 = vpop.f32.mrf.mxu3  ;;  %v2651_v59 = vpop.f32.mrf.mxu1  ;;  %v3046_v63 = vld [vmem:[%s21396_s11 + $0x18] sm:$0xff]  ;;  %v3088_v26 = vld [vmem:[%s21396_s11 + $0x168] sm:$0xff] }
 0x172   :  { %3146 = vmatpush.msra.mxu2 %v3056_v1  ;;  %3165 = vmatpush.msrb.mxu0 %v3073_v48  ;;  %v3049_v1 = vld [vmem:[%s21396_s11 + $0x30] sm:$0xff]  ;;  %v2938_v48 = vadd.f32 %v2937_v28, %v2936_v10  ;;  %v3062_v10 = vld [vmem:[%s21396_s11 + $0x98] sm:$0xff]  ;;  %v2934_v22 = vrot.slane %v2933_v8, 1  ;;  %v3104_v29 = vld [vmem:[%s21396_s11 + $0x1e8] sm:$0xff] }
 0x173   :  { %2904 = vmatpush.bf16.msrb.mxu3 %v12149_v7  ;;  %v3066_v7 = vld [vmem:[%s21396_s11 + $0xb8] sm:$0xff]  ;;  %v2996_v58 = vrot.slane %v2995_v13, 2  ;;  %v3084_v15 = vld [vmem:[%s21396_s11 + $0x148] sm:$0xff] }
 0x174   :  { %3147 = vmatpush.msra.mxu2 %v3055_v51  ;;  %3166 = vmatpush.msrb.mxu0 %v3072_v54  ;;  %v11784_v51 = vld [vmem:[%s21423_s3 + $0x718] sm:$0xf]  ;;  %v2627_v42 = vpop.f32.mrf.mxu2  ;;  %v2939_v61 = vrot.slane %v2938_v48, 2 }
 0x175   :  { %2892 = vmatpush.bf16.msrb.mxu1 %v11897_v56  ;;  %v12008_v54 = vld [vmem:[%s21423_s3 + $0x8d8] sm:$0xf]  ;;  %v15533_v56 = vld [vmem:[%s21423_s3 + $0x8f0] sm:$0xf0]  ;;  %v2997_v39 = vadd.f32 %v2996_v58, %v2995_v13  ;;  %v3059_v13 = vld [vmem:[%s21396_s11 + $0x80] sm:$0xff]  ;;  %s21427_s3 = sld [smem:[#allocation9_spill]] }
 0x176   :  { %3148 = vmatpush.msra.mxu2 %v3054_v24  ;;  %3167 = vmatpush.msrb.mxu0 %v3071_v18  ;;  %v2640_v24 = vpop.f32.mrf.mxu0  ;;  %v11785_v18 = vor.u32 %v15477_v52, %v11784_v51  ;;  %v3122_v40 = vld [vmem:[%s21396_s11 + $0x278] sm:$0xff]  ;;  %v3100_v58 = vld [vmem:[%s21396_s11 + $0x1c8] sm:$0xff]  ;;  %v3099_v42 = vld [vmem:[%s21396_s11 + $0x1c0] sm:$0xff] }
 0x177   :  { %2905 = vmatpush.bf16.msrb.mxu3 %v12121_v57  ;;  %v2990_v57 = vadd.f32 %v2989_v41, %v2988_v17  ;;  %v2998_v17 = vrot.slane %v2997_v39, 1  ;;  %v2943_v41 = vsel %vm2928_vm1, %v18563_v35, 0.0  ;;  %v3120_v24 = vld [vmem:[%s21396_s11 + $0x268] sm:$0xff] }
 0x178   :  { %3149 = vmatpush.msra.mxu2 %v3053_v62  ;;  %3168 = vmatpush.msrb.mxu0 %v3070_v0  ;;  %v2639_v62 = vadd.f32 %v2638_v11, %v2626_v55  ;;  %v12009_v0 = vor.u32 %v15533_v56, %v12008_v54  ;;  %v2981_v11 = vmul.f32 %v18563_v35, %v18563_v35  ;;  %v2944_v51 = vrot.slane %v2943_v41, 4 }
 0x179   :  { %2893 = vmatpush.bf16.msrb.mxu1 %v11869_v23  ;;  %v3063_v23 = vld [vmem:[%s21396_s11 + $0xa0] sm:$0xff]  ;;  %v2991_v5 = vrot.slane %v2990_v57, 1  ;;  %v2999_v38 = vadd.f32 %v2998_v17, %v2997_v39  ;;  %v3098_v39 = vld [vmem:[%s21396_s11 + $0x1b8] sm:$0xff] }
 0x17a   :  { %3150 = vmatpush.msra.mxu2 %v3052_v3  ;;  %3169 = vmatpush.msrb.mxu0 %v3069_v33  ;;  %v18818_v2 = vadd.f32 %v2651_v59, %v2639_v62  ;;  %v3045_v3 = vld [vmem:[%s21396_s11 + $0x10] sm:$0xff]  ;;  %v2940_v33 = vadd.f32 %v2939_v61, %v2938_v48  ;;  %v3102_v48 = vld [vmem:[%s21396_s11 + $0x1d8] sm:$0xff] }
 0x17b   :  { %2906 = vmatpush.bf16.msrb.mxu3 %v12093_v4  ;;  %12240 = vmatmul.msk.bf16.vlgmr.msra.gmra.mxu0 %vm2287_vm0, %v16958_v9  ;;  %v3047_v9 = vld [vmem:[%s21396_s11 + $0x20] sm:$0xff]  ;;  %v3090_v4 = vld [vmem:[%s21396_s11 + $0x178] sm:$0xff]  ;;  %v2992_v20 = vadd.f32 %v2991_v5, %v2990_v57 }
 0x17c   :  { %3151 = vmatpush.msra.mxu2 %v3051_v46  ;;  %3170 = vmatpush.msrb.mxu0 %v3068_v21  ;;  %v2982_v12 = vmul.f32 %v18818_v2, %v18818_v2  ;;  %v3061_v46 = vld [vmem:[%s21396_s11 + $0x90] sm:$0xff]  ;;  %v2653_v21 = vpop.f32.mrf.mxu1  ;;  %v2941_v28 = vrot.slane %v2940_v33, 1  ;;  %v2950_v45 = vsel %vm2928_vm1, %v18818_v2, 0.0  ;;  %v3082_v62 = vld [vmem:[%s21396_s11 + $0x138] sm:$0xff] }
 0x17d   :  { %2894 = vmatpush.bf16.msrb.mxu1 %v11841_v25  ;;  %v3043_v25 = vld [vmem:[%s21396_s11] sm:$0xff]  ;;  %v2951_v56 = vrot.slane %v2950_v45, 4 }
 0x17e   :  { %3152 = vmatpush.msra.mxu2 %v3050_v30  ;;  %3171 = vmatpush.msrb.mxu0 %v3067_v36  ;;  %v2935_v30 = vadd.f32 %v2934_v22, %v2933_v8  ;;  %v3007_v34 = vsel %vm2928_vm1, %v2982_v12, 0.0  ;;  %v3103_v36 = vld [vmem:[%s21396_s11 + $0x1e0] sm:$0xff]  ;;  %v3097_v22 = vld [vmem:[%s21396_s11 + $0x1b0] sm:$0xff]  ;;  %v3096_v12 = vld [vmem:[%s21396_s11 + $0x1a8] sm:$0xff] }
 0x17f   :  { %2907 = vmatpush.bf16.msrb.mxu3 %v12065_v31  ;;  %v3087_v31 = vld [vmem:[%s21396_s11 + $0x160] sm:$0xff]  ;;  %v3008_v55 = vrot.slane %v3007_v34, 4  ;;  %v2952_v61 = vadd.f32 %v2951_v56, %v2950_v45 }
 0x180   :  { %3153 = vmatpush.msra.mxu2 %v3049_v1  ;;  %3172 = vmatpush.msrb.mxu0 %v3066_v7  ;;  %v3036_v16 = vsel %vm3035_vm2, %v2935_v30, %v2992_v20  ;;  %v3086_v1 = vld [vmem:[%s21396_s11 + $0x158] sm:$0xff]  ;;  %v2942_v7 = vadd.f32 %v2941_v28, %v2940_v33  ;;  %v3115_v20 = vld [vmem:[%s21396_s11 + $0x240] sm:$0xff] }
 0x181   :  { %2895 = vmatpush.bf16.msrb.mxu1 %v11813_v43  ;;  %v3009_v59 = vadd.f32 %v3008_v55, %v3007_v34  ;;  %v3077_v34 = vld [vmem:[%s21396_s11 + $0x110] sm:$0xff] }
 0x182   :  { %3154 = vmatpush.msra.mxu2 %v3048_v49  ;;  %3173 = vmatpush.msrb.mxu0 %v3065_v53  ;;  %v3085_v49 = vld [vmem:[%s21396_s11 + $0x150] sm:$0xff]  ;;  %v3037_v52 = vsel %vm3035_vm2, %v2942_v7, %v2999_v38  ;;  %v3112_v7 = vld [vmem:[%s21396_s11 + $0x228] sm:$0xff] }
 0x183   :  { %2908 = vmatpush.bf16.msrb.mxu3 %v12037_v50  ;;  %v3121_v50 = vld [vmem:[%s21396_s11 + $0x270] sm:$0xff] }
 0x184   :  { %3155 = vmatpush.msra.mxu2 %v3047_v9  ;;  %3174 = vmatpush.msrb.mxu0 %v3064_v60  ;;  %v3101_v53 = vld [vmem:[%s21396_s11 + $0x1d0] sm:$0xff]  ;;  %v3083_v9 = vld [vmem:[%s21396_s11 + $0x140] sm:$0xff] }
 0x185   :  { %2896 = vmatpush.bf16.msrb.mxu1 %v11785_v18  ;;  %v18897_v54 = vpop.f32.mrf.mxu1  ;;  %v3119_v60 = vld [vmem:[%s21396_s11 + $0x260] sm:$0xff]  ;;  %v2945_v18 = vadd.f32 %v2944_v51, %v2943_v41  ;;  %v3113_v38 = vld [vmem:[%s21396_s11 + $0x230] sm:$0xff] }
 0x186   :  { %3156 = vmatpush.msra.mxu2 %v3046_v63  ;;  %3175 = vmatpush.msrb.mxu0 %v3063_v23  ;;  %v3093_v41 = vld [vmem:[%s21396_s11 + $0x190] sm:$0xff]  ;;  %v3091_v51 = vld [vmem:[%s21396_s11 + $0x180] sm:$0xff] }
 0x187   :  { %2909 = vmatpush.bf16.msrb.mxu3 %v12009_v0  ;;  %v3118_v0 = vld [vmem:[%s21396_s11 + $0x258] sm:$0xff] }
 0x188   :  { %3157 = vmatpush.msra.mxu2 %v3045_v3  ;;  %3176 = vmatpush.msrb.mxu0 %v3062_v10  ;;  %v18917_v8 = vpop.f32.mrf.mxu0  ;;  %v3010_v3 = vrot.slane %v3009_v59, 2  ;;  %v2946_v10 = vrot.slane %v2945_v18, 2 }
 0x189   :  { %3184 = vmatpush.msra.mxu1 %v3090_v4  ;;  %v18922_v63 = vpop.f32.mrf.mxu3  ;;  %v3081_v4 = vld [vmem:[%s21396_s11 + $0x130] sm:$0xff] }
 0x18a   :  { %2897 = vmatmul.bf16.vlgmr.msrb.gmra.mxu1 %v16995_v32  ;;  %2910 = vmatmul.bf16.vlgmr.msrb.gmra.mxu3 %v17006_v37  ;;  %v3000_v32 = vsel %vm2928_vm1, %v2981_v11, 0.0  ;;  %v3060_v37 = vld [vmem:[%s21396_s11 + $0x88] sm:$0xff]  ;;  %v2953_v11 = vrot.slane %v2952_v61, 2  ;;  %v2947_v21 = vadd.f32 %v2946_v10, %v2945_v18  ;;  %v2678_v56 = vadd.f32 %v18897_v54, %v18922_v63 }
 0x18b   :  { %3204 = vmatpush.msra.mxu3 %v3106_v6  ;;  %3158 = vmatpush.msra.mxu2 %v3044_v14  ;;  %v3001_v43 = vrot.slane %v3000_v32, 4  ;;  %v3117_v6 = vld [vmem:[%s21396_s11 + $0x250] sm:$0xff]  ;;  %v3080_v14 = vld [vmem:[%s21396_s11 + $0x128] sm:$0xff] }
 0x18c   :  { %3185 = vmatpush.msra.mxu1 %v3089_v47  ;;  %3177 = vmatpush.msrb.mxu0 %v3061_v46  ;;  %v18933_v5 = vpop.f32.mrf.mxu2  ;;  %v3116_v47 = vld [vmem:[%s21396_s11 + $0x248] sm:$0xff]  ;;  %v3079_v46 = vld [vmem:[%s21396_s11 + $0x120] sm:$0xff]  ;;  %v2954_v28 = vadd.f32 %v2953_v11, %v2952_v61 }
 0x18d   :  { %3205 = vmatpush.msra.mxu3 %v3105_v19  ;;  %3159 = vmatpush.msra.mxu2 %v3043_v25  ;;  %v3002_v57 = vadd.f32 %v3001_v43, %v3000_v32  ;;  %v2679_v33 = vpop.f32.mrf.mxu1  ;;  %v3011_v19 = vadd.f32 %v3010_v3, %v3009_v59  ;;  %v3095_v25 = vld [vmem:[%s21396_s11 + $0x1a0] sm:$0xff]  ;;  %v3114_v32 = vld [vmem:[%s21396_s11 + $0x238] sm:$0xff]  ;;  %v3092_v43 = vld [vmem:[%s21396_s11 + $0x188] sm:$0xff]  ;;  %v2691_v54 = vadd.f32 %v18933_v5, %v2678_v56 }
 0x18e   :  { %3186 = vmatpush.msra.mxu1 %v3088_v26  ;;  %3160 = vmatmul.f32.vlgmr.msra.gmra.mxu2 %v3036_v16  ;;  %v3108_v59 = vld [vmem:[%s21396_s11 + $0x208] sm:$0xff] }
 0x18f   :  { %3206 = vmatpush.msra.mxu3 %v3104_v29  ;;  %3178 = vmatpush.msrb.mxu0 %v3060_v37  ;;  %v3003_v23 = vrot.slane %v3002_v57, 2  ;;  %v3078_v29 = vld [vmem:[%s21396_s11 + $0x118] sm:$0xff]  ;;  %v3012_v16 = vrot.slane %v3011_v19, 1 }
 0x190   :  { %3187 = vmatpush.msra.mxu1 %v3087_v31  ;;  %3224 = vmatpush.msrb.mxu2 %v3122_v40  ;;  %v2705_v26 = vpop.f32.mrf.mxu0  ;;  %v3094_v31 = vld [vmem:[%s21396_s11 + $0x198] sm:$0xff]  ;;  %v2948_v40 = vrot.slane %v2947_v21, 1 }
 0x191   :  { %3207 = vmatpush.msra.mxu3 %v3103_v36  ;;  %3179 = vmatpush.msrb.mxu0 %v3059_v13  ;;  %v3004_v17 = vadd.f32 %v3003_v23, %v3002_v57  ;;  %v2666_v30 = vpop.f32.mrf.mxu3  ;;  %v2955_v13 = vrot.slane %v2954_v28, 1  ;;  %v3013_v55 = vadd.f32 %v3012_v16, %v3011_v19  ;;  %v3137_v23 = vld [vmem:[%s21396_s11 + $0x2f0] sm:$0xff] }
 0x192   :  { %3188 = vmatpush.msra.mxu1 %v3086_v1  ;;  %3180 = vmatmul.f32.vlgmr.msrb.gmra.mxu0 %v3037_v52  ;;  %v3076_v1 = vld [vmem:[%s21396_s11 + $0x108] sm:$0xff] }
 0x193   :  { %3208 = vmatpush.msra.mxu3 %v3102_v48  ;;  %3225 = vmatpush.msrb.mxu2 %v3121_v50  ;;  %v3005_v37 = vrot.slane %v3004_v17, 1  ;;  %v3075_v48 = vld [vmem:[%s21396_s11 + $0x100] sm:$0xff]  ;;  %v2949_v50 = vadd.f32 %v2948_v40, %v2947_v21  ;;  %v2956_v52 = vadd.f32 %v2955_v13, %v2954_v28 }
 0x194   :  { %3189 = vmatpush.msra.mxu1 %v3085_v49  ;;  %v2692_v36 = vpop.f32.mrf.mxu2  ;;  %v3111_v49 = vld [vmem:[%s21396_s11 + $0x220] sm:$0xff] }
 0x195   :  { %3209 = vmatpush.msra.mxu3 %v3101_v53  ;;  %3226 = vmatpush.msrb.mxu2 %v3120_v24  ;;  %v3006_v45 = vadd.f32 %v3005_v37, %v3004_v17  ;;  %v3110_v53 = vld [vmem:[%s21396_s11 + $0x218] sm:$0xff]  ;;  %v3039_v24 = vsel %vm3035_vm2, %v2956_v52, %v3013_v55  ;;  %v3131_v37 = vld [vmem:[%s21396_s11 + $0x2c0] sm:$0xff]  ;;  %v3124_v55 = vld [vmem:[%s21396_s11 + $0x288] sm:$0xff] }
 0x196   :  { %3190 = vmatpush.msra.mxu1 %v3084_v15  ;;  %v3127_v13 = vld [vmem:[%s21396_s11 + $0x2a0] sm:$0xff] }
 0x197   :  { %3210 = vmatpush.msra.mxu3 %v3100_v58  ;;  %3227 = vmatpush.msrb.mxu2 %v3119_v60  ;;  %v3038_v15 = vsel %vm3035_vm2, %v2949_v50, %v3006_v45  ;;  %v3109_v58 = vld [vmem:[%s21396_s11 + $0x210] sm:$0xff]  ;;  %v2704_v60 = vadd.f32 %v18917_v8, %v2691_v54  ;;  %v3136_v8 = vld [vmem:[%s21396_s11 + $0x2e8] sm:$0xff]  ;;  %v3123_v50 = vld [vmem:[%s21396_s11 + $0x280] sm:$0xff] }
 0x198   :  { %3191 = vmatpush.msra.mxu1 %v3083_v9  ;;  %v3107_v9 = vld [vmem:[%s21396_s11 + $0x200] sm:$0xff] }
 0x199   :  { %3211 = vmatpush.msra.mxu3 %v3099_v42  ;;  %3228 = vmatpush.msrb.mxu2 %v3118_v0 }
 0x19a   :  { %3192 = vmatpush.msra.mxu1 %v3082_v62  ;;  %v3138_v62 = vld [vmem:[%s21396_s11 + $0x2f8] sm:$0xff] }
 0x19b   :  { %3212 = vmatpush.msra.mxu3 %v3098_v39  ;;  %3229 = vmatpush.msrb.mxu2 %v3117_v6 }
 0x19c   :  { %3193 = vmatpush.msra.mxu1 %v3081_v4  ;;  %v2742_v57 = vpop.f32.mrf.mxu2  ;;  %3244 = vmatpush.msra.mxu0 %v3138_v62  ;;  %v3135_v4 = vld [vmem:[%s21396_s11 + $0x2e0] sm:$0xff] }
 0x19d   :  { %3213 = vmatpush.msra.mxu3 %v3097_v22  ;;  %3230 = vmatpush.msrb.mxu2 %v3116_v47  ;;  %v3134_v22 = vld [vmem:[%s21396_s11 + $0x2d8] sm:$0xff] }
 0x19e   :  { %3194 = vmatpush.msra.mxu1 %v3080_v14  ;;  %3245 = vmatpush.msra.mxu0 %v3137_v23 }
 0x19f   :  { %3214 = vmatpush.msra.mxu3 %v3096_v12  ;;  %3231 = vmatpush.msrb.mxu2 %v3115_v20  ;;  %v3133_v12 = vld [vmem:[%s21396_s11 + $0x2d0] sm:$0xff] }
 0x1a0   :  { %3195 = vmatpush.msra.mxu1 %v3079_v46  ;;  %3246 = vmatpush.msra.mxu0 %v3136_v8 }
 0x1a1   :  { %3215 = vmatpush.msra.mxu3 %v3095_v25  ;;  %3232 = vmatpush.msrb.mxu2 %v3114_v32 }
 0x1a2   :  { %3196 = vmatpush.msra.mxu1 %v3078_v29  ;;  %3247 = vmatpush.msra.mxu0 %v3135_v4  ;;  %v3132_v29 = vld [vmem:[%s21396_s11 + $0x2c8] sm:$0xff] }
 0x1a3   :  { %3216 = vmatpush.msra.mxu3 %v3094_v31  ;;  %3233 = vmatpush.msrb.mxu2 %v3113_v38  ;;  %v3129_v38 = vld [vmem:[%s21396_s11 + $0x2b0] sm:$0xff] }
 0x1a4   :  { %3197 = vmatpush.msra.mxu1 %v3077_v34  ;;  %v2744_v18 = vpop.f32.mrf.mxu2  ;;  %3248 = vmatpush.msra.mxu0 %v3134_v22  ;;  %v3130_v34 = vld [vmem:[%s21396_s11 + $0x2b8] sm:$0xff] }
 0x1a5   :  { %3217 = vmatpush.msra.mxu3 %v3093_v41  ;;  %3234 = vmatpush.msrb.mxu2 %v3112_v7  ;;  %v2729_v61 = vpop.f32.mrf.mxu1  ;;  %v3128_v41 = vld [vmem:[%s21396_s11 + $0x2a8] sm:$0xff]  ;;  %v3125_v7 = vld [vmem:[%s21396_s11 + $0x290] sm:$0xff] }
 0x1a6   :  { %3198 = vmatpush.msra.mxu1 %v3076_v1  ;;  %3249 = vmatpush.msra.mxu0 %v3133_v12  ;;  %v3126_v1 = vld [vmem:[%s21396_s11 + $0x298] sm:$0xff] }
 0x1a7   :  { %3218 = vmatpush.msra.mxu3 %v3092_v43  ;;  %3235 = vmatpush.msrb.mxu2 %v3111_v49 }
 0x1a8   :  { %3199 = vmatpush.msra.mxu1 %v3075_v48  ;;  %v2755_v0 = vpop.f32.mrf.mxu0  ;;  %3250 = vmatpush.msra.mxu0 %v3132_v29 }
 0x1a9   :  { %3219 = vmatpush.msra.mxu3 %v3091_v51  ;;  %3200 = vmatmul.f32.vlgmr.msra.gmra.mxu1 %v3038_v15  ;;  %v2716_v42 = vpop.f32.mrf.mxu3 }
 0x1aa   :  { %3220 = vmatmul.f32.vlgmr.msra.gmra.mxu3 %v3039_v24  ;;  %3236 = vmatpush.msrb.mxu2 %v3110_v53  ;;  %v2717_v63 = vadd.f32 %v2716_v42, %v2704_v60 }
 0x1ab   :  { %3251 = vmatpush.msra.mxu0 %v3131_v37 }
 0x1ac   :  { %3237 = vmatpush.msrb.mxu2 %v3109_v58  ;;  %v2730_v39 = vadd.f32 %v2729_v61, %v2717_v63 }
 0x1ad   :  { %v2731_v14 = vpop.f32.mrf.mxu1  ;;  %3252 = vmatpush.msra.mxu0 %v3130_v34 }
 0x1ae   :  { %3238 = vmatpush.msrb.mxu2 %v3108_v59  ;;  %v19019_v3 = vadd.f32 %v2742_v57, %v2730_v39 }
 0x1af   :  { %3253 = vmatpush.msra.mxu0 %v3129_v38 }
 0x1b0   :  { %3239 = vmatpush.msrb.mxu2 %v3107_v9  ;;  %v2957_v5 = vsel %vm2928_vm1, %v19019_v3, 0.0  ;;  %v2983_v6 = vmul.f32 %v19019_v3, %v19019_v3  ;;  %v2768_v10 = vpop.f32.mrf.mxu2  ;;  %v2757_v17 = vpop.f32.mrf.mxu0 }
 0x1b1   :  { %v2958_v33 = vrot.slane %v2957_v5, 4  ;;  %v2718_v11 = vpop.f32.mrf.mxu3  ;;  %3254 = vmatpush.msra.mxu0 %v3128_v41  ;;  %v2769_v43 = vadd.f32 %v2768_v10, %v2755_v0 }
 0x1b2   :  { %v3014_v47 = vsel %vm2928_vm1, %v2983_v6, 0.0 }
 0x1b3   :  { %v2959_v19 = vadd.f32 %v2958_v33, %v2957_v5  ;;  %v3015_v46 = vrot.slane %v3014_v47, 4  ;;  %3255 = vmatpush.msra.mxu0 %v3127_v13 }
 0x1b5   :  { %v2960_v20 = vrot.slane %v2959_v19, 2  ;;  %v3016_v21 = vadd.f32 %v3015_v46, %v3014_v47  ;;  %3256 = vmatpush.msra.mxu0 %v3126_v1 }
 0x1b7   :  { %v2961_v25 = vadd.f32 %v2960_v20, %v2959_v19  ;;  %v3017_v26 = vrot.slane %v3016_v21, 2  ;;  %3257 = vmatpush.msra.mxu0 %v3125_v7 }
 0x1b8   :  { %v2770_v28 = vpop.f32.mrf.mxu2 }
 0x1b9   :  { %v2962_v30 = vrot.slane %v2961_v25, 1  ;;  %v3018_v32 = vadd.f32 %v3017_v26, %v3016_v21  ;;  %3258 = vmatpush.msra.mxu0 %v3124_v55  ;;  %v3140_v26 = vld [vmem:[%s21396_s11 + $0x308] sm:$0xff]  ;;  %v3139_v28 = vld [vmem:[%s21396_s11 + $0x300] sm:$0xff] }
 0x1ba   :  { %3278 = vmatpush.msrb.mxu1 %v3140_v26  ;;  %v3325_v26 = vld [vmem:[%s21397_s12 + $0x18] sm:$0xf] }
 0x1bb   :  { %v3019_v31 = vrot.slane %v3018_v32, 1  ;;  %v2963_v16 = vadd.f32 %v2962_v30, %v2961_v25  ;;  %3259 = vmatpush.msra.mxu0 %v3123_v50  ;;  %3336 = vst [vmem:[#allocation1 + $0x30] ss:$2 sm:$0xff] %v3325_v26 }
 0x1bc   :  { %3279 = vmatpush.msrb.mxu1 %v3139_v28 }
 0x1bd   :  { %v3020_v36 = vadd.f32 %v3019_v31, %v3018_v32 }
 0x1bf   :  { %v3040_v40 = vsel %vm3035_vm2, %v2963_v16, %v3020_v36 }
 0x1c0   :  { %3240 = vmatmul.f32.vlgmr.msrb.gmra.mxu2 %v3040_v40 }
 0x1c5   :  { %v2794_v48 = vpop.f32.mrf.mxu1 }
 0x1c8   :  { %v2807_v49 = vpop.f32.mrf.mxu0 }
 0x1c9   :  { %v2781_v45 = vpop.f32.mrf.mxu3 }
 0x1ca   :  { %v2782_v51 = vadd.f32 %v2781_v45, %v2769_v43 }
 0x1cc   :  { %v2795_v53 = vadd.f32 %v2794_v48, %v2782_v51 }
 0x1cd   :  { %v2796_v15 = vpop.f32.mrf.mxu1 }
 0x1ce   :  { %v2808_v57 = vadd.f32 %v2807_v49, %v2795_v53 }
 0x1d0   :  { %v2820_v52 = vpop.f32.mrf.mxu2  ;;  %v2809_v24 = vpop.f32.mrf.mxu0 }
 0x1d1   :  { %v2783_v56 = vpop.f32.mrf.mxu3  ;;  %v2821_v59 = vadd.f32 %v2820_v52, %v2808_v57 }
 0x1d8   :  { %v2822_v58 = vpop.f32.mrf.mxu2 }
 0x1d9   :  { %v2833_v54 = vpop.f32.mrf.mxu3  ;;  %v16431_v58 = vmov 392.0  }
 0x1da   :  { %v19069_v9 = vadd.f32 %v2833_v54, %v2821_v59  ;;  %16334 = vrcp.f32 %v16431_v58  ;;  %v12498_v58 = vld [vmem:[%s21425_s1 + $0x1e0] sm:$0xf] }
 0x1dc   :  { %v2964_v60 = vsel %vm2928_vm1, %v19069_v9, 0.0  ;;  %v2984_v18 = vmul.f32 %v19069_v9, %v19069_v9 }
 0x1dd   :  { %v2965_v42 = vrot.slane %v2964_v60, 4 }
 0x1de   :  { %v3021_v61 = vsel %vm2928_vm1, %v2984_v18, 0.0 }
 0x1df   :  { %v2966_v62 = vadd.f32 %v2965_v42, %v2964_v60  ;;  %v3022_v63 = vrot.slane %v3021_v61, 4 }
 0x1e0   :  { %v16335_v59 = vpop.eup %16334 }
 0x1e1   :  { %v2967_v0 = vrot.slane %v2966_v62, 2  ;;  %v3023_v23 = vadd.f32 %v3022_v63, %v3021_v61  ;;  %v2835_v39 = vpop.f32.mrf.mxu3  ;;  %v3285_v54 = vmul.f32 392.0, %v16335_v59  ;;  %vm3289_vm4 = vweird.f32 %v16335_v59 }
 0x1e3   :  { %v2968_v8 = vadd.f32 %v2967_v0, %v2966_v62  ;;  %v3024_v4 = vrot.slane %v3023_v23, 2  ;;  %v3286_v42 = vsub.f32 1.0, %v3285_v54  ;;  %v12754_v54 = vld [vmem:[%s21425_s1 + $0x3e0] sm:$0xf] }
 0x1e5   :  { %v2846_v5 = vpop.f32.mrf.mxu1  ;;  %v2969_v6 = vrot.slane %v2968_v8, 1  ;;  %v3025_v10 = vadd.f32 %v3024_v4, %v3023_v23  ;;  %v3287_v0 = vmul.f32 %v16335_v59, %v3286_v42 }
 0x1e7   :  { %v3026_v33 = vrot.slane %v3025_v10, 1  ;;  %v2970_v11 = vadd.f32 %v2969_v6, %v2968_v8 }
 0x1e8   :  { %v2872_v22 = vpop.f32.mrf.mxu0 }
 0x1e9   :  { %v3027_v14 = vadd.f32 %v3026_v33, %v3025_v10 }
 0x1eb   :  { %v3041_v47 = vsel %vm3035_vm2, %v2970_v11, %v3027_v14 }
 0x1ec   :  { %3260 = vmatmul.f32.vlgmr.msra.gmra.mxu0 %v3041_v47 }
 0x1ed   :  { %v2848_v17 = vpop.f32.mrf.mxu1  ;;  %v2859_v12 = vpop.f32.mrf.mxu3 }
 0x1ee   :  { %v2860_v29 = vadd.f32 %v2859_v12, %v2846_v5  ;;  %v3288_v5 = vadd.f32 %v16335_v59, %v3287_v0  ;;  %v15648_v0 = vld [vmem:[%s21425_s1 + $0x1cc] sm:$0xf0] }
 0x1f0   :  { %v2874_v19 = vpop.f32.mrf.mxu0  ;;  %v2885_v46 = vpop.f32.mrf.mxu2  ;;  %v2873_v32 = vadd.f32 %v2872_v22, %v2860_v29  ;;  %v19092_v33 = vsel %vm3289_vm4, %v16335_v59, %v3288_v5  ;;  %v15652_v59 = vld [vmem:[%s21425_s1 + $0x1ec] sm:$0xf0]  ;;  %vm5710_vm4 = vcmask 254976  }
 0x1f1   :  { %v12499_v42 = vor.u32 %v15652_v59, %v12498_v58  ;;  %v12402_v59 = vld [vmem:[%s21425_s1 + $0x120] sm:$0xf] }
 0x1f2   :  { %v2886_v31 = vadd.f32 %v2885_v46, %v2873_v32  ;;  %v7663_v32 = vld [vmem:[%s21397_s12 + $0x18] sm:$0xf] }
 0x1f5   :  { %v2861_v20 = vpop.f32.mrf.mxu3 }
 0x1f8   :  { %v2924_v21 = vpop.f32.mrf.mxu0  ;;  %v2887_v25 = vpop.f32.mrf.mxu2 }
 0x200   :  { %v2926_v30 = vpop.f32.mrf.mxu0 }
 0x207   :  { %v2898_v37 = vpop.f32.mrf.mxu1 }
 0x208   :  { %v2899_v34 = vadd.f32 %v2898_v37, %v2886_v31  ;;  %v3343_v37 = vld.sshfl [vmem:[#allocation1 + $0x30] sm:$0xff pattern:$0x75316420]  ;;  %v3297_v31 = vld [vmem:[%s21400_s15] sm:$0x1] }
 0x209   :  { %7674 = vst [vmem:[#allocation1 + $0x30] ss:$2 sm:$0xff] %v7663_v32  ;;  %v15684_v32 = vld [vmem:[%s21425_s1 + $0x2ec] sm:$0xf0] }
 0x20d   :  { %v2911_v16 = vpop.f32.mrf.mxu3 }
 0x20e   :  { %v2912_v36 = vadd.f32 %v2911_v16, %v2899_v34  ;;  %v3322_v34 = vld [vmem:[%s21397_s12] sm:$0xff]  ;;  %v3324_v16 = vld [vmem:[%s21397_s12 + $0x10] sm:$0xff] }
 0x20f   :  { %v2900_v38 = vpop.f32.mrf.mxu1  ;;  %v3181_v18 = vpop.f32.mrf.mxu0 }
 0x210   :  { %v19083_v40 = vadd.f32 %v2924_v21, %v2912_v36  ;;  %v3323_v38 = vld [vmem:[%s21397_s12 + $0x8] sm:$0xff] }
 0x211   :  { %v3161_v60 = vpop.f32.mrf.mxu2 }
 0x212   :  { %v2972_v41 = vsel %vm2971_vm3, %v19083_v40, 0.0  ;;  %v2985_v13 = vmul.f32 %v19083_v40, %v19083_v40  ;;  %v3182_v62 = vadd.f32 %v3181_v18, %v3161_v60  ;;  %v15716_v60 = vld [vmem:[%s21425_s1 + $0x3ec] sm:$0xf0] }
 0x213   :  { %v2973_v1 = vrot.slane %v2972_v41, 4 }
 0x214   :  { %v3028_v7 = vsel %vm2971_vm3, %v2985_v13, 0.0  ;;  %v3315_v13 = vld [vmem:[%s21401_s16] sm:$0x1] }
 0x215   :  { %v2974_v43 = vadd.f32 %v2973_v1, %v2972_v41  ;;  %v3029_v45 = vrot.slane %v3028_v7, 4  ;;  %v2913_v48 = vpop.f32.mrf.mxu3 }
 0x216   :  { %v15620_v48 = vld [vmem:[%s21425_s1 + $0xec] sm:$0xf0] }
 0x217   :  { %v2975_v55 = vrot.slane %v2974_v43, 2  ;;  %v3030_v49 = vadd.f32 %v3029_v45, %v3028_v7  ;;  %v12370_v45 = vld [vmem:[%s21425_s1 + $0xe0] sm:$0xf] }
 0x219   :  { %v2976_v50 = vadd.f32 %v2975_v55, %v2974_v43  ;;  %v3031_v51 = vrot.slane %v3030_v49, 2 }
 0x21b   :  { %v2977_v52 = vrot.slane %v2976_v50, 1  ;;  %v3032_v53 = vadd.f32 %v3031_v51, %v3030_v49 }
 0x21d   :  { %v3033_v56 = vrot.slane %v3032_v53, 1  ;;  %v2978_v15 = vadd.f32 %v2977_v52, %v2976_v50 }
 0x21f   :  { %v3034_v24 = vadd.f32 %v3033_v56, %v3032_v53 }
 0x221   :  { %v3042_v57 = vsel %vm3035_vm2, %v2978_v15, %v3034_v24  ;;  %v12371_v15 = vor.u32 %v15620_v48, %v12370_v45  ;;  %v12354_v24 = vld [vmem:[%s21425_s1 + $0xc0] sm:$0xf]  ;;  %v15680_v45 = vld [vmem:[%s21425_s1 + $0x2cc] sm:$0xf0] }
 0x222   :  { %12241 = vmatmul.msk.f32.vlgmr.msrb.gmra.mxu1 %vm2287_vm0, %v3042_v57  ;;  %v15616_v57 = vld [vmem:[%s21425_s1 + $0xcc] sm:$0xf0] }
 0x223   :  { %v12355_v18 = vor.u32 %v15616_v57, %v12354_v24  ;;  %v15696_v24 = vld [vmem:[%s21425_s1 + $0x34c] sm:$0xf0] }
 0x226   :  { %v3201_v61 = vpop.f32.mrf.mxu1 }
 0x227   :  { %v3202_v23 = vadd.f32 %v3201_v61, %v3182_v62  ;;  %v12338_v61 = vld [vmem:[%s21425_s1 + $0xa0] sm:$0xf]  ;;  %v15612_v62 = vld [vmem:[%s21425_s1 + $0xac] sm:$0xf0] }
 0x22d   :  { %v3221_v63 = vpop.f32.mrf.mxu3 }
 0x22e   :  { %v3222_v8 = vadd.f32 %v3221_v63, %v3202_v23  ;;  %v12482_v63 = vld [vmem:[%s21425_s1 + $0x1c0] sm:$0xf]  ;;  %v12755_v23 = vor.u32 %v15716_v60, %v12754_v54  ;;  %v15592_v60 = vld [vmem:[%s21425_s1 + $0xc] sm:$0xf0] }
 0x22f   :  { %v12483_v5 = vor.u32 %v15648_v0, %v12482_v63  ;;  %v12258_v54 = vld [vmem:[%s21425_s1] sm:$0xf]  ;;  %v15692_v0 = vld [vmem:[%s21425_s1 + $0x32c] sm:$0xf0] }
 0x230   :  { %v12658_v63 = vld [vmem:[%s21425_s1 + $0x320] sm:$0xf] }
 0x243   :  { %v3241_v39 = vpop.f32.mrf.mxu2 }
 0x244   :  { %v3242_v6 = vadd.f32 %v3241_v39, %v3222_v8  ;;  %v12738_v39 = vld [vmem:[%s21425_s1 + $0x3c0] sm:$0xf]  ;;  %v15712_v8 = vld [vmem:[%s21425_s1 + $0x3cc] sm:$0xf0] }
 0x269   :  { %v3261_v4 = vpop.f32.mrf.mxu0 }
 0x26a   :  { %v3262_v10 = vadd.f32 %v3261_v4, %v3242_v6  ;;  %v12339_v4 = vor.u32 %v15612_v62, %v12338_v61  ;;  %v12322_v6 = vld [vmem:[%s21425_s1 + $0x80] sm:$0xf]  ;;  %v15748_v62 = vld [vmem:[%s21425_s1 + $0x4ec] sm:$0xf0] }
 0x26b   :  { %v12882_v61 = vld [vmem:[%s21425_s1 + $0x4e0] sm:$0xf] }
 0x29f   :  { %v3281_v22 = vpop.f32.mrf.mxu1 }
 0x2a0   :  { %v3282_v11 = vadd.f32 %v3281_v22, %v3262_v10  ;;  %v15608_v10 = vld [vmem:[%s21425_s1 + $0x8c] sm:$0xf0]  ;;  %v12466_v22 = vld [vmem:[%s21425_s1 + $0x1a0] sm:$0xf] }
 0x2a2   :  { %v3291_v14 = vmul.f32 %v19092_v33, %v3282_v11  ;;  %v15644_v11 = vld [vmem:[%s21425_s1 + $0x1ac] sm:$0xf0] }
 0x2a4   :  { %v3292_v47 = vmul.f32 %v3291_v14, %v3291_v14 }
 0x2a6   :  { %v3294_v17 = vrot.slane %v3292_v47, 7  ;;  %v12722_v47 = vld [vmem:[%s21425_s1 + $0x3a0] sm:$0xf] }
 0x2a8   :  { %v3296_v12 = vsub.f32 %v3291_v14, %v3294_v17  ;;  %v15708_v17 = vld [vmem:[%s21425_s1 + $0x3ac] sm:$0xf0] }
 0x2a9   :  { %v12723_v26 = vor.u32 %v15708_v17, %v12722_v47  ;;  %v12642_v47 = vld [vmem:[%s21425_s1 + $0x300] sm:$0xf]  ;;  %v15688_v17 = vld [vmem:[%s21425_s1 + $0x30c] sm:$0xf0] }
 0x2aa   :  { %v3298_v19 = vadd.f32 1e-05, %v3296_v12  ;;  %v12323_v12 = vor.u32 %v15608_v10, %v12322_v6  ;;  %v13010_v6 = vld [vmem:[%s21425_s1 + $0x5e0] sm:$0xf]  ;;  %v12659_v10 = vor.u32 %v15692_v0, %v12658_v63 }
 0x2ab   :  { %v12578_v0 = vld [vmem:[%s21425_s1 + $0x280] sm:$0xf] }
 0x2ac   :  { %16336 = vrsqrt.f32 %v3298_v19  ;;  %vm3305_vm6 = vweird.f32 %v3298_v19 }
 0x2b2   :  { %v16337_v46 = vpop.eup %16336 }
 0x2b3   :  { %v3300_v20 = vmul.f32 %v16337_v46, %v3298_v19  ;;  %vm3306_vm5 = vweird.f32 %v16337_v46  ;;  %v12467_v19 = vor.u32 %v15644_v11, %v12466_v22  ;;  %v12866_v22 = vld [vmem:[%s21425_s1 + $0x4c0] sm:$0xf]  ;;  %v15744_v11 = vld [vmem:[%s21425_s1 + $0x4cc] sm:$0xf0] }
 0x2b4   :  { %vm3307_vm7 = vmor %vm3305_vm6, %vm3306_vm5 }
 0x2b5   :  { %v3301_v21 = vmul.f32 %v16337_v46, %v3300_v20  ;;  %v15604_v20 = vld [vmem:[%s21425_s1 + $0x6c] sm:$0xf0] }
 0x2b7   :  { %v3302_v25 = vmul.f32 0.5, %v3301_v21  ;;  %v12450_v21 = vld [vmem:[%s21425_s1 + $0x180] sm:$0xf] }
 0x2b9   :  { %v3303_v28 = vsub.f32 1.5, %v3302_v25  ;;  %v15640_v25 = vld [vmem:[%s21425_s1 + $0x18c] sm:$0xf0] }
 0x2bb   :  { %v3304_v29 = vmul.f32 %v16337_v46, %v3303_v28  ;;  %v12706_v28 = vld [vmem:[%s21425_s1 + $0x380] sm:$0xf] }
 0x2bd   :  { %v3308_v30 = vsel %vm3307_vm7, %v16337_v46, %v3304_v29  ;;  %v12306_v46 = vld [vmem:[%s21425_s1 + $0x60] sm:$0xf]  ;;  %v15704_v29 = vld [vmem:[%s21425_s1 + $0x38c] sm:$0xf0] }
 0x2be   :  { %3310 = vst [vmem:[#allocation1] sm:$0xff] %v3308_v30  ;;  %v12626_v30 = vld [vmem:[%s21425_s1 + $0x2e0] sm:$0xf] }
 0x2c5   :  { %v3312_v36 = vld [vmem:[#allocation1 + $0x1] ss:$9 sm:$0xff] }
 0x2c6   :  { %v3314_v41 = vmul.f32 %v3312_v36, %v3297_v31  ;;  %3330 = vst [vmem:[#allocation1] ss:$2 sm:$0xff] %v3322_v34  ;;  %v12627_v31 = vor.u32 %v15684_v32, %v12626_v30  ;;  %v12451_v34 = vor.u32 %v15640_v25, %v12450_v21  ;;  %v15600_v36 = vld [vmem:[%s21425_s1 + $0x4c] sm:$0xf0]  ;;  %v12643_v25 = vor.u32 %v15688_v17, %v12642_v47  ;;  %v12562_v17 = vld [vmem:[%s21425_s1 + $0x260] sm:$0xf] }
 0x2c7   :  { %3334 = vst [vmem:[#allocation1 + $0x20] ss:$2 sm:$0xff] %v3324_v16  ;;  %v12290_v16 = vld [vmem:[%s21425_s1 + $0x40] sm:$0xf]  ;;  %v15776_v30 = vld [vmem:[%s21425_s1 + $0x5cc] sm:$0xf0] }
 0x2c8   :  { %v3316_v1 = vmul.f32 %v3314_v41, %v3291_v14  ;;  %3332 = vst [vmem:[#allocation1 + $0x10] ss:$2 sm:$0xff] %v3323_v38  ;;  %v12739_v14 = vor.u32 %v15712_v8, %v12738_v39  ;;  %v12434_v38 = vld [vmem:[%s21425_s1 + $0x160] sm:$0xf]  ;;  %4750 = vmatpush.bf16.msrb.mxu0 %v12627_v31  ;;  %v12291_v48 = vor.u32 %v15600_v36, %v12290_v16  ;;  %v12356_v31 = vld [vmem:[%s21425_s1 + $0xd0] sm:$0xf0] }
 0x2c9   :  { %v12386_v8 = vld [vmem:[%s21425_s1 + $0x100] sm:$0xf] }
 0x2ca   :  { %v3317_v7 = vsub.f32 %v3315_v13, %v3316_v1  ;;  %v12707_v13 = vor.u32 %v15704_v29, %v12706_v28  ;;  %v12690_v1 = vld [vmem:[%s21425_s1 + $0x360] sm:$0xf]  ;;  %v15740_v28 = vld [vmem:[%s21425_s1 + $0x4ac] sm:$0xf0] }
 0x2cb   :  { %v12994_v29 = vld [vmem:[%s21425_s1 + $0x5c0] sm:$0xf] }
 0x2cc   :  { %v3319_v43 = vperm.slane %v3317_v7, 0  ;;  %v15700_v7 = vld [vmem:[%s21425_s1 + $0x36c] sm:$0xf0]  ;;  %v12995_v16 = vor.u32 %v15776_v30, %v12994_v29  ;;  %v12978_v36 = vld [vmem:[%s21425_s1 + $0x5a0] sm:$0xf] }
 0x2cd   :  { %v3337_v55 = vld.sshfl [vmem:[#allocation1] sm:$0xff pattern:$0x75316420]  ;;  %v3338_v49 = vld.sshfl [vmem:[#allocation1 + $0x8] sm:$0xff pattern:$0x75316420] }
 0x2ce   :  { %12242 = vmatpush.msk.msrb.mxu3 %vm3348_vm8, %v3337_v55  ;;  %12244 = vmatpush.msk.msra.mxu1 %vm3348_vm8, %v3338_v49  ;;  %v3341_v50 = vld.sshfl [vmem:[#allocation1 + $0x20] sm:$0xff pattern:$0x75316420]  ;;  %v3321_v51 = vsel %vm3035_vm2, %v3314_v41, %v3319_v43  ;;  %v3342_v52 = vld.sshfl [vmem:[#allocation1 + $0x28] sm:$0xff pattern:$0x75316420] }
 0x2cf   :  { %12250 = vmatpush.msk.msra.mxu2 %vm3348_vm8, %v3341_v50  ;;  %12243 = vmatmul.msk.f32.vlgmr.msrb.gmra.mxu3 %vm3344_vm9, %v3321_v51  ;;  %v3339_v53 = vld.sshfl [vmem:[#allocation1 + $0x10] sm:$0xff pattern:$0x75316420]  ;;  %v3340_v56 = vld.sshfl [vmem:[#allocation1 + $0x18] sm:$0xff pattern:$0x75316420] }
 0x2d0   :  { %12245 = vmatmul.msk.f32.vlgmr.msra.gmra.mxu1 %vm3344_vm9, %v3321_v51  ;;  %12251 = vmatmul.msk.f32.vlgmr.msra.gmra.mxu2 %vm3344_vm9, %v3321_v51  ;;  %v15636_v41 = vld [vmem:[%s21425_s1 + $0x16c] sm:$0xf0]  ;;  %v12610_v43 = vld [vmem:[%s21425_s1 + $0x2c0] sm:$0xf] }
 0x2d1   :  { %12246 = vmatpush.msk.msra.mxu3 %vm3348_vm8, %v3339_v53  ;;  %12248 = vmatpush.msk.msrb.mxu1 %vm3348_vm8, %v3340_v56  ;;  %v12611_v55 = vor.u32 %v15680_v45, %v12610_v43  ;;  %v12435_v49 = vor.u32 %v15636_v41, %v12434_v38  ;;  %v12274_v50 = vld [vmem:[%s21425_s1 + $0x20] sm:$0xf]  ;;  %v15632_v53 = vld [vmem:[%s21425_s1 + $0x14c] sm:$0xf0]  ;;  %v12691_v56 = vor.u32 %v15700_v7, %v12690_v1  ;;  %v12340_v1 = vld [vmem:[%s21425_s1 + $0xb0] sm:$0xf0] }
 0x2d2   :  { %4724 = vmatpush.bf16.msrb.mxu2 %v12371_v15  ;;  %v12674_v15 = vld [vmem:[%s21425_s1 + $0x340] sm:$0xf]  ;;  %v15772_v38 = vld [vmem:[%s21425_s1 + $0x5ac] sm:$0xf0] }
 0x2d3   :  { %12252 = vmatpush.msk.msrb.mxu3 %vm3348_vm8, %v3342_v52  ;;  %12254 = vmatpush.msk.msra.mxu1 %vm3348_vm8, %v3343_v37  ;;  %v12307_v37 = vor.u32 %v15604_v20, %v12306_v46  ;;  %v12418_v52 = vld [vmem:[%s21425_s1 + $0x140] sm:$0xf]  ;;  %v12867_v20 = vor.u32 %v15744_v11, %v12866_v22  ;;  %v12979_v7 = vor.u32 %v15772_v38, %v12978_v36  ;;  %v15768_v45 = vld [vmem:[%s21425_s1 + $0x58c] sm:$0xf0]  ;;  %v12276_v36 = vld [vmem:[%s21425_s1 + $0x30] sm:$0xf0] }
 0x2d4   :  { %4751 = vmatpush.bf16.msrb.mxu0 %v12611_v55  ;;  %v12419_v58 = vor.u32 %v15632_v53, %v12418_v52  ;;  %v12962_v43 = vld [vmem:[%s21425_s1 + $0x580] sm:$0xf]  ;;  %v15736_v53 = vld [vmem:[%s21425_s1 + $0x48c] sm:$0xf0] }
 0x2d5   :  { %v12963_v55 = vor.u32 %v15768_v45, %v12962_v43  ;;  %v12834_v52 = vld [vmem:[%s21425_s1 + $0x480] sm:$0xf]  ;;  %v15724_v30 = vld [vmem:[%s21425_s1 + $0x42c] sm:$0xf0] }
 0x2d6   :  { %4725 = vmatpush.bf16.msrb.mxu2 %v12355_v18  ;;  %v15628_v18 = vld [vmem:[%s21425_s1 + $0x12c] sm:$0xf0]  ;;  %v12802_v11 = vld [vmem:[%s21425_s1 + $0x440] sm:$0xf] }
 0x2d7   :  { %12247 = vmatmul.msk.f32.vlgmr.msra.gmra.mxu3 %vm3344_vm9, %v3321_v51  ;;  %v12403_v39 = vor.u32 %v15628_v18, %v12402_v59  ;;  %v15760_v59 = vld [vmem:[%s21425_s1 + $0x54c] sm:$0xf0]  ;;  %v12324_v18 = vld [vmem:[%s21425_s1 + $0x90] sm:$0xf0]  ;;  %v12786_v29 = vld [vmem:[%s21425_s1 + $0x420] sm:$0xf] }
 0x2d8   :  { %12249 = vmatmul.msk.f32.vlgmr.msrb.gmra.mxu1 %vm3344_vm9, %v3321_v51  ;;  %4737 = vmatpush.bf16.msra.mxu3 %v12499_v42  ;;  %v12675_v42 = vor.u32 %v15696_v24, %v12674_v15  ;;  %v12594_v15 = vld [vmem:[%s21425_s1 + $0x2a0] sm:$0xf]  ;;  %v15676_v24 = vld [vmem:[%s21425_s1 + $0x2ac] sm:$0xf0] }
 0x2d9   :  { %4763 = vmatpush.bf16.msrb.mxu1 %v12755_v23  ;;  %v12259_v23 = vor.u32 %v15592_v60, %v12258_v54  ;;  %v15606_v54 = vld [vmem:[%s21425_s1 + $0x84] sm:$0xf]  ;;  %v15660_v43 = vld [vmem:[%s21425_s1 + $0x22c] sm:$0xf0] }
 0x2da   :  { %4726 = vmatpush.bf16.msrb.mxu2 %v12339_v4  ;;  %v15624_v4 = vld [vmem:[%s21425_s1 + $0x10c] sm:$0xf0] }
 0x2db   :  { %v12387_v46 = vor.u32 %v15624_v4, %v12386_v8  ;;  %v12914_v8 = vld [vmem:[%s21425_s1 + $0x520] sm:$0xf]  ;;  %v15756_v4 = vld [vmem:[%s21425_s1 + $0x52c] sm:$0xf0] }
 0x2dc   :  { %4738 = vmatpush.bf16.msra.mxu3 %v12483_v5  ;;  %v12883_v5 = vor.u32 %v15748_v62, %v12882_v61  ;;  %v12818_v61 = vld [vmem:[%s21425_s1 + $0x460] sm:$0xf]  ;;  %v15732_v62 = vld [vmem:[%s21425_s1 + $0x46c] sm:$0xf0] }
 0x2dd   :  { %4764 = vmatpush.bf16.msrb.mxu1 %v12739_v14  ;;  %v15780_v14 = vld [vmem:[%s21425_s1 + $0x5ec] sm:$0xf0]  ;;  %v12819_v63 = vor.u32 %v15732_v62, %v12818_v61 }
 0x2de   :  { %4727 = vmatpush.bf16.msrb.mxu2 %v12323_v12  ;;  %v15618_v12 = vld [vmem:[%s21425_s1 + $0xe4] sm:$0xf]  ;;  %v13011_v21 = vor.u32 %v15780_v14, %v13010_v6  ;;  %v12915_v6 = vor.u32 %v15756_v4, %v12914_v8  ;;  %v15728_v14 = vld [vmem:[%s21425_s1 + $0x44c] sm:$0xf0] }
 0x2df   :  { %12253 = vmatmul.msk.f32.vlgmr.msrb.gmra.mxu3 %vm3344_vm9, %v3321_v51  ;;  %v12803_v47 = vor.u32 %v15728_v14, %v12802_v11  ;;  %v15710_v4 = vld [vmem:[%s21425_s1 + $0x3c4] sm:$0xf] }
 0x2e0   :  { %12255 = vmatmul.msk.f32.vlgmr.msra.gmra.mxu1 %vm3344_vm9, %v3321_v51  ;;  %4739 = vmatpush.bf16.msra.mxu3 %v12467_v19  ;;  %v15596_v51 = vld [vmem:[%s21425_s1 + $0x2c] sm:$0xf0]  ;;  %v12372_v19 = vld [vmem:[%s21425_s1 + $0xf0] sm:$0xf0] }
 0x2e1   :  { %4765 = vmatpush.bf16.msrb.mxu1 %v12723_v26  ;;  %v12275_v57 = vor.u32 %v15596_v51, %v12274_v50  ;;  %v12850_v26 = vld [vmem:[%s21425_s1 + $0x4a0] sm:$0xf]  ;;  %v12375_v32 = vor.u32 %v15618_v12, %v12372_v19  ;;  %v15764_v50 = vld [vmem:[%s21425_s1 + $0x56c] sm:$0xf0] }
 0x2e2   :  { %4728 = vmatpush.bf16.msrb.mxu2 %v12307_v37  ;;  %v15614_v37 = vld [vmem:[%s21425_s1 + $0xc4] sm:$0xf]  ;;  %v15668_v12 = vld [vmem:[%s21425_s1 + $0x26c] sm:$0xf0] }
 0x2e3   :  { %v12359_v41 = vor.u32 %v15614_v37, %v12356_v31  ;;  %v12563_v19 = vor.u32 %v15668_v12, %v12562_v17  ;;  %v12546_v37 = vld [vmem:[%s21425_s1 + $0x240] sm:$0xf]  ;;  %v15664_v31 = vld [vmem:[%s21425_s1 + $0x24c] sm:$0xf0]  ;;  %v15706_v12 = vld [vmem:[%s21425_s1 + $0x3a4] sm:$0xf] }
 0x2e4   :  { %4740 = vmatpush.bf16.msra.mxu3 %v12451_v34  ;;  %v12851_v34 = vor.u32 %v15740_v28, %v12850_v26  ;;  %v12292_v26 = vld [vmem:[%s21425_s1 + $0x50] sm:$0xf0] }
 0x2e5   :  { %4766 = vmatpush.bf16.msrb.mxu1 %v12707_v13  ;;  %v15610_v13 = vld [vmem:[%s21425_s1 + $0xa4] sm:$0xf] }
 0x2e6   :  { %4729 = vmatpush.bf16.msrb.mxu2 %v12291_v48  ;;  %v12343_v48 = vor.u32 %v15610_v13, %v12340_v1  ;;  %v15720_v13 = vld [vmem:[%s21425_s1 + $0x40c] sm:$0xf0] }
 0x2e8   :  { %4741 = vmatpush.bf16.msra.mxu3 %v12435_v49  ;;  %v12946_v49 = vld [vmem:[%s21425_s1 + $0x560] sm:$0xf] }
 0x2e9   :  { %4767 = vmatpush.bf16.msrb.mxu1 %v12691_v56  ;;  %v12947_v51 = vor.u32 %v15764_v50, %v12946_v49  ;;  %v12835_v56 = vor.u32 %v15736_v53, %v12834_v52  ;;  %v12514_v50 = vld [vmem:[%s21425_s1 + $0x200] sm:$0xf] }
 0x2ea   :  { %4730 = vmatpush.bf16.msrb.mxu2 %v12275_v57  ;;  %v12595_v57 = vor.u32 %v15676_v24, %v12594_v15  ;;  %v13026_v53 = vld [vmem:[%s21425_s1 + $0x600] sm:$0xf] }
 0x2ec   :  { %4742 = vmatpush.bf16.msra.mxu3 %v12419_v58  ;;  %v12930_v58 = vld [vmem:[%s21425_s1 + $0x540] sm:$0xf]  ;;  %4752 = vmatpush.bf16.msrb.mxu0 %v12595_v57 }
 0x2ed   :  { %4768 = vmatpush.bf16.msrb.mxu1 %v12675_v42  ;;  %v12931_v60 = vor.u32 %v15760_v59, %v12930_v58  ;;  %v12327_v42 = vor.u32 %v15606_v54, %v12324_v18  ;;  %v15714_v18 = vld [vmem:[%s21425_s1 + $0x3e4] sm:$0xf] }
 0x2ee   :  { %4731 = vmatpush.bf16.msrb.mxu2 %v12259_v23  ;;  %v15672_v23 = vld [vmem:[%s21425_s1 + $0x28c] sm:$0xf0] }
 0x2f0   :  { %4743 = vmatpush.bf16.msra.mxu3 %v12403_v39  ;;  %v12579_v39 = vor.u32 %v15672_v23, %v12578_v0 }
 0x2f1   :  { %4769 = vmatpush.bf16.msrb.mxu1 %v12659_v10  ;;  %v12308_v10 = vld [vmem:[%s21425_s1 + $0x70] sm:$0xf0] }
 0x2f2   :  { %4776 = vmatpush.bf16.msra.mxu2 %v12883_v5  ;;  %v15602_v5 = vld [vmem:[%s21425_s1 + $0x64] sm:$0xf]  ;;  %4753 = vmatpush.bf16.msrb.mxu0 %v12579_v39 }
 0x2f3   :  { %v12311_v22 = vor.u32 %v15602_v5, %v12308_v10  ;;  %v12740_v5 = vld [vmem:[%s21425_s1 + $0x3d0] sm:$0xf0]  ;;  %v15682_v10 = vld [vmem:[%s21425_s1 + $0x2e4] sm:$0xf] }
 0x2f4   :  { %4744 = vmatpush.bf16.msra.mxu3 %v12387_v46  ;;  %v12898_v46 = vld [vmem:[%s21425_s1 + $0x500] sm:$0xf]  ;;  %v12743_v17 = vor.u32 %v15710_v4, %v12740_v5 }
 0x2f5   :  { %4770 = vmatpush.bf16.msrb.mxu1 %v12643_v25 }
 0x2f6   :  { %4777 = vmatpush.bf16.msra.mxu2 %v12867_v20  ;;  %v15752_v20 = vld [vmem:[%s21425_s1 + $0x50c] sm:$0xf0]  ;;  %4754 = vmatpush.bf16.msrb.mxu0 %v12563_v19 }
 0x2f7   :  { %v12899_v25 = vor.u32 %v15752_v20, %v12898_v46 }
 0x2f8   :  { %4789 = vmatpush.bf16.msrb.mxu3 %v13011_v21  ;;  %v15598_v21 = vld [vmem:[%s21425_s1 + $0x44] sm:$0xf] }
 0x2f9   :  { %4815 = vmatpush.bf16.msra.mxu1 %v12375_v32  ;;  %v12295_v28 = vor.u32 %v15598_v21, %v12292_v26  ;;  %v12787_v32 = vor.u32 %v15724_v30, %v12786_v29  ;;  %v12724_v21 = vld [vmem:[%s21425_s1 + $0x3b0] sm:$0xf0]  ;;  %v15678_v29 = vld [vmem:[%s21425_s1 + $0x2c4] sm:$0xf] }
 0x2fa   :  { %4778 = vmatpush.bf16.msra.mxu2 %v12851_v34  ;;  %v12547_v34 = vor.u32 %v15664_v31, %v12546_v37  ;;  %v12612_v30 = vld [vmem:[%s21425_s1 + $0x2d0] sm:$0xf0] }
 0x2fc   :  { %4790 = vmatpush.bf16.msrb.mxu3 %v12995_v16  ;;  %v15594_v16 = vld [vmem:[%s21425_s1 + $0x24] sm:$0xf]  ;;  %4755 = vmatpush.bf16.msrb.mxu0 %v12547_v34 }
 0x2fd   :  { %4816 = vmatpush.bf16.msra.mxu1 %v12359_v41  ;;  %v12279_v38 = vor.u32 %v15594_v16, %v12276_v36  ;;  %v12770_v41 = vld [vmem:[%s21425_s1 + $0x400] sm:$0xf]  ;;  %v12727_v16 = vor.u32 %v15706_v12, %v12724_v21  ;;  %v12468_v12 = vld [vmem:[%s21425_s1 + $0x1b0] sm:$0xf0] }
 0x2fe   :  { %4779 = vmatpush.bf16.msra.mxu2 %v12835_v56  ;;  %v12771_v1 = vor.u32 %v15720_v13, %v12770_v41  ;;  %v15784_v56 = vld [vmem:[%s21425_s1 + $0x60c] sm:$0xf0]  ;;  %v12615_v13 = vor.u32 %v15678_v29, %v12612_v30  ;;  %v12564_v21 = vld [vmem:[%s21425_s1 + $0x270] sm:$0xf0]  ;;  %v15690_v29 = vld [vmem:[%s21425_s1 + $0x324] sm:$0xf] }
 0x2ff   :  { %v13027_v15 = vor.u32 %v15784_v56, %v13026_v53 }
 0x300   :  { %4791 = vmatpush.bf16.msrb.mxu3 %v12979_v7  ;;  %v12530_v7 = vld [vmem:[%s21425_s1 + $0x220] sm:$0xf] }
 0x301   :  { %4817 = vmatpush.bf16.msra.mxu1 %v12343_v48  ;;  %v12531_v45 = vor.u32 %v15660_v43, %v12530_v7  ;;  %v15590_v48 = vld [vmem:[%s21425_s1 + $0x4] sm:$0xf]  ;;  %v12868_v7 = vld [vmem:[%s21425_s1 + $0x4d0] sm:$0xf0] }
 0x302   :  { %4780 = vmatpush.bf16.msra.mxu2 %v12819_v63 }
 0x303   :  { %4756 = vmatpush.bf16.msrb.mxu0 %v12531_v45  ;;  %v15674_v45 = vld [vmem:[%s21425_s1 + $0x2a4] sm:$0xf] }
 0x304   :  { %4792 = vmatpush.bf16.msrb.mxu3 %v12963_v55  ;;  %v12260_v55 = vld [vmem:[%s21425_s1 + $0x10] sm:$0xf0] }
 0x305   :  { %4818 = vmatpush.bf16.msra.mxu1 %v12327_v42  ;;  %v12263_v49 = vor.u32 %v15590_v48, %v12260_v55  ;;  %v12756_v42 = vld [vmem:[%s21425_s1 + $0x3f0] sm:$0xf0] }
 0x306   :  { %4781 = vmatpush.bf16.msra.mxu2 %v12803_v47  ;;  %v12759_v39 = vor.u32 %v15714_v18, %v12756_v42  ;;  %v12596_v48 = vld [vmem:[%s21425_s1 + $0x2b0] sm:$0xf0] }
 0x308   :  { %4793 = vmatpush.bf16.msrb.mxu3 %v12947_v51  ;;  %v15656_v51 = vld [vmem:[%s21425_s1 + $0x20c] sm:$0xf0] }
 0x309   :  { %4819 = vmatpush.bf16.msra.mxu1 %v12311_v22  ;;  %v12515_v52 = vor.u32 %v15656_v51, %v12514_v50  ;;  %v12500_v50 = vld [vmem:[%s21425_s1 + $0x1f0] sm:$0xf0] }
 0x30a   :  { %4782 = vmatpush.bf16.msra.mxu2 %v12787_v32 }
 0x30b   :  { %4757 = vmatpush.bf16.msrb.mxu0 %v12515_v52 }
 0x30c   :  { %4794 = vmatpush.bf16.msrb.mxu3 %v12931_v60 }
 0x30d   :  { %4820 = vmatpush.bf16.msra.mxu1 %v12295_v28 }
 0x30e   :  { %4783 = vmatpush.bf16.msra.mxu2 %v12771_v1  ;;  %v12708_v1 = vld [vmem:[%s21425_s1 + $0x390] sm:$0xf0] }
 0x30f   :  { %4809 = vmatpush.bf16.msra.mxu0 %v13027_v15  ;;  %v12692_v15 = vld [vmem:[%s21425_s1 + $0x370] sm:$0xf0] }
 0x310   :  { %4795 = vmatpush.bf16.msrb.mxu3 %v12915_v6 }
 0x311   :  { %4821 = vmatpush.bf16.msra.mxu1 %v12279_v38  ;;  %v15702_v38 = vld [vmem:[%s21425_s1 + $0x384] sm:$0xf] }
 0x312   :  { %v12711_v53 = vor.u32 %v15702_v38, %v12708_v1  ;;  %v12452_v1 = vld [vmem:[%s21425_s1 + $0x190] sm:$0xf0] }
 0x314   :  { %4796 = vmatpush.bf16.msrb.mxu3 %v12899_v25  ;;  %v12884_v25 = vld [vmem:[%s21425_s1 + $0x4f0] sm:$0xf0] }
 0x315   :  { %4822 = vmatpush.bf16.msra.mxu1 %v12263_v49  ;;  %v15650_v49 = vld [vmem:[%s21425_s1 + $0x1e4] sm:$0xf] }
 0x316   :  { %v12503_v42 = vor.u32 %v15650_v49, %v12500_v50  ;;  %v15726_v49 = vld [vmem:[%s21425_s1 + $0x444] sm:$0xf]  ;;  %v12804_v50 = vld [vmem:[%s21425_s1 + $0x450] sm:$0xf0] }
 0x34d   :  { %v3400_v24 = vpop.f32.mrf.mxu1 }
 0x34e   :  { %v3504_v57 = vperm.slane %v3400_v24, 0  ;;  %v3518_v59 = vperm.slane %v3400_v24, 1 }
 0x350   :  { %v3511_v58 = vmul.f32 %v3504_v57, %v18209_v44 }
 0x352   :  { %v3525_v54 = vadd.f32 %v3518_v59, %v3511_v58  ;;  %v3380_v60 = vpop.f32.mrf.mxu3  ;;  %v12599_v58 = vor.u32 %v15674_v45, %v12596_v48  ;;  %v15738_v59 = vld [vmem:[%s21425_s1 + $0x4a4] sm:$0xf] }
 0x353   :  { %v3503_v61 = vperm.slane %v3380_v60, 0  ;;  %v3517_v0 = vperm.slane %v3380_v60, 1  ;;  %v3460_v47 = vpop.f32.mrf.mxu2  ;;  %v15686_v48 = vld [vmem:[%s21425_s1 + $0x304] sm:$0xf] }
 0x354   :  { %v3532_v62 = vmax.f32 %v3525_v54, 0.0  ;;  %v3507_v32 = vperm.slane %v3460_v47, 0  ;;  %v3521_v24 = vperm.slane %v3460_v47, 1  ;;  %v12852_v54 = vld [vmem:[%s21425_s1 + $0x4b0] sm:$0xf0] }
 0x355   :  { %v3510_v63 = vmul.f32 %v3503_v61, %v18651_v27  ;;  %v3440_v23 = vpop.f32.mrf.mxu1  ;;  %v12628_v27 = vld [vmem:[%s21425_s1 + $0x2f0] sm:$0xf0]  ;;  %v15670_v61 = vld [vmem:[%s21425_s1 + $0x284] sm:$0xf] }
 0x356   :  { %v19481_v8 = vpack.c.bf16 %v3532_v62, %v3532_v62  ;;  %v3506_v44 = vperm.slane %v3440_v23, 0  ;;  %v3520_v11 = vperm.slane %v3440_v23, 1  ;;  %v12631_v20 = vor.u32 %v15682_v10, %v12628_v27  ;;  %v12580_v62 = vld [vmem:[%s21425_s1 + $0x290] sm:$0xf0]  ;;  %v15646_v23 = vld [vmem:[%s21425_s1 + $0x1c4] sm:$0xf] }
 0x357   :  { %v3524_v6 = vadd.f32 %v3517_v0, %v3510_v63  ;;  %v3514_v55 = vmul.f32 %v3507_v32, %v19019_v3  ;;  %v15698_v3 = vld [vmem:[%s21425_s1 + $0x364] sm:$0xf]  ;;  %v12583_v27 = vor.u32 %v15670_v61, %v12580_v62  ;;  %v12788_v61 = vld [vmem:[%s21425_s1 + $0x430] sm:$0xf0] }
 0x358   :  { %v3513_v22 = vmul.f32 %v3506_v44, %v18818_v2  ;;  %4745 = vmatmul.bf16.vlgmr.msra.gmra.mxu3 %v19481_v8  ;;  %v15746_v2 = vld [vmem:[%s21425_s1 + $0x4e4] sm:$0xf]  ;;  %v12695_v5 = vor.u32 %v15698_v3, %v12692_v15  ;;  %v12436_v15 = vld [vmem:[%s21425_s1 + $0x170] sm:$0xf0] }
 0x359   :  { %v3531_v14 = vmax.f32 %v3524_v6, 0.0  ;;  %4854 = vmatpush.bf16.msra.mxu3 %v12759_v39  ;;  %v12887_v36 = vor.u32 %v15746_v2, %v12884_v25  ;;  %v3528_v63 = vadd.f32 %v3521_v24, %v3514_v55  ;;  %v12484_v39 = vld [vmem:[%s21425_s1 + $0x1d0] sm:$0xf0]  ;;  %v12855_v6 = vor.u32 %v15738_v59, %v12852_v54  ;;  %v15694_v10 = vld [vmem:[%s21425_s1 + $0x344] sm:$0xf] }
 0x35a   :  { %v3527_v19 = vadd.f32 %v3520_v11, %v3513_v22  ;;  %v3420_v46 = vpop.f32.mrf.mxu3  ;;  %v12676_v22 = vld [vmem:[%s21425_s1 + $0x350] sm:$0xf0]  ;;  %v12487_v47 = vor.u32 %v15646_v23, %v12484_v39  ;;  %v15730_v32 = vld [vmem:[%s21425_s1 + $0x464] sm:$0xf]  ;;  %v12807_v54 = vor.u32 %v15726_v49, %v12804_v50  ;;  %v15617_v23 = vld [vmem:[%s21425_s1 + $0xd4] sm:$0xf0] }
 0x35b   :  { %v19509_v26 = vpack.c.bf16 %v3531_v14, %v3531_v14  ;;  %v3505_v28 = vperm.slane %v3420_v46, 0  ;;  %v3519_v34 = vperm.slane %v3420_v46, 1  ;;  %v12836_v11 = vld [vmem:[%s21425_s1 + $0x490] sm:$0xf0]  ;;  %v12679_v25 = vor.u32 %v15694_v10, %v12676_v22  ;;  %v15634_v3 = vld [vmem:[%s21425_s1 + $0x164] sm:$0xf] }
 0x35c   :  { %v3534_v37 = vmax.f32 %v3527_v19, 0.0  ;;  %v3535_v19 = vmax.f32 %v3528_v63, 0.0  ;;  %v12644_v55 = vld [vmem:[%s21425_s1 + $0x310] sm:$0xf0]  ;;  %v12439_v62 = vor.u32 %v15634_v3, %v12436_v15  ;;  %v15630_v39 = vld [vmem:[%s21425_s1 + $0x144] sm:$0xf] }
 0x35d   :  { %v3512_v31 = vmul.f32 %v3505_v28, %v18563_v35  ;;  %4855 = vmatpush.bf16.msra.mxu3 %v12743_v17  ;;  %4732 = vmatmul.bf16.vlgmr.msrb.gmra.mxu2 %v19509_v26  ;;  %v15742_v35 = vld [vmem:[%s21425_s1 + $0x4c4] sm:$0xf]  ;;  %v3500_v52 = vpop.f32.mrf.mxu1  ;;  %v12647_v59 = vor.u32 %v15686_v48, %v12644_v55  ;;  %v13028_v22 = vld [vmem:[%s21425_s1 + $0x610] sm:$0xf0]  ;;  %v15645_v3 = vld [vmem:[%s21425_s1 + $0x1b4] sm:$0xf0] }
 0x35e   :  { %v19522_v41 = vpack.c.bf16 %v3534_v37, %v3534_v37  ;;  %4841 = vmatpush.bf16.msrb.mxu2 %v12631_v20  ;;  %v12871_v56 = vor.u32 %v15742_v35, %v12868_v7  ;;  %v3509_v0 = vperm.slane %v3500_v52, 0  ;;  %v15642_v17 = vld [vmem:[%s21425_s1 + $0x1a4] sm:$0xf]  ;;  %v3523_v30 = vperm.slane %v3500_v52, 1  ;;  %v12820_v37 = vld [vmem:[%s21425_s1 + $0x470] sm:$0xf0] }
 0x35f   :  { %v3526_v43 = vadd.f32 %v3519_v34, %v3512_v31  ;;  %v15666_v20 = vld [vmem:[%s21425_s1 + $0x264] sm:$0xf]  ;;  %v12471_v34 = vor.u32 %v15642_v17, %v12468_v12  ;;  %v19617_v38 = vpack.c.bf16 %v3535_v19, %v3535_v19  ;;  %v12548_v7 = vld [vmem:[%s21425_s1 + $0x250] sm:$0xf0]  ;;  %v12823_v45 = vor.u32 %v15730_v32, %v12820_v37  ;;  %v15613_v19 = vld [vmem:[%s21425_s1 + $0xb4] sm:$0xf0] }
 0x360   :  { %4771 = vmatmul.bf16.vlgmr.msrb.gmra.mxu1 %v19522_v41  ;;  %v3516_v46 = vmul.f32 %v3509_v0, %v19083_v40  ;;  %v12660_v40 = vld [vmem:[%s21425_s1 + $0x330] sm:$0xf0]  ;;  %v15662_v35 = vld [vmem:[%s21425_s1 + $0x244] sm:$0xf]  ;;  %v12362_v0 = vld [vmem:[%s21425_s1 + $0xc8] sm:$0xf] }
 0x361   :  { %v3533_v51 = vmax.f32 %v3526_v43, 0.0  ;;  %4856 = vmatpush.bf16.msra.mxu3 %v12727_v16  ;;  %4867 = vmatpush.bf16.msrb.mxu1 %v12887_v36  ;;  %v12567_v16 = vor.u32 %v15666_v20, %v12564_v21  ;;  %v15638_v36 = vld [vmem:[%s21425_s1 + $0x184] sm:$0xf]  ;;  %v12663_v43 = vor.u32 %v15690_v29, %v12660_v40  ;;  %v15653_v20 = vld [vmem:[%s21425_s1 + $0x1f4] sm:$0xf0] }
 0x362   :  { %4842 = vmatpush.bf16.msrb.mxu2 %v12615_v13  ;;  %v3480_v57 = vpop.f32.mrf.mxu3  ;;  %v3530_v13 = vadd.f32 %v3523_v30, %v3516_v46  ;;  %v12455_v52 = vor.u32 %v15638_v36, %v12452_v1  ;;  %v12506_v46 = vld [vmem:[%s21425_s1 + $0x1e8] sm:$0xf]  ;;  %v15685_v40 = vld [vmem:[%s21425_s1 + $0x2f4] sm:$0xf0]  ;;  %v15778_v48 = vld [vmem:[%s21425_s1 + $0x5e4] sm:$0xf] }
 0x363   :  { %v19559_v60 = vpack.c.bf16 %v3533_v51, %v3533_v51  ;;  %v3508_v18 = vperm.slane %v3480_v57, 0  ;;  %v3522_v4 = vperm.slane %v3480_v57, 1  ;;  %v12378_v51 = vld [vmem:[%s21425_s1 + $0xe8] sm:$0xf]  ;;  %v15658_v57 = vld [vmem:[%s21425_s1 + $0x224] sm:$0xf]  ;;  %v12507_v32 = vor.u32 %v15653_v20, %v12506_v46 }
 0x364   :  { %v3537_v24 = vmax.f32 %v3530_v13, 0.0  ;;  %v12634_v29 = vld [vmem:[%s21425_s1 + $0x2e8] sm:$0xf]  ;;  %v15649_v13 = vld [vmem:[%s21425_s1 + $0x1d4] sm:$0xf0] }
 0x365   :  { %v3515_v44 = vmul.f32 %v3508_v18, %v19069_v9  ;;  %4857 = vmatpush.bf16.msra.mxu3 %v12711_v53  ;;  %4868 = vmatpush.bf16.msrb.mxu1 %v12871_v56  ;;  %v15734_v9 = vld [vmem:[%s21425_s1 + $0x484] sm:$0xf]  ;;  %v12551_v53 = vor.u32 %v15662_v35, %v12548_v7  ;;  %v15621_v56 = vld [vmem:[%s21425_s1 + $0xf4] sm:$0xf0]  ;;  %v12330_v37 = vld [vmem:[%s21425_s1 + $0x88] sm:$0xf]  ;;  %v12635_v1 = vor.u32 %v15685_v40, %v12634_v29 }
 0x366   :  { %4758 = vmatmul.bf16.vlgmr.msrb.gmra.mxu0 %v19559_v60  ;;  %4843 = vmatpush.bf16.msrb.mxu2 %v12599_v58  ;;  %v12839_v28 = vor.u32 %v15734_v9, %v12836_v11  ;;  %v12532_v58 = vld [vmem:[%s21425_s1 + $0x230] sm:$0xf0]  ;;  %v12379_v18 = vor.u32 %v15621_v56, %v12378_v51  ;;  %v12363_v9 = vor.u32 %v15617_v23, %v12362_v0  ;;  %v15718_v11 = vld [vmem:[%s21425_s1 + $0x404] sm:$0xf]  ;;  %v12490_v36 = vld [vmem:[%s21425_s1 + $0x1c8] sm:$0xf] }
 0x367   :  { %v3529_v14 = vadd.f32 %v3522_v4, %v3515_v44  ;;  %4828 = vmatpush.bf16.msrb.mxu0 %v12503_v42  ;;  %v15722_v42 = vld [vmem:[%s21425_s1 + $0x424] sm:$0xf]  ;;  %v12535_v63 = vor.u32 %v15658_v57, %v12532_v58  ;;  %v19676_v44 = vpack.c.bf16 %v3537_v24, %v3537_v24  ;;  %v12420_v4 = vld [vmem:[%s21425_s1 + $0x150] sm:$0xf0]  ;;  %v12491_v50 = vor.u32 %v15649_v13, %v12490_v36  ;;  %v12314_v51 = vld [vmem:[%s21425_s1 + $0x68] sm:$0xf] }
 0x368   :  { %v12791_v10 = vor.u32 %v15722_v42, %v12788_v61  ;;  %v12423_v17 = vor.u32 %v15630_v39, %v12420_v4  ;;  %v15622_v35 = vld [vmem:[%s21425_s1 + $0x104] sm:$0xf]  ;;  %v12388_v7 = vld [vmem:[%s21425_s1 + $0x110] sm:$0xf0]  ;;  %v12474_v56 = vld [vmem:[%s21425_s1 + $0x1a8] sm:$0xf] }
 0x369   :  { %v3536_v2 = vmax.f32 %v3529_v14, 0.0  ;;  %4858 = vmatpush.bf16.msra.mxu3 %v12695_v5  ;;  %4869 = vmatpush.bf16.msrb.mxu1 %v12855_v6  ;;  %v15654_v5 = vld [vmem:[%s21425_s1 + $0x204] sm:$0xf]  ;;  %v12516_v6 = vld [vmem:[%s21425_s1 + $0x210] sm:$0xf0]  ;;  %v12475_v42 = vor.u32 %v15645_v3, %v12474_v56 }
 0x36a   :  { %4844 = vmatpush.bf16.msrb.mxu2 %v12583_v27  ;;  %v15782_v27 = vld [vmem:[%s21425_s1 + $0x604] sm:$0xf]  ;;  %v12772_v14 = vld [vmem:[%s21425_s1 + $0x410] sm:$0xf0]  ;;  %v12519_v12 = vor.u32 %v15654_v5, %v12516_v6  ;;  %v12602_v57 = vld [vmem:[%s21425_s1 + $0x2a8] sm:$0xf] }
 0x36b   :  { %v19612_v31 = vpack.c.bf16 %v3536_v2, %v3536_v2  ;;  %4829 = vmatpush.bf16.msrb.mxu0 %v12487_v47  ;;  %v12346_v47 = vld [vmem:[%s21425_s1 + $0xa8] sm:$0xf]  ;;  %v13031_v21 = vor.u32 %v15782_v27, %v13028_v22  ;;  %v15626_v2 = vld [vmem:[%s21425_s1 + $0x124] sm:$0xf]  ;;  %v13012_v55 = vld [vmem:[%s21425_s1 + $0x5f0] sm:$0xf0] }
 0x36c   :  { %v12347_v30 = vor.u32 %v15613_v19, %v12346_v47  ;;  %v13015_v24 = vor.u32 %v15778_v48, %v13012_v55  ;;  %v15677_v58 = vld [vmem:[%s21425_s1 + $0x2b4] sm:$0xf0]  ;;  %v12298_v61 = vld [vmem:[%s21425_s1 + $0x48] sm:$0xf]  ;;  %v15770_v6 = vld [vmem:[%s21425_s1 + $0x5a4] sm:$0xf] }
 0x36d   :  { %4859 = vmatpush.bf16.msra.mxu3 %v12679_v25  ;;  %4870 = vmatpush.bf16.msrb.mxu1 %v12839_v28  ;;  %v12404_v25 = vld [vmem:[%s21425_s1 + $0x130] sm:$0xf0]  ;;  %v12775_v28 = vor.u32 %v15718_v11, %v12772_v14  ;;  %v15641_v0 = vld [vmem:[%s21425_s1 + $0x194] sm:$0xf0]  ;;  %v12603_v23 = vor.u32 %v15677_v58, %v12602_v57  ;;  %v12586_v4 = vld [vmem:[%s21425_s1 + $0x288] sm:$0xf] }
 0x36e   :  { %4784 = vmatmul.bf16.vlgmr.msra.gmra.mxu2 %v19617_v38  ;;  %4797 = vmatmul.bf16.vlgmr.msrb.gmra.mxu3 %v19612_v31  ;;  %v15673_v5 = vld [vmem:[%s21425_s1 + $0x294] sm:$0xf0]  ;;  %v12442_v14 = vld [vmem:[%s21425_s1 + $0x168] sm:$0xf]  ;;  %v15766_v20 = vld [vmem:[%s21425_s1 + $0x584] sm:$0xf] }
 0x36f   :  { %4830 = vmatpush.bf16.msrb.mxu0 %v12471_v34  ;;  %4845 = vmatpush.bf16.msrb.mxu2 %v12567_v16  ;;  %v12407_v34 = vor.u32 %v15626_v2, %v12404_v25  ;;  %v15609_v16 = vld [vmem:[%s21425_s1 + $0x94] sm:$0xf0]  ;;  %v12570_v19 = vld [vmem:[%s21425_s1 + $0x268] sm:$0xf]  ;;  %v15758_v3 = vld [vmem:[%s21425_s1 + $0x544] sm:$0xf] }
 0x370   :  { %4823 = vmatmul.bf16.vlgmr.msra.gmra.mxu1 %v19509_v26  ;;  %v12331_v49 = vor.u32 %v15609_v16, %v12330_v37  ;;  %v15597_v11 = vld [vmem:[%s21425_s1 + $0x34] sm:$0xf0]  ;;  %v12426_v40 = vld [vmem:[%s21425_s1 + $0x148] sm:$0xf] }
 0x371   :  { %4860 = vmatpush.bf16.msra.mxu3 %v12663_v43  ;;  %4871 = vmatpush.bf16.msrb.mxu1 %v12823_v45  ;;  %v12618_v43 = vld [vmem:[%s21425_s1 + $0x2c8] sm:$0xf]  ;;  %v15681_v45 = vld [vmem:[%s21425_s1 + $0x2d4] sm:$0xf0] }
 0x372   :  { %v12619_v15 = vor.u32 %v15681_v45, %v12618_v43  ;;  %v15637_v47 = vld [vmem:[%s21425_s1 + $0x174] sm:$0xf0]  ;;  %v12890_v16 = vld [vmem:[%s21425_s1 + $0x4e8] sm:$0xf] }
 0x373   :  { %4831 = vmatpush.bf16.msrb.mxu0 %v12455_v52  ;;  %4846 = vmatpush.bf16.msrb.mxu2 %v12551_v53  ;;  %v12391_v52 = vor.u32 %v15622_v35, %v12388_v7  ;;  %v15605_v53 = vld [vmem:[%s21425_s1 + $0x74] sm:$0xf0]  ;;  %v12443_v25 = vor.u32 %v15637_v47, %v12442_v14  ;;  %v12948_v35 = vld [vmem:[%s21425_s1 + $0x570] sm:$0xf0]  ;;  %v12410_v48 = vld [vmem:[%s21425_s1 + $0x128] sm:$0xf] }
 0x374   :  { %v15669_v46 = vld [vmem:[%s21425_s1 + $0x274] sm:$0xf0]  ;;  %v12394_v57 = vld [vmem:[%s21425_s1 + $0x108] sm:$0xf] }
 0x375   :  { %4861 = vmatpush.bf16.msra.mxu3 %v12647_v59  ;;  %4872 = vmatpush.bf16.msrb.mxu1 %v12807_v54  ;;  %v15774_v59 = vld [vmem:[%s21425_s1 + $0x5c4] sm:$0xf]  ;;  %v12996_v54 = vld [vmem:[%s21425_s1 + $0x5d0] sm:$0xf0]  ;;  %v15593_v29 = vld [vmem:[%s21425_s1 + $0x14] sm:$0xf0] }
 0x376   :  { %13040 = vmatmul.msk.bf16.vlgmr.msra.gmra.mxu0 %vm2287_vm0, %v19676_v44  ;;  %v12999_v39 = vor.u32 %v15774_v59, %v12996_v54  ;;  %v15749_v36 = vld [vmem:[%s21425_s1 + $0x4f4] sm:$0xf0]  ;;  %v12522_v54 = vld [vmem:[%s21425_s1 + $0x208] sm:$0xf] }
 0x377   :  { %4832 = vmatpush.bf16.msrb.mxu0 %v12439_v62  ;;  %4847 = vmatpush.bf16.msrb.mxu2 %v12535_v63  ;;  %v15601_v62 = vld [vmem:[%s21425_s1 + $0x54] sm:$0xf0]  ;;  %v12458_v63 = vld [vmem:[%s21425_s1 + $0x188] sm:$0xf]  ;;  %v12891_v45 = vor.u32 %v15749_v36, %v12890_v16 }
 0x378   :  { %v12299_v27 = vor.u32 %v15601_v62, %v12298_v61  ;;  %v12459_v22 = vor.u32 %v15641_v0, %v12458_v63  ;;  %v15665_v13 = vld [vmem:[%s21425_s1 + $0x254] sm:$0xf0]  ;;  %v13018_v63 = vld [vmem:[%s21425_s1 + $0x5e8] sm:$0xf] }
 0x379   :  { %4906 = vmatpush.bf16.msrb.mxu3 %v12379_v18  ;;  %4873 = vmatpush.bf16.msrb.mxu1 %v12791_v10  ;;  %v12315_v18 = vor.u32 %v15605_v53, %v12314_v51  ;;  %v12980_v10 = vld [vmem:[%s21425_s1 + $0x5b0] sm:$0xf0]  ;;  %v15629_v55 = vld [vmem:[%s21425_s1 + $0x134] sm:$0xf0]  ;;  %v12538_v51 = vld [vmem:[%s21425_s1 + $0x228] sm:$0xf] }
 0x37a   :  { %v15745_v53 = vld [vmem:[%s21425_s1 + $0x4d4] sm:$0xf0]  ;;  %v12842_v14 = vld [vmem:[%s21425_s1 + $0x488] sm:$0xf] }
 0x37b   :  { %4833 = vmatpush.bf16.msrb.mxu0 %v12423_v17  ;;  %4848 = vmatpush.bf16.msrb.mxu2 %v12519_v12  ;;  %v12587_v17 = vor.u32 %v15673_v5, %v12586_v4  ;;  %v12983_v12 = vor.u32 %v15770_v6, %v12980_v10  ;;  %v15661_v56 = vld [vmem:[%s21425_s1 + $0x234] sm:$0xf0]  ;;  %v12916_v4 = vld [vmem:[%s21425_s1 + $0x530] sm:$0xf0]  ;;  %v13034_v6 = vld [vmem:[%s21425_s1 + $0x608] sm:$0xf] }
 0x37c   :  { %v15625_v59 = vld [vmem:[%s21425_s1 + $0x114] sm:$0xf0]  ;;  %v12986_v16 = vld [vmem:[%s21425_s1 + $0x5a8] sm:$0xf] }
 0x37d   :  { %4907 = vmatpush.bf16.msrb.mxu3 %v12363_v9  ;;  %4874 = vmatpush.bf16.msrb.mxu1 %v12775_v28  ;;  %v12282_v9 = vld [vmem:[%s21425_s1 + $0x28] sm:$0xf]  ;;  %v15741_v62 = vld [vmem:[%s21425_s1 + $0x4b4] sm:$0xf0]  ;;  %v12395_v5 = vor.u32 %v15625_v59, %v12394_v57 }
 0x37e   :  { %4849 = vmatmul.bf16.vlgmr.msrb.gmra.mxu2 %v19559_v60  ;;  %4862 = vmatmul.bf16.vlgmr.msra.gmra.mxu3 %v19522_v41  ;;  %v12283_v2 = vor.u32 %v15597_v11, %v12282_v9  ;;  %v12266_v28 = vld [vmem:[%s21425_s1 + $0x8] sm:$0xf]  ;;  %v15781_v0 = vld [vmem:[%s21425_s1 + $0x5f4] sm:$0xf0] }
 0x37f   :  { %4900 = vmatpush.bf16.msra.mxu2 %v13031_v21  ;;  %4834 = vmatpush.bf16.msrb.mxu0 %v12407_v34  ;;  %v12964_v21 = vld [vmem:[%s21425_s1 + $0x590] sm:$0xf0]  ;;  %v12554_v34 = vld [vmem:[%s21425_s1 + $0x248] sm:$0xf]  ;;  %v12267_v7 = vor.u32 %v15593_v29, %v12266_v28  ;;  %v15785_v10 = vld [vmem:[%s21425_s1 + $0x614] sm:$0xf0] }
 0x380   :  { %4875 = vmatmul.bf16.vlgmr.msrb.gmra.mxu1 %v19617_v38  ;;  %v12967_v37 = vor.u32 %v15766_v20, %v12964_v21  ;;  %v15737_v47 = vld [vmem:[%s21425_s1 + $0x494] sm:$0xf0]  ;;  %v12508_v20 = vld [vmem:[%s21425_s1 + $0x1f8] sm:$0xf0]  ;;  %v15750_v21 = vld [vmem:[%s21425_s1 + $0x504] sm:$0xf] }
 0x381   :  { %4908 = vmatpush.bf16.msrb.mxu3 %v12347_v30  ;;  %4919 = vmatpush.bf16.msra.mxu1 %v12507_v32  ;;  %v15633_v30 = vld [vmem:[%s21425_s1 + $0x154] sm:$0xf0]  ;;  %v12571_v32 = vor.u32 %v15669_v46, %v12570_v19  ;;  %v15651_v46 = vld [vmem:[%s21425_s1 + $0x1ec] sm:$0xf]  ;;  %v12762_v28 = vld [vmem:[%s21425_s1 + $0x3e8] sm:$0xf] }
 0x382   :  { %v12427_v43 = vor.u32 %v15633_v30, %v12426_v40  ;;  %v15777_v19 = vld [vmem:[%s21425_s1 + $0x5d4] sm:$0xf0]  ;;  %v12511_v30 = vor.u32 %v15651_v46, %v12508_v20  ;;  %v12794_v59 = vld [vmem:[%s21425_s1 + $0x428] sm:$0xf] }
 0x383   :  { %4932 = vmatpush.bf16.msrb.mxu2 %v12635_v1  ;;  %4835 = vmatpush.bf16.msrb.mxu0 %v12391_v52  ;;  %v15762_v1 = vld [vmem:[%s21425_s1 + $0x564] sm:$0xf]  ;;  %v12874_v52 = vld [vmem:[%s21425_s1 + $0x4c8] sm:$0xf]  ;;  %v15717_v29 = vld [vmem:[%s21425_s1 + $0x3f4] sm:$0xf0] }
 0x384   :  { %v12875_v58 = vor.u32 %v15745_v53, %v12874_v52  ;;  %v15773_v36 = vld [vmem:[%s21425_s1 + $0x5b4] sm:$0xf0]  ;;  %v12698_v46 = vld [vmem:[%s21425_s1 + $0x368] sm:$0xf] }
 0x385   :  { %4909 = vmatpush.bf16.msrb.mxu3 %v12331_v49  ;;  %4920 = vmatpush.bf16.msra.mxu1 %v12491_v50  ;;  %v12555_v49 = vor.u32 %v15665_v13, %v12554_v34  ;;  %v12951_v50 = vor.u32 %v15762_v1, %v12948_v35  ;;  %v12763_v13 = vor.u32 %v15717_v29, %v12762_v28  ;;  %v15647_v1 = vld [vmem:[%s21425_s1 + $0x1cc] sm:$0xf]  ;;  %v12492_v35 = vld [vmem:[%s21425_s1 + $0x1d8] sm:$0xf0]  ;;  %v15769_v52 = vld [vmem:[%s21425_s1 + $0x594] sm:$0xf0] }
 0x386   :  { %4836 = vmatmul.bf16.vlgmr.msrb.gmra.mxu0 %v19481_v8  ;;  %v15709_v57 = vld [vmem:[%s21425_s1 + $0x3b4] sm:$0xf0] }
 0x387   :  { %4933 = vmatpush.bf16.msrb.mxu2 %v12619_v15  ;;  %4880 = vmatpush.bf16.msra.mxu0 %v13015_v24  ;;  %v12932_v15 = vld [vmem:[%s21425_s1 + $0x550] sm:$0xf0]  ;;  %v12411_v24 = vor.u32 %v15629_v55, %v12410_v48  ;;  %v12987_v48 = vor.u32 %v15773_v36, %v12986_v16  ;;  %v12810_v55 = vld [vmem:[%s21425_s1 + $0x448] sm:$0xf]  ;;  %v15701_v20 = vld [vmem:[%s21425_s1 + $0x374] sm:$0xf0] }
 0x388   :  { %v12935_v61 = vor.u32 %v15758_v3, %v12932_v15  ;;  %v12476_v3 = vld [vmem:[%s21425_s1 + $0x1b8] sm:$0xf0]  ;;  %v15757_v29 = vld [vmem:[%s21425_s1 + $0x534] sm:$0xf0]  ;;  %v12682_v16 = vld [vmem:[%s21425_s1 + $0x348] sm:$0xf] }
 0x389   :  { %4910 = vmatpush.bf16.msrb.mxu3 %v12315_v18  ;;  %4921 = vmatpush.bf16.msra.mxu1 %v12475_v42  ;;  %v12858_v18 = vld [vmem:[%s21425_s1 + $0x4a8] sm:$0xf]  ;;  %v12539_v42 = vor.u32 %v15661_v56, %v12538_v51  ;;  %v15643_v56 = vld [vmem:[%s21425_s1 + $0x1ac] sm:$0xf]  ;;  %v15697_v36 = vld [vmem:[%s21425_s1 + $0x354] sm:$0xf0] }
 0x38a   :  { %v12970_v51 = vld [vmem:[%s21425_s1 + $0x588] sm:$0xf] }
 0x38b   :  { %4934 = vmatpush.bf16.msrb.mxu2 %v12603_v23  ;;  %4881 = vmatpush.bf16.msra.mxu0 %v12999_v39  ;;  %v15657_v23 = vld [vmem:[%s21425_s1 + $0x214] sm:$0xf0]  ;;  %v15754_v39 = vld [vmem:[%s21425_s1 + $0x524] sm:$0xf] }
 0x38c   :  { %v12523_v9 = vor.u32 %v15657_v23, %v12522_v54  ;;  %v12919_v11 = vor.u32 %v15754_v39, %v12916_v4  ;;  %v15725_v54 = vld [vmem:[%s21425_s1 + $0x434] sm:$0xf0]  ;;  %v12714_v39 = vld [vmem:[%s21425_s1 + $0x388] sm:$0xf] }
 0x38d   :  { %4911 = vmatpush.bf16.msrb.mxu3 %v12299_v27  ;;  %4922 = vmatpush.bf16.msra.mxu1 %v12459_v22  ;;  %v12859_v27 = vor.u32 %v15741_v62, %v12858_v18  ;;  %v13019_v22 = vor.u32 %v15781_v0, %v13018_v63  ;;  %v12479_v18 = vor.u32 %v15643_v56, %v12476_v3  ;;  %v15639_v63 = vld [vmem:[%s21425_s1 + $0x18c] sm:$0xf]  ;;  %v12460_v0 = vld [vmem:[%s21425_s1 + $0x198] sm:$0xf0]  ;;  %v15705_v4 = vld [vmem:[%s21425_s1 + $0x394] sm:$0xf0] }
 0x38e   :  { %13041 = vmatmul.msk.bf16.vlgmr.msra.gmra.mxu2 %vm2287_vm0, %v19676_v44  ;;  %v12795_v23 = vor.u32 %v15725_v54, %v12794_v59  ;;  %v15693_v56 = vld [vmem:[%s21425_s1 + $0x334] sm:$0xf0]  ;;  %v12396_v59 = vld [vmem:[%s21425_s1 + $0x118] sm:$0xf0]  ;;  %v15671_v54 = vld [vmem:[%s21425_s1 + $0x28c] sm:$0xf] }
 0x38f   :  { %4935 = vmatpush.bf16.msrb.mxu2 %v12587_v17  ;;  %4882 = vmatpush.bf16.msra.mxu0 %v12983_v12  ;;  %v13002_v17 = vld [vmem:[%s21425_s1 + $0x5c8] sm:$0xf]  ;;  %v13035_v12 = vor.u32 %v15785_v10, %v13034_v6  ;;  %v15721_v10 = vld [vmem:[%s21425_s1 + $0x414] sm:$0xf0] }
 0x390   :  { %v13003_v40 = vor.u32 %v15777_v19, %v13002_v17  ;;  %v12778_v6 = vld [vmem:[%s21425_s1 + $0x408] sm:$0xf]  ;;  %v15635_v17 = vld [vmem:[%s21425_s1 + $0x16c] sm:$0xf] }
 0x391   :  { %4912 = vmatpush.bf16.msrb.mxu3 %v12283_v2  ;;  %4923 = vmatpush.bf16.msra.mxu1 %v12443_v25  ;;  %v12900_v2 = vld [vmem:[%s21425_s1 + $0x510] sm:$0xf0]  ;;  %v12843_v25 = vor.u32 %v15737_v47, %v12842_v14  ;;  %v12636_v14 = vld [vmem:[%s21425_s1 + $0x2f8] sm:$0xf0]  ;;  %v12715_v47 = vor.u32 %v15705_v4, %v12714_v39  ;;  %v12779_v19 = vor.u32 %v15721_v10, %v12778_v6  ;;  %v15689_v39 = vld [vmem:[%s21425_s1 + $0x314] sm:$0xf0] }
 0x392   :  { %v12903_v34 = vor.u32 %v15750_v21, %v12900_v2  ;;  %v12380_v6 = vld [vmem:[%s21425_s1 + $0xf8] sm:$0xf0] }
 0x393   :  { %4936 = vmatpush.bf16.msrb.mxu2 %v12571_v32  ;;  %4883 = vmatpush.bf16.msra.mxu0 %v12967_v37  ;;  %v12826_v32 = vld [vmem:[%s21425_s1 + $0x468] sm:$0xf]  ;;  %v15733_v37 = vld [vmem:[%s21425_s1 + $0x474] sm:$0xf0] }
 0x395   :  { %4913 = vmatpush.bf16.msrb.mxu3 %v12267_v7  ;;  %4924 = vmatpush.bf16.msra.mxu1 %v12427_v43  ;;  %v12827_v7 = vor.u32 %v15733_v37, %v12826_v32  ;;  %v12746_v43 = vld [vmem:[%s21425_s1 + $0x3c8] sm:$0xf]  ;;  %v12699_v32 = vor.u32 %v15701_v20, %v12698_v46  ;;  %v15631_v37 = vld [vmem:[%s21425_s1 + $0x14c] sm:$0xf]  ;;  %v13004_v46 = vld [vmem:[%s21425_s1 + $0x5d8] sm:$0xf0] }
 0x397   :  { %4937 = vmatpush.bf16.msrb.mxu2 %v12555_v49  ;;  %4884 = vmatpush.bf16.msra.mxu0 %v12951_v50  ;;  %v15729_v49 = vld [vmem:[%s21425_s1 + $0x454] sm:$0xf0]  ;;  %v12495_v50 = vor.u32 %v15647_v1, %v12492_v35  ;;  %v12906_v35 = vld [vmem:[%s21425_s1 + $0x508] sm:$0xf] }
 0x398   :  { %4914 = vmatmul.bf16.vlgmr.msrb.gmra.mxu3 %v19509_v26  ;;  %v12811_v15 = vor.u32 %v15729_v49, %v12810_v55  ;;  %v12604_v55 = vld [vmem:[%s21425_s1 + $0x2b8] sm:$0xf0]  ;;  %v12683_v49 = vor.u32 %v15697_v36, %v12682_v16 }
 0x399   :  { %4958 = vmatpush.bf16.msra.mxu3 %v12891_v45  ;;  %4925 = vmatpush.bf16.msra.mxu1 %v12411_v24  ;;  %v15713_v45 = vld [vmem:[%s21425_s1 + $0x3d4] sm:$0xf0]  ;;  %v12730_v24 = vld [vmem:[%s21425_s1 + $0x3a8] sm:$0xf]  ;;  %v12988_v16 = vld [vmem:[%s21425_s1 + $0x5b8] sm:$0xf0] }
 0x39a   :  { %v12747_v53 = vor.u32 %v15713_v45, %v12746_v43  ;;  %v12731_v62 = vor.u32 %v15709_v57, %v12730_v24  ;;  %v15627_v45 = vld [vmem:[%s21425_s1 + $0x12c] sm:$0xf] }
 0x39b   :  { %4938 = vmatpush.bf16.msrb.mxu2 %v12539_v42  ;;  %4885 = vmatpush.bf16.msra.mxu0 %v12935_v61  ;;  %v12954_v42 = vld [vmem:[%s21425_s1 + $0x568] sm:$0xf]  ;;  %v15765_v61 = vld [vmem:[%s21425_s1 + $0x574] sm:$0xf0]  ;;  %v15623_v24 = vld [vmem:[%s21425_s1 + $0x10c] sm:$0xf] }
 0x39c   :  { %v12399_v10 = vor.u32 %v15623_v24, %v12396_v59  ;;  %v15695_v24 = vld [vmem:[%s21425_s1 + $0x34c] sm:$0xf] }
 0x39d   :  { %4959 = vmatpush.bf16.msra.mxu3 %v12875_v58  ;;  %4926 = vmatpush.bf16.msra.mxu1 %v12395_v5  ;;  %v12971_v58 = vor.u32 %v15769_v52, %v12970_v51  ;;  %v12955_v5 = vor.u32 %v15765_v61, %v12954_v42  ;;  %v15715_v51 = vld [vmem:[%s21425_s1 + $0x3ec] sm:$0xf]  ;;  %v12764_v52 = vld [vmem:[%s21425_s1 + $0x3f8] sm:$0xf0] }
 0x39e   :  { %v15711_v61 = vld [vmem:[%s21425_s1 + $0x3cc] sm:$0xf] }
 0x39f   :  { %4939 = vmatpush.bf16.msrb.mxu2 %v12523_v9  ;;  %4886 = vmatpush.bf16.msra.mxu0 %v12919_v11  ;;  %v15761_v9 = vld [vmem:[%s21425_s1 + $0x554] sm:$0xf0]  ;;  %v15683_v11 = vld [vmem:[%s21425_s1 + $0x2ec] sm:$0xf] }
 0x3a0   :  { %4927 = vmatmul.bf16.vlgmr.msra.gmra.mxu1 %v19481_v8  ;;  %v12639_v2 = vor.u32 %v15683_v11, %v12636_v14  ;;  %v15783_v59 = vld [vmem:[%s21425_s1 + $0x60c] sm:$0xf] }
 0x3a1   :  { %4960 = vmatpush.bf16.msra.mxu3 %v12859_v27  ;;  %4971 = vmatpush.bf16.msrb.mxu1 %v13019_v22  ;;  %v12938_v27 = vld [vmem:[%s21425_s1 + $0x548] sm:$0xf]  ;;  %v12463_v22 = vor.u32 %v15639_v63, %v12460_v0  ;;  %v15779_v63 = vld [vmem:[%s21425_s1 + $0x5ec] sm:$0xf]  ;;  %v13020_v0 = vld [vmem:[%s21425_s1 + $0x5f8] sm:$0xf0] }
 0x3a2   :  { %4940 = vmatmul.bf16.vlgmr.msrb.gmra.mxu2 %v19559_v60  ;;  %v12939_v21 = vor.u32 %v15761_v9, %v12938_v27  ;;  %v12572_v9 = vld [vmem:[%s21425_s1 + $0x278] sm:$0xf0]  ;;  %v13023_v11 = vor.u32 %v15779_v63, %v13020_v0  ;;  %v15603_v63 = vld [vmem:[%s21425_s1 + $0x6c] sm:$0xf] }
 0x3a3   :  { %4991 = vmatpush.bf16.msra.mxu2 %v13035_v12  ;;  %4887 = vmatpush.bf16.msra.mxu0 %v12903_v34  ;;  %v12444_v12 = vld [vmem:[%s21425_s1 + $0x178] sm:$0xf0] }
 0x3a4   :  { %v12447_v28 = vor.u32 %v15635_v17, %v12444_v12  ;;  %v12428_v34 = vld [vmem:[%s21425_s1 + $0x158] sm:$0xf0] }
 0x3a5   :  { %4961 = vmatpush.bf16.msra.mxu3 %v12843_v25  ;;  %4972 = vmatpush.bf16.msrb.mxu1 %v13003_v40  ;;  %v12922_v25 = vld [vmem:[%s21425_s1 + $0x528] sm:$0xf]  ;;  %v15679_v40 = vld [vmem:[%s21425_s1 + $0x2cc] sm:$0xf]  ;;  %v12431_v43 = vor.u32 %v15631_v37, %v12428_v34  ;;  %v12732_v17 = vld [vmem:[%s21425_s1 + $0x3b8] sm:$0xf0] }
 0x3a6   :  { %4888 = vmatmul.bf16.vlgmr.msra.gmra.mxu0 %v19612_v31  ;;  %v15771_v34 = vld [vmem:[%s21425_s1 + $0x5ac] sm:$0xf]  ;;  %v12316_v0 = vld [vmem:[%s21425_s1 + $0x78] sm:$0xf0] }
 0x3a7   :  { %5010 = vmatpush.bf16.msrb.mxu2 %v12511_v30  ;;  %4945 = vmatpush.bf16.msrb.mxu0 %v12763_v13  ;;  %v12620_v30 = vld [vmem:[%s21425_s1 + $0x2d8] sm:$0xf0]  ;;  %v12923_v13 = vor.u32 %v15757_v29, %v12922_v25 }
 0x3a8   :  { %v12623_v1 = vor.u32 %v15679_v40, %v12620_v30  ;;  %v12556_v29 = vld [vmem:[%s21425_s1 + $0x258] sm:$0xf0]  ;;  %v15703_v30 = vld [vmem:[%s21425_s1 + $0x38c] sm:$0xf] }
 0x3a9   :  { %4962 = vmatpush.bf16.msra.mxu3 %v12827_v7  ;;  %4973 = vmatpush.bf16.msrb.mxu1 %v12987_v48  ;;  %v15753_v7 = vld [vmem:[%s21425_s1 + $0x514] sm:$0xf0]  ;;  %v15675_v48 = vld [vmem:[%s21425_s1 + $0x2ac] sm:$0xf] }
 0x3aa   :  { %v12907_v3 = vor.u32 %v15753_v7, %v12906_v35  ;;  %v15659_v7 = vld [vmem:[%s21425_s1 + $0x22c] sm:$0xf] }
 0x3ab   :  { %5011 = vmatpush.bf16.msrb.mxu2 %v12495_v50  ;;  %4946 = vmatpush.bf16.msrb.mxu0 %v12747_v53  ;;  %v12412_v50 = vld [vmem:[%s21425_s1 + $0x138] sm:$0xf0]  ;;  %v12666_v53 = vld [vmem:[%s21425_s1 + $0x328] sm:$0xf] }
 0x3ac   :  { %v12415_v57 = vor.u32 %v15627_v45, %v12412_v50  ;;  %v12667_v42 = vor.u32 %v15693_v56, %v12666_v53  ;;  %v15699_v45 = vld [vmem:[%s21425_s1 + $0x36c] sm:$0xf]  ;;  %v12972_v50 = vld [vmem:[%s21425_s1 + $0x598] sm:$0xf0] }
 0x3ad   :  { %4963 = vmatpush.bf16.msra.mxu3 %v12811_v15  ;;  %4974 = vmatpush.bf16.msrb.mxu1 %v12971_v58  ;;  %v12607_v15 = vor.u32 %v15675_v48, %v12604_v55  ;;  %v12767_v58 = vor.u32 %v15715_v51, %v12764_v52  ;;  %v12700_v48 = vld [vmem:[%s21425_s1 + $0x378] sm:$0xf0]  ;;  %v15607_v52 = vld [vmem:[%s21425_s1 + $0x8c] sm:$0xf] }
 0x3ae   :  { %v12332_v53 = vld [vmem:[%s21425_s1 + $0x98] sm:$0xf0]  ;;  %v12703_v56 = vor.u32 %v15699_v45, %v12700_v48  ;;  %v5165_v45 = vld [vmem:[%s21398_s13 + $0x60] sm:$0xff] }
 0x3af   :  { %5012 = vmatpush.bf16.msrb.mxu2 %v12479_v18  ;;  %4947 = vmatpush.bf16.msrb.mxu0 %v12731_v62  ;;  %v12588_v18 = vld [vmem:[%s21425_s1 + $0x298] sm:$0xf0] }
 0x3b0   :  { %v12748_v62 = vld [vmem:[%s21425_s1 + $0x3d8] sm:$0xf0]  ;;  %v12591_v4 = vor.u32 %v15671_v54, %v12588_v18  ;;  %v12335_v18 = vor.u32 %v15607_v52, %v12332_v53  ;;  %v5163_v52 = vld [vmem:[%s21398_s13 + $0x50] sm:$0xff] }
 0x3b1   :  { %4964 = vmatpush.bf16.msra.mxu3 %v12795_v23  ;;  %4975 = vmatpush.bf16.msrb.mxu1 %v12955_v5  ;;  %v12650_v23 = vld [vmem:[%s21425_s1 + $0x308] sm:$0xf]  ;;  %v15619_v5 = vld [vmem:[%s21425_s1 + $0xec] sm:$0xf]  ;;  %v12751_v27 = vor.u32 %v15711_v61, %v12748_v62  ;;  %v13036_v54 = vld [vmem:[%s21425_s1 + $0x618] sm:$0xf0] }
 0x3b2   :  { %13042 = vmatmul.msk.bf16.vlgmr.msra.gmra.mxu2 %vm2287_vm0, %v19676_v44  ;;  %v12651_v14 = vor.u32 %v15689_v39, %v12650_v23  ;;  %v12383_v12 = vor.u32 %v15619_v5, %v12380_v6  ;;  %v12956_v61 = vld [vmem:[%s21425_s1 + $0x578] sm:$0xf0]  ;;  %v13039_v39 = vor.u32 %v15783_v59, %v13036_v54  ;;  %v15691_v5 = vld [vmem:[%s21425_s1 + $0x32c] sm:$0xf] }
 0x3b3   :  { %5013 = vmatpush.bf16.msrb.mxu2 %v12463_v22  ;;  %4948 = vmatpush.bf16.msrb.mxu0 %v12715_v47  ;;  %v15667_v22 = vld [vmem:[%s21425_s1 + $0x26c] sm:$0xf]  ;;  %v12668_v6 = vld [vmem:[%s21425_s1 + $0x338] sm:$0xf0] }
 0x3b4   :  { %v15707_v47 = vld [vmem:[%s21425_s1 + $0x3ac] sm:$0xf]  ;;  %v12575_v20 = vor.u32 %v15667_v22, %v12572_v9  ;;  %v12940_v22 = vld [vmem:[%s21425_s1 + $0x558] sm:$0xf0] }
 0x3b5   :  { %4965 = vmatpush.bf16.msra.mxu3 %v12779_v19  ;;  %4976 = vmatpush.bf16.msrb.mxu1 %v12939_v21  ;;  %v15775_v19 = vld [vmem:[%s21425_s1 + $0x5cc] sm:$0xf]  ;;  %v12735_v25 = vor.u32 %v15707_v47, %v12732_v17 }
 0x3b6   :  { %v15615_v21 = vld [vmem:[%s21425_s1 + $0xcc] sm:$0xf]  ;;  %v13007_v40 = vor.u32 %v15775_v19, %v13004_v46 }
 0x3b7   :  { %5014 = vmatpush.bf16.msrb.mxu2 %v12447_v28  ;;  %4949 = vmatpush.bf16.msrb.mxu0 %v12699_v32  ;;  %v15663_v28 = vld [vmem:[%s21425_s1 + $0x24c] sm:$0xf]  ;;  %v12716_v32 = vld [vmem:[%s21425_s1 + $0x398] sm:$0xf0] }
 0x3b8   :  { %4966 = vmatmul.bf16.vlgmr.msra.gmra.mxu3 %v19617_v38  ;;  %v12559_v36 = vor.u32 %v15663_v28, %v12556_v29  ;;  %v12719_v35 = vor.u32 %v15703_v30, %v12716_v32  ;;  %v15599_v9 = vld [vmem:[%s21425_s1 + $0x4c] sm:$0xf]  ;;  %v5168_v30 = vld [vmem:[%s21398_s13 + $0x78] sm:$0xff] }
 0x3b9   :  { %5023 = vmatpush.bf16.msrb.mxu3 %v12639_v2  ;;  %4977 = vmatpush.bf16.msrb.mxu1 %v12923_v13  ;;  %v12364_v2 = vld [vmem:[%s21425_s1 + $0xd8] sm:$0xf0]  ;;  %v15611_v13 = vld [vmem:[%s21425_s1 + $0xac] sm:$0xf] }
 0x3ba   :  { %v12367_v37 = vor.u32 %v15615_v21, %v12364_v2  ;;  %v15687_v17 = vld [vmem:[%s21425_s1 + $0x30c] sm:$0xf]  ;;  %v12284_v2 = vld [vmem:[%s21425_s1 + $0x38] sm:$0xf0] }
 0x3bb   :  { %5015 = vmatpush.bf16.msrb.mxu2 %v12431_v43  ;;  %4950 = vmatpush.bf16.msrb.mxu0 %v12683_v49  ;;  %v12991_v43 = vor.u32 %v15771_v34, %v12988_v16  ;;  %v15767_v49 = vld [vmem:[%s21425_s1 + $0x58c] sm:$0xf]  ;;  %v12892_v16 = vld [vmem:[%s21425_s1 + $0x4f8] sm:$0xf0] }
 0x3bc   :  { %v15755_v46 = vld [vmem:[%s21425_s1 + $0x52c] sm:$0xf] }
 0x3bd   :  { %5024 = vmatpush.bf16.msrb.mxu3 %v12623_v1  ;;  %4978 = vmatpush.bf16.msrb.mxu1 %v12907_v3  ;;  %v12348_v1 = vld [vmem:[%s21425_s1 + $0xb8] sm:$0xf0]  ;;  %v15655_v3 = vld [vmem:[%s21425_s1 + $0x20c] sm:$0xf] }
 0x3be   :  { %v12351_v55 = vor.u32 %v15611_v13, %v12348_v1  ;;  %v15595_v21 = vld [vmem:[%s21425_s1 + $0x2c] sm:$0xf]  ;;  %v5167_v13 = vld [vmem:[%s21398_s13 + $0x70] sm:$0xff] }
 0x3bf   :  { %5016 = vmatpush.bf16.msrb.mxu2 %v12415_v57  ;;  %4951 = vmatpush.bf16.msrb.mxu0 %v12667_v42  ;;  %v12975_v57 = vor.u32 %v15767_v49, %v12972_v50  ;;  %v15763_v42 = vld [vmem:[%s21425_s1 + $0x56c] sm:$0xf]  ;;  %v12287_v28 = vor.u32 %v15595_v21, %v12284_v2  ;;  %v12780_v21 = vld [vmem:[%s21425_s1 + $0x418] sm:$0xf0] }
 0x3c0   :  { %4979 = vmatmul.bf16.vlgmr.msrb.gmra.mxu1 %v19612_v31  ;;  %v15751_v29 = vld [vmem:[%s21425_s1 + $0x50c] sm:$0xf] }
 0x3c1   :  { %5025 = vmatpush.bf16.msrb.mxu3 %v12607_v15  ;;  %5036 = vmatpush.bf16.msra.mxu1 %v12767_v58  ;;  %v12524_v15 = vld [vmem:[%s21425_s1 + $0x218] sm:$0xf0]  ;;  %v15591_v32 = vld [vmem:[%s21425_s1 + $0xc] sm:$0xf] }
 0x3c2   :  { %v12684_v58 = vld [vmem:[%s21425_s1 + $0x358] sm:$0xf0]  ;;  %v12527_v62 = vor.u32 %v15655_v3, %v12524_v15  ;;  %v15747_v34 = vld [vmem:[%s21425_s1 + $0x4ec] sm:$0xf] }
 0x3c3   :  { %5017 = vmatpush.bf16.msrb.mxu2 %v12399_v10  ;;  %4952 = vmatpush.bf16.msrb.mxu0 %v12651_v14  ;;  %v12687_v23 = vor.u32 %v15695_v24, %v12684_v58  ;;  %v12319_v10 = vor.u32 %v15603_v63, %v12316_v0  ;;  %v12671_v14 = vor.u32 %v15691_v5, %v12668_v6  ;;  %v15739_v50 = vld [vmem:[%s21425_s1 + $0x4ac] sm:$0xf]  ;;  %v5160_v58 = vld [vmem:[%s21398_s13 + $0x38] sm:$0xff] }
 0x3c4   :  { %v15735_v3 = vld [vmem:[%s21425_s1 + $0x48c] sm:$0xf] }
 0x3c5   :  { %5026 = vmatpush.bf16.msrb.mxu3 %v12591_v4  ;;  %5037 = vmatpush.bf16.msra.mxu1 %v12751_v27  ;;  %v12959_v4 = vor.u32 %v15763_v42, %v12956_v61  ;;  %v15759_v27 = vld [vmem:[%s21425_s1 + $0x54c] sm:$0xf]  ;;  %v5159_v42 = vld [vmem:[%s21398_s13 + $0x30] sm:$0xff] }
 0x3c6   :  { %5018 = vmatmul.bf16.vlgmr.msrb.gmra.mxu2 %v19481_v8  ;;  %4953 = vmatmul.bf16.vlgmr.msrb.gmra.mxu0 %v19522_v41  ;;  %v12540_v8 = vld [vmem:[%s21425_s1 + $0x238] sm:$0xf0]  ;;  %v12943_v47 = vor.u32 %v15759_v27, %v12940_v22  ;;  %v15731_v54 = vld [vmem:[%s21425_s1 + $0x46c] sm:$0xf] }
 0x3c7   :  { %5062 = vmatpush.bf16.msra.mxu2 %v13023_v11  ;;  %4997 = vmatpush.bf16.msra.mxu0 %v12383_v12  ;;  %v12543_v51 = vor.u32 %v15659_v7, %v12540_v8  ;;  %v12300_v11 = vld [vmem:[%s21425_s1 + $0x58] sm:$0xf0]  ;;  %v5166_v7 = vld [vmem:[%s21398_s13 + $0x68] sm:$0xff] }
 0x3c8   :  { %v12652_v12 = vld [vmem:[%s21425_s1 + $0x318] sm:$0xf0]  ;;  %v12303_v19 = vor.u32 %v15599_v9, %v12300_v11  ;;  %v15743_v8 = vld [vmem:[%s21425_s1 + $0x4cc] sm:$0xf] }
 0x3c9   :  { %5027 = vmatpush.bf16.msrb.mxu3 %v12575_v20  ;;  %5038 = vmatpush.bf16.msra.mxu1 %v12735_v25  ;;  %v12924_v20 = vld [vmem:[%s21425_s1 + $0x538] sm:$0xf0]  ;;  %v12655_v25 = vor.u32 %v15687_v17, %v12652_v12  ;;  %v5158_v0 = vld [vmem:[%s21398_s13 + $0x28] sm:$0xff] }
 0x3ca   :  { %v5156_v27 = vld [vmem:[%s21398_s13 + $0x18] sm:$0xff]  ;;  %v15723_v9 = vld [vmem:[%s21425_s1 + $0x42c] sm:$0xf] }
 0x3cb   :  { %5063 = vmatpush.bf16.msra.mxu2 %v13007_v40  ;;  %4998 = vmatpush.bf16.msra.mxu0 %v12367_v37  ;;  %v12908_v40 = vld [vmem:[%s21425_s1 + $0x518] sm:$0xf0]  ;;  %v5154_v12 = vld [vmem:[%s21398_s13 + $0x8] sm:$0xff] }
 0x3cc   :  { %v12268_v37 = vld [vmem:[%s21425_s1 + $0x18] sm:$0xf0] }
 0x3cd   :  { %5028 = vmatpush.bf16.msrb.mxu3 %v12559_v36  ;;  %5039 = vmatpush.bf16.msra.mxu1 %v12719_v35  ;;  %v12911_v36 = vor.u32 %v15751_v29, %v12908_v40  ;;  %v12271_v1 = vor.u32 %v15591_v32, %v12268_v37  ;;  %v12895_v35 = vor.u32 %v15747_v34, %v12892_v16  ;;  %v12796_v11 = vld [vmem:[%s21425_s1 + $0x438] sm:$0xf0]  ;;  %v5183_v16 = vld [vmem:[%s21398_s13 + $0xf0] sm:$0xff] }
 0x3ce   :  { %v12799_v17 = vor.u32 %v15723_v9, %v12796_v11 }
 0x3cf   :  { %5064 = vmatpush.bf16.msra.mxu2 %v12991_v43  ;;  %4999 = vmatpush.bf16.msra.mxu0 %v12351_v55  ;;  %v12876_v43 = vld [vmem:[%s21425_s1 + $0x4d8] sm:$0xf0] }
 0x3d0   :  { %v12879_v48 = vor.u32 %v15743_v8, %v12876_v43  ;;  %v5164_v55 = vld [vmem:[%s21398_s13 + $0x58] sm:$0xff] }
 0x3d1   :  { %5029 = vmatpush.bf16.msrb.mxu3 %v12543_v51  ;;  %5040 = vmatpush.bf16.msra.mxu1 %v12703_v56  ;;  %v12860_v51 = vld [vmem:[%s21425_s1 + $0x4b8] sm:$0xf0]  ;;  %v5162_v56 = vld [vmem:[%s21398_s13 + $0x48] sm:$0xff] }
 0x3d2   :  { %v12863_v53 = vor.u32 %v15739_v50, %v12860_v51 }
 0x3d3   :  { %5065 = vmatpush.bf16.msra.mxu2 %v12975_v57  ;;  %5000 = vmatpush.bf16.msra.mxu0 %v12335_v18  ;;  %v12828_v18 = vld [vmem:[%s21425_s1 + $0x478] sm:$0xf0] }
 0x3d4   :  { %v12831_v63 = vor.u32 %v15731_v54, %v12828_v18  ;;  %v5176_v18 = vld [vmem:[%s21398_s13 + $0xb8] sm:$0xff] }
 0x3d5   :  { %5030 = vmatpush.bf16.msrb.mxu3 %v12527_v62  ;;  %5041 = vmatpush.bf16.msra.mxu1 %v12687_v23  ;;  %v15727_v23 = vld [vmem:[%s21425_s1 + $0x44c] sm:$0xf] }
 0x3d7   :  { %5066 = vmatpush.bf16.msra.mxu2 %v12959_v4  ;;  %5001 = vmatpush.bf16.msra.mxu0 %v12319_v10  ;;  %v5157_v4 = vld [vmem:[%s21398_s13 + $0x20] sm:$0xff] }
 0x3d8   :  { %5031 = vmatmul.bf16.vlgmr.msrb.gmra.mxu3 %v19559_v60  ;;  %v12927_v60 = vor.u32 %v15755_v46, %v12924_v20  ;;  %v15719_v20 = vld [vmem:[%s21425_s1 + $0x40c] sm:$0xf] }
 0x3d9   :  { %5082 = vmatpush.bf16.msra.mxu3 %v13039_v39  ;;  %5042 = vmatpush.bf16.msra.mxu1 %v12671_v14  ;;  %v12812_v39 = vld [vmem:[%s21425_s1 + $0x458] sm:$0xf0]  ;;  %v5155_v14 = vld [vmem:[%s21398_s13 + $0x10] sm:$0xff]  ;;  %v12783_v40 = vor.u32 %v15719_v20, %v12780_v21 }
 0x3da   :  { %v12815_v10 = vor.u32 %v15727_v23, %v12812_v39  ;;  %v5173_v23 = vld [vmem:[%s21398_s13 + $0xa0] sm:$0xff]  ;;  %v5172_v39 = vld [vmem:[%s21398_s13 + $0x98] sm:$0xff] }
 0x3db   :  { %5067 = vmatpush.bf16.msra.mxu2 %v12943_v47  ;;  %5002 = vmatpush.bf16.msra.mxu0 %v12303_v19 }
 0x3dd   :  { %5043 = vmatpush.bf16.msra.mxu1 %v12655_v25  ;;  %v4772_v49 = vpop.f32.mrf.mxu1  ;;  %v5153_v25 = vld [vmem:[%s21398_s13] sm:$0xff] }
 0x3df   :  { %5068 = vmatpush.bf16.msra.mxu2 %v12927_v60  ;;  %5003 = vmatpush.bf16.msra.mxu0 %v12287_v28  ;;  %v5184_v60 = vld [vmem:[%s21398_s13 + $0xf8] sm:$0xff] }
 0x3e0   :  { %5044 = vmatmul.bf16.vlgmr.msra.gmra.mxu1 %v19522_v41  ;;  %v4746_v41 = vpop.f32.mrf.mxu3  ;;  %5226 = vmatpush.msrb.mxu3 %v5184_v60 }
 0x3e1   :  { %5206 = vmatpush.msrb.mxu1 %v5168_v30 }
 0x3e2   :  { %5227 = vmatpush.msrb.mxu3 %v5183_v16 }
 0x3e3   :  { %5207 = vmatpush.msrb.mxu1 %v5167_v13  ;;  %5069 = vmatpush.bf16.msra.mxu2 %v12911_v36  ;;  %v4759_v24 = vpop.f32.mrf.mxu0 }
 0x3e4   :  { %5004 = vmatpush.bf16.msra.mxu0 %v12271_v1 }
 0x3e5   :  { %5208 = vmatpush.msrb.mxu1 %v5166_v7  ;;  %v4774_v59 = vpop.f32.mrf.mxu1 }
 0x3e6   :  { %5070 = vmatmul.bf16.vlgmr.msra.gmra.mxu2 %v19612_v31  ;;  %v4733_v31 = vpop.f32.mrf.mxu2 }
 0x3e7   :  { %5209 = vmatpush.msrb.mxu1 %v5165_v45  ;;  %5005 = vmatmul.bf16.vlgmr.msra.gmra.mxu0 %v19509_v26  ;;  %v12844_v26 = vld [vmem:[%s21425_s1 + $0x498] sm:$0xf0]  ;;  %v4747_v61 = vadd.f32 %v4746_v41, %v4733_v31  ;;  %v5182_v45 = vld [vmem:[%s21398_s13 + $0xe8] sm:$0xff]  ;;  %v5181_v41 = vld [vmem:[%s21398_s13 + $0xe0] sm:$0xff] }
 0x3e8   :  { %5049 = vmatpush.bf16.msrb.mxu0 %v12895_v35  ;;  %13043 = vmatmul.msk.bf16.vlgmr.msra.gmra.mxu3 %vm2287_vm0, %v19676_v44  ;;  %v5161_v44 = vld [vmem:[%s21398_s13 + $0x40] sm:$0xff]  ;;  %v4748_v15 = vpop.f32.mrf.mxu3  ;;  %v12847_v57 = vor.u32 %v15735_v3, %v12844_v26 }
 0x3e9   :  { %5210 = vmatpush.msrb.mxu1 %v5164_v55  ;;  %v4760_v6 = vadd.f32 %v4759_v24, %v4747_v61  ;;  %5228 = vmatpush.msrb.mxu3 %v5182_v45 }
 0x3eb   :  { %5211 = vmatpush.msrb.mxu1 %v5163_v52  ;;  %v4761_v5 = vpop.f32.mrf.mxu0  ;;  %v4773_v47 = vadd.f32 %v4772_v49, %v4760_v6  ;;  %v5180_v49 = vld [vmem:[%s21398_s13 + $0xd8] sm:$0xff]  ;;  %5229 = vmatpush.msrb.mxu3 %v5181_v41  ;;  %v5170_v6 = vld [vmem:[%s21398_s13 + $0x88] sm:$0xff]  ;;  %v5191_v41 = vld [vmem:[%s21398_s13 + $0x130] sm:$0xff] }
 0x3ec   :  { %5050 = vmatpush.bf16.msrb.mxu0 %v12879_v48 }
 0x3ed   :  { %5212 = vmatpush.msrb.mxu1 %v5162_v56  ;;  %v20386_v22 = vpop.f32.mrf.mxu1  ;;  %5230 = vmatpush.msrb.mxu3 %v5180_v49  ;;  %v5190_v49 = vld [vmem:[%s21398_s13 + $0x128] sm:$0xff] }
 0x3ee   :  { %v4735_v62 = vpop.f32.mrf.mxu2 }
 0x3ef   :  { %5213 = vmatpush.msrb.mxu1 %v5161_v44  ;;  %v5178_v44 = vld [vmem:[%s21398_s13 + $0xc8] sm:$0xff] }
 0x3f0   :  { %5051 = vmatpush.bf16.msrb.mxu0 %v12863_v53  ;;  %v5179_v53 = vld [vmem:[%s21398_s13 + $0xd0] sm:$0xff] }
 0x3f1   :  { %5214 = vmatpush.msrb.mxu1 %v5160_v58  ;;  %v4798_v46 = vpop.f32.mrf.mxu3  ;;  %5231 = vmatpush.msrb.mxu3 %v5179_v53  ;;  %v5177_v58 = vld [vmem:[%s21398_s13 + $0xc0] sm:$0xff] }
 0x3f3   :  { %5215 = vmatpush.msrb.mxu1 %v5159_v42  ;;  %v4811_v28 = vpop.f32.mrf.mxu0  ;;  %5232 = vmatpush.msrb.mxu3 %v5178_v44  ;;  %v5175_v42 = vld [vmem:[%s21398_s13 + $0xb0] sm:$0xff]  ;;  %v5186_v44 = vld [vmem:[%s21398_s13 + $0x108] sm:$0xff] }
 0x3f4   :  { %5052 = vmatpush.bf16.msrb.mxu0 %v12847_v57 }
 0x3f5   :  { %5216 = vmatpush.msrb.mxu1 %v5158_v0  ;;  %v4826_v30 = vpop.f32.mrf.mxu1  ;;  %5233 = vmatpush.msrb.mxu3 %v5177_v58 }
 0x3f6   :  { %v4785_v19 = vpop.f32.mrf.mxu2 }
 0x3f7   :  { %5217 = vmatpush.msrb.mxu1 %v5157_v4  ;;  %v4786_v2 = vadd.f32 %v4785_v19, %v4773_v47  ;;  %5234 = vmatpush.msrb.mxu3 %v5176_v18  ;;  %v5171_v4 = vld [vmem:[%s21398_s13 + $0x90] sm:$0xff] }
 0x3f8   :  { %5053 = vmatpush.bf16.msrb.mxu0 %v12831_v63  ;;  %v5174_v63 = vld [vmem:[%s21398_s13 + $0xa8] sm:$0xff]  ;;  %v5199_v47 = vld [vmem:[%s21398_s13 + $0x170] sm:$0xff] }
 0x3f9   :  { %5218 = vmatpush.msrb.mxu1 %v5156_v27  ;;  %v4799_v29 = vadd.f32 %v4798_v46, %v4786_v2  ;;  %v4800_v1 = vpop.f32.mrf.mxu3  ;;  %5235 = vmatpush.msrb.mxu3 %v5175_v42  ;;  %v5197_v46 = vld [vmem:[%s21398_s13 + $0x160] sm:$0xff]  ;;  %v5196_v2 = vld [vmem:[%s21398_s13 + $0x158] sm:$0xff] }
 0x3fb   :  { %5219 = vmatpush.msrb.mxu1 %v5155_v14  ;;  %v20412_v32 = vadd.f32 %v4811_v28, %v4799_v29  ;;  %v4813_v43 = vpop.f32.mrf.mxu0  ;;  %5236 = vmatpush.msrb.mxu3 %v5174_v63  ;;  %v5200_v14 = vld [vmem:[%s21398_s13 + $0x178] sm:$0xff] }
 0x3fc   :  { %5054 = vmatpush.bf16.msrb.mxu0 %v12815_v10  ;;  %v5169_v10 = vld [vmem:[%s21398_s13 + $0x80] sm:$0xff] }
 0x3fd   :  { %5220 = vmatpush.msrb.mxu1 %v5154_v12  ;;  %v5088_v37 = vsel %vm2928_vm1, %v20412_v32, 0.0  ;;  %v5117_v34 = vmul.f32 %v20412_v32, %v20412_v32  ;;  %v4876_v50 = vpop.f32.mrf.mxu1  ;;  %5237 = vmatpush.msrb.mxu3 %v5173_v23 }
 0x3fe   :  { %v5089_v36 = vrot.slane %v5088_v37, 4  ;;  %v4787_v13 = vpop.f32.mrf.mxu2 }
 0x3ff   :  { %5221 = vmatpush.msrb.mxu1 %v5153_v25  ;;  %v5121_v35 = vsel %vm2928_vm1, %v5117_v34, 0.0  ;;  %5238 = vmatpush.msrb.mxu3 %v5172_v39 }
 0x400   :  { %5055 = vmatpush.bf16.msrb.mxu0 %v12799_v17  ;;  %v5090_v7 = vadd.f32 %v5089_v36, %v5088_v37  ;;  %v5122_v8 = vrot.slane %v5121_v35, 4  ;;  %v5194_v37 = vld [vmem:[%s21398_s13 + $0x148] sm:$0xff]  ;;  %v5193_v36 = vld [vmem:[%s21398_s13 + $0x140] sm:$0xff] }
 0x401   :  { %v4863_v3 = vpop.f32.mrf.mxu3  ;;  %5239 = vmatpush.msrb.mxu3 %v5171_v4 }
 0x402   :  { %v5091_v48 = vrot.slane %v5090_v7, 2  ;;  %v5123_v55 = vadd.f32 %v5122_v8, %v5121_v35  ;;  %v5192_v35 = vld [vmem:[%s21398_s13 + $0x138] sm:$0xff] }
 0x403   :  { %v4837_v15 = vpop.f32.mrf.mxu0  ;;  %5240 = vmatpush.msrb.mxu3 %v5170_v6 }
 0x404   :  { %5056 = vmatpush.bf16.msrb.mxu0 %v12783_v40  ;;  %v5092_v51 = vadd.f32 %v5091_v48, %v5090_v7  ;;  %v4838_v27 = vadd.f32 %v4837_v15, %v20386_v22  ;;  %v5198_v22 = vld [vmem:[%s21398_s13 + $0x168] sm:$0xff]  ;;  %v5195_v40 = vld [vmem:[%s21398_s13 + $0x150] sm:$0xff] }
 0x405   :  { %v4878_v59 = vpop.f32.mrf.mxu1  ;;  %5241 = vmatpush.msrb.mxu3 %v5169_v10 }
 0x406   :  { %v5093_v52 = vrot.slane %v5092_v51, 1  ;;  %v4850_v56 = vpop.f32.mrf.mxu2  ;;  %v5185_v59 = vld [vmem:[%s21398_s13 + $0x100] sm:$0xff] }
 0x407   :  { %5057 = vmatmul.bf16.vlgmr.msrb.gmra.mxu0 %v19617_v38  ;;  %v5124_v38 = vrot.slane %v5123_v55, 2  ;;  %v4851_v9 = vadd.f32 %v4850_v56, %v4838_v27  ;;  %v5187_v56 = vld [vmem:[%s21398_s13 + $0x110] sm:$0xff] }
 0x408   :  { %v5094_v24 = vadd.f32 %v5093_v52, %v5092_v51  ;;  %5246 = vmatpush.msra.mxu0 %v5200_v14  ;;  %v5188_v52 = vld [vmem:[%s21398_s13 + $0x118] sm:$0xff] }
 0x409   :  { %v5125_v31 = vadd.f32 %v5124_v38, %v5123_v55  ;;  %v4865_v62 = vpop.f32.mrf.mxu3  ;;  %v4864_v19 = vadd.f32 %v4863_v3, %v4851_v9 }
 0x40a   :  { %5247 = vmatpush.msra.mxu0 %v5199_v47 }
 0x40b   :  { %v5126_v26 = vrot.slane %v5125_v31, 1  ;;  %v4839_v0 = vpop.f32.mrf.mxu0  ;;  %v4877_v20 = vadd.f32 %v4876_v50, %v4864_v19  ;;  %v5189_v50 = vld [vmem:[%s21398_s13 + $0x120] sm:$0xff] }
 0x40c   :  { %5248 = vmatpush.msra.mxu0 %v5198_v22 }
 0x40d   :  { %v5127_v57 = vadd.f32 %v5126_v26, %v5125_v31 }
 0x40e   :  { %v4852_v61 = vpop.f32.mrf.mxu2  ;;  %5249 = vmatpush.msra.mxu0 %v5197_v46 }
 0x40f   :  { %v5149_v54 = vsel %vm3035_vm2, %v5094_v24, %v5127_v57 }
 0x410   :  { %5222 = vmatmul.f32.vlgmr.msrb.gmra.mxu1 %v5149_v54  ;;  %5250 = vmatpush.msra.mxu0 %v5196_v2 }
 0x412   :  { %5251 = vmatpush.msra.mxu0 %v5195_v40 }
 0x414   :  { %5252 = vmatpush.msra.mxu0 %v5194_v37 }
 0x416   :  { %v4902_v5 = vpop.f32.mrf.mxu2  ;;  %5253 = vmatpush.msra.mxu0 %v5193_v36 }
 0x418   :  { %5254 = vmatpush.msra.mxu0 %v5192_v35 }
 0x41a   :  { %5255 = vmatpush.msra.mxu0 %v5191_v41 }
 0x41b   :  { %v20467_v11 = vpop.f32.mrf.mxu3 }
 0x41c   :  { %5256 = vmatpush.msra.mxu0 %v5190_v49 }
 0x41d   :  { %v4928_v12 = vpop.f32.mrf.mxu1 }
 0x41e   :  { %v4904_v17 = vpop.f32.mrf.mxu2  ;;  %5257 = vmatpush.msra.mxu0 %v5189_v50  ;;  %v4929_v42 = vadd.f32 %v4928_v12, %v20467_v11 }
 0x420   :  { %5258 = vmatpush.msra.mxu0 %v5188_v52 }
 0x422   :  { %5259 = vmatpush.msra.mxu0 %v5187_v56 }
 0x423   :  { %v4917_v21 = vpop.f32.mrf.mxu3  ;;  %v4889_v25 = vpop.f32.mrf.mxu0 }
 0x424   :  { %v4890_v60 = vadd.f32 %v4889_v25, %v4877_v20  ;;  %5260 = vmatpush.msra.mxu0 %v5186_v44 }
 0x425   :  { %v4930_v28 = vpop.f32.mrf.mxu1 }
 0x426   :  { %v4941_v29 = vpop.f32.mrf.mxu2  ;;  %v20487_v30 = vadd.f32 %v4902_v5, %v4890_v60  ;;  %5261 = vmatpush.msra.mxu0 %v5185_v59 }
 0x427   :  { %v4942_v61 = vadd.f32 %v4941_v29, %v4929_v42 }
 0x428   :  { %v5095_v34 = vsel %vm2928_vm1, %v20487_v30, 0.0  ;;  %v5118_v16 = vmul.f32 %v20487_v30, %v20487_v30 }
 0x429   :  { %v5096_v13 = vrot.slane %v5095_v34, 4 }
 0x42a   :  { %v5128_v1 = vsel %vm2928_vm1, %v5118_v16, 0.0 }
 0x42b   :  { %v5097_v7 = vadd.f32 %v5096_v13, %v5095_v34  ;;  %v5129_v8 = vrot.slane %v5128_v1, 4  ;;  %v4891_v43 = vpop.f32.mrf.mxu0 }
 0x42d   :  { %v5098_v48 = vrot.slane %v5097_v7, 2  ;;  %v5130_v55 = vadd.f32 %v5129_v8, %v5128_v1 }
 0x42e   :  { %v4943_v45 = vpop.f32.mrf.mxu2 }
 0x42f   :  { %v5099_v51 = vadd.f32 %v5098_v48, %v5097_v7  ;;  %v5131_v38 = vrot.slane %v5130_v55, 2  ;;  %v5201_v7 = vld [vmem:[%s21398_s13 + $0x180] sm:$0xff] }
 0x430   :  { %5281 = vmatpush.msra.mxu1 %v5201_v7 }
 0x431   :  { %v5100_v31 = vrot.slane %v5099_v51, 1  ;;  %v5132_v53 = vadd.f32 %v5131_v38, %v5130_v55 }
 0x433   :  { %v5133_v3 = vrot.slane %v5132_v53, 1  ;;  %v5101_v15 = vadd.f32 %v5100_v31, %v5099_v51 }
 0x435   :  { %v5134_v24 = vadd.f32 %v5133_v3, %v5132_v53 }
 0x436   :  { %v4993_v26 = vpop.f32.mrf.mxu2 }
 0x437   :  { %v5150_v58 = vsel %vm3035_vm2, %v5101_v15, %v5134_v24 }
 0x438   :  { %5242 = vmatmul.f32.vlgmr.msrb.gmra.mxu3 %v5150_v58 }
 0x43b   :  { %v4967_v57 = vpop.f32.mrf.mxu3 }
 0x43d   :  { %v4980_v54 = vpop.f32.mrf.mxu1 }
 0x43e   :  { %v4995_v18 = vpop.f32.mrf.mxu2 }
 0x443   :  { %v4969_v62 = vpop.f32.mrf.mxu3  ;;  %v4954_v63 = vpop.f32.mrf.mxu0 }
 0x444   :  { %v4955_v0 = vadd.f32 %v4954_v63, %v4942_v61  ;;  %v16432_v62 = vmov 98.0  }
 0x445   :  { %v4982_v23 = vpop.f32.mrf.mxu1  ;;  %16338 = vrcp.f32 %v16432_v62 }
 0x446   :  { %v4968_v39 = vadd.f32 %v4967_v57, %v4955_v0 }
 0x448   :  { %v4981_v4 = vadd.f32 %v4980_v54, %v4968_v39 }
 0x449   :  { %v5019_v5 = vpop.f32.mrf.mxu2 }
 0x44a   :  { %v20526_v6 = vadd.f32 %v4993_v26, %v4981_v4 }
 0x44b   :  { %v4956_v10 = vpop.f32.mrf.mxu0  ;;  %v16339_v63 = vpop.eup %16338 }
 0x44c   :  { %v5102_v27 = vsel %vm2928_vm1, %v20526_v6, 0.0  ;;  %v5119_v9 = vmul.f32 %v20526_v6, %v20526_v6  ;;  %v5287_v0 = vmul.f32 98.0, %v16339_v63  ;;  %vm5291_vm12 = vweird.f32 %v16339_v63 }
 0x44d   :  { %v5103_v14 = vrot.slane %v5102_v27, 4 }
 0x44e   :  { %v5135_v11 = vsel %vm2928_vm1, %v5119_v9, 0.0  ;;  %v5288_v23 = vsub.f32 1.0, %v5287_v0  ;;  %v15786_v0 = vld [vmem:[%s21426_s5] sm:$0xff] }
 0x44f   :  { %v5104_v47 = vadd.f32 %v5103_v14, %v5102_v27  ;;  %v5136_v17 = vrot.slane %v5135_v11, 4 }
 0x450   :  { %v5289_v4 = vmul.f32 %v16339_v63, %v5288_v23  ;;  %v15804_v23 = vld [vmem:[%s21426_s5 + $0x90] sm:$0xff] }
 0x451   :  { %v5021_v12 = vpop.f32.mrf.mxu2  ;;  %v5105_v22 = vrot.slane %v5104_v47, 2  ;;  %v5137_v19 = vadd.f32 %v5136_v17, %v5135_v11 }
 0x452   :  { %v5290_v27 = vadd.f32 %v16339_v63, %v5289_v4  ;;  %v15803_v4 = vld [vmem:[%s21426_s5 + $0x88] sm:$0xff] }
 0x453   :  { %v5106_v46 = vadd.f32 %v5105_v22, %v5104_v47  ;;  %v5138_v20 = vrot.slane %v5137_v19, 2 }
 0x454   :  { %v5292_v47 = vsel %vm5291_vm12, %v16339_v63, %v5290_v27 }
 0x455   :  { %v5107_v21 = vrot.slane %v5106_v46, 1  ;;  %v5139_v2 = vadd.f32 %v5138_v20, %v5137_v19 }
 0x457   :  { %v5140_v60 = vrot.slane %v5139_v2, 1  ;;  %v5108_v28 = vadd.f32 %v5107_v21, %v5106_v46  ;;  %v5324_v21 = vld [vmem:[%s21399_s14] sm:$0xff] }
 0x458   :  { %5346 = vmatpush.msrb.mxu2 %v5324_v21 }
 0x459   :  { %v5141_v29 = vadd.f32 %v5140_v60, %v5139_v2  ;;  %v5325_v2 = vld [vmem:[%s21399_s14 + $0x8] sm:$0xff]  ;;  %v5326_v60 = vld [vmem:[%s21399_s14 + $0x10] sm:$0xff] }
 0x45a   :  { %5366 = vmatpush.msrb.mxu1 %v5325_v2  ;;  %5386 = vmatpush.msra.mxu2 %v5326_v60 }
 0x45b   :  { %v5032_v25 = vpop.f32.mrf.mxu3  ;;  %v5151_v37 = vsel %vm3035_vm2, %v5108_v28, %v5141_v29 }
 0x45c   :  { %5262 = vmatmul.f32.vlgmr.msra.gmra.mxu0 %v5151_v37 }
 0x45d   :  { %v5045_v40 = vpop.f32.mrf.mxu1 }
 0x463   :  { %v5034_v34 = vpop.f32.mrf.mxu3 }
 0x464   :  { %v5006_v16 = vpop.f32.mrf.mxu0  ;;  %v15801_v34 = vld [vmem:[%s21426_s5 + $0x78] sm:$0xff] }
 0x465   :  { %v5047_v36 = vpop.f32.mrf.mxu1  ;;  %v5020_v45 = vadd.f32 %v5019_v5, %v5006_v16  ;;  %v15793_v16 = vld [vmem:[%s21426_s5 + $0x38] sm:$0xff] }
 0x466   :  { %5641 = vmatpush.bf16.msrb.mxu0 %v15793_v16 }
 0x467   :  { %v5033_v41 = vadd.f32 %v5032_v25, %v5020_v45  ;;  %v5327_v25 = vld [vmem:[%s21399_s14 + $0x18] sm:$0xff]  ;;  %v15798_v45 = vld [vmem:[%s21426_s5 + $0x60] sm:$0xff] }
 0x468   :  { %5406 = vmatpush.msra.mxu3 %v5327_v25 }
 0x469   :  { %v5071_v13 = vpop.f32.mrf.mxu2  ;;  %v5046_v48 = vadd.f32 %v5045_v40, %v5033_v41  ;;  %v15790_v41 = vld [vmem:[%s21426_s5 + $0x20] sm:$0xff] }
 0x46b   :  { %v5084_v1 = vpop.f32.mrf.mxu3 }
 0x46c   :  { %v5008_v35 = vpop.f32.mrf.mxu0 }
 0x471   :  { %v5073_v8 = vpop.f32.mrf.mxu2 }
 0x472   :  { %v15799_v8 = vld [vmem:[%s21426_s5 + $0x68] sm:$0xff] }
 0x473   :  { %v5086_v43 = vpop.f32.mrf.mxu3 }
 0x474   :  { %v15791_v43 = vld [vmem:[%s21426_s5 + $0x28] sm:$0xff] }
 0x484   :  { %v5058_v55 = vpop.f32.mrf.mxu0 }
 0x485   :  { %v5059_v49 = vadd.f32 %v5058_v55, %v5046_v48  ;;  %v5299_v48 = vld [vmem:[%s21402_s17] sm:$0x1] }
 0x487   :  { %v5072_v50 = vadd.f32 %v5071_v13, %v5059_v49  ;;  %v15800_v13 = vld [vmem:[%s21426_s5 + $0x70] sm:$0xff]  ;;  %v15797_v49 = vld [vmem:[%s21426_s5 + $0x58] sm:$0xff] }
 0x489   :  { %v20537_v51 = vadd.f32 %v5084_v1, %v5072_v50  ;;  %v15792_v1 = vld [vmem:[%s21426_s5 + $0x30] sm:$0xff] }
 0x48a   :  { %5642 = vmatpush.bf16.msrb.mxu0 %v15792_v1 }
 0x48b   :  { %v5110_v38 = vsel %vm5109_vm10, %v20537_v51, 0.0  ;;  %v5120_v52 = vmul.f32 %v20537_v51, %v20537_v51 }
 0x48c   :  { %v5111_v31 = vrot.slane %v5110_v38, 4  ;;  %v5060_v53 = vpop.f32.mrf.mxu0 }
 0x48d   :  { %v5142_v56 = vsel %vm5109_vm10, %v5120_v52, 0.0  ;;  %v5223_v39 = vpop.f32.mrf.mxu1 }
 0x48e   :  { %v5112_v3 = vadd.f32 %v5111_v31, %v5110_v38  ;;  %v5143_v26 = vrot.slane %v5142_v56, 4  ;;  %5643 = vmatpush.bf16.msrb.mxu0 %v15791_v43  ;;  %v5317_v38 = vld [vmem:[%s21403_s18] sm:$0x1] }
 0x490   :  { %v5113_v44 = vrot.slane %v5112_v3, 2  ;;  %v5144_v15 = vadd.f32 %v5143_v26, %v5142_v56  ;;  %v15809_v56 = vld [vmem:[%s21426_s5 + $0xb8] sm:$0xff]  ;;  %v15808_v26 = vld [vmem:[%s21426_s5 + $0xb0] sm:$0xff] }
 0x492   :  { %v5114_v24 = vadd.f32 %v5113_v44, %v5112_v3  ;;  %v5145_v57 = vrot.slane %v5144_v15, 2  ;;  %5644 = vmatpush.bf16.msrb.mxu0 %v15790_v41  ;;  %v15796_v44 = vld [vmem:[%s21426_s5 + $0x50] sm:$0xff] }
 0x494   :  { %v5115_v58 = vrot.slane %v5114_v24, 1  ;;  %v5146_v59 = vadd.f32 %v5145_v57, %v5144_v15  ;;  %v15789_v15 = vld [vmem:[%s21426_s5 + $0x18] sm:$0xff]  ;;  %v15795_v57 = vld [vmem:[%s21426_s5 + $0x48] sm:$0xff] }
 0x496   :  { %v5147_v54 = vrot.slane %v5146_v59, 1  ;;  %v5116_v18 = vadd.f32 %v5115_v58, %v5114_v24  ;;  %v15807_v24 = vld [vmem:[%s21426_s5 + $0xa8] sm:$0xff]  ;;  %5645 = vmatpush.bf16.msrb.mxu0 %v15789_v15  ;;  %v15788_v58 = vld [vmem:[%s21426_s5 + $0x10] sm:$0xff] }
 0x498   :  { %v5148_v42 = vadd.f32 %v5147_v54, %v5146_v59  ;;  %v15806_v59 = vld [vmem:[%s21426_s5 + $0xa0] sm:$0xff] }
 0x499   :  { %v15794_v54 = vld [vmem:[%s21426_s5 + $0x40] sm:$0xff] }
 0x49a   :  { %v5152_v61 = vsel %vm3035_vm2, %v5116_v18, %v5148_v42  ;;  %5646 = vmatpush.bf16.msrb.mxu0 %v15788_v58  ;;  %v15787_v18 = vld [vmem:[%s21426_s5 + $0x8] sm:$0xff]  ;;  %v15805_v42 = vld [vmem:[%s21426_s5 + $0x98] sm:$0xff]  ;;  %v15812_v58 = vld [vmem:[%s21393_s8 + $0xc] sm:$0xf0] }
 0x49b   :  { %13044 = vmatmul.msk.f32.vlgmr.msra.gmra.mxu1 %vm5202_vm11, %v5152_v61  ;;  %v5483_v61 = vld [vmem:[%s21426_s5 + $0xc0] sm:$0xf] }
 0x49c   :  { %5654 = vmatpush.bf16.msra.mxu1 %v15801_v34  ;;  %v5585_v62 = vunpack.c.l.b16 %v5483_v61  ;;  %v13159_v61 = vld [vmem:[%s21393_s8 + $0x18] sm:$0xf0] }
 0x49e   :  { %5647 = vmatpush.bf16.msrb.mxu0 %v15787_v18  ;;  %v5610_v63 = vpack.c.b16 %v5585_v62, %v5585_v62  ;;  %v15813_v18 = vld [vmem:[%s21393_s8 + $0x14] sm:$0xf0] }
 0x4a0   :  { %5655 = vmatpush.bf16.msra.mxu1 %v15800_v13 }
 0x4a2   :  { %5648 = vmatpush.bf16.msrb.mxu0 %v15786_v0  ;;  %v15810_v0 = vld [vmem:[%s21393_s8 + $0x4] sm:$0xf] }
 0x4a4   :  { %5656 = vmatpush.bf16.msra.mxu1 %v15799_v8 }
 0x4a8   :  { %5657 = vmatpush.bf16.msra.mxu1 %v15798_v45  ;;  %v16333_v45 = vld [vmem:[%s21392_s7] ss:$0 sm:$0xff]  ;;  %s16434_s7 = smov 112  }
 0x4ac   :  { %5658 = vmatpush.bf16.msra.mxu1 %v15797_v49 }
 0x4b0   :  { %5659 = vmatpush.bf16.msra.mxu1 %v15796_v44 }
 0x4b4   :  { %5660 = vmatpush.bf16.msra.mxu1 %v15795_v57  ;;  %v13149_v57 = vld [vmem:[%s21393_s8] sm:$0xf] }
 0x4b8   :  { %5661 = vmatpush.bf16.msra.mxu1 %v15794_v54  ;;  %v13150_v54 = vor.u32 %v15812_v58, %v13149_v57  ;;  %v15908_v57 = vld [vmem:[#allocation2 + $0x2f0] sm:$0xf0] }
 0x4bb   :  { %v5243_v5 = vpop.f32.mrf.mxu3 }
 0x4bc   :  { %v5244_v9 = vadd.f32 %v5243_v5, %v5223_v39  ;;  %v5639_v39 = vsel %vm3348_vm8, %v5610_v63, 0  ;;  %v15802_v5 = vld [vmem:[%s21426_s5 + $0x80] sm:$0xff] }
 0x4bd   :  { %5687 = vmatpush.bf16.msrb.mxu3 %v5639_v39 }
 0x4d9   :  { %v5263_v10 = vpop.f32.mrf.mxu0 }
 0x4da   :  { %v5264_v14 = vadd.f32 %v5263_v10, %v5244_v9  ;;  %v5698_v10 = vld [vmem:[%s21427_s3] sm:$0x3] }
 0x4db   :  { %5700 = vrot.lane.b32.xlu0 %v5698_v10, %s16433_s4  ;;  %v13337_v10 = vld [vmem:[#allocation2 + $0x150] sm:$0xf] }
 0x518   :  { %v5283_v11 = vpop.f32.mrf.mxu1 }
 0x519   :  { %v5284_v17 = vadd.f32 %v5283_v11, %v5264_v14 }
 0x51b   :  { %v5293_v12 = vmul.f32 %v5292_v47, %v5284_v17 }
 0x51d   :  { %v5294_v22 = vmul.f32 %v5293_v12, %v5293_v12 }
 0x51f   :  { %v5296_v19 = vrot.slane %v5294_v22, 7 }
 0x521   :  { %v5298_v46 = vsub.f32 %v5293_v12, %v5296_v19 }
 0x523   :  { %v5300_v20 = vadd.f32 1e-05, %v5298_v46 }
 0x525   :  { %16340 = vrsqrt.f32 %v5300_v20  ;;  %vm5307_vm14 = vweird.f32 %v5300_v20 }
 0x52b   :  { %v16341_v28 = vpop.eup %16340 }
 0x52c   :  { %v5302_v29 = vmul.f32 %v16341_v28, %v5300_v20  ;;  %vm5308_vm13 = vweird.f32 %v16341_v28 }
 0x52d   :  { %vm5309_vm15 = vmor %vm5307_vm14, %vm5308_vm13 }
 0x52e   :  { %v5303_v40 = vmul.f32 %v16341_v28, %v5302_v29 }
 0x530   :  { %v5304_v37 = vmul.f32 0.5, %v5303_v40 }
 0x532   :  { %v5305_v36 = vsub.f32 1.5, %v5304_v37 }
 0x534   :  { %v5306_v35 = vmul.f32 %v16341_v28, %v5305_v36 }
 0x536   :  { %v5310_v7 = vsel %vm5309_vm15, %v16341_v28, %v5306_v35 }
 0x537   :  { %5312 = vst [vmem:[#allocation1] sm:$0xff] %v5310_v7 }
 0x53e   :  { %v5314_v55 = vld [vmem:[#allocation1 + $0x1] ss:$9 sm:$0xff] }
 0x53f   :  { %v5316_v50 = vmul.f32 %v5314_v55, %v5299_v48 }
 0x541   :  { %v5318_v52 = vmul.f32 %v5316_v50, %v5293_v12 }
 0x543   :  { %v5319_v31 = vsub.f32 %v5317_v38, %v5318_v52 }
 0x545   :  { %v5321_v53 = vperm.slane %v5319_v31, 0 }
 0x547   :  { %v5323_v3 = vsel %vm3035_vm2, %v5316_v50, %v5321_v53 }
 0x548   :  { %13045 = vmatmul.msk.f32.vlgmr.msrb.gmra.mxu2 %vm5202_vm11, %v5323_v3  ;;  %13046 = vmatmul.msk.f32.vlgmr.msrb.gmra.mxu1 %vm5202_vm11, %v5323_v3 }
 0x549   :  { %13048 = vmatmul.msk.f32.vlgmr.msra.gmra.mxu3 %vm5202_vm11, %v5323_v3  ;;  %5667 = vmatpush.bf16.msrb.mxu2 %v15809_v56 }
 0x54a   :  { %5757 = vmatpush.bf16.msra.mxu3 %v13150_v54  ;;  %v15849_v54 = vld [vmem:[#allocation2 + $0x11c] sm:$0xf] }
 0x54d   :  { %5668 = vmatpush.bf16.msrb.mxu2 %v15808_v26  ;;  %v5701_v44 = vpop.permute.xlu0 %5700 }
 0x550   :  { %13047 = vmatmul.msk.f32.vlgmr.msra.gmra.mxu2 %vm5202_vm11, %v5323_v3 }
 0x551   :  { %5669 = vmatpush.bf16.msrb.mxu2 %v15807_v24 }
 0x555   :  { %5670 = vmatpush.bf16.msrb.mxu2 %v15806_v59  ;;  %v13157_v59 = vld [vmem:[%s21393_s8 + $0x8] sm:$0xf] }
 0x556   :  { %v13158_v62 = vor.u32 %v15813_v18, %v13157_v59  ;;  %v13197_v59 = vld [vmem:[#allocation2 + $0x38] sm:$0xf] }
 0x557   :  { %v13311_v18 = vld [vmem:[#allocation2 + $0x134] sm:$0xf0] }
 0x558   :  { %5783 = vmatpush.bf16.msra.mxu0 %v13158_v62  ;;  %v13673_v62 = vld [vmem:[#allocation2 + $0x3f0] sm:$0xf] }
 0x559   :  { %5671 = vmatpush.bf16.msrb.mxu2 %v15805_v42  ;;  %v15811_v42 = vld [vmem:[%s21393_s8 + $0xc] sm:$0xf] }
 0x55a   :  { %v13162_v63 = vor.u32 %v15811_v42, %v13159_v61  ;;  %v15824_v61 = vld [vmem:[#allocation2 + $0x50] sm:$0xf0] }
 0x55c   :  { %5796 = vmatpush.bf16.msrb.mxu1 %v13162_v63  ;;  %v15943_v63 = vld [vmem:[#allocation2 + $0x408] sm:$0xf0] }
 0x55d   :  { %5672 = vmatpush.bf16.msrb.mxu2 %v15804_v23  ;;  %v13151_v23 = vld [vmem:[%s21393_s8 + $0x10] sm:$0xf0] }
 0x55e   :  { %v13154_v39 = vor.u32 %v15810_v0, %v13151_v23  ;;  %v13314_v23 = vor.u32 %v15849_v54, %v13311_v18 }
 0x561   :  { %5673 = vmatpush.bf16.msrb.mxu2 %v15803_v4  ;;  %v13365_v4 = vld [vmem:[#allocation2 + $0x188] sm:$0xf] }
 0x565   :  { %5674 = vmatpush.bf16.msrb.mxu2 %v15802_v5  ;;  %v15866_v5 = vld [vmem:[#allocation2 + $0x1a0] sm:$0xf0] }
 0x5c5   :  { %v5368_v27 = vpop.f32.mrf.mxu1 }
 0x5c6   :  { %v5412_v9 = vperm.slane %v5368_v27, 0  ;;  %v5420_v11 = vperm.slane %v5368_v27, 1  ;;  %v13366_v27 = vor.u32 %v15866_v5, %v13365_v4  ;;  %v15901_v4 = vld [vmem:[#allocation2 + $0x2b8] sm:$0xf0]  ;;  %v13198_v5 = vor.u32 %v15824_v61, %v13197_v59  ;;  %v15880_v61 = vld [vmem:[#allocation2 + $0x210] sm:$0xf0] }
 0x5c8   :  { %v5416_v14 = vmul.f32 %v5412_v9, %v20487_v30  ;;  %v15859_v9 = vld [vmem:[#allocation2 + $0x168] sm:$0xf0]  ;;  %6912 = vmatpush.bf16.msra.mxu2 %v13366_v27  ;;  %v15842_v27 = vld [vmem:[#allocation2 + $0xe4] sm:$0xf] }
 0x5ca   :  { %v5424_v47 = vadd.f32 %v5420_v11, %v5416_v14  ;;  %v13338_v14 = vor.u32 %v15859_v9, %v13337_v10  ;;  %v13309_v11 = vld [vmem:[#allocation2 + $0x118] sm:$0xf]  ;;  %v13169_v10 = vld [vmem:[#allocation2] sm:$0xf] }
 0x5cb   :  { %v5348_v17 = vpop.f32.mrf.mxu2  ;;  %v13283_v9 = vld [vmem:[#allocation2 + $0xfc] sm:$0xf0] }
 0x5cc   :  { %v5428_v12 = vmax.f32 %v5424_v47, 0.0  ;;  %v5411_v22 = vperm.slane %v5348_v17, 0  ;;  %v5408_v19 = vpop.f32.mrf.mxu3  ;;  %v5419_v2 = vperm.slane %v5348_v17, 1  ;;  %v15852_v47 = vld [vmem:[#allocation2 + $0x130] sm:$0xf0]  ;;  %6913 = vmatpush.bf16.msra.mxu2 %v13338_v14  ;;  %v13674_v14 = vor.u32 %v15943_v63, %v13673_v62 }
 0x5cd   :  { %v5414_v46 = vperm.slane %v5408_v19, 0  ;;  %v5422_v60 = vperm.slane %v5408_v19, 1  ;;  %v13813_v17 = vld [vmem:[#allocation2 + $0x508] sm:$0xf]  ;;  %v15877_v62 = vld [vmem:[#allocation2 + $0x1fc] sm:$0xf] }
 0x5ce   :  { %v5432_v20 = vpack.c.bf16 %v5428_v12, %v5428_v12  ;;  %v5415_v21 = vmul.f32 %v5411_v22, %v20412_v32  ;;  %v15978_v12 = vld [vmem:[#allocation2 + $0x520] sm:$0xf0] }
 0x5cf   :  { %v5418_v25 = vmul.f32 %v5414_v46, %v20537_v51  ;;  %v20686_v22 = vld [vmem:[#allocation2 + $0x540] sm:$0xff]  ;;  %v13814_v19 = vor.u32 %v15978_v12, %v13813_v17  ;;  %v15936_v17 = vld [vmem:[#allocation2 + $0x3d0] sm:$0xf0]  ;;  %v15919_v12 = vld [vmem:[#allocation2 + $0x34c] sm:$0xf] }
 0x5d0   :  { %v5423_v28 = vadd.f32 %v5419_v2, %v5415_v21  ;;  %5662 = vmatmul.bf16.vlgmr.msra.gmra.mxu1 %v5432_v20  ;;  %v6538_v46 = vunpack.c.l.b16 %v20686_v22  ;;  %v13785_v20 = vld [vmem:[#allocation2 + $0x4d0] sm:$0xf]  ;;  %v15971_v21 = vld [vmem:[#allocation2 + $0x4e8] sm:$0xf0]  ;;  %v13310_v2 = vor.u32 %v15852_v47, %v13309_v11  ;;  %v15817_v11 = vld [vmem:[#allocation2 + $0x18] sm:$0xf0] }
 0x5d1   :  { %v5426_v29 = vadd.f32 %v5422_v60, %v5418_v25  ;;  %v13281_v25 = vld [vmem:[#allocation2 + $0xe0] sm:$0xf]  ;;  %v13645_v47 = vld [vmem:[#allocation2 + $0x3b8] sm:$0xf] }
 0x5d2   :  { %v5427_v40 = vmax.f32 %v5423_v28, 0.0  ;;  %v6713_v60 = vpack.c.b16 %v6538_v46, %v6538_v46  ;;  %v13786_v28 = vor.u32 %v15971_v21, %v13785_v20  ;;  %6914 = vmatpush.bf16.msra.mxu2 %v13310_v2  ;;  %v13286_v20 = vor.u32 %v15842_v27, %v13283_v9  ;;  %v15835_v2 = vld [vmem:[#allocation2 + $0xac] sm:$0xf] }
 0x5d3   :  { %v5430_v37 = vmax.f32 %v5426_v29, 0.0  ;;  %v5388_v30 = vpop.f32.mrf.mxu2  ;;  %v15845_v29 = vld [vmem:[#allocation2 + $0xf8] sm:$0xf0]  ;;  %v13170_v21 = vor.u32 %v15817_v11, %v13169_v10  ;;  %v13395_v10 = vld [vmem:[#allocation2 + $0x1dc] sm:$0xf0] }
 0x5d4   :  { %v5431_v34 = vpack.c.bf16 %v5427_v40, %v5427_v40  ;;  %v5413_v16 = vperm.slane %v5388_v30, 0  ;;  %v5421_v1 = vperm.slane %v5388_v30, 1  ;;  %v13757_v40 = vld [vmem:[#allocation2 + $0x498] sm:$0xf]  ;;  %v6892_v30 = vsel %vm3348_vm8, %v6713_v60, 0 }
 0x5d5   :  { %v5434_v36 = vpack.c.bf16 %v5430_v37, %v5430_v37  ;;  %v15964_v37 = vld [vmem:[#allocation2 + $0x4b0] sm:$0xf0]  ;;  %6958 = vmatpush.bf16.msra.mxu1 %v6892_v30  ;;  %v13646_v60 = vor.u32 %v15936_v17, %v13645_v47  ;;  %v15975_v27 = vld [vmem:[#allocation2 + $0x50c] sm:$0xf]  ;;  %v13787_v17 = vld [vmem:[#allocation2 + $0x4ec] sm:$0xf0] }
 0x5d6   :  { %v5417_v13 = vmul.f32 %v5413_v16, %v20526_v6  ;;  %5649 = vmatmul.bf16.vlgmr.msrb.gmra.mxu0 %v5431_v34  ;;  %v13589_v34 = vld [vmem:[#allocation2 + $0x348] sm:$0xf]  ;;  %v15922_v16 = vld [vmem:[#allocation2 + $0x360] sm:$0xf0]  ;;  %v15828_v30 = vld [vmem:[#allocation2 + $0x74] sm:$0xf] }
 0x5d7   :  { %13145 = vmatmul.msk.bf16.vlgmr.msrb.gmra.mxu3 %vm5202_vm11, %v5434_v36  ;;  %6938 = vmatpush.bf16.msrb.mxu0 %v13814_v19  ;;  %v13591_v19 = vld [vmem:[#allocation2 + $0x364] sm:$0xf0]  ;;  %v15968_v47 = vld [vmem:[#allocation2 + $0x4d4] sm:$0xf] }
 0x5d8   :  { %v5425_v32 = vadd.f32 %v5421_v1, %v5417_v13  ;;  %5770 = vmatpush.bf16.msrb.mxu3 %v13154_v39  ;;  %v13282_v13 = vor.u32 %v15845_v29, %v13281_v25  ;;  %v13253_v1 = vld [vmem:[#allocation2 + $0xa8] sm:$0xf]  ;;  %v13505_v39 = vld [vmem:[#allocation2 + $0x2a0] sm:$0xf]  ;;  %v15912_v29 = vld [vmem:[#allocation2 + $0x314] sm:$0xf] }
 0x5d9   :  { %v13506_v46 = vor.u32 %v15901_v4, %v13505_v39  ;;  %v13255_v25 = vld [vmem:[#allocation2 + $0xc4] sm:$0xf0]  ;;  %v15873_v39 = vld [vmem:[#allocation2 + $0x1d8] sm:$0xf0] }
 0x5da   :  { %v5429_v35 = vmax.f32 %v5425_v32, 0.0  ;;  %v15863_v32 = vld [vmem:[#allocation2 + $0x18c] sm:$0xf]  ;;  %6915 = vmatpush.bf16.msra.mxu2 %v13282_v13  ;;  %v13535_v13 = vld [vmem:[#allocation2 + $0x2f4] sm:$0xf0] }
 0x5db   :  { %6939 = vmatpush.bf16.msrb.mxu0 %v13786_v28  ;;  %v13594_v28 = vor.u32 %v15919_v12, %v13591_v19  ;;  %v13790_v12 = vor.u32 %v15968_v47, %v13787_v17  ;;  %v15961_v19 = vld [vmem:[#allocation2 + $0x49c] sm:$0xf]  ;;  %v15846_v47 = vld [vmem:[#allocation2 + $0x100] sm:$0xf0] }
 0x5dc   :  { %v5433_v7 = vpack.c.bf16 %v5429_v35, %v5429_v35  ;;  %v13367_v35 = vld [vmem:[#allocation2 + $0x1a4] sm:$0xf0] }
 0x5de   :  { %5675 = vmatmul.bf16.vlgmr.msrb.gmra.mxu2 %v5433_v7  ;;  %v13758_v7 = vor.u32 %v15964_v37, %v13757_v40  ;;  %v13563_v40 = vld [vmem:[#allocation2 + $0x32c] sm:$0xf0]  ;;  %v13258_v37 = vor.u32 %v15835_v2, %v13255_v25  ;;  %v13731_v2 = vld [vmem:[#allocation2 + $0x47c] sm:$0xf0] }
 0x5e0   :  { %6940 = vmatpush.bf16.msrb.mxu0 %v13758_v7  ;;  %v13507_v7 = vld [vmem:[#allocation2 + $0x2bc] sm:$0xf0] }
 0x64d   :  { %v5663_v51 = vpop.f32.mrf.mxu1 }
 0x653   :  { %v5650_v8 = vpop.f32.mrf.mxu0 }
 0x654   :  { %v5651_v55 = vadd.f32 %v16333_v45, %v5650_v8  ;;  %v15838_v8 = vld [vmem:[#allocation2 + $0xc0] sm:$0xf0]  ;;  %v15957_v45 = vld [vmem:[#allocation2 + $0x478] sm:$0xf0] }
 0x655   :  { %v5665_v43 = vpop.f32.mrf.mxu1 }
 0x656   :  { %v5664_v49 = vadd.f32 %v5663_v51, %v5651_v55  ;;  %v13729_v43 = vld [vmem:[#allocation2 + $0x460] sm:$0xf]  ;;  %v13370_v55 = vor.u32 %v15863_v32, %v13367_v35  ;;  %v15898_v35 = vld [vmem:[#allocation2 + $0x2a4] sm:$0xf] }
 0x65a   :  { %v5689_v41 = vpop.f32.mrf.mxu3 }
 0x65b   :  { %v5652_v48 = vpop.f32.mrf.mxu0 }
 0x661   :  { %v5676_v6 = vpop.f32.mrf.mxu2 }
 0x662   :  { %v5677_v50 = vadd.f32 %v5676_v6, %v5664_v49  ;;  %v5691_v38 = vpop.f32.mrf.mxu3  ;;  %v13561_v49 = vld [vmem:[#allocation2 + $0x310] sm:$0xf]  ;;  %v15915_v6 = vld [vmem:[#allocation2 + $0x328] sm:$0xf0] }
 0x663   :  { %v13225_v38 = vld [vmem:[#allocation2 + $0x70] sm:$0xf] }
 0x664   :  { %v20654_v52 = vadd.f32 %v5689_v41, %v5677_v50  ;;  %v13590_v41 = vor.u32 %v15922_v16, %v13589_v34  ;;  %v13254_v50 = vor.u32 %v15838_v8, %v13253_v1  ;;  %v13227_v34 = vld [vmem:[#allocation2 + $0x8c] sm:$0xf0]  ;;  %v13566_v16 = vor.u32 %v15912_v29, %v13563_v40  ;;  %v13477_v8 = vld [vmem:[#allocation2 + $0x268] sm:$0xf] }
 0x665   :  { %v13230_v1 = vor.u32 %v15828_v30, %v13227_v34  ;;  %v13703_v29 = vld [vmem:[#allocation2 + $0x444] sm:$0xf0] }
 0x666   :  { %v13146_v31 = vclamps-f32 %v20654_v52, 4.0  ;;  %6916 = vmatpush.bf16.msra.mxu2 %v13254_v50 }
 0x668   :  { %v5709_v53 = vsel %vm2287_vm0, %v20654_v52, %v13146_v31  ;;  %v5695_v56 = vmul.f32 0.5, %v13146_v31  ;;  %v15856_v31 = vld [vmem:[#allocation2 + $0x154] sm:$0xf] }
 0x669   :  { %5711 = vst.msk [vmem:[%s21407_s22] sm:$0x3] %vm5710_vm4, %v5709_v53  ;;  %v5678_v3 = vpop.f32.mrf.mxu2  ;;  %v13339_v53 = vld [vmem:[#allocation2 + $0x16c] sm:$0xf0] }
 0x66a   :  { %v5696_v26 = vmul.f32 1.442695, %v5695_v56  ;;  %v13730_v56 = vor.u32 %v15957_v45, %v13729_v43  ;;  %v13701_v3 = vld [vmem:[#allocation2 + $0x428] sm:$0xf]  ;;  %v15894_v43 = vld [vmem:[#allocation2 + $0x280] sm:$0xf0] }
 0x66b   :  { %v15891_v45 = vld [vmem:[#allocation2 + $0x26c] sm:$0xf] }
 0x66c   :  { %16342 = vpow2.f32 %v5696_v26  ;;  %v15950_v26 = vld [vmem:[#allocation2 + $0x440] sm:$0xf0]  ;;  %6941 = vmatpush.bf16.msrb.mxu0 %v13730_v56  ;;  %v13449_v56 = vld [vmem:[#allocation2 + $0x230] sm:$0xf] }
 0x66d   :  { %v13702_v42 = vor.u32 %v15950_v26, %v13701_v3  ;;  %v15884_v3 = vld [vmem:[#allocation2 + $0x234] sm:$0xf]  ;;  %v6539_v26 = vunpack.c.h.b16 %v20686_v22  ;;  %v13423_v22 = vld [vmem:[#allocation2 + $0x214] sm:$0xf0] }
 0x66f   :  { %v6714_v59 = vpack.c.b16 %v6539_v26, %v6539_v26  ;;  %v15916_v26 = vld [vmem:[#allocation2 + $0x330] sm:$0xf0] }
 0x670   :  { %6942 = vmatpush.bf16.msrb.mxu0 %v13702_v42  ;;  %v13421_v42 = vld [vmem:[#allocation2 + $0x1f8] sm:$0xf] }
 0x671   :  { %v6895_v18 = vsel %vm3348_vm8, %v6714_v59, 0  ;;  %v13422_v63 = vor.u32 %v15880_v61, %v13421_v42 }
 0x672   :  { %v16343_v15 = vpop.eup %16342 }
 0x673   :  { %v5703_v24 = vmul.f32 %v16343_v15, %v5701_v44  ;;  %v13562_v44 = vor.u32 %v15915_v6, %v13561_v49  ;;  %v13342_v15 = vor.u32 %v15856_v31, %v13339_v53  ;;  %v15821_v49 = vld [vmem:[#allocation2 + $0x3c] sm:$0xf]  ;;  %v13199_v6 = vld [vmem:[#allocation2 + $0x54] sm:$0xf0] }
 0x674   :  { %6943 = vmatpush.bf16.msrb.mxu0 %v13674_v14  ;;  %v13202_v50 = vor.u32 %v15821_v49, %v13199_v6  ;;  %v15929_v31 = vld [vmem:[#allocation2 + $0x398] sm:$0xf0]  ;;  %v13815_v14 = vld [vmem:[#allocation2 + $0x524] sm:$0xf0]  ;;  %v13345_v49 = vld [vmem:[#allocation2 + $0x158] sm:$0xf] }
 0x675   :  { %5705 = vrot.lane.b32.xlu0 %v5703_v24, %s16434_s7  ;;  %v13533_v24 = vld [vmem:[#allocation2 + $0x2d8] sm:$0xf]  ;;  %v13818_v11 = vor.u32 %v15975_v27, %v13815_v14  ;;  %v15972_v27 = vld [vmem:[#allocation2 + $0x4f0] sm:$0xf0] }
 0x676   :  { %v13534_v0 = vor.u32 %v15908_v57, %v13533_v24  ;;  %v15814_v57 = vld [vmem:[#allocation2 + $0x4] sm:$0xf] }
 0x678   :  { %6944 = vmatpush.bf16.msrb.mxu0 %v13646_v60  ;;  %v20706_v60 = vld [vmem:[%s21394_s9] sm:$0xf] }
 0x679   :  { %v5721_v40 = vperm.slane %v20706_v60, 2  ;;  %v5722_v30 = vperm.slane %v20706_v60, 3 }
 0x6e7   :  { %v5706_v36 = vpop.permute.xlu0 %5705 }
 0x6e8   :  { %v5708_v51 = vadd.f32 %v5706_v36, %v20654_v52  ;;  %v15831_v52 = vld [vmem:[#allocation2 + $0x88] sm:$0xf0]  ;;  %v15905_v36 = vld [vmem:[#allocation2 + $0x2dc] sm:$0xf] }
 0x6e9   :  { %v13226_v58 = vor.u32 %v15831_v52, %v13225_v38  ;;  %v13538_v32 = vor.u32 %v15905_v36, %v13535_v13  ;;  %v13617_v38 = vld [vmem:[#allocation2 + $0x380] sm:$0xf]  ;;  %v15887_v52 = vld [vmem:[#allocation2 + $0x248] sm:$0xf0]  ;;  %v13675_v36 = vld [vmem:[#allocation2 + $0x40c] sm:$0xf0] }
 0x6ea   :  { %v20691_v48 = vpack.c.bf16 %v5708_v51, %v5708_v51  ;;  %v13510_v51 = vor.u32 %v15898_v35, %v13507_v7  ;;  %v13618_v53 = vor.u32 %v15929_v31, %v13617_v38  ;;  %v15867_v35 = vld [vmem:[#allocation2 + $0x1a8] sm:$0xf0]  ;;  %v15860_v38 = vld [vmem:[#allocation2 + $0x170] sm:$0xf0]  ;;  %v15933_v31 = vld [vmem:[#allocation2 + $0x3bc] sm:$0xf] }
 0x6eb   :  { %6917 = vmatpush.bf16.msra.mxu2 %v13226_v58  ;;  %v13171_v58 = vld [vmem:[#allocation2 + $0x1c] sm:$0xf0]  ;;  %v13346_v59 = vor.u32 %v15860_v38, %v13345_v49  ;;  %v13709_v49 = vld [vmem:[#allocation2 + $0x430] sm:$0xf] }
 0x6ec   :  { %13163 = vmatmul.msk.bf16.vlgmr.msra.gmra.mxu3 %vm2287_vm0, %v20691_v48  ;;  %13165 = vmatmul.msk.bf16.vlgmr.msra.gmra.mxu0 %vm2287_vm0, %v20691_v48  ;;  %v13174_v54 = vor.u32 %v15814_v57, %v13171_v58  ;;  %v15979_v57 = vld [vmem:[#allocation2 + $0x528] sm:$0xf0] }
 0x6ed   :  { %13166 = vmatmul.msk.bf16.vlgmr.msrb.gmra.mxu1 %vm2287_vm0, %v20691_v48  ;;  %6925 = vmatpush.bf16.msra.mxu3 %v13590_v41  ;;  %v13478_v41 = vor.u32 %v15894_v43, %v13477_v8  ;;  %v13597_v8 = vld [vmem:[#allocation2 + $0x350] sm:$0xf]  ;;  %v15923_v43 = vld [vmem:[#allocation2 + $0x368] sm:$0xf0] }
 0x6ee   :  { %6964 = vmatpush.bf16.msrb.mxu1 %v13370_v55  ;;  %v13479_v55 = vld [vmem:[#allocation2 + $0x284] sm:$0xf0]  ;;  %6945 = vmatpush.bf16.msrb.mxu0 %v13618_v53  ;;  %v13647_v53 = vld [vmem:[#allocation2 + $0x3d4] sm:$0xf0] }
 0x6ef   :  { %6918 = vmatpush.bf16.msra.mxu2 %v13198_v5  ;;  %v15870_v5 = vld [vmem:[#allocation2 + $0x1c4] sm:$0xf] }
 0x6f0   :  { %v13398_v9 = vor.u32 %v15870_v5, %v13395_v10  ;;  %v13793_v10 = vld [vmem:[#allocation2 + $0x4d8] sm:$0xf] }
 0x6f1   :  { %6926 = vmatpush.bf16.msra.mxu3 %v13562_v44  ;;  %v13450_v44 = vor.u32 %v15887_v52, %v13449_v56 }
 0x6f2   :  { %6965 = vmatpush.bf16.msrb.mxu1 %v13342_v15  ;;  %v13451_v15 = vld [vmem:[#allocation2 + $0x24c] sm:$0xf0]  ;;  %7010 = vmatpush.bf16.msra.mxu0 %v6895_v18  ;;  %v13619_v18 = vld [vmem:[#allocation2 + $0x39c] sm:$0xf0] }
 0x6f3   :  { %6919 = vmatpush.bf16.msra.mxu2 %v13170_v21  ;;  %v13454_v24 = vor.u32 %v15884_v3, %v13451_v15  ;;  %v15954_v21 = vld [vmem:[#allocation2 + $0x464] sm:$0xf]  ;;  %v13569_v3 = vld [vmem:[#allocation2 + $0x318] sm:$0xf] }
 0x6f4   :  { %v13734_v25 = vor.u32 %v15954_v21, %v13731_v2  ;;  %v15965_v21 = vld [vmem:[#allocation2 + $0x4b8] sm:$0xf0] }
 0x6f5   :  { %6927 = vmatpush.bf16.msra.mxu3 %v13534_v0  ;;  %v13426_v0 = vor.u32 %v15877_v62, %v13423_v22  ;;  %v13570_v62 = vor.u32 %v15916_v26, %v13569_v3  ;;  %v15853_v22 = vld [vmem:[#allocation2 + $0x138] sm:$0xf0]  ;;  %v13429_v3 = vld [vmem:[#allocation2 + $0x200] sm:$0xf] }
 0x6f6   :  { %6966 = vmatpush.bf16.msrb.mxu1 %v13314_v23  ;;  %v13393_v23 = vld [vmem:[#allocation2 + $0x1c0] sm:$0xf]  ;;  %v15881_v26 = vld [vmem:[#allocation2 + $0x218] sm:$0xf0] }
 0x6f7   :  { %6977 = vmatpush.bf16.msrb.mxu2 %v13594_v28  ;;  %v13394_v4 = vor.u32 %v15873_v39, %v13393_v23  ;;  %v15947_v28 = vld [vmem:[#allocation2 + $0x42c] sm:$0xf]  ;;  %v13541_v23 = vld [vmem:[#allocation2 + $0x2e0] sm:$0xf]  ;;  %v15909_v39 = vld [vmem:[#allocation2 + $0x2f8] sm:$0xf0] }
 0x6f8   :  { %v13542_v14 = vor.u32 %v15909_v39, %v13541_v23  ;;  %v15976_v39 = vld [vmem:[#allocation2 + $0x514] sm:$0xf] }
 0x6f9   :  { %6928 = vmatpush.bf16.msra.mxu3 %v13506_v46  ;;  %v13759_v46 = vld [vmem:[#allocation2 + $0x4b4] sm:$0xf0] }
 0x6fa   :  { %6967 = vmatpush.bf16.msrb.mxu1 %v13286_v20  ;;  %v13762_v20 = vor.u32 %v15961_v19, %v13759_v46  ;;  %v13513_v19 = vld [vmem:[#allocation2 + $0x2a8] sm:$0xf]  ;;  %v15902_v46 = vld [vmem:[#allocation2 + $0x2c0] sm:$0xf0] }
 0x6fb   :  { %6978 = vmatpush.bf16.msrb.mxu2 %v13566_v16  ;;  %v15940_v16 = vld [vmem:[#allocation2 + $0x3f4] sm:$0xf] }
 0x6fc   :  { %13164 = vmatmul.msk.bf16.vlgmr.msrb.gmra.mxu3 %vm2287_vm0, %v20691_v48  ;;  %v13482_v48 = vor.u32 %v15891_v45, %v13479_v55  ;;  %v13678_v7 = vor.u32 %v15940_v16, %v13675_v36  ;;  %v5720_v16 = vperm.slane %v20706_v60, 1  ;;  %v13737_v36 = vld [vmem:[#allocation2 + $0x468] sm:$0xf] }
 0x6fd   :  { %6929 = vmatpush.bf16.msra.mxu3 %v13478_v41  ;;  %v5719_v41 = vperm.slane %v20706_v60, 0 }
 0x6fe   :  { %6968 = vmatpush.bf16.msrb.mxu1 %v13258_v37  ;;  %v13706_v37 = vor.u32 %v15947_v28, %v13703_v29  ;;  %v13514_v28 = vor.u32 %v15902_v46, %v13513_v19  ;;  %v13261_v29 = vld [vmem:[#allocation2 + $0xb0] sm:$0xf]  ;;  %v13571_v19 = vld [vmem:[#allocation2 + $0x334] sm:$0xf0] }
 0x6ff   :  { %6979 = vmatpush.bf16.msrb.mxu2 %v13538_v32  ;;  %v13373_v32 = vld [vmem:[#allocation2 + $0x190] sm:$0xf] }
 0x701   :  { %6930 = vmatpush.bf16.msra.mxu3 %v13450_v44  ;;  %v13650_v44 = vor.u32 %v15933_v31, %v13647_v53  ;;  %v13205_v53 = vld [vmem:[#allocation2 + $0x40] sm:$0xf] }
 0x702   :  { %6969 = vmatpush.bf16.msrb.mxu1 %v13230_v1 }
 0x703   :  { %6980 = vmatpush.bf16.msrb.mxu2 %v13510_v51 }
 0x705   :  { %6931 = vmatpush.bf16.msra.mxu3 %v13422_v63  ;;  %v13317_v63 = vld [vmem:[#allocation2 + $0x120] sm:$0xf] }
 0x706   :  { %6970 = vmatpush.bf16.msrb.mxu1 %v13202_v50  ;;  %v13598_v50 = vor.u32 %v15923_v43, %v13597_v8 }
 0x707   :  { %6981 = vmatpush.bf16.msrb.mxu2 %v13482_v48  ;;  %v13374_v48 = vor.u32 %v15867_v35, %v13373_v32 }
 0x709   :  { %6932 = vmatpush.bf16.msra.mxu3 %v13394_v4 }
 0x70a   :  { %6971 = vmatpush.bf16.msrb.mxu1 %v13174_v54  ;;  %v15926_v54 = vld [vmem:[#allocation2 + $0x384] sm:$0xf] }
 0x70b   :  { %6982 = vmatpush.bf16.msrb.mxu2 %v13454_v24  ;;  %v13821_v24 = vld [vmem:[#allocation2 + $0x510] sm:$0xf]  ;;  %v13622_v4 = vor.u32 %v15926_v54, %v13619_v18  ;;  %v13430_v54 = vor.u32 %v15881_v26, %v13429_v3  ;;  %v13177_v18 = vld [vmem:[#allocation2 + $0x8] sm:$0xf]  ;;  %v15892_v3 = vld [vmem:[#allocation2 + $0x274] sm:$0xf] }
 0x70c   :  { %v13487_v26 = vld [vmem:[#allocation2 + $0x28c] sm:$0xf0] }
 0x70d   :  { %6990 = vmatpush.bf16.msrb.mxu3 %v13818_v11  ;;  %v13289_v11 = vld [vmem:[#allocation2 + $0xe8] sm:$0xf] }
 0x70e   :  { %v13290_v2 = vor.u32 %v15846_v47, %v13289_v11 }
 0x70f   :  { %6983 = vmatpush.bf16.msrb.mxu2 %v13426_v0  ;;  %v13822_v0 = vor.u32 %v15979_v57, %v13821_v24 }
 0x711   :  { %6991 = vmatpush.bf16.msrb.mxu3 %v13790_v12  ;;  %v13794_v12 = vor.u32 %v15972_v27, %v13793_v10  ;;  %v13653_v27 = vld [vmem:[#allocation2 + $0x3c0] sm:$0xf] }
 0x713   :  { %6984 = vmatpush.bf16.msrb.mxu2 %v13398_v9  ;;  %v13318_v9 = vor.u32 %v15853_v22, %v13317_v63  ;;  %v15874_v63 = vld [vmem:[#allocation2 + $0x1e0] sm:$0xf0]  ;;  %v15920_v22 = vld [vmem:[#allocation2 + $0x354] sm:$0xf] }
 0x715   :  { %6992 = vmatpush.bf16.msrb.mxu3 %v13762_v20  ;;  %v13765_v20 = vld [vmem:[#allocation2 + $0x4a0] sm:$0xf] }
 0x719   :  { %6993 = vmatpush.bf16.msrb.mxu3 %v13734_v25  ;;  %v20721_v25 = vld [vmem:[#allocation2 + $0x548] sm:$0xff] }
 0x71a   :  { %v6541_v47 = vunpack.c.h.b16 %v20721_v25 }
 0x71d   :  { %6994 = vmatpush.bf16.msrb.mxu3 %v13706_v37  ;;  %v13766_v37 = vor.u32 %v15965_v21, %v13765_v20  ;;  %v15969_v20 = vld [vmem:[#allocation2 + $0x4dc] sm:$0xf]  ;;  %v13795_v21 = vld [vmem:[#allocation2 + $0x4f4] sm:$0xf0] }
 0x721   :  { %6995 = vmatpush.bf16.msrb.mxu3 %v13678_v7  ;;  %v13233_v7 = vld [vmem:[#allocation2 + $0x78] sm:$0xf] }
 0x725   :  { %6996 = vmatpush.bf16.msrb.mxu3 %v13650_v44 }
 0x729   :  { %6997 = vmatpush.bf16.msrb.mxu3 %v13622_v4  ;;  %v13823_v4 = vld [vmem:[#allocation2 + $0x52c] sm:$0xf0] }
 0x769   :  { %v5785_v34 = vpop.f32.mrf.mxu0 }
 0x76a   :  { %v5786_v13 = vadd.f32 %v5785_v34, %v5721_v40  ;;  %v5798_v1 = vpop.f32.mrf.mxu1  ;;  %v15839_v40 = vld [vmem:[#allocation2 + $0xc8] sm:$0xf0] }
 0x76b   :  { %v5799_v51 = vadd.f32 %v5798_v1, %v5722_v30  ;;  %v13485_v30 = vld [vmem:[#allocation2 + $0x270] sm:$0xf]  ;;  %v15895_v34 = vld [vmem:[#allocation2 + $0x288] sm:$0xf0]  ;;  %v6540_v1 = vunpack.c.l.b16 %v20721_v25  ;;  %v13262_v32 = vor.u32 %v15839_v40, %v13261_v29  ;;  %v6716_v40 = vpack.c.b16 %v6541_v47, %v6541_v47 }
 0x76c   :  { %v5804_v45 = vmax.f32 %v5786_v13, 0.0  ;;  %v15958_v13 = vld [vmem:[#allocation2 + $0x480] sm:$0xf0]  ;;  %v13486_v35 = vor.u32 %v15895_v34, %v13485_v30  ;;  %v13543_v34 = vld [vmem:[#allocation2 + $0x2fc] sm:$0xf0] }
 0x76d   :  { %v5805_v55 = vmax.f32 %v5799_v51, 0.0  ;;  %v15832_v51 = vld [vmem:[#allocation2 + $0x90] sm:$0xf0]  ;;  %v13738_v43 = vor.u32 %v15958_v13, %v13737_v36  ;;  %v6715_v60 = vpack.c.b16 %v6540_v1, %v6540_v1  ;;  %v15906_v30 = vld [vmem:[#allocation2 + $0x2e4] sm:$0xf] }
 0x76e   :  { %v20711_v6 = vpack.c.bf16 %v5804_v45, %v5804_v45  ;;  %v13457_v45 = vld [vmem:[#allocation2 + $0x238] sm:$0xf]  ;;  %v13767_v36 = vld [vmem:[#allocation2 + $0x4bc] sm:$0xf0]  ;;  %v15864_v13 = vld [vmem:[#allocation2 + $0x194] sm:$0xf] }
 0x76f   :  { %v20713_v56 = vpack.c.bf16 %v5805_v55, %v5805_v55  ;;  %v5759_v52 = vpop.f32.mrf.mxu3  ;;  %v6898_v24 = vsel %vm3348_vm8, %v6715_v60, 0  ;;  %v13375_v1 = vld [vmem:[#allocation2 + $0x1ac] sm:$0xf0]  ;;  %v15955_v60 = vld [vmem:[#allocation2 + $0x46c] sm:$0xf] }
 0x770   :  { %v5760_v15 = vadd.f32 %v5759_v52, %v5719_v41  ;;  %6946 = vmatmul.bf16.vlgmr.msrb.gmra.mxu0 %v20711_v6  ;;  %v15888_v41 = vld [vmem:[#allocation2 + $0x250] sm:$0xf0]  ;;  %v15825_v52 = vld [vmem:[#allocation2 + $0x58] sm:$0xf0] }
 0x771   :  { %13839 = vmatmul.msk.bf16.vlgmr.msra.gmra.mxu1 %vm5202_vm11, %v20713_v56  ;;  %7016 = vmatpush.bf16.msrb.mxu0 %v13374_v48  ;;  %v5787_v58 = vpop.f32.mrf.mxu0  ;;  %v13234_v48 = vor.u32 %v15832_v51, %v13233_v7  ;;  %v13458_v31 = vor.u32 %v15888_v41, %v13457_v45  ;;  %v13206_v57 = vor.u32 %v15825_v52, %v13205_v53  ;;  %v6901_v51 = vsel %vm3348_vm8, %v6716_v40, 0  ;;  %v13515_v45 = vld [vmem:[#allocation2 + $0x2c4] sm:$0xf0]  ;;  %v13269_v40 = vld [vmem:[#allocation2 + $0xb8] sm:$0xf] }
 0x772   :  { %v5802_v42 = vmax.f32 %v5760_v15, 0.0  ;;  %7029 = vmatpush.bf16.msra.mxu1 %v13598_v50  ;;  %v5800_v61 = vpop.f32.mrf.mxu1  ;;  %v15951_v50 = vld [vmem:[#allocation2 + $0x448] sm:$0xf0]  ;;  %v13681_v58 = vld [vmem:[#allocation2 + $0x3f8] sm:$0xf]  ;;  %v13546_v7 = vor.u32 %v15906_v30, %v13543_v34  ;;  %v13378_v41 = vor.u32 %v15864_v13, %v13375_v1 }
 0x773   :  { %v13710_v15 = vor.u32 %v15951_v50, %v13709_v49  ;;  %v13401_v61 = vld [vmem:[#allocation2 + $0x1c8] sm:$0xf]  ;;  %v15857_v49 = vld [vmem:[#allocation2 + $0x15c] sm:$0xf]  ;;  %v13347_v50 = vld [vmem:[#allocation2 + $0x174] sm:$0xf0] }
 0x774   :  { %v20718_v5 = vpack.c.bf16 %v5802_v42, %v5802_v42  ;;  %v15818_v42 = vld [vmem:[#allocation2 + $0x20] sm:$0xf0]  ;;  %v15871_v34 = vld [vmem:[#allocation2 + $0x1cc] sm:$0xf]  ;;  %v13627_v1 = vld [vmem:[#allocation2 + $0x3a4] sm:$0xf0] }
 0x775   :  { %7017 = vmatpush.bf16.msrb.mxu0 %v13346_v59  ;;  %v15944_v59 = vld [vmem:[#allocation2 + $0x410] sm:$0xf0]  ;;  %v13178_v10 = vor.u32 %v15818_v42, %v13177_v18  ;;  %v13325_v18 = vld [vmem:[#allocation2 + $0x128] sm:$0xf]  ;;  %v15854_v42 = vld [vmem:[#allocation2 + $0x140] sm:$0xf0] }
 0x776   :  { %7030 = vmatpush.bf16.msra.mxu1 %v13570_v62  ;;  %6920 = vmatmul.bf16.vlgmr.msra.gmra.mxu2 %v20718_v5  ;;  %v13682_v23 = vor.u32 %v15944_v59, %v13681_v58  ;;  %v13711_v58 = vld [vmem:[#allocation2 + $0x44c] sm:$0xf0]  ;;  %v15850_v59 = vld [vmem:[#allocation2 + $0x124] sm:$0xf]  ;;  %v15927_v13 = vld [vmem:[#allocation2 + $0x38c] sm:$0xf] }
 0x777   :  { %7042 = vmatpush.bf16.msra.mxu2 %v13822_v0  ;;  %v5761_v17 = vpop.f32.mrf.mxu3  ;;  %v13599_v0 = vld [vmem:[#allocation2 + $0x36c] sm:$0xf0] }
 0x778   :  { %v13602_v11 = vor.u32 %v15920_v22, %v13599_v0  ;;  %v13826_v17 = vor.u32 %v15976_v39, %v13823_v4  ;;  %v13459_v22 = vld [vmem:[#allocation2 + $0x254] sm:$0xf0]  ;;  %v15941_v39 = vld [vmem:[#allocation2 + $0x3fc] sm:$0xf] }
 0x779   :  { %7018 = vmatpush.bf16.msrb.mxu0 %v13318_v9  ;;  %v15937_v9 = vld [vmem:[#allocation2 + $0x3d8] sm:$0xf0]  ;;  %v13683_v4 = vld [vmem:[#allocation2 + $0x414] sm:$0xf0] }
 0x77a   :  { %7031 = vmatpush.bf16.msra.mxu1 %v13542_v14  ;;  %v13402_v14 = vor.u32 %v15874_v63, %v13401_v61  ;;  %v13654_v46 = vor.u32 %v15937_v9, %v13653_v27  ;;  %v13490_v61 = vor.u32 %v15892_v3, %v13487_v26  ;;  %v15885_v63 = vld [vmem:[#allocation2 + $0x23c] sm:$0xf]  ;;  %v13291_v27 = vld [vmem:[#allocation2 + $0x104] sm:$0xf0]  ;;  %v13297_v9 = vld [vmem:[#allocation2 + $0xf0] sm:$0xf]  ;;  %v13686_v47 = vor.u32 %v15941_v39, %v13683_v4 }
 0x77b   :  { %7043 = vmatpush.bf16.msra.mxu2 %v13794_v12  ;;  %v15913_v12 = vld [vmem:[#allocation2 + $0x31c] sm:$0xf]  ;;  %v13801_v3 = vld [vmem:[#allocation2 + $0x4e0] sm:$0xf]  ;;  %v13185_v39 = vld [vmem:[#allocation2 + $0x10] sm:$0xf] }
 0x77c   :  { %v13574_v29 = vor.u32 %v15913_v12, %v13571_v19  ;;  %v13431_v12 = vld [vmem:[#allocation2 + $0x21c] sm:$0xf0]  ;;  %v20739_v19 = vld [vmem:[#allocation2 + $0x550] sm:$0xff]  ;;  %v15973_v26 = vld [vmem:[#allocation2 + $0x4f8] sm:$0xf0] }
 0x77d   :  { %7019 = vmatpush.bf16.msrb.mxu0 %v13290_v2  ;;  %v13625_v2 = vld [vmem:[#allocation2 + $0x388] sm:$0xf]  ;;  %v15819_v4 = vld [vmem:[#allocation2 + $0x28] sm:$0xf0] }
 0x77e   :  { %7032 = vmatpush.bf16.msra.mxu1 %v13514_v28  ;;  %v15930_v28 = vld [vmem:[#allocation2 + $0x3a0] sm:$0xf0] }
 0x77f   :  { %7044 = vmatpush.bf16.msra.mxu2 %v13766_v37  ;;  %v5772_v8 = vpop.f32.mrf.mxu3  ;;  %v13798_v37 = vor.u32 %v15969_v20, %v13795_v21  ;;  %v13626_v25 = vor.u32 %v15930_v28, %v13625_v2  ;;  %v15934_v21 = vld [vmem:[#allocation2 + $0x3c4] sm:$0xf]  ;;  %v13655_v2 = vld [vmem:[#allocation2 + $0x3dc] sm:$0xf0]  ;;  %v15836_v28 = vld [vmem:[#allocation2 + $0xb4] sm:$0xf] }
 0x780   :  { %v5773_v55 = vadd.f32 %v5772_v8, %v5720_v16  ;;  %13840 = vmatmul.msk.bf16.vlgmr.msra.gmra.mxu0 %vm5202_vm11, %v20713_v56  ;;  %v15962_v16 = vld [vmem:[#allocation2 + $0x4a4] sm:$0xf] }
 0x781   :  { %6972 = vmatmul.bf16.vlgmr.msrb.gmra.mxu1 %v20718_v5  ;;  %7020 = vmatpush.bf16.msrb.mxu0 %v13262_v32  ;;  %v13381_v32 = vld [vmem:[#allocation2 + $0x198] sm:$0xf]  ;;  %v13770_v8 = vor.u32 %v15962_v16, %v13767_v36  ;;  %v13658_v16 = vor.u32 %v15934_v21, %v13655_v2  ;;  %v13403_v36 = vld [vmem:[#allocation2 + $0x1e4] sm:$0xf0] }
 0x782   :  { %v5803_v38 = vmax.f32 %v5773_v55, 0.0  ;;  %7033 = vmatpush.bf16.msra.mxu1 %v13486_v35  ;;  %v15868_v35 = vld [vmem:[#allocation2 + $0x1b0] sm:$0xf0] }
 0x783   :  { %7045 = vmatpush.bf16.msra.mxu2 %v13738_v43  ;;  %v15899_v43 = vld [vmem:[#allocation2 + $0x2ac] sm:$0xf]  ;;  %v13382_v55 = vor.u32 %v15868_v35, %v13381_v32 }
 0x784   :  { %v20728_v44 = vpack.c.bf16 %v5803_v38, %v5803_v38  ;;  %v13353_v38 = vld [vmem:[#allocation2 + $0x160] sm:$0xf]  ;;  %v13518_v53 = vor.u32 %v15899_v43, %v13515_v45  ;;  %v13235_v43 = vld [vmem:[#allocation2 + $0x94] sm:$0xf0] }
 0x785   :  { %7021 = vmatpush.bf16.msrb.mxu0 %v13234_v48  ;;  %v13739_v48 = vld [vmem:[#allocation2 + $0x484] sm:$0xf0]  ;;  %v13241_v45 = vld [vmem:[#allocation2 + $0x80] sm:$0xf] }
 0x786   :  { %7034 = vmatpush.bf16.msra.mxu1 %v13458_v31  ;;  %6933 = vmatmul.bf16.vlgmr.msra.gmra.mxu3 %v20728_v44  ;;  %v15861_v31 = vld [vmem:[#allocation2 + $0x178] sm:$0xf0]  ;;  %v13742_v52 = vor.u32 %v15955_v60, %v13739_v48  ;;  %v13630_v48 = vor.u32 %v15927_v13, %v13627_v1  ;;  %v13299_v13 = vld [vmem:[#allocation2 + $0x10c] sm:$0xf0] }
 0x787   :  { %6985 = vmatmul.bf16.vlgmr.msrb.gmra.mxu2 %v20728_v44  ;;  %v5774_v62 = vpop.f32.mrf.mxu3  ;;  %7062 = vmatpush.bf16.msra.mxu3 %v6898_v24  ;;  %v13354_v24 = vor.u32 %v15861_v31, %v13353_v38  ;;  %v13383_v38 = vld [vmem:[#allocation2 + $0x1b4] sm:$0xf0] }
 0x788   :  { %7046 = vmatpush.bf16.msra.mxu2 %v13710_v15  ;;  %v13350_v15 = vor.u32 %v15857_v49, %v13347_v50  ;;  %v15865_v50 = vld [vmem:[#allocation2 + $0x19c] sm:$0xf] }
 0x789   :  { %7022 = vmatpush.bf16.msrb.mxu0 %v13206_v57  ;;  %v15948_v57 = vld [vmem:[#allocation2 + $0x434] sm:$0xf] }
 0x78a   :  { %7035 = vmatpush.bf16.msra.mxu1 %v13430_v54  ;;  %v13319_v54 = vld [vmem:[#allocation2 + $0x13c] sm:$0xf0]  ;;  %v13714_v62 = vor.u32 %v15948_v57, %v13711_v58  ;;  %v15826_v57 = vld [vmem:[#allocation2 + $0x60] sm:$0xf0] }
 0x78b   :  { %v13322_v0 = vor.u32 %v15850_v59, %v13319_v54  ;;  %v13386_v59 = vor.u32 %v15865_v50, %v13383_v38  ;;  %v13802_v54 = vor.u32 %v15973_v26, %v13801_v3  ;;  %v13689_v38 = vld [vmem:[#allocation2 + $0x400] sm:$0xf]  ;;  %v15900_v3 = vld [vmem:[#allocation2 + $0x2b4] sm:$0xf]  ;;  %v13523_v26 = vld [vmem:[#allocation2 + $0x2cc] sm:$0xf0] }
 0x78c   :  { %7047 = vmatpush.bf16.msra.mxu2 %v13682_v23  ;;  %v13326_v23 = vor.u32 %v15854_v42, %v13325_v18  ;;  %v15858_v18 = vld [vmem:[#allocation2 + $0x164] sm:$0xf]  ;;  %v13355_v42 = vld [vmem:[#allocation2 + $0x17c] sm:$0xf0] }
 0x78d   :  { %7023 = vmatpush.bf16.msrb.mxu0 %v13178_v10  ;;  %v15843_v10 = vld [vmem:[#allocation2 + $0xec] sm:$0xf] }
 0x78e   :  { %7036 = vmatpush.bf16.msra.mxu1 %v13402_v14  ;;  %v15847_v14 = vld [vmem:[#allocation2 + $0x108] sm:$0xf0] }
 0x78f   :  { %v13298_v20 = vor.u32 %v15847_v14, %v13297_v9  ;;  %v15921_v9 = vld [vmem:[#allocation2 + $0x35c] sm:$0xf]  ;;  %v13607_v14 = vld [vmem:[#allocation2 + $0x374] sm:$0xf0] }
 0x790   :  { %7048 = vmatpush.bf16.msra.mxu2 %v13654_v46  ;;  %7024 = vmatmul.bf16.vlgmr.msrb.gmra.mxu0 %v20718_v5  ;;  %v13294_v46 = vor.u32 %v15843_v10, %v13291_v27  ;;  %v13605_v10 = vld [vmem:[#allocation2 + $0x358] sm:$0xf]  ;;  %v15924_v27 = vld [vmem:[#allocation2 + $0x370] sm:$0xf0]  ;;  %v13610_v2 = vor.u32 %v15921_v9, %v13607_v14  ;;  %v13633_v14 = vld [vmem:[#allocation2 + $0x390] sm:$0xf] }
 0x791   :  { %7081 = vmatpush.bf16.msra.mxu0 %v13602_v11  ;;  %7037 = vmatmul.bf16.vlgmr.msra.gmra.mxu1 %v20728_v44  ;;  %v13462_v11 = vor.u32 %v15885_v63, %v13459_v22  ;;  %v13179_v22 = vld [vmem:[#allocation2 + $0x24] sm:$0xf0]  ;;  %v13606_v21 = vor.u32 %v15924_v27, %v13605_v10 }
 0x792   :  { %7094 = vmatpush.bf16.msrb.mxu1 %v13826_v17  ;;  %v15878_v17 = vld [vmem:[#allocation2 + $0x204] sm:$0xf]  ;;  %v13215_v10 = vld [vmem:[#allocation2 + $0x64] sm:$0xf0] }
 0x793   :  { %v13434_v30 = vor.u32 %v15878_v17, %v13431_v12  ;;  %v13186_v12 = vor.u32 %v15819_v4, %v13185_v39  ;;  %v15823_v4 = vld [vmem:[#allocation2 + $0x4c] sm:$0xf] }
 0x794   :  { %7049 = vmatpush.bf16.msra.mxu2 %v13626_v25  ;;  %v6542_v25 = vunpack.c.l.b16 %v20739_v19 }
 0x795   :  { %7082 = vmatpush.bf16.msra.mxu0 %v13574_v29  ;;  %v13263_v29 = vld [vmem:[#allocation2 + $0xcc] sm:$0xf0] }
 0x796   :  { %7095 = vmatpush.bf16.msrb.mxu1 %v13798_v37  ;;  %6998 = vmatmul.bf16.vlgmr.msrb.gmra.mxu3 %v20711_v6  ;;  %v15840_v37 = vld [vmem:[#allocation2 + $0xd0] sm:$0xf0]  ;;  %v13266_v32 = vor.u32 %v15836_v28, %v13263_v29  ;;  %v6717_v60 = vpack.c.b16 %v6542_v25, %v6542_v25  ;;  %v13745_v28 = vld [vmem:[#allocation2 + $0x470] sm:$0xf]  ;;  %v15959_v29 = vld [vmem:[#allocation2 + $0x488] sm:$0xf0] }
 0x797   :  { %7050 = vmatmul.bf16.vlgmr.msra.gmra.mxu2 %v20711_v6  ;;  %7068 = vmatpush.bf16.msrb.mxu3 %v13378_v41  ;;  %v13270_v35 = vor.u32 %v15840_v37, %v13269_v40  ;;  %v15833_v41 = vld [vmem:[#allocation2 + $0x98] sm:$0xf0]  ;;  %v13577_v40 = vld [vmem:[#allocation2 + $0x320] sm:$0xf] }
 0x798   :  { %7114 = vmatpush.bf16.msrb.mxu2 %v6901_v51  ;;  %v13829_v51 = vld [vmem:[#allocation2 + $0x518] sm:$0xf]  ;;  %v6904_v58 = vsel %vm3348_vm8, %v6717_v60, 0  ;;  %v15917_v37 = vld [vmem:[#allocation2 + $0x338] sm:$0xf0] }
 0x799   :  { %7083 = vmatpush.bf16.msra.mxu0 %v13546_v7  ;;  %v15829_v7 = vld [vmem:[#allocation2 + $0x7c] sm:$0xf]  ;;  %v13578_v1 = vor.u32 %v15917_v37, %v13577_v40 }
 0x79a   :  { %7096 = vmatpush.bf16.msrb.mxu1 %v13770_v8  ;;  %v15980_v8 = vld [vmem:[#allocation2 + $0x530] sm:$0xf0]  ;;  %v13238_v31 = vor.u32 %v15829_v7, %v13235_v43  ;;  %v15907_v43 = vld [vmem:[#allocation2 + $0x2ec] sm:$0xf]  ;;  %v15837_v60 = vld [vmem:[#allocation2 + $0xbc] sm:$0xf] }
 0x79b   :  { %7069 = vmatpush.bf16.msrb.mxu3 %v13350_v15  ;;  %v13830_v49 = vor.u32 %v15980_v8, %v13829_v51  ;;  %v13207_v15 = vld [vmem:[#allocation2 + $0x5c] sm:$0xf0]  ;;  %v15952_v7 = vld [vmem:[#allocation2 + $0x450] sm:$0xf0]  ;;  %v13549_v51 = vld [vmem:[#allocation2 + $0x2e8] sm:$0xf] }
 0x79c   :  { %7120 = vmatpush.bf16.msra.mxu2 %v13382_v55  ;;  %v13406_v55 = vor.u32 %v15871_v34, %v13403_v36  ;;  %v13579_v34 = vld [vmem:[#allocation2 + $0x33c] sm:$0xf0]  ;;  %v15844_v36 = vld [vmem:[#allocation2 + $0xf4] sm:$0xf]  ;;  %v15910_v8 = vld [vmem:[#allocation2 + $0x300] sm:$0xf0] }
 0x79d   :  { %7084 = vmatpush.bf16.msra.mxu0 %v13518_v53  ;;  %v13242_v53 = vor.u32 %v15833_v41, %v13241_v45  ;;  %v13551_v45 = vld [vmem:[#allocation2 + $0x304] sm:$0xf0]  ;;  %v13302_v41 = vor.u32 %v15844_v36, %v13299_v13  ;;  %v15869_v40 = vld [vmem:[#allocation2 + $0x1b8] sm:$0xf0]  ;;  %v15882_v36 = vld [vmem:[#allocation2 + $0x220] sm:$0xf0] }
 0x79e   :  { %7097 = vmatpush.bf16.msrb.mxu1 %v13742_v52  ;;  %v15822_v52 = vld [vmem:[#allocation2 + $0x44] sm:$0xf]  ;;  %v13554_v50 = vor.u32 %v15907_v43, %v13551_v45  ;;  %v15879_v13 = vld [vmem:[#allocation2 + $0x20c] sm:$0xf]  ;;  %v13585_v45 = vld [vmem:[#allocation2 + $0x328] sm:$0xf] }
 0x79f   :  { %7070 = vmatpush.bf16.msrb.mxu3 %v13322_v0  ;;  %v13773_v0 = vld [vmem:[#allocation2 + $0x4a8] sm:$0xf]  ;;  %v15862_v43 = vld [vmem:[#allocation2 + $0x180] sm:$0xf0] }
 0x7a0   :  { %7121 = vmatpush.bf16.msra.mxu2 %v13354_v24  ;;  %v13213_v24 = vld [vmem:[#allocation2 + $0x48] sm:$0xf] }
 0x7a1   :  { %7085 = vmatpush.bf16.msra.mxu0 %v13490_v61  ;;  %v15815_v61 = vld [vmem:[#allocation2 + $0xc] sm:$0xf]  ;;  %v13214_v63 = vor.u32 %v15826_v57, %v13213_v24  ;;  %v15830_v57 = vld [vmem:[#allocation2 + $0x84] sm:$0xf] }
 0x7a2   :  { %7098 = vmatpush.bf16.msrb.mxu1 %v13714_v62  ;;  %v13210_v62 = vor.u32 %v15822_v52, %v13207_v15  ;;  %v13182_v17 = vor.u32 %v15815_v61, %v13179_v22  ;;  %v15903_v52 = vld [vmem:[#allocation2 + $0x2c8] sm:$0xf0]  ;;  %v13493_v61 = vld [vmem:[#allocation2 + $0x278] sm:$0xf] }
 0x7a3   :  { %7071 = vmatpush.bf16.msrb.mxu3 %v13294_v46  ;;  %v15851_v46 = vld [vmem:[#allocation2 + $0x12c] sm:$0xf]  ;;  %v13495_v22 = vld [vmem:[#allocation2 + $0x294] sm:$0xf0] }
 0x7a4   :  { %7122 = vmatpush.bf16.msra.mxu2 %v13326_v23  ;;  %v15966_v23 = vld [vmem:[#allocation2 + $0x4c0] sm:$0xf0] }
 0x7a5   :  { %7086 = vmatpush.bf16.msra.mxu0 %v13462_v11  ;;  %v13358_v11 = vor.u32 %v15858_v18, %v13355_v42  ;;  %v13661_v18 = vld [vmem:[#allocation2 + $0x3c8] sm:$0xf]  ;;  %v15938_v42 = vld [vmem:[#allocation2 + $0x3e0] sm:$0xf0] }
 0x7a6   :  { %7099 = vmatpush.bf16.msrb.mxu1 %v13686_v47  ;;  %13841 = vmatmul.msk.bf16.vlgmr.msra.gmra.mxu3 %vm5202_vm11, %v20713_v56  ;;  %v13774_v47 = vor.u32 %v15966_v23, %v13773_v0  ;;  %v6543_v23 = vunpack.c.h.b16 %v20739_v19  ;;  %v13662_v39 = vor.u32 %v15938_v42, %v13661_v18  ;;  %v13557_v42 = vld [vmem:[#allocation2 + $0x2f0] sm:$0xf] }
 0x7a7   :  { %13842 = vmatmul.msk.bf16.vlgmr.msrb.gmra.mxu2 %vm5202_vm11, %v20713_v56  ;;  %7072 = vmatpush.bf16.msrb.mxu3 %v13266_v32 }
 0x7a8   :  { %7123 = vmatpush.bf16.msra.mxu2 %v13298_v20  ;;  %v13327_v20 = vld [vmem:[#allocation2 + $0x144] sm:$0xf0] }
 0x7a9   :  { %7087 = vmatpush.bf16.msra.mxu0 %v13434_v30  ;;  %v15914_v30 = vld [vmem:[#allocation2 + $0x324] sm:$0xf]  ;;  %v13330_v25 = vor.u32 %v15851_v46, %v13327_v20  ;;  %v13467_v46 = vld [vmem:[#allocation2 + $0x25c] sm:$0xf0]  ;;  %v13218_v20 = vor.u32 %v15823_v4, %v13215_v10  ;;  %v13305_v4 = vld [vmem:[#allocation2 + $0xf8] sm:$0xf] }
 0x7aa   :  { %7100 = vmatpush.bf16.msrb.mxu1 %v13658_v16  ;;  %v13746_v16 = vor.u32 %v15959_v29, %v13745_v28  ;;  %v13582_v32 = vor.u32 %v15914_v30, %v13579_v34  ;;  %v13187_v28 = vld [vmem:[#allocation2 + $0x2c] sm:$0xf0]  ;;  %v13389_v29 = vld [vmem:[#allocation2 + $0x1a0] sm:$0xf]  ;;  %v15848_v10 = vld [vmem:[#allocation2 + $0x110] sm:$0xf0] }
 0x7ab   :  { %7073 = vmatpush.bf16.msrb.mxu3 %v13238_v31  ;;  %v15945_v31 = vld [vmem:[#allocation2 + $0x418] sm:$0xf0]  ;;  %v13613_v34 = vld [vmem:[#allocation2 + $0x360] sm:$0xf] }
 0x7ac   :  { %7124 = vmatpush.bf16.msra.mxu2 %v13270_v35  ;;  %v13717_v35 = vld [vmem:[#allocation2 + $0x438] sm:$0xf]  ;;  %v13690_v24 = vor.u32 %v15945_v31, %v13689_v38  ;;  %v13411_v38 = vld [vmem:[#allocation2 + $0x1ec] sm:$0xf0]  ;;  %v15977_v31 = vld [vmem:[#allocation2 + $0x51c] sm:$0xf] }
 0x7ad   :  { %7088 = vmatpush.bf16.msra.mxu0 %v13406_v55  ;;  %v13718_v55 = vor.u32 %v15952_v7, %v13717_v35  ;;  %v13390_v7 = vor.u32 %v15869_v40, %v13389_v29  ;;  %v13501_v40 = vld [vmem:[#allocation2 + $0x280] sm:$0xf] }
 0x7ae   :  { %7101 = vmatpush.bf16.msrb.mxu1 %v13630_v48  ;;  %v13271_v48 = vld [vmem:[#allocation2 + $0xd4] sm:$0xf0] }
 0x7af   :  { %7074 = vmatpush.bf16.msrb.mxu3 %v13210_v62  ;;  %v13274_v15 = vor.u32 %v15837_v60, %v13271_v48  ;;  %v15896_v62 = vld [vmem:[#allocation2 + $0x290] sm:$0xf0]  ;;  %v15918_v60 = vld [vmem:[#allocation2 + $0x340] sm:$0xf0]  ;;  %v13409_v48 = vld [vmem:[#allocation2 + $0x1d0] sm:$0xf] }
 0x7b0   :  { %7125 = vmatpush.bf16.msra.mxu2 %v13242_v53  ;;  %7089 = vmatmul.bf16.vlgmr.msra.gmra.mxu0 %v20728_v44  ;;  %v13521_v53 = vld [vmem:[#allocation2 + $0x2b0] sm:$0xf]  ;;  %v13494_v27 = vor.u32 %v15896_v62, %v13493_v61  ;;  %v15911_v61 = vld [vmem:[#allocation2 + $0x308] sm:$0xf0]  ;;  %v15970_v62 = vld [vmem:[#allocation2 + $0x4e4] sm:$0xf] }
 0x7b1   :  { %7146 = vmatpush.bf16.msrb.mxu0 %v13830_v49  ;;  %7102 = vmatmul.bf16.vlgmr.msrb.gmra.mxu1 %v20711_v6  ;;  %v13550_v49 = vor.u32 %v15910_v8, %v13549_v51  ;;  %v13361_v8 = vld [vmem:[#allocation2 + $0x168] sm:$0xf] }
 0x7b2   :  { %7166 = vmatpush.bf16.msra.mxu1 %v6904_v58  ;;  %v13243_v58 = vld [vmem:[#allocation2 + $0x9c] sm:$0xf0] }
 0x7b3   :  { %7075 = vmatpush.bf16.msrb.mxu3 %v13182_v17  ;;  %v13246_v0 = vor.u32 %v15830_v57, %v13243_v58  ;;  %v15889_v17 = vld [vmem:[#allocation2 + $0x258] sm:$0xf0]  ;;  %v13333_v58 = vld [vmem:[#allocation2 + $0x130] sm:$0xf] }
 0x7b4   :  { %7126 = vmatpush.bf16.msra.mxu2 %v13214_v63  ;;  %v15893_v63 = vld [vmem:[#allocation2 + $0x27c] sm:$0xf] }
 0x7b5   :  { %7147 = vmatpush.bf16.msrb.mxu0 %v13802_v54  ;;  %v13526_v54 = vor.u32 %v15900_v3, %v13523_v26  ;;  %v13498_v9 = vor.u32 %v15893_v63, %v13495_v22  ;;  %v15981_v3 = vld [vmem:[#allocation2 + $0x538] sm:$0xf0]  ;;  %v13362_v26 = vor.u32 %v15862_v43, %v13361_v8  ;;  %v13803_v63 = vld [vmem:[#allocation2 + $0x4fc] sm:$0xf0]  ;;  %v13809_v22 = vld [vmem:[#allocation2 + $0x4e8] sm:$0xf] }
 0x7b6   :  { %7172 = vmatpush.bf16.msrb.mxu1 %v13386_v59  ;;  %7076 = vmatmul.bf16.vlgmr.msrb.gmra.mxu3 %v20718_v5  ;;  %v13522_v59 = vor.u32 %v15903_v52, %v13521_v53  ;;  %v13831_v53 = vld [vmem:[#allocation2 + $0x534] sm:$0xf0]  ;;  %v13837_v52 = vld [vmem:[#allocation2 + $0x520] sm:$0xf]  ;;  %v15890_v8 = vld [vmem:[#allocation2 + $0x260] sm:$0xf0] }
 0x7b7   :  { %7133 = vmatpush.bf16.msra.mxu3 %v13606_v21  ;;  %v15816_v21 = vld [vmem:[#allocation2 + $0x14] sm:$0xf]  ;;  %v13838_v18 = vor.u32 %v15981_v3, %v13837_v52  ;;  %v15949_v43 = vld [vmem:[#allocation2 + $0x43c] sm:$0xf]  ;;  %v15883_v52 = vld [vmem:[#allocation2 + $0x228] sm:$0xf0] }
 0x7b8   :  { %7127 = vmatpush.bf16.msra.mxu2 %v13186_v12  ;;  %v15886_v12 = vld [vmem:[#allocation2 + $0x244] sm:$0xf] }
 0x7b9   :  { %7148 = vmatpush.bf16.msrb.mxu0 %v13774_v47  ;;  %v13465_v47 = vld [vmem:[#allocation2 + $0x240] sm:$0xf]  ;;  %v13470_v30 = vor.u32 %v15886_v12, %v13467_v46  ;;  %v13781_v12 = vld [vmem:[#allocation2 + $0x4b0] sm:$0xf]  ;;  %v15967_v46 = vld [vmem:[#allocation2 + $0x4c8] sm:$0xf0] }
 0x7ba   :  { %7173 = vmatpush.bf16.msrb.mxu1 %v13358_v11  ;;  %v15931_v11 = vld [vmem:[#allocation2 + $0x3a8] sm:$0xf0]  ;;  %v13466_v37 = vor.u32 %v15889_v17, %v13465_v47  ;;  %v13775_v17 = vld [vmem:[#allocation2 + $0x4c4] sm:$0xf0]  ;;  %v13782_v29 = vor.u32 %v15967_v46, %v13781_v12  ;;  %v15942_v3 = vld [vmem:[#allocation2 + $0x404] sm:$0xf] }
 0x7bb   :  { %7128 = vmatmul.bf16.vlgmr.msra.gmra.mxu2 %v20718_v5  ;;  %7134 = vmatpush.bf16.msra.mxu3 %v13578_v1  ;;  %v13634_v19 = vor.u32 %v15931_v11, %v13633_v14  ;;  %v13439_v1 = vld [vmem:[#allocation2 + $0x224] sm:$0xf0]  ;;  %v13529_v14 = vld [vmem:[#allocation2 + $0x2b8] sm:$0xf]  ;;  %v15904_v11 = vld [vmem:[#allocation2 + $0x2d0] sm:$0xf0] }
 0x7bc   :  { %7185 = vmatpush.bf16.msrb.mxu2 %v13610_v2  ;;  %v6718_v2 = vpack.c.b16 %v6543_v23, %v6543_v23  ;;  %v15963_v47 = vld [vmem:[#allocation2 + $0x4ac] sm:$0xf]  ;;  %v15932_v12 = vld [vmem:[#allocation2 + $0x3b0] sm:$0xf0] }
 0x7bd   :  { %7149 = vmatpush.bf16.msrb.mxu0 %v13746_v16  ;;  %v13437_v16 = vld [vmem:[#allocation2 + $0x208] sm:$0xf] }
 0x7be   :  { %7174 = vmatpush.bf16.msrb.mxu1 %v13330_v25  ;;  %v15925_v25 = vld [vmem:[#allocation2 + $0x378] sm:$0xf0]  ;;  %v6907_v35 = vsel %vm3348_vm8, %v6718_v2, 0  ;;  %v13277_v2 = vld [vmem:[#allocation2 + $0xc0] sm:$0xf] }
 0x7bf   :  { %7135 = vmatpush.bf16.msra.mxu3 %v13550_v49  ;;  %v13614_v51 = vor.u32 %v15925_v25, %v13613_v34  ;;  %v15875_v49 = vld [vmem:[#allocation2 + $0x1e8] sm:$0xf0]  ;;  %v13747_v34 = vld [vmem:[#allocation2 + $0x48c] sm:$0xf0]  ;;  %v13753_v25 = vld [vmem:[#allocation2 + $0x478] sm:$0xf] }
 0x7c0   :  { %7186 = vmatpush.bf16.msrb.mxu2 %v13582_v32  ;;  %v13190_v32 = vor.u32 %v15816_v21, %v13187_v28  ;;  %v13530_v21 = vor.u32 %v15904_v11, %v13529_v14  ;;  %v13778_v28 = vor.u32 %v15963_v47, %v13775_v17  ;;  %v15928_v11 = vld [vmem:[#allocation2 + $0x394] sm:$0xf]  ;;  %v13635_v47 = vld [vmem:[#allocation2 + $0x3ac] sm:$0xf0]  ;;  %v13641_v17 = vld [vmem:[#allocation2 + $0x398] sm:$0xf] }
 0x7c1   :  { %7150 = vmatpush.bf16.msrb.mxu0 %v13718_v55  ;;  %13843 = vmatmul.msk.bf16.vlgmr.msra.gmra.mxu1 %vm5202_vm11, %v20713_v56  ;;  %v13442_v55 = vor.u32 %v15879_v13, %v13439_v1  ;;  %v13249_v1 = vld [vmem:[#allocation2 + $0x88] sm:$0xf] }
 0x7c2   :  { %7175 = vmatpush.bf16.msrb.mxu1 %v13302_v41  ;;  %v13438_v41 = vor.u32 %v15882_v36, %v13437_v16  ;;  %v15960_v16 = vld [vmem:[#allocation2 + $0x490] sm:$0xf0] }
 0x7c3   :  { %7136 = vmatpush.bf16.msra.mxu3 %v13522_v59  ;;  %v15855_v59 = vld [vmem:[#allocation2 + $0x148] sm:$0xf0] }
 0x7c4   :  { %7187 = vmatpush.bf16.msrb.mxu2 %v13554_v50  ;;  %v15872_v50 = vld [vmem:[#allocation2 + $0x1d4] sm:$0xf]  ;;  %v13334_v23 = vor.u32 %v15855_v59, %v13333_v58  ;;  %v13193_v59 = vld [vmem:[#allocation2 + $0x18] sm:$0xf] }
 0x7c5   :  { %7151 = vmatpush.bf16.msrb.mxu0 %v13690_v24  ;;  %v13410_v24 = vor.u32 %v15875_v49, %v13409_v48  ;;  %v13414_v57 = vor.u32 %v15872_v50, %v13411_v38  ;;  %v13221_v49 = vld [vmem:[#allocation2 + $0x50] sm:$0xf]  ;;  %v15827_v50 = vld [vmem:[#allocation2 + $0x68] sm:$0xf0] }
 0x7c6   :  { %7176 = vmatpush.bf16.msrb.mxu1 %v13274_v15  ;;  %v13586_v15 = vor.u32 %v15918_v60, %v13585_v45  ;;  %v13719_v45 = vld [vmem:[#allocation2 + $0x454] sm:$0xf0] }
 0x7c7   :  { %7137 = vmatpush.bf16.msra.mxu3 %v13494_v27  ;;  %v13806_v27 = vor.u32 %v15970_v62, %v13803_v63  ;;  %v13722_v38 = vor.u32 %v15949_v43, %v13719_v45  ;;  %v13417_v62 = vld [vmem:[#allocation2 + $0x1d8] sm:$0xf]  ;;  %v15876_v63 = vld [vmem:[#allocation2 + $0x1f0] sm:$0xf0]  ;;  %v7413_v43 = vld [vmem:[%s21396_s11 + $0xc8] sm:$0xff] }
 0x7c8   :  { %7188 = vmatpush.bf16.msrb.mxu2 %v13526_v54  ;;  %v13834_v54 = vor.u32 %v15977_v31, %v13831_v53  ;;  %v13445_v53 = vld [vmem:[#allocation2 + $0x210] sm:$0xf] }
 0x7c9   :  { %7152 = vmatpush.bf16.msrb.mxu0 %v13662_v39  ;;  %v13558_v39 = vor.u32 %v15911_v61, %v13557_v42  ;;  %v13446_v58 = vor.u32 %v15883_v52, %v13445_v53  ;;  %v7433_v53 = vld [vmem:[%s21396_s11 + $0x168] sm:$0xff] }
 0x7ca   :  { %7177 = vmatpush.bf16.msrb.mxu1 %v13246_v0  ;;  %v15974_v0 = vld [vmem:[#allocation2 + $0x500] sm:$0xf0] }
 0x7cb   :  { %7138 = vmatpush.bf16.msra.mxu3 %v13466_v37  ;;  %v15897_v37 = vld [vmem:[#allocation2 + $0x298] sm:$0xf0] }
 0x7cc   :  { %7189 = vmatpush.bf16.msrb.mxu2 %v13498_v9  ;;  %v13810_v9 = vor.u32 %v15974_v0, %v13809_v22  ;;  %v13502_v13 = vor.u32 %v15897_v37, %v13501_v40  ;;  %v15935_v22 = vld [vmem:[#allocation2 + $0x3cc] sm:$0xf]  ;;  %v13663_v0 = vld [vmem:[#allocation2 + $0x3e4] sm:$0xf0]  ;;  %v7401_v40 = vld [vmem:[%s21396_s11 + $0x68] sm:$0xff] }
 0x7cd   :  { %7153 = vmatpush.bf16.msrb.mxu0 %v13634_v19  ;;  %v15841_v19 = vld [vmem:[#allocation2 + $0xd8] sm:$0xf0]  ;;  %v7418_v37 = vld [vmem:[%s21396_s11 + $0xf0] sm:$0xff] }
 0x7ce   :  { %7178 = vmatpush.bf16.msrb.mxu1 %v13218_v20  ;;  %v13306_v20 = vor.u32 %v15848_v10, %v13305_v4  ;;  %v13278_v36 = vor.u32 %v15841_v19, %v13277_v2 }
 0x7cf   :  { %7139 = vmatpush.bf16.msra.mxu3 %v13438_v41  ;;  %v13725_v41 = vld [vmem:[#allocation2 + $0x440] sm:$0xf] }
 0x7d0   :  { %7190 = vmatpush.bf16.msrb.mxu2 %v13470_v30  ;;  %7154 = vmatmul.bf16.vlgmr.msrb.gmra.mxu0 %v20711_v6  ;;  %v15956_v30 = vld [vmem:[#allocation2 + $0x474] sm:$0xf] }
 0x7d1   :  { %7218 = vmatpush.bf16.msra.mxu0 %v6907_v35  ;;  %v13750_v35 = vor.u32 %v15956_v30, %v13747_v34  ;;  %v7400_v30 = vld [vmem:[%s21396_s11 + $0x60] sm:$0xff]  ;;  %v7417_v34 = vld [vmem:[%s21396_s11 + $0xe8] sm:$0xff] }
 0x7d2   :  { %7179 = vmatpush.bf16.msrb.mxu1 %v13190_v32  ;;  %v15834_v32 = vld [vmem:[#allocation2 + $0xa0] sm:$0xf0] }
 0x7d3   :  { %7140 = vmatpush.bf16.msra.mxu3 %v13410_v24  ;;  %v13250_v60 = vor.u32 %v15834_v32, %v13249_v1  ;;  %v15946_v24 = vld [vmem:[#allocation2 + $0x420] sm:$0xf0]  ;;  %v7398_v32 = vld [vmem:[%s21396_s11 + $0x50] sm:$0xff] }
 0x7d4   :  { %7191 = vmatpush.bf16.msrb.mxu2 %v13442_v55  ;;  %v15953_v55 = vld [vmem:[#allocation2 + $0x458] sm:$0xf0] }
 0x7d5   :  { %7224 = vmatpush.bf16.msrb.mxu0 %v13390_v7  ;;  %7180 = vmatmul.bf16.vlgmr.msrb.gmra.mxu1 %v20718_v5  ;;  %v13754_v7 = vor.u32 %v15960_v16, %v13753_v25  ;;  %v13726_v31 = vor.u32 %v15953_v55, %v13725_v41  ;;  %v7399_v16 = vld [vmem:[%s21396_s11 + $0x58] sm:$0xff]  ;;  %v7412_v55 = vld [vmem:[%s21396_s11 + $0xc0] sm:$0xff] }
 0x7d6   :  { %7237 = vmatpush.bf16.msra.mxu1 %v13614_v51  ;;  %7141 = vmatmul.bf16.vlgmr.msra.gmra.mxu3 %v20728_v44  ;;  %v13473_v51 = vld [vmem:[#allocation2 + $0x248] sm:$0xf]  ;;  %v7395_v41 = vld [vmem:[%s21396_s11 + $0x38] sm:$0xff] }
 0x7d7   :  { %7198 = vmatpush.bf16.msrb.mxu3 %v13834_v54  ;;  %v13474_v48 = vor.u32 %v15890_v8, %v13473_v51  ;;  %v15820_v54 = vld [vmem:[#allocation2 + $0x30] sm:$0xf0]  ;;  %v7396_v8 = vld [vmem:[%s21396_s11 + $0x40] sm:$0xff] }
 0x7d8   :  { %7192 = vmatpush.bf16.msrb.mxu2 %v13414_v57  ;;  %v13222_v57 = vor.u32 %v15827_v50, %v13221_v49  ;;  %v13194_v10 = vor.u32 %v15820_v54, %v13193_v59  ;;  %v7394_v49 = vld [vmem:[%s21396_s11 + $0x30] sm:$0xff]  ;;  %v7411_v50 = vld [vmem:[%s21396_s11 + $0xb8] sm:$0xff] }
 0x7d9   :  { %7225 = vmatpush.bf16.msrb.mxu0 %v13362_v26  ;;  %v13691_v26 = vld [vmem:[#allocation2 + $0x41c] sm:$0xf0]  ;;  %v7431_v59 = vld [vmem:[%s21396_s11 + $0x158] sm:$0xff] }
 0x7da   :  { %7238 = vmatpush.bf16.msra.mxu1 %v13586_v15  ;;  %v13697_v15 = vld [vmem:[#allocation2 + $0x408] sm:$0xf]  ;;  %v13694_v42 = vor.u32 %v15942_v3, %v13691_v26  ;;  %v7392_v3 = vld [vmem:[%s21396_s11 + $0x20] sm:$0xff]  ;;  %v7409_v26 = vld [vmem:[%s21396_s11 + $0xa8] sm:$0xff] }
 0x7db   :  { %7193 = vmatmul.bf16.vlgmr.msrb.gmra.mxu2 %v20728_v44  ;;  %7199 = vmatpush.bf16.msrb.mxu3 %v13806_v27  ;;  %v13698_v61 = vor.u32 %v15946_v24, %v13697_v15  ;;  %v13418_v27 = vor.u32 %v15876_v63, %v13417_v62  ;;  %v7432_v15 = vld [vmem:[%s21396_s11 + $0x160] sm:$0xff]  ;;  %v7407_v54 = vld [vmem:[%s21396_s11 + $0x98] sm:$0xff] }
 0x7dc   :  { %7250 = vmatpush.bf16.msra.mxu2 %v13838_v18  ;;  %v6005_v18 = vld [vmem:[#allocation2 + $0x558] sm:$0xf] }
 0x7dd   :  { %7226 = vmatpush.bf16.msrb.mxu0 %v13334_v23  ;;  %v13669_v23 = vld [vmem:[#allocation2 + $0x3d0] sm:$0xf]  ;;  %v6544_v4 = vunpack.c.l.b16 %v6005_v18  ;;  %v7430_v18 = vld [vmem:[%s21396_s11 + $0x150] sm:$0xff] }
 0x7de   :  { %7239 = vmatpush.bf16.msra.mxu1 %v13558_v39  ;;  %v15939_v39 = vld [vmem:[#allocation2 + $0x3e8] sm:$0xf0] }
 0x7df   :  { %7200 = vmatpush.bf16.msrb.mxu3 %v13778_v28  ;;  %v13670_v14 = vor.u32 %v15939_v39, %v13669_v23  ;;  %v6719_v46 = vpack.c.b16 %v6544_v4, %v6544_v4  ;;  %v7429_v23 = vld [vmem:[%s21396_s11 + $0x148] sm:$0xff] }
 0x7e0   :  { %7251 = vmatpush.bf16.msra.mxu2 %v13810_v9  ;;  %13844 = vmatmul.msk.bf16.vlgmr.msra.gmra.mxu0 %vm5202_vm11, %v20713_v56  ;;  %v13666_v9 = vor.u32 %v15935_v22, %v13663_v0  ;;  %v7389_v22 = vld [vmem:[%s21396_s11 + $0x8] sm:$0xff]  ;;  %v7406_v0 = vld [vmem:[%s21396_s11 + $0x90] sm:$0xff] }
 0x7e1   :  { %7227 = vmatpush.bf16.msrb.mxu0 %v13306_v20  ;;  %v13638_v20 = vor.u32 %v15928_v11, %v13635_v47  ;;  %v6910_v2 = vsel %vm3348_vm8, %v6719_v46, 0  ;;  %v7404_v47 = vld [vmem:[%s21396_s11 + $0x80] sm:$0xff] }
 0x7e2   :  { %7240 = vmatpush.bf16.msra.mxu1 %v13530_v21  ;;  %v13642_v21 = vor.u32 %v15932_v12, %v13641_v17  ;;  %v7427_v17 = vld [vmem:[%s21396_s11 + $0x138] sm:$0xff] }
 0x7e3   :  { %7201 = vmatpush.bf16.msrb.mxu3 %v13750_v35  ;;  %v7397_v35 = vld [vmem:[%s21396_s11 + $0x48] sm:$0xff] }
 0x7e4   :  { %7252 = vmatpush.bf16.msra.mxu2 %v13782_v29  ;;  %v7403_v29 = vld [vmem:[%s21396_s11 + $0x78] sm:$0xff] }
 0x7e5   :  { %7228 = vmatpush.bf16.msrb.mxu0 %v13278_v36  ;;  %v7416_v36 = vld [vmem:[%s21396_s11 + $0xe0] sm:$0xff] }
 0x7e6   :  { %7241 = vmatpush.bf16.msra.mxu1 %v13502_v13  ;;  %v7415_v13 = vld [vmem:[%s21396_s11 + $0xd8] sm:$0xff] }
 0x7e7   :  { %7202 = vmatpush.bf16.msrb.mxu3 %v13722_v38  ;;  %v7434_v38 = vld [vmem:[%s21396_s11 + $0x170] sm:$0xff] }
 0x7e8   :  { %7253 = vmatpush.bf16.msra.mxu2 %v13754_v7  ;;  %v7414_v7 = vld [vmem:[%s21396_s11 + $0xd0] sm:$0xff] }
 0x7e9   :  { %7229 = vmatpush.bf16.msrb.mxu0 %v13250_v60  ;;  %v7435_v60 = vld [vmem:[%s21396_s11 + $0x178] sm:$0xff] }
 0x7ea   :  { %7242 = vmatpush.bf16.msra.mxu1 %v13474_v48 }
 0x7eb   :  { %7203 = vmatpush.bf16.msrb.mxu3 %v13694_v42 }
 0x7ec   :  { %7254 = vmatpush.bf16.msra.mxu2 %v13726_v31  ;;  %v7410_v31 = vld [vmem:[%s21396_s11 + $0xb0] sm:$0xff] }
 0x7ed   :  { %7230 = vmatpush.bf16.msrb.mxu0 %v13222_v57  ;;  %v20764_v19 = vpop.f32.mrf.mxu0  ;;  %v7391_v57 = vld [vmem:[%s21396_s11 + $0x18] sm:$0xff] }
 0x7ee   :  { %7243 = vmatpush.bf16.msra.mxu1 %v13446_v58  ;;  %v20766_v28 = vpop.f32.mrf.mxu1  ;;  %v7408_v58 = vld [vmem:[%s21396_s11 + $0xa0] sm:$0xff] }
 0x7ef   :  { %7204 = vmatpush.bf16.msrb.mxu3 %v13666_v9  ;;  %v7428_v9 = vld [vmem:[%s21396_s11 + $0x140] sm:$0xff] }
 0x7f0   :  { %7255 = vmatpush.bf16.msra.mxu2 %v13698_v61  ;;  %v7390_v61 = vld [vmem:[%s21396_s11 + $0x10] sm:$0xff] }
 0x7f1   :  { %7231 = vmatpush.bf16.msrb.mxu0 %v13194_v10  ;;  %v7388_v10 = vld [vmem:[%s21396_s11] sm:$0xff] }
 0x7f2   :  { %7244 = vmatpush.bf16.msra.mxu1 %v13418_v27  ;;  %v7405_v27 = vld [vmem:[%s21396_s11 + $0x88] sm:$0xff] }
 0x7f3   :  { %7205 = vmatpush.bf16.msrb.mxu3 %v13638_v20 }
 0x7f4   :  { %7256 = vmatpush.bf16.msra.mxu2 %v13670_v14  ;;  %7232 = vmatmul.bf16.vlgmr.msrb.gmra.mxu0 %v20718_v5  ;;  %v7402_v5 = vld [vmem:[%s21396_s11 + $0x70] sm:$0xff] }
 0x7f5   :  { %7245 = vmatmul.bf16.vlgmr.msra.gmra.mxu1 %v20728_v44  ;;  %v7419_v44 = vld [vmem:[%s21396_s11 + $0xf8] sm:$0xff] }
 0x7f6   :  { %7206 = vmatmul.bf16.vlgmr.msrb.gmra.mxu3 %v20711_v6  ;;  %7509 = vmatpush.msra.mxu0 %v7419_v44  ;;  %v6962_v25 = vpop.f32.mrf.mxu1  ;;  %v7425_v44 = vld [vmem:[%s21396_s11 + $0x128] sm:$0xff] }
 0x7f7   :  { %7270 = vmatpush.bf16.msra.mxu3 %v6910_v2  ;;  %7529 = vmatpush.msrb.mxu1 %v7435_v60  ;;  %v7426_v2 = vld [vmem:[%s21396_s11 + $0x130] sm:$0xff] }
 0x7f8   :  { %7257 = vmatpush.bf16.msra.mxu2 %v13642_v21  ;;  %7510 = vmatpush.msra.mxu0 %v7418_v37  ;;  %v7450_v25 = vld [vmem:[%s21396_s11 + $0x1f0] sm:$0xff] }
 0x7f9   :  { %v6921_v1 = vpop.f32.mrf.mxu2  ;;  %7530 = vmatpush.msrb.mxu1 %v7434_v38 }
 0x7fa   :  { %7511 = vmatpush.msra.mxu0 %v7417_v34  ;;  %v7424_v34 = vld [vmem:[%s21396_s11 + $0x120] sm:$0xff] }
 0x7fb   :  { %7258 = vmatmul.bf16.vlgmr.msra.gmra.mxu2 %v20711_v6  ;;  %7489 = vmatpush.msrb.mxu3 %v7403_v29  ;;  %v6949_v6 = vpop.f32.mrf.mxu0 }
 0x7fc   :  { %7512 = vmatpush.msra.mxu0 %v7416_v36  ;;  %7531 = vmatpush.msrb.mxu1 %v7433_v53  ;;  %v7420_v53 = vld [vmem:[%s21396_s11 + $0x100] sm:$0xff] }
 0x7fd   :  { %7490 = vmatpush.msrb.mxu3 %v7402_v5 }
 0x7fe   :  { %7513 = vmatpush.msra.mxu0 %v7415_v13  ;;  %v20817_v45 = vpop.f32.mrf.mxu1  ;;  %7532 = vmatpush.msrb.mxu1 %v7432_v15 }
 0x7ff   :  { %7491 = vmatpush.msrb.mxu3 %v7401_v40  ;;  %v7451_v40 = vld [vmem:[%s21396_s11 + $0x1f8] sm:$0xff] }
 0x800   :  { %7514 = vmatpush.msra.mxu0 %v7414_v7  ;;  %7533 = vmatpush.msrb.mxu1 %v7431_v59  ;;  %v7422_v7 = vld [vmem:[%s21396_s11 + $0x110] sm:$0xff] }
 0x801   :  { %7492 = vmatpush.msrb.mxu3 %v7400_v30  ;;  %v6923_v48 = vpop.f32.mrf.mxu2  ;;  %7549 = vmatpush.msrb.mxu2 %v7451_v40  ;;  %v7467_v40 = vld [vmem:[%s21396_s11 + $0x278] sm:$0xff] }
 0x802   :  { %7515 = vmatpush.msra.mxu0 %v7413_v43  ;;  %7534 = vmatpush.msrb.mxu1 %v7430_v18  ;;  %v7444_v18 = vld [vmem:[%s21396_s11 + $0x1c0] sm:$0xff] }
 0x803   :  { %7493 = vmatpush.msrb.mxu3 %v7399_v16  ;;  %v20809_v51 = vpop.f32.mrf.mxu0  ;;  %7550 = vmatpush.msrb.mxu2 %v7450_v25 }
 0x804   :  { %7516 = vmatpush.msra.mxu0 %v7412_v55  ;;  %7535 = vmatpush.msrb.mxu1 %v7429_v23  ;;  %v7442_v23 = vld [vmem:[%s21396_s11 + $0x1b0] sm:$0xff] }
 0x805   :  { %7494 = vmatpush.msrb.mxu3 %v7398_v32  ;;  %v7449_v32 = vld [vmem:[%s21396_s11 + $0x1e8] sm:$0xff] }
 0x806   :  { %13845 = vmatmul.msk.bf16.vlgmr.msra.gmra.mxu3 %vm5202_vm11, %v20713_v56  ;;  %7517 = vmatpush.msra.mxu0 %v7411_v50  ;;  %v7393_v56 = vld [vmem:[%s21396_s11 + $0x28] sm:$0xff]  ;;  %v6975_v24 = vpop.f32.mrf.mxu1  ;;  %v7447_v50 = vld [vmem:[%s21396_s11 + $0x1d8] sm:$0xff] }
 0x807   :  { %7495 = vmatpush.msrb.mxu3 %v7397_v35  ;;  %7536 = vmatpush.msrb.mxu1 %v7428_v9  ;;  %v7445_v24 = vld [vmem:[%s21396_s11 + $0x1c8] sm:$0xff] }
 0x808   :  { %7518 = vmatpush.msra.mxu0 %v7410_v31  ;;  %7551 = vmatpush.msrb.mxu2 %v7449_v32  ;;  %v7441_v9 = vld [vmem:[%s21396_s11 + $0x1a8] sm:$0xff] }
 0x809   :  { %7496 = vmatpush.msrb.mxu3 %v7396_v8  ;;  %v6934_v42 = vpop.f32.mrf.mxu3  ;;  %7537 = vmatpush.msrb.mxu1 %v7427_v17  ;;  %v7448_v8 = vld [vmem:[%s21396_s11 + $0x1e0] sm:$0xff] }
 0x80a   :  { %7519 = vmatpush.msra.mxu0 %v7409_v26  ;;  %v6935_v62 = vadd.f32 %v6934_v42, %v6921_v1  ;;  %v6986_v63 = vpop.f32.mrf.mxu2  ;;  %v7423_v1 = vld [vmem:[%s21396_s11 + $0x118] sm:$0xff]  ;;  %7552 = vmatpush.msrb.mxu2 %v7448_v8  ;;  %v7440_v17 = vld [vmem:[%s21396_s11 + $0x1a0] sm:$0xff] }
 0x80b   :  { %7497 = vmatpush.msrb.mxu3 %v7395_v41  ;;  %v7014_v52 = vpop.f32.mrf.mxu0  ;;  %7538 = vmatpush.msrb.mxu1 %v7426_v2  ;;  %v6987_v35 = vadd.f32 %v6986_v63, %v20817_v45  ;;  %v7421_v45 = vld [vmem:[%s21396_s11 + $0x108] sm:$0xff]  ;;  %v7443_v63 = vld [vmem:[%s21396_s11 + $0x1b8] sm:$0xff] }
 0x80c   :  { %7520 = vmatpush.msra.mxu0 %v7408_v58  ;;  %v6948_v39 = vadd.f32 %v20764_v19, %v6935_v62  ;;  %7553 = vmatpush.msrb.mxu2 %v7447_v50  ;;  %v7446_v52 = vld [vmem:[%s21396_s11 + $0x1d0] sm:$0xff] }
 0x80d   :  { %7498 = vmatpush.msrb.mxu3 %v7394_v49  ;;  %7539 = vmatpush.msrb.mxu1 %v7425_v44 }
 0x80e   :  { %7521 = vmatpush.msra.mxu0 %v7407_v54  ;;  %v20897_v14 = vadd.f32 %v20766_v28, %v6948_v39  ;;  %v20899_v11 = vpop.f32.mrf.mxu1  ;;  %7554 = vmatpush.msrb.mxu2 %v7446_v52  ;;  %v7462_v52 = vld [vmem:[%s21396_s11 + $0x250] sm:$0xff] }
 0x80f   :  { %7499 = vmatpush.msrb.mxu3 %v7393_v56  ;;  %7540 = vmatpush.msrb.mxu1 %v7424_v34 }
 0x810   :  { %7522 = vmatpush.msra.mxu0 %v7406_v0  ;;  %v7276_v12 = vsel %vm2928_vm1, %v20897_v14, 0.0  ;;  %v7325_v46 = vmul.f32 %v20897_v14, %v20897_v14  ;;  %7555 = vmatpush.msrb.mxu2 %v7445_v24 }
 0x811   :  { %7500 = vmatpush.msrb.mxu3 %v7392_v3  ;;  %v7277_v20 = vrot.slane %v7276_v12, 4  ;;  %v6936_v21 = vpop.f32.mrf.mxu3  ;;  %7541 = vmatpush.msrb.mxu1 %v7423_v1 }
 0x812   :  { %7523 = vmatpush.msra.mxu0 %v7405_v27  ;;  %v7332_v19 = vsel %vm2928_vm1, %v7325_v46, 0.0  ;;  %v6988_v28 = vpop.f32.mrf.mxu2  ;;  %7556 = vmatpush.msrb.mxu2 %v7444_v18  ;;  %v7459_v18 = vld [vmem:[%s21396_s11 + $0x238] sm:$0xff] }
 0x813   :  { %7501 = vmatpush.msrb.mxu3 %v7391_v57  ;;  %v20885_v4 = vpop.f32.mrf.mxu0  ;;  %v7278_v29 = vadd.f32 %v7277_v20, %v7276_v12  ;;  %v7333_v5 = vrot.slane %v7332_v19, 4  ;;  %7542 = vmatpush.msrb.mxu1 %v7422_v7  ;;  %v7439_v28 = vld [vmem:[%s21396_s11 + $0x198] sm:$0xff] }
 0x814   :  { %7524 = vmatpush.msra.mxu0 %v7404_v47  ;;  %7557 = vmatpush.msrb.mxu2 %v7443_v63  ;;  %v7039_v39 = vadd.f32 %v20899_v11, %v20885_v4 }
 0x815   :  { %7502 = vmatpush.msrb.mxu3 %v7390_v61  ;;  %v7279_v37 = vrot.slane %v7278_v29, 2  ;;  %v7334_v6 = vadd.f32 %v7333_v5, %v7332_v19  ;;  %7543 = vmatpush.msrb.mxu1 %v7421_v45 }
 0x816   :  { %v7040_v16 = vpop.f32.mrf.mxu1  ;;  %7558 = vmatpush.msrb.mxu2 %v7442_v23 }
 0x817   :  { %7503 = vmatpush.msrb.mxu3 %v7389_v22  ;;  %v7280_v36 = vadd.f32 %v7279_v37, %v7278_v29  ;;  %v7335_v13 = vrot.slane %v7334_v6, 2  ;;  %7544 = vmatpush.msrb.mxu1 %v7420_v53  ;;  %v7438_v29 = vld [vmem:[%s21396_s11 + $0x190] sm:$0xff] }
 0x818   :  { %7559 = vmatpush.msrb.mxu2 %v7441_v9 }
 0x819   :  { %7504 = vmatpush.msrb.mxu3 %v7388_v10  ;;  %v6999_v43 = vpop.f32.mrf.mxu3  ;;  %v7281_v41 = vrot.slane %v7280_v36, 1  ;;  %v7336_v55 = vadd.f32 %v7335_v13, %v7334_v6  ;;  %v7466_v13 = vld [vmem:[%s21396_s11 + $0x270] sm:$0xff] }
 0x81a   :  { %v7000_v60 = vadd.f32 %v6999_v43, %v6987_v35  ;;  %v7051_v48 = vpop.f32.mrf.mxu2  ;;  %7560 = vmatpush.msrb.mxu2 %v7440_v17  ;;  %v7455_v17 = vld [vmem:[%s21396_s11 + $0x218] sm:$0xff] }
 0x81b   :  { %v7027_v30 = vpop.f32.mrf.mxu0  ;;  %v7337_v49 = vrot.slane %v7336_v55, 1  ;;  %v7282_v56 = vadd.f32 %v7281_v41, %v7280_v36  ;;  %v7052_v47 = vadd.f32 %v7051_v48, %v7039_v39  ;;  %7569 = vmatpush.msra.mxu3 %v7467_v40  ;;  %v7436_v36 = vld [vmem:[%s21396_s11 + $0x180] sm:$0xff] }
 0x81c   :  { %v20947_v38 = vadd.f32 %v20809_v51, %v7000_v60  ;;  %7561 = vmatpush.msrb.mxu2 %v7439_v28  ;;  %v7437_v30 = vld [vmem:[%s21396_s11 + $0x188] sm:$0xff]  ;;  %v7464_v48 = vld [vmem:[%s21396_s11 + $0x260] sm:$0xff] }
 0x81d   :  { %v7338_v31 = vadd.f32 %v7337_v49, %v7336_v55  ;;  %7570 = vmatpush.msra.mxu3 %v7466_v13  ;;  %v7465_v60 = vld [vmem:[%s21396_s11 + $0x268] sm:$0xff]  ;;  %v7480_v13 = vld [vmem:[%s21396_s11 + $0x2e0] sm:$0xff] }
 0x81e   :  { %v7283_v3 = vsel %vm2928_vm1, %v20947_v38, 0.0  ;;  %v7326_v26 = vmul.f32 %v20947_v38, %v20947_v38  ;;  %7562 = vmatpush.msrb.mxu2 %v7438_v29  ;;  %v7483_v29 = vld [vmem:[%s21396_s11 + $0x2f8] sm:$0xff] }
 0x81f   :  { %v7284_v51 = vrot.slane %v7283_v3, 4  ;;  %v7381_v15 = vsel %vm3035_vm2, %v7282_v56, %v7338_v31  ;;  %7571 = vmatpush.msra.mxu3 %v7465_v60  ;;  %v7463_v56 = vld [vmem:[%s21396_s11 + $0x258] sm:$0xff]  ;;  %7589 = vmatpush.msrb.mxu0 %v7483_v29  ;;  %v7476_v60 = vld [vmem:[%s21396_s11 + $0x2c0] sm:$0xff] }
 0x820   :  { %v7339_v57 = vsel %vm2928_vm1, %v7326_v26, 0.0  ;;  %7505 = vmatmul.f32.vlgmr.msrb.gmra.mxu3 %v7381_v15  ;;  %7563 = vmatpush.msrb.mxu2 %v7437_v30 }
 0x821   :  { %v7285_v58 = vadd.f32 %v7284_v51, %v7283_v3  ;;  %v7340_v59 = vrot.slane %v7339_v57, 4  ;;  %v7001_v54 = vpop.f32.mrf.mxu3  ;;  %7572 = vmatpush.msra.mxu3 %v7464_v48 }
 0x822   :  { %v7053_v42 = vpop.f32.mrf.mxu2  ;;  %7564 = vmatpush.msrb.mxu2 %v7436_v36 }
 0x823   :  { %v7286_v61 = vrot.slane %v7285_v58, 2  ;;  %v7341_v62 = vadd.f32 %v7340_v59, %v7339_v57  ;;  %7573 = vmatpush.msra.mxu3 %v7463_v56  ;;  %v7461_v57 = vld [vmem:[%s21396_s11 + $0x248] sm:$0xff]  ;;  %v7460_v59 = vld [vmem:[%s21396_s11 + $0x240] sm:$0xff] }
 0x825   :  { %v7287_v22 = vadd.f32 %v7286_v61, %v7285_v58  ;;  %v7342_v0 = vrot.slane %v7341_v62, 2  ;;  %7574 = vmatpush.msra.mxu3 %v7462_v52 }
 0x827   :  { %v7288_v10 = vrot.slane %v7287_v22, 1  ;;  %v7343_v27 = vadd.f32 %v7342_v0, %v7341_v62  ;;  %7575 = vmatpush.msra.mxu3 %v7461_v57  ;;  %v7458_v62 = vld [vmem:[%s21396_s11 + $0x230] sm:$0xff] }
 0x829   :  { %v7064_v12 = vpop.f32.mrf.mxu3  ;;  %v7344_v46 = vrot.slane %v7343_v27, 1  ;;  %v7289_v11 = vadd.f32 %v7288_v10, %v7287_v22  ;;  %7576 = vmatpush.msra.mxu3 %v7460_v59  ;;  %v7457_v10 = vld [vmem:[%s21396_s11 + $0x228] sm:$0xff]  ;;  %v7471_v59 = vld [vmem:[%s21396_s11 + $0x298] sm:$0xff] }
 0x82a   :  { %v20981_v20 = vadd.f32 %v7064_v12, %v7052_v47  ;;  %v7116_v2 = vpop.f32.mrf.mxu2  ;;  %v7456_v47 = vld [vmem:[%s21396_s11 + $0x220] sm:$0xff] }
 0x82b   :  { %v7345_v19 = vadd.f32 %v7344_v46, %v7343_v27  ;;  %7577 = vmatpush.msra.mxu3 %v7459_v18 }
 0x82c   :  { %v7290_v5 = vsel %vm2928_vm1, %v20981_v20, 0.0  ;;  %v7327_v44 = vmul.f32 %v20981_v20, %v20981_v20 }
 0x82d   :  { %v7090_v21 = vpop.f32.mrf.mxu0  ;;  %v7291_v37 = vrot.slane %v7290_v5, 4  ;;  %v7382_v6 = vsel %vm3035_vm2, %v7289_v11, %v7345_v19  ;;  %7578 = vmatpush.msra.mxu3 %v7458_v62  ;;  %v7454_v11 = vld [vmem:[%s21396_s11 + $0x210] sm:$0xff] }
 0x82e   :  { %v7103_v4 = vpop.f32.mrf.mxu1  ;;  %v7346_v34 = vsel %vm2928_vm1, %v7327_v44, 0.0  ;;  %7525 = vmatmul.f32.vlgmr.msra.gmra.mxu0 %v7382_v6  ;;  %v7482_v44 = vld [vmem:[%s21396_s11 + $0x2f0] sm:$0xff] }
 0x82f   :  { %v7292_v25 = vadd.f32 %v7291_v37, %v7290_v5  ;;  %v7347_v16 = vrot.slane %v7346_v34, 4  ;;  %7579 = vmatpush.msra.mxu3 %v7457_v10  ;;  %v7453_v5 = vld [vmem:[%s21396_s11 + $0x208] sm:$0xff]  ;;  %v7452_v37 = vld [vmem:[%s21396_s11 + $0x200] sm:$0xff]  ;;  %7590 = vmatpush.msrb.mxu0 %v7482_v44 }
 0x831   :  { %v7293_v1 = vrot.slane %v7292_v25, 2  ;;  %v7348_v32 = vadd.f32 %v7347_v16, %v7346_v34  ;;  %v7066_v35 = vpop.f32.mrf.mxu3  ;;  %7580 = vmatpush.msra.mxu3 %v7456_v47 }
 0x832   :  { %v7118_v8 = vpop.f32.mrf.mxu2  ;;  %v7478_v35 = vld [vmem:[%s21396_s11 + $0x2d0] sm:$0xff] }
 0x833   :  { %v7294_v43 = vadd.f32 %v7293_v1, %v7292_v25  ;;  %v7349_v41 = vrot.slane %v7348_v32, 2  ;;  %7581 = vmatpush.msra.mxu3 %v7455_v17  ;;  %v7481_v25 = vld [vmem:[%s21396_s11 + $0x2e8] sm:$0xff]  ;;  %v7479_v1 = vld [vmem:[%s21396_s11 + $0x2d8] sm:$0xff] }
 0x834   :  { %7591 = vmatpush.msrb.mxu0 %v7481_v25 }
 0x835   :  { %v7092_v7 = vpop.f32.mrf.mxu0  ;;  %v7295_v49 = vrot.slane %v7294_v43, 1  ;;  %v7350_v45 = vadd.f32 %v7349_v41, %v7348_v32  ;;  %7582 = vmatpush.msra.mxu3 %v7454_v11 }
 0x836   :  { %v7105_v55 = vpop.f32.mrf.mxu1  ;;  %7592 = vmatpush.msrb.mxu0 %v7480_v13  ;;  %v7477_v7 = vld [vmem:[%s21396_s11 + $0x2c8] sm:$0xff] }
 0x837   :  { %v7351_v50 = vrot.slane %v7350_v45, 1  ;;  %v7296_v31 = vadd.f32 %v7295_v49, %v7294_v43  ;;  %7583 = vmatpush.msra.mxu3 %v7453_v5  ;;  %v7475_v49 = vld [vmem:[%s21396_s11 + $0x2b8] sm:$0xff] }
 0x838   :  { %7593 = vmatpush.msrb.mxu0 %v7479_v1 }
 0x839   :  { %v7352_v53 = vadd.f32 %v7351_v50, %v7350_v45  ;;  %v7077_v3 = vpop.f32.mrf.mxu3  ;;  %7584 = vmatpush.msra.mxu3 %v7452_v37  ;;  %v7474_v50 = vld [vmem:[%s21396_s11 + $0x2b0] sm:$0xff] }
 0x83a   :  { %v7091_v26 = vadd.f32 %v7090_v21, %v7077_v3  ;;  %7594 = vmatpush.msrb.mxu0 %v7478_v35 }
 0x83b   :  { %v7383_v24 = vsel %vm3035_vm2, %v7296_v31, %v7352_v53  ;;  %v7473_v53 = vld [vmem:[%s21396_s11 + $0x2a8] sm:$0xff] }
 0x83c   :  { %7545 = vmatmul.f32.vlgmr.msrb.gmra.mxu1 %v7383_v24  ;;  %v7104_v58 = vadd.f32 %v7103_v4, %v7091_v26  ;;  %7595 = vmatpush.msrb.mxu0 %v7477_v7  ;;  %v7472_v24 = vld [vmem:[%s21396_s11 + $0x2a0] sm:$0xff] }
 0x83e   :  { %v21019_v51 = vpop.f32.mrf.mxu2  ;;  %v21021_v15 = vpop.f32.mrf.mxu1  ;;  %v21030_v54 = vadd.f32 %v7116_v2, %v7104_v58  ;;  %7596 = vmatpush.msrb.mxu0 %v7476_v60 }
 0x840   :  { %v7297_v42 = vsel %vm2928_vm1, %v21030_v54, 0.0  ;;  %v7328_v61 = vmul.f32 %v21030_v54, %v21030_v54  ;;  %7597 = vmatpush.msrb.mxu0 %v7475_v49 }
 0x841   :  { %v7298_v63 = vrot.slane %v7297_v42, 4  ;;  %v7079_v22 = vpop.f32.mrf.mxu3 }
 0x842   :  { %v7353_v0 = vsel %vm2928_vm1, %v7328_v61, 0.0  ;;  %7598 = vmatpush.msrb.mxu0 %v7474_v50  ;;  %v7470_v61 = vld [vmem:[%s21396_s11 + $0x290] sm:$0xff]  ;;  %v7469_v22 = vld [vmem:[%s21396_s11 + $0x288] sm:$0xff] }
 0x843   :  { %v7299_v27 = vadd.f32 %v7298_v63, %v7297_v42  ;;  %v7354_v9 = vrot.slane %v7353_v0, 4 }
 0x844   :  { %7599 = vmatpush.msrb.mxu0 %v7473_v53 }
 0x845   :  { %v7300_v12 = vrot.slane %v7299_v27, 2  ;;  %v7355_v46 = vadd.f32 %v7354_v9, %v7353_v0 }
 0x846   :  { %v7131_v23 = vpop.f32.mrf.mxu2  ;;  %v7170_v39 = vpop.f32.mrf.mxu1  ;;  %7600 = vmatpush.msrb.mxu0 %v7472_v24 }
 0x847   :  { %v7301_v21 = vadd.f32 %v7300_v12, %v7299_v27  ;;  %v7356_v2 = vrot.slane %v7355_v46, 2  ;;  %v7468_v39 = vld [vmem:[%s21396_s11 + $0x280] sm:$0xff] }
 0x848   :  { %7601 = vmatpush.msrb.mxu0 %v7471_v59 }
 0x849   :  { %v7302_v19 = vrot.slane %v7301_v21, 1  ;;  %v7357_v28 = vadd.f32 %v7356_v2, %v7355_v46 }
 0x84a   :  { %7602 = vmatpush.msrb.mxu0 %v7470_v61 }
 0x84b   :  { %v7358_v6 = vrot.slane %v7357_v28, 1  ;;  %v7303_v30 = vadd.f32 %v7302_v19, %v7301_v21  ;;  %v7485_v19 = vld [vmem:[%s21396_s11 + $0x308] sm:$0xff] }
 0x84c   :  { %7603 = vmatpush.msrb.mxu0 %v7469_v22  ;;  %7623 = vmatpush.msra.mxu1 %v7485_v19 }
 0x84d   :  { %v7155_v4 = vpop.f32.mrf.mxu0  ;;  %v7359_v34 = vadd.f32 %v7358_v6, %v7357_v28  ;;  %v7484_v28 = vld [vmem:[%s21396_s11 + $0x300] sm:$0xff] }
 0x84e   :  { %7604 = vmatpush.msrb.mxu0 %v7468_v39  ;;  %7624 = vmatpush.msra.mxu1 %v7484_v28 }
 0x84f   :  { %v7384_v36 = vsel %vm3035_vm2, %v7303_v30, %v7359_v34 }
 0x850   :  { %7565 = vmatmul.f32.vlgmr.msrb.gmra.mxu2 %v7384_v36 }
 0x852   :  { %v21064_v40 = vpop.f32.mrf.mxu1 }
 0x855   :  { %v7157_v16 = vpop.f32.mrf.mxu0 }
 0x859   :  { %v7142_v8 = vpop.f32.mrf.mxu3 }
 0x85a   :  { %v7183_v32 = vpop.f32.mrf.mxu1  ;;  %v7143_v41 = vadd.f32 %v7142_v8, %v21019_v51 }
 0x85c   :  { %v7156_v48 = vadd.f32 %v7155_v4, %v7143_v41 }
 0x85d   :  { %v7220_v55 = vpop.f32.mrf.mxu0 }
 0x85e   :  { %v7194_v43 = vpop.f32.mrf.mxu2  ;;  %v21093_v45 = vadd.f32 %v21021_v15, %v7156_v48 }
 0x85f   :  { %v7195_v2 = vadd.f32 %v7194_v43, %v21064_v40 }
 0x860   :  { %v7304_v56 = vsel %vm2928_vm1, %v21093_v45, 0.0  ;;  %v7329_v31 = vmul.f32 %v21093_v45, %v21093_v45 }
 0x861   :  { %v7305_v52 = vrot.slane %v7304_v56, 4  ;;  %v7144_v3 = vpop.f32.mrf.mxu3 }
 0x862   :  { %v7360_v51 = vsel %vm2928_vm1, %v7329_v31, 0.0 }
 0x863   :  { %v7306_v57 = vadd.f32 %v7305_v52, %v7304_v56  ;;  %v7361_v58 = vrot.slane %v7360_v51, 4 }
 0x865   :  { %v7222_v15 = vpop.f32.mrf.mxu0  ;;  %v7307_v18 = vrot.slane %v7306_v57, 2  ;;  %v7362_v42 = vadd.f32 %v7361_v58, %v7360_v51 }
 0x866   :  { %v7196_v26 = vpop.f32.mrf.mxu2 }
 0x867   :  { %v7308_v62 = vadd.f32 %v7307_v18, %v7306_v57  ;;  %v7363_v63 = vrot.slane %v7362_v42, 2 }
 0x869   :  { %v7309_v0 = vrot.slane %v7308_v62, 1  ;;  %v7364_v23 = vadd.f32 %v7363_v63, %v7362_v42 }
 0x86b   :  { %v7365_v9 = vrot.slane %v7364_v23, 1  ;;  %v7310_v47 = vadd.f32 %v7309_v0, %v7308_v62 }
 0x86d   :  { %v7366_v17 = vadd.f32 %v7365_v9, %v7364_v23 }
 0x86f   :  { %v7385_v12 = vsel %vm3035_vm2, %v7310_v47, %v7366_v17 }
 0x870   :  { %7585 = vmatmul.f32.vlgmr.msra.gmra.mxu3 %v7385_v12 }
 0x871   :  { %v7233_v10 = vpop.f32.mrf.mxu0 }
 0x872   :  { %v7246_v27 = vpop.f32.mrf.mxu1 }
 0x873   :  { %v7247_v35 = vadd.f32 %v7246_v27, %v7233_v10 }
 0x879   :  { %v7235_v46 = vpop.f32.mrf.mxu0  ;;  %v7207_v4 = vpop.f32.mrf.mxu3 }
 0x87a   :  { %v7248_v21 = vpop.f32.mrf.mxu1  ;;  %v7208_v29 = vadd.f32 %v7207_v4, %v7195_v2 }
 0x87c   :  { %v21129_v5 = vadd.f32 %v7220_v55, %v7208_v29 }
 0x87e   :  { %v7259_v11 = vpop.f32.mrf.mxu2  ;;  %v7311_v44 = vsel %vm2928_vm1, %v21129_v5, 0.0  ;;  %v7330_v40 = vmul.f32 %v21129_v5, %v21129_v5 }
 0x87f   :  { %v7312_v37 = vrot.slane %v7311_v44, 4  ;;  %v7260_v43 = vadd.f32 %v7259_v11, %v7247_v35  ;;  %v7653_v35 = vld [vmem:[%s21405_s20] sm:$0x1]  ;;  %s21428_s20 = sld [smem:[#allocation15_spill]] }
 0x880   :  { %v7367_v6 = vsel %vm2928_vm1, %v7330_v40, 0.0 }
 0x881   :  { %v7313_v30 = vadd.f32 %v7312_v37, %v7311_v44  ;;  %v7368_v34 = vrot.slane %v7367_v6, 4  ;;  %v7209_v25 = vpop.f32.mrf.mxu3 }
 0x883   :  { %v7314_v36 = vrot.slane %v7313_v30, 2  ;;  %v7369_v13 = vadd.f32 %v7368_v34, %v7367_v6 }
 0x885   :  { %v7315_v1 = vadd.f32 %v7314_v36, %v7313_v30  ;;  %v7370_v32 = vrot.slane %v7369_v13, 2  ;;  %v7661_v36 = vld [vmem:[%s21397_s12 + $0x8] sm:$0xff] }
 0x886   :  { %v7261_v16 = vpop.f32.mrf.mxu2 }
 0x887   :  { %v7316_v7 = vrot.slane %v7315_v1, 1  ;;  %v7371_v8 = vadd.f32 %v7370_v32, %v7369_v13  ;;  %v7660_v16 = vld [vmem:[%s21397_s12] sm:$0xff] }
 0x889   :  { %v7272_v41 = vpop.f32.mrf.mxu3  ;;  %v7372_v55 = vrot.slane %v7371_v8, 1  ;;  %v7317_v48 = vadd.f32 %v7316_v7, %v7315_v1  ;;  %v7662_v1 = vld [vmem:[%s21397_s12 + $0x10] sm:$0xff]  ;;  %v14283_v7 = vld [vmem:[#allocation4 + $0x348] sm:$0xf] }
 0x88a   :  { %v21136_v60 = vadd.f32 %v7272_v41, %v7260_v43 }
 0x88b   :  { %v7373_v49 = vadd.f32 %v7372_v55, %v7371_v8  ;;  %v16090_v8 = vld [vmem:[#allocation4 + $0x360] sm:$0xf0]  ;;  %v14059_v55 = vld [vmem:[#allocation4 + $0x188] sm:$0xf] }
 0x88c   :  { %v7318_v50 = vsel %vm2971_vm3, %v21136_v60, 0.0  ;;  %v7331_v56 = vmul.f32 %v21136_v60, %v21136_v60  ;;  %v14284_v41 = vor.u32 %v16090_v8, %v14283_v7  ;;  %v16146_v7 = vld [vmem:[#allocation4 + $0x520] sm:$0xf0] }
 0x88d   :  { %v7319_v31 = vrot.slane %v7318_v50, 4  ;;  %v7386_v53 = vsel %vm3035_vm2, %v7317_v48, %v7373_v49  ;;  %v16034_v48 = vld [vmem:[#allocation4 + $0x1a0] sm:$0xf0] }
 0x88e   :  { %v7374_v52 = vsel %vm2971_vm3, %v7331_v56, 0.0  ;;  %7605 = vmatmul.f32.vlgmr.msrb.gmra.mxu0 %v7386_v53  ;;  %v14060_v56 = vor.u32 %v16034_v48, %v14059_v55  ;;  %v14031_v53 = vld [vmem:[#allocation4 + $0x150] sm:$0xf]  ;;  %v16188_v55 = vld [vmem:[#allocation4 + $0x670] sm:$0xf0] }
 0x88f   :  { %v7320_v3 = vadd.f32 %v7319_v31, %v7318_v50  ;;  %v7375_v26 = vrot.slane %v7374_v52, 4  ;;  %10069 = vmatpush.bf16.msra.mxu0 %v14284_v41  ;;  %v14255_v50 = vld [vmem:[#allocation4 + $0x310] sm:$0xf]  ;;  %v16083_v31 = vld [vmem:[#allocation4 + $0x328] sm:$0xf0] }
 0x890   :  { %10056 = vmatpush.bf16.msrb.mxu3 %v14060_v56  ;;  %v14675_v41 = vld [vmem:[#allocation4 + $0x658] sm:$0xf]  ;;  %v14479_v48 = vld [vmem:[#allocation4 + $0x4d0] sm:$0xf]  ;;  %v16041_v56 = vld [vmem:[#allocation4 + $0x1d8] sm:$0xf0] }
 0x891   :  { %v7321_v51 = vrot.slane %v7320_v3, 2  ;;  %v7376_v15 = vadd.f32 %v7375_v26, %v7374_v52  ;;  %v7274_v24 = vpop.f32.mrf.mxu3  ;;  %v16027_v52 = vld [vmem:[#allocation4 + $0x168] sm:$0xf0] }
 0x892   :  { %v16076_v24 = vld [vmem:[#allocation4 + $0x2f0] sm:$0xf0] }
 0x893   :  { %v7322_v57 = vadd.f32 %v7321_v51, %v7320_v3  ;;  %v7377_v58 = vrot.slane %v7376_v15, 2 }
 0x895   :  { %v7323_v59 = vrot.slane %v7322_v57, 1  ;;  %v7378_v18 = vadd.f32 %v7377_v58, %v7376_v15  ;;  %v14227_v15 = vld [vmem:[#allocation4 + $0x2d8] sm:$0xf] }
 0x897   :  { %v7379_v42 = vrot.slane %v7378_v18, 1  ;;  %v7324_v61 = vadd.f32 %v7323_v59, %v7322_v57 }
 0x899   :  { %v7380_v62 = vadd.f32 %v7379_v42, %v7378_v18  ;;  %v14256_v18 = vor.u32 %v16083_v31, %v14255_v50  ;;  %v14032_v42 = vor.u32 %v16027_v52, %v14031_v53  ;;  %v14087_v50 = vld [vmem:[#allocation4 + $0x1c0] sm:$0xf]  ;;  %v16139_v53 = vld [vmem:[#allocation4 + $0x4e8] sm:$0xf0]  ;;  %v15179_v52 = vld [vmem:[#allocation4 + $0xa48] sm:$0xf] }
 0x89b   :  { %v7387_v63 = vsel %vm3035_vm2, %v7324_v61, %v7380_v62  ;;  %10070 = vmatpush.bf16.msra.mxu0 %v14256_v18  ;;  %10057 = vmatpush.bf16.msrb.mxu3 %v14032_v42  ;;  %v14647_v18 = vld [vmem:[#allocation4 + $0x620] sm:$0xf]  ;;  %v16181_v42 = vld [vmem:[#allocation4 + $0x638] sm:$0xf0] }
 0x89c   :  { %13846 = vmatmul.msk.f32.vlgmr.msra.gmra.mxu1 %vm2287_vm0, %v7387_v63  ;;  %v14003_v63 = vld [vmem:[#allocation4 + $0x118] sm:$0xf] }
 0x8a3   :  { %v7506_v22 = vpop.f32.mrf.mxu3 }
 0x8ab   :  { %v7526_v0 = vpop.f32.mrf.mxu0 }
 0x8ac   :  { %v7527_v39 = vadd.f32 %v7526_v0, %v7506_v22  ;;  %v16020_v22 = vld [vmem:[#allocation4 + $0x130] sm:$0xf0]  ;;  %v14228_v0 = vor.u32 %v16076_v24, %v14227_v15  ;;  %v14676_v15 = vor.u32 %v16188_v55, %v14675_v41  ;;  %v16314_v24 = vld [vmem:[#allocation4 + $0xa60] sm:$0xf0]  ;;  %v14033_v41 = vld [vmem:[#allocation4 + $0x16c] sm:$0xf0] }
 0x8ae   :  { %10071 = vmatpush.bf16.msra.mxu0 %v14228_v0 }
 0x8b9   :  { %v7546_v23 = vpop.f32.mrf.mxu1 }
 0x8ba   :  { %v7547_v27 = vadd.f32 %v7546_v23, %v7527_v39  ;;  %v14199_v23 = vld [vmem:[#allocation4 + $0x2a0] sm:$0xf]  ;;  %v14004_v39 = vor.u32 %v16020_v22, %v14003_v63  ;;  %v15180_v63 = vor.u32 %v16314_v24, %v15179_v52  ;;  %v15151_v22 = vld [vmem:[#allocation4 + $0xa10] sm:$0xf]  ;;  %v14451_v52 = vld [vmem:[#allocation4 + $0x498] sm:$0xf] }
 0x8bb   :  { %v16010_v24 = vld [vmem:[#allocation4 + $0xe4] sm:$0xf] }
 0x8bc   :  { %10058 = vmatpush.bf16.msrb.mxu3 %v14004_v39  ;;  %v16307_v39 = vld [vmem:[#allocation4 + $0xa28] sm:$0xf0] }
 0x8d3   :  { %v7566_v10 = vpop.f32.mrf.mxu2 }
 0x8d4   :  { %v7567_v47 = vadd.f32 %v7566_v10, %v7547_v27  ;;  %v16069_v10 = vld [vmem:[#allocation4 + $0x2b8] sm:$0xf0]  ;;  %v13975_v27 = vld [vmem:[#allocation4 + $0xe0] sm:$0xf] }
 0x8f3   :  { %v7586_v9 = vpop.f32.mrf.mxu3 }
 0x8f4   :  { %v7587_v12 = vadd.f32 %v7586_v9, %v7567_v47  ;;  %v16013_v9 = vld [vmem:[#allocation4 + $0xf8] sm:$0xf0]  ;;  %v7681_v47 = vld.sshfl [vmem:[#allocation1 + $0x30] sm:$0xff pattern:$0x75316420] }
 0x90b   :  { %v7606_v17 = vpop.f32.mrf.mxu0 }
 0x90c   :  { %v7607_v46 = vadd.f32 %v7606_v17, %v7587_v12  ;;  %v14200_v17 = vor.u32 %v16069_v10, %v14199_v23  ;;  %v14171_v12 = vld [vmem:[#allocation4 + $0x268] sm:$0xf]  ;;  %v14648_v23 = vor.u32 %v16181_v42, %v14647_v18  ;;  %v14927_v10 = vld [vmem:[#allocation4 + $0x850] sm:$0xf] }
 0x90d   :  { %v14843_v42 = vld [vmem:[#allocation4 + $0x7a8] sm:$0xf] }
 0x90e   :  { %10072 = vmatpush.bf16.msra.mxu0 %v14200_v17  ;;  %v15152_v17 = vor.u32 %v16307_v39, %v15151_v22  ;;  %v16125_v22 = vld [vmem:[#allocation4 + $0x478] sm:$0xf0]  ;;  %v16272_v39 = vld [vmem:[#allocation4 + $0x910] sm:$0xf0] }
 0x919   :  { %v7626_v21 = vpop.f32.mrf.mxu1 }
 0x91a   :  { %v7627_v2 = vadd.f32 %v7626_v21, %v7607_v46  ;;  %v13976_v46 = vor.u32 %v16013_v9, %v13975_v27  ;;  %v16062_v21 = vld [vmem:[#allocation4 + $0x280] sm:$0xf0]  ;;  %v16251_v27 = vld [vmem:[#allocation4 + $0x868] sm:$0xf0]  ;;  %v14619_v9 = vld [vmem:[#allocation4 + $0x5e8] sm:$0xf] }
 0x91c   :  { %v7629_v4 = vmul.f32 %v7627_v2, %v19092_v33  ;;  %v7635_v33 = vld [vmem:[%s21404_s19] sm:$0x1]  ;;  %v13947_v2 = vld [vmem:[#allocation4 + $0xa8] sm:$0xf]  ;;  %10059 = vmatpush.bf16.msrb.mxu3 %v13976_v46  ;;  %v14928_v46 = vor.u32 %v16251_v27, %v14927_v10  ;;  %v16003_v10 = vld [vmem:[#allocation4 + $0xac] sm:$0xf] }
 0x91e   :  { %v7630_v11 = vmul.f32 %v7629_v4, %v7629_v4 }
 0x920   :  { %v7632_v19 = vrot.slane %v7630_v11, 7  ;;  %v14731_v11 = vld [vmem:[#allocation4 + $0x6c8] sm:$0xf] }
 0x922   :  { %v7634_v28 = vsub.f32 %v7629_v4, %v7632_v19  ;;  %v16202_v19 = vld [vmem:[#allocation4 + $0x6e0] sm:$0xf0] }
 0x924   :  { %v7636_v29 = vadd.f32 1e-05, %v7634_v28  ;;  %v14172_v28 = vor.u32 %v16062_v21, %v14171_v12  ;;  %v15123_v12 = vld [vmem:[#allocation4 + $0x9d8] sm:$0xf]  ;;  %v16300_v21 = vld [vmem:[#allocation4 + $0x9f0] sm:$0xf0] }
 0x926   :  { %16344 = vrsqrt.f32 %v7636_v29  ;;  %vm7643_vm5 = vweird.f32 %v7636_v29  ;;  %10073 = vmatpush.bf16.msra.mxu0 %v14172_v28  ;;  %v15124_v28 = vor.u32 %v16300_v21, %v15123_v12  ;;  %v16223_v12 = vld [vmem:[#allocation4 + $0x788] sm:$0xf0]  ;;  %v16118_v21 = vld [vmem:[#allocation4 + $0x440] sm:$0xf0] }
 0x92c   :  { %v16345_v44 = vpop.eup %16344 }
 0x92d   :  { %v7638_v40 = vmul.f32 %v16345_v44, %v7636_v29  ;;  %vm7644_vm3 = vweird.f32 %v16345_v44  ;;  %v14143_v29 = vld [vmem:[#allocation4 + $0x230] sm:$0xf] }
 0x92e   :  { %vm7645_vm6 = vmor %vm7643_vm5, %vm7644_vm3 }
 0x92f   :  { %v7639_v37 = vmul.f32 %v16345_v44, %v7638_v40  ;;  %v16055_v40 = vld [vmem:[#allocation4 + $0x248] sm:$0xf0] }
 0x931   :  { %v7640_v6 = vmul.f32 0.5, %v7639_v37  ;;  %v13919_v37 = vld [vmem:[#allocation4 + $0x70] sm:$0xf] }
 0x933   :  { %v7641_v30 = vsub.f32 1.5, %v7640_v6  ;;  %v15999_v6 = vld [vmem:[#allocation4 + $0x88] sm:$0xf0] }
 0x935   :  { %v7642_v34 = vmul.f32 %v16345_v44, %v7641_v30  ;;  %v14732_v30 = vor.u32 %v16202_v19, %v14731_v11  ;;  %v14591_v11 = vld [vmem:[#allocation4 + $0x5b0] sm:$0xf]  ;;  %v16167_v19 = vld [vmem:[#allocation4 + $0x5c8] sm:$0xf0] }
 0x937   :  { %v7646_v25 = vsel %vm7645_vm6, %v16345_v44, %v7642_v34  ;;  %v14703_v34 = vld [vmem:[#allocation4 + $0x690] sm:$0xf] }
 0x938   :  { %7648 = vst [vmem:[#allocation1] sm:$0xff] %v7646_v25  ;;  %v16195_v25 = vld [vmem:[#allocation4 + $0x6a8] sm:$0xf0] }
 0x939   :  { %v14704_v8 = vor.u32 %v16195_v25, %v14703_v34 }
 0x93f   :  { %v7650_v13 = vld [vmem:[#allocation1 + $0x1] ss:$9 sm:$0xff] }
 0x940   :  { %v7652_v32 = vmul.f32 %v7650_v13, %v7635_v33  ;;  %7668 = vst [vmem:[#allocation1] ss:$2 sm:$0xff] %v7660_v16  ;;  %v14144_v33 = vor.u32 %v16055_v40, %v14143_v29  ;;  %v14115_v16 = vld [vmem:[#allocation4 + $0x1f8] sm:$0xf]  ;;  %v13920_v13 = vor.u32 %v15999_v6, %v13919_v37  ;;  %v15095_v40 = vld [vmem:[#allocation4 + $0x9a0] sm:$0xf] }
 0x941   :  { %7670 = vst [vmem:[#allocation1 + $0x10] ss:$2 sm:$0xff] %v7661_v36  ;;  %v16048_v36 = vld [vmem:[#allocation4 + $0x210] sm:$0xf0]  ;;  %v16293_v37 = vld [vmem:[#allocation4 + $0x9b8] sm:$0xf0] }
 0x942   :  { %v7654_v43 = vmul.f32 %v7652_v32, %v7629_v4  ;;  %7672 = vst [vmem:[#allocation1 + $0x20] ss:$2 sm:$0xff] %v7662_v1  ;;  %v16006_v4 = vld [vmem:[#allocation4 + $0xc0] sm:$0xf0]  ;;  %v13891_v1 = vld [vmem:[#allocation4 + $0x38] sm:$0xf]  ;;  %10074 = vmatpush.bf16.msra.mxu0 %v14144_v33  ;;  %v15096_v34 = vor.u32 %v16293_v37, %v15095_v40 }
 0x943   :  { %v13948_v44 = vor.u32 %v16006_v4, %v13947_v2  ;;  %v14899_v2 = vld [vmem:[#allocation4 + $0x818] sm:$0xf]  ;;  %v16244_v4 = vld [vmem:[#allocation4 + $0x830] sm:$0xf0]  ;;  %v15067_v33 = vld [vmem:[#allocation4 + $0x968] sm:$0xf] }
 0x944   :  { %v7655_v49 = vsub.f32 %v7653_v35, %v7654_v43  ;;  %v14507_v35 = vld [vmem:[#allocation4 + $0x508] sm:$0xf]  ;;  %v14900_v29 = vor.u32 %v16244_v4, %v14899_v2  ;;  %v14563_v6 = vld [vmem:[#allocation4 + $0x578] sm:$0xf]  ;;  %v14983_v4 = vld [vmem:[#allocation4 + $0x8c0] sm:$0xf] }
 0x945   :  { %10060 = vmatpush.bf16.msrb.mxu3 %v13948_v44  ;;  %v14508_v43 = vor.u32 %v16146_v7, %v14507_v35  ;;  %v14592_v44 = vor.u32 %v16167_v19, %v14591_v11  ;;  %v16265_v11 = vld [vmem:[#allocation4 + $0x8d8] sm:$0xf0]  ;;  %v15996_v19 = vld [vmem:[#allocation4 + $0x74] sm:$0xf]  ;;  %v14787_v40 = vld [vmem:[#allocation4 + $0x738] sm:$0xf] }
 0x946   :  { %v7657_v3 = vperm.slane %v7655_v49, 0  ;;  %v14116_v49 = vor.u32 %v16048_v36, %v14115_v16  ;;  %v16286_v16 = vld [vmem:[#allocation4 + $0x980] sm:$0xf0]  ;;  %v14535_v36 = vld [vmem:[#allocation4 + $0x540] sm:$0xf] }
 0x947   :  { %v7675_v26 = vld.sshfl [vmem:[#allocation1] sm:$0xff pattern:$0x75316420]  ;;  %v7676_v51 = vld.sshfl [vmem:[#allocation1 + $0x8] sm:$0xff pattern:$0x75316420]  ;;  %v15068_v35 = vor.u32 %v16286_v16, %v15067_v33 }
 0x948   :  { %13847 = vmatpush.msk.msra.mxu2 %vm3348_vm8, %v7675_v26  ;;  %13849 = vmatpush.msk.msrb.mxu1 %vm3348_vm8, %v7676_v51  ;;  %v21165_v57 = vsel %vm3035_vm2, %v7652_v32, %v7657_v3  ;;  %v7677_v58 = vld.sshfl [vmem:[#allocation1 + $0x10] sm:$0xff pattern:$0x75316420]  ;;  %v7678_v59 = vld.sshfl [vmem:[#allocation1 + $0x18] sm:$0xff pattern:$0x75316420]  ;;  %v14480_v51 = vor.u32 %v16139_v53, %v14479_v48 }
 0x949   :  { %13848 = vmatmul.msk.f32.vlgmr.msra.gmra.mxu2 %vm3344_vm9, %v21165_v57  ;;  %13850 = vmatmul.msk.f32.vlgmr.msrb.gmra.mxu1 %vm3344_vm9, %v21165_v57  ;;  %v7679_v61 = vld.sshfl [vmem:[#allocation1 + $0x20] sm:$0xff pattern:$0x75316420]  ;;  %v7680_v62 = vld.sshfl [vmem:[#allocation1 + $0x28] sm:$0xff pattern:$0x75316420] }
 0x94a   :  { %13851 = vmatpush.msk.msrb.mxu2 %vm3348_vm8, %v7677_v58  ;;  %13853 = vmatpush.msk.msra.mxu1 %vm3348_vm8, %v7678_v59  ;;  %v15992_v32 = vld [vmem:[#allocation4 + $0x50] sm:$0xf0]  ;;  %v13863_v3 = vld [vmem:[#allocation4] sm:$0xf]  ;;  %v15985_v26 = vld [vmem:[#allocation4 + $0x18] sm:$0xf0] }
 0x94b   :  { %10061 = vmatpush.bf16.msrb.mxu3 %v13920_v13  ;;  %v13892_v31 = vor.u32 %v15992_v32, %v13891_v1  ;;  %v14955_v58 = vld [vmem:[#allocation4 + $0x888] sm:$0xf]  ;;  %v16258_v59 = vld [vmem:[#allocation4 + $0x8a0] sm:$0xf0]  ;;  %10075 = vmatpush.bf16.msra.mxu0 %v14116_v49  ;;  %v16153_v13 = vld [vmem:[#allocation4 + $0x558] sm:$0xf0] }
 0x94c   :  { %13855 = vmatpush.msk.msra.mxu2 %vm3348_vm8, %v7679_v61  ;;  %13857 = vmatpush.msk.msrb.mxu1 %vm3348_vm8, %v7680_v62  ;;  %v14088_v61 = vor.u32 %v16041_v56, %v14087_v50  ;;  %v13864_v62 = vor.u32 %v15985_v26, %v13863_v3  ;;  %v14956_v0 = vor.u32 %v16258_v59, %v14955_v58  ;;  %v16031_v1 = vld [vmem:[#allocation4 + $0x18c] sm:$0xf]  ;;  %v14061_v32 = vld [vmem:[#allocation4 + $0x1a4] sm:$0xf0]  ;;  %v16017_v48 = vld [vmem:[#allocation4 + $0x11c] sm:$0xf] }
 0x94d   :  { %v14536_v7 = vor.u32 %v16153_v13, %v14535_v36  ;;  %v14005_v49 = vld [vmem:[#allocation4 + $0x134] sm:$0xf0]  ;;  %v14871_v56 = vld [vmem:[#allocation4 + $0x7e0] sm:$0xf]  ;;  %v16132_v3 = vld [vmem:[#allocation4 + $0x4b0] sm:$0xf0] }
 0x94e   :  { %v14008_v50 = vor.u32 %v16017_v48, %v14005_v49  ;;  %v14452_v26 = vor.u32 %v16132_v3, %v14451_v52  ;;  %v13977_v59 = vld [vmem:[#allocation4 + $0xfc] sm:$0xf0]  ;;  %v16216_v37 = vld [vmem:[#allocation4 + $0x750] sm:$0xf0]  ;;  %v15989_v33 = vld [vmem:[#allocation4 + $0x3c] sm:$0xf] }
 0x94f   :  { %10062 = vmatpush.bf16.msrb.mxu3 %v13892_v31  ;;  %10076 = vmatpush.bf16.msra.mxu0 %v14088_v61  ;;  %v16237_v31 = vld [vmem:[#allocation4 + $0x7f8] sm:$0xf0]  ;;  %v13980_v18 = vor.u32 %v16010_v24, %v13977_v59  ;;  %v16230_v61 = vld [vmem:[#allocation4 + $0x7c0] sm:$0xf0]  ;;  %v13893_v16 = vld [vmem:[#allocation4 + $0x54] sm:$0xf0] }
 0x950   :  { %v14872_v53 = vor.u32 %v16237_v31, %v14871_v56  ;;  %v13896_v36 = vor.u32 %v15989_v33, %v13893_v16  ;;  %v14759_v13 = vld [vmem:[#allocation4 + $0x700] sm:$0xf]  ;;  %v16097_v49 = vld [vmem:[#allocation4 + $0x398] sm:$0xf0]  ;;  %v16199_v24 = vld [vmem:[#allocation4 + $0x6cc] sm:$0xf] }
 0x951   :  { %13852 = vmatmul.msk.f32.vlgmr.msrb.gmra.mxu2 %vm3344_vm9, %v21165_v57  ;;  %13854 = vmatmul.msk.f32.vlgmr.msra.gmra.mxu1 %vm3344_vm9, %v21165_v57  ;;  %v14311_v48 = vld [vmem:[#allocation4 + $0x380] sm:$0xf]  ;;  %v16321_v31 = vld [vmem:[#allocation4 + $0xa98] sm:$0xf0] }
 0x952   :  { %13859 = vmatpush.msk.msrb.mxu2 %vm3348_vm8, %v7681_v47  ;;  %10082 = vmatpush.bf16.msra.mxu1 %v14508_v43  ;;  %v16174_v47 = vld [vmem:[#allocation4 + $0x600] sm:$0xf0]  ;;  %v16024_v43 = vld [vmem:[#allocation4 + $0x154] sm:$0xf]  ;;  %v15207_v56 = vld [vmem:[#allocation4 + $0xa80] sm:$0xf] }
 0x953   :  { %10063 = vmatpush.bf16.msrb.mxu3 %v13864_v62  ;;  %10121 = vmatpush.bf16.msrb.mxu0 %v15180_v63  ;;  %v14036_v55 = vor.u32 %v16024_v43, %v14033_v41  ;;  %v14844_v62 = vor.u32 %v16230_v61, %v14843_v42  ;;  %v14423_v63 = vld [vmem:[#allocation4 + $0x460] sm:$0xf]  ;;  %v15982_v43 = vld [vmem:[#allocation4 + $0x4] sm:$0xf] }
 0x954   :  { %v13865_v41 = vld [vmem:[#allocation4 + $0x1c] sm:$0xf0] }
 0x956   :  { %10083 = vmatpush.bf16.msra.mxu1 %v14480_v51  ;;  %v15039_v51 = vld [vmem:[#allocation4 + $0x930] sm:$0xf] }
 0x957   :  { %10108 = vmatpush.bf16.msra.mxu3 %v14956_v0  ;;  %10122 = vmatpush.bf16.msrb.mxu0 %v15152_v17  ;;  %v14424_v0 = vor.u32 %v16125_v22, %v14423_v63  ;;  %v14815_v17 = vld [vmem:[#allocation4 + $0x770] sm:$0xf] }
 0x959   :  { %13856 = vmatmul.msk.f32.vlgmr.msra.gmra.mxu2 %vm3344_vm9, %v21165_v57  ;;  %13858 = vmatmul.msk.f32.vlgmr.msrb.gmra.mxu1 %vm3344_vm9, %v21165_v57 }
 0x95a   :  { %10095 = vmatpush.bf16.msra.mxu2 %v14732_v30  ;;  %v16160_v30 = vld [vmem:[#allocation4 + $0x590] sm:$0xf0]  ;;  %10084 = vmatpush.bf16.msra.mxu1 %v14452_v26 }
 0x95b   :  { %10109 = vmatpush.bf16.msra.mxu3 %v14928_v46  ;;  %10123 = vmatpush.bf16.msrb.mxu0 %v15124_v28  ;;  %v14564_v25 = vor.u32 %v16160_v30, %v14563_v6  ;;  %v14816_v46 = vor.u32 %v16223_v12, %v14815_v17  ;;  %v14984_v28 = vor.u32 %v16265_v11, %v14983_v4  ;;  %v14367_v30 = vld [vmem:[#allocation4 + $0x3f0] sm:$0xf]  ;;  %v14509_v17 = vld [vmem:[#allocation4 + $0x524] sm:$0xf0]  ;;  %v16255_v4 = vld [vmem:[#allocation4 + $0x88c] sm:$0xf] }
 0x95c   :  { %v14788_v6 = vor.u32 %v16216_v37, %v14787_v40  ;;  %v14481_v40 = vld [vmem:[#allocation4 + $0x4ec] sm:$0xf0] }
 0x95e   :  { %10096 = vmatpush.bf16.msra.mxu2 %v14704_v8  ;;  %v14064_v8 = vor.u32 %v16031_v1, %v14061_v32  ;;  %10085 = vmatpush.bf16.msra.mxu1 %v14424_v0  ;;  %v16209_v1 = vld [vmem:[#allocation4 + $0x718] sm:$0xf0] }
 0x95f   :  { %10110 = vmatpush.bf16.msra.mxu3 %v14900_v29  ;;  %10124 = vmatpush.bf16.msrb.mxu0 %v15096_v34  ;;  %v13921_v29 = vld [vmem:[#allocation4 + $0x8c] sm:$0xf0]  ;;  %v16111_v34 = vld [vmem:[#allocation4 + $0x408] sm:$0xf0]  ;;  %v14760_v32 = vor.u32 %v16209_v1, %v14759_v13  ;;  %v16248_v1 = vld [vmem:[#allocation4 + $0x854] sm:$0xf] }
 0x961   :  { %13860 = vmatmul.msk.f32.vlgmr.msrb.gmra.mxu2 %vm3344_vm9, %v21165_v57  ;;  %v14620_v57 = vor.u32 %v16174_v47, %v14619_v9  ;;  %v13949_v9 = vld [vmem:[#allocation4 + $0xc4] sm:$0xf0] }
 0x962   :  { %10097 = vmatpush.bf16.msra.mxu2 %v14676_v15  ;;  %v16279_v15 = vld [vmem:[#allocation4 + $0x948] sm:$0xf0]  ;;  %v13952_v47 = vor.u32 %v16003_v10, %v13949_v9  ;;  %v14705_v10 = vld [vmem:[#allocation4 + $0x6ac] sm:$0xf0] }
 0x963   :  { %10125 = vmatpush.bf16.msrb.mxu0 %v15068_v35  ;;  %10111 = vmatpush.bf16.msra.mxu3 %v14872_v53  ;;  %v15040_v58 = vor.u32 %v16279_v15, %v15039_v51  ;;  %v14339_v35 = vld [vmem:[#allocation4 + $0x3b8] sm:$0xf]  ;;  %v15208_v53 = vor.u32 %v16321_v31, %v15207_v56  ;;  %v16171_v56 = vld [vmem:[#allocation4 + $0x5ec] sm:$0xf]  ;;  %v14621_v31 = vld [vmem:[#allocation4 + $0x604] sm:$0xf0] }
 0x966   :  { %10098 = vmatpush.bf16.msra.mxu2 %v14648_v23  ;;  %v15011_v23 = vld [vmem:[#allocation4 + $0x8f8] sm:$0xf] }
 0x967   :  { %10126 = vmatpush.bf16.msrb.mxu0 %v15040_v58  ;;  %10112 = vmatpush.bf16.msra.mxu3 %v14844_v62  ;;  %v15012_v27 = vor.u32 %v16272_v39, %v15011_v23  ;;  %v14733_v58 = vld [vmem:[#allocation4 + $0x6e4] sm:$0xf0]  ;;  %v16192_v39 = vld [vmem:[#allocation4 + $0x694] sm:$0xf] }
 0x968   :  { %v14736_v62 = vor.u32 %v16199_v24, %v14733_v58  ;;  %v14708_v12 = vor.u32 %v16192_v39, %v14705_v10  ;;  %v14257_v58 = vld [vmem:[#allocation4 + $0x32c] sm:$0xf0] }
 0x969   :  { %v14593_v39 = vld [vmem:[#allocation4 + $0x5cc] sm:$0xf0] }
 0x96a   :  { %10099 = vmatpush.bf16.msra.mxu2 %v14620_v57  ;;  %v14395_v57 = vld [vmem:[#allocation4 + $0x428] sm:$0xf] }
 0x96b   :  { %10127 = vmatpush.bf16.msrb.mxu0 %v15012_v27  ;;  %v14396_v2 = vor.u32 %v16118_v21, %v14395_v57  ;;  %10113 = vmatpush.bf16.msra.mxu3 %v14816_v46  ;;  %v16185_v46 = vld [vmem:[#allocation4 + $0x65c] sm:$0xf]  ;;  %v14677_v57 = vld [vmem:[#allocation4 + $0x674] sm:$0xf0] }
 0x96d   :  { %10086 = vmatpush.bf16.msra.mxu1 %v14396_v2 }
 0x96e   :  { %10100 = vmatpush.bf16.msra.mxu2 %v14592_v44  ;;  %v13924_v44 = vor.u32 %v15996_v19, %v13921_v29 }
 0x96f   :  { %10128 = vmatpush.bf16.msrb.mxu0 %v14984_v28  ;;  %10114 = vmatpush.bf16.msra.mxu3 %v14788_v6  ;;  %v14680_v6 = vor.u32 %v16185_v46, %v14677_v57  ;;  %v16073_v46 = vld [vmem:[#allocation4 + $0x2dc] sm:$0xf] }
 0x972   :  { %10101 = vmatpush.bf16.msra.mxu2 %v14564_v25  ;;  %v14368_v25 = vor.u32 %v16111_v34, %v14367_v30  ;;  %v16178_v34 = vld [vmem:[#allocation4 + $0x624] sm:$0xf] }
 0x973   :  { %10115 = vmatpush.bf16.msra.mxu3 %v14760_v32  ;;  %v14929_v32 = vld [vmem:[#allocation4 + $0x86c] sm:$0xf0] }
 0x974   :  { %10087 = vmatpush.bf16.msra.mxu1 %v14368_v25  ;;  %v14649_v25 = vld [vmem:[#allocation4 + $0x63c] sm:$0xf0] }
 0x976   :  { %10102 = vmatpush.bf16.msra.mxu2 %v14536_v7  ;;  %v16104_v7 = vld [vmem:[#allocation4 + $0x3d0] sm:$0xf0] }
 0x97a   :  { %10147 = vmatpush.bf16.msrb.mxu2 %v14064_v8  ;;  %v14340_v8 = vor.u32 %v16104_v7, %v14339_v35  ;;  %v16087_v7 = vld [vmem:[#allocation4 + $0x34c] sm:$0xf] }
 0x97c   :  { %10088 = vmatpush.bf16.msra.mxu1 %v14340_v8  ;;  %v14285_v8 = vld [vmem:[#allocation4 + $0x364] sm:$0xf0] }
 0x97e   :  { %10148 = vmatpush.bf16.msrb.mxu2 %v14036_v55  ;;  %v13868_v55 = vor.u32 %v15982_v43, %v13865_v41 }
 0x982   :  { %10149 = vmatpush.bf16.msrb.mxu2 %v14008_v50  ;;  %v14312_v50 = vor.u32 %v16097_v49, %v14311_v48  ;;  %v16129_v48 = vld [vmem:[#allocation4 + $0x49c] sm:$0xf]  ;;  %v14453_v49 = vld [vmem:[#allocation4 + $0x4b4] sm:$0xf0] }
 0x983   :  { %v14456_v24 = vor.u32 %v16129_v48, %v14453_v49 }
 0x984   :  { %10089 = vmatpush.bf16.msra.mxu1 %v14312_v50  ;;  %v14932_v50 = vor.u32 %v16248_v1, %v14929_v32 }
 0x986   :  { %10150 = vmatpush.bf16.msrb.mxu2 %v13980_v18 }
 0x988   :  { %10141 = vmatpush.bf16.msrb.mxu1 %v15208_v53 }
 0x98a   :  { %10151 = vmatpush.bf16.msrb.mxu2 %v13952_v47  ;;  %v16143_v47 = vld [vmem:[#allocation4 + $0x50c] sm:$0xf] }
 0x98b   :  { %v14512_v19 = vor.u32 %v16143_v47, %v14509_v17  ;;  %v14873_v47 = vld [vmem:[#allocation4 + $0x7fc] sm:$0xf0] }
 0x98e   :  { %10152 = vmatpush.bf16.msrb.mxu2 %v13924_v44 }
 0x992   :  { %10153 = vmatpush.bf16.msrb.mxu2 %v13896_v36 }
 0x996   :  { %10154 = vmatpush.bf16.msrb.mxu2 %v13868_v55 }
 0x9c6   :  { %v7736_v52 = vpop.f32.mrf.mxu1 }
 0x9c7   :  { %v7840_v3 = vperm.slane %v7736_v52, 0  ;;  %v7854_v51 = vperm.slane %v7736_v52, 1 }
 0x9c9   :  { %v7847_v26 = vmul.f32 %v7840_v3, %v20947_v38  ;;  %v16241_v3 = vld [vmem:[#allocation4 + $0x81c] sm:$0xf] }
 0x9cb   :  { %v7861_v15 = vadd.f32 %v7854_v51, %v7847_v26  ;;  %v14901_v26 = vld [vmem:[#allocation4 + $0x834] sm:$0xf0] }
 0x9cc   :  { %v7716_v59 = vpop.f32.mrf.mxu2 }
 0x9cd   :  { %v7868_v18 = vmax.f32 %v7861_v15, 0.0  ;;  %v7839_v42 = vperm.slane %v7716_v59, 0  ;;  %v7853_v0 = vperm.slane %v7716_v59, 1  ;;  %v14288_v15 = vor.u32 %v16087_v7, %v14285_v8  ;;  %v14537_v7 = vld [vmem:[#allocation4 + $0x55c] sm:$0xf0] }
 0x9ce   :  { %v7776_v61 = vpop.f32.mrf.mxu1 }
 0x9cf   :  { %v21187_v63 = vpack.c.bf16 %v7868_v18, %v7868_v18  ;;  %v7846_v22 = vmul.f32 %v7839_v42, %v20897_v14  ;;  %v7842_v23 = vperm.slane %v7776_v61, 0  ;;  %v7856_v9 = vperm.slane %v7776_v61, 1  ;;  %v14957_v14 = vld [vmem:[#allocation4 + $0x8a4] sm:$0xf0]  ;;  %v16122_v61 = vld [vmem:[#allocation4 + $0x464] sm:$0xf] }
 0x9d0   :  { %v14960_v30 = vor.u32 %v16255_v4, %v14957_v14  ;;  %v14397_v4 = vld [vmem:[#allocation4 + $0x444] sm:$0xf0] }
 0x9d1   :  { %v7860_v27 = vadd.f32 %v7853_v0, %v7846_v22  ;;  %v7849_v38 = vmul.f32 %v7842_v23, %v21030_v54  ;;  %10077 = vmatmul.bf16.vlgmr.msra.gmra.mxu0 %v21187_v63  ;;  %v16136_v54 = vld [vmem:[#allocation4 + $0x4d4] sm:$0xf]  ;;  %v14624_v22 = vor.u32 %v16171_v56, %v14621_v31  ;;  %v14904_v0 = vor.u32 %v16241_v3, %v14901_v26  ;;  %v16059_v56 = vld [vmem:[#allocation4 + $0x26c] sm:$0xf]  ;;  %v14341_v3 = vld [vmem:[#allocation4 + $0x3d4] sm:$0xf0] }
 0x9d2   :  { %10186 = vmatpush.bf16.msra.mxu0 %v14736_v62  ;;  %v14484_v35 = vor.u32 %v16136_v54, %v14481_v40  ;;  %v14425_v62 = vld [vmem:[#allocation4 + $0x47c] sm:$0xf0]  ;;  %v16164_v23 = vld [vmem:[#allocation4 + $0x5b4] sm:$0xf]  ;;  %v14845_v54 = vld [vmem:[#allocation4 + $0x7c4] sm:$0xf0] }
 0x9d3   :  { %v7867_v21 = vmax.f32 %v7860_v27, 0.0  ;;  %v7863_v2 = vadd.f32 %v7856_v9, %v7849_v38  ;;  %v16234_v9 = vld [vmem:[#allocation4 + $0x7e4] sm:$0xf]  ;;  %v14596_v14 = vor.u32 %v16164_v23, %v14593_v39  ;;  %v14313_v39 = vld [vmem:[#allocation4 + $0x39c] sm:$0xf0] }
 0x9d4   :  { %v7756_v11 = vpop.f32.mrf.mxu2  ;;  %v16094_v23 = vld [vmem:[#allocation4 + $0x384] sm:$0xf] }
 0x9d5   :  { %v21192_v28 = vpack.c.bf16 %v7867_v21, %v7867_v21  ;;  %v7870_v29 = vmax.f32 %v7863_v2, 0.0  ;;  %v7841_v44 = vperm.slane %v7756_v11, 0  ;;  %v7855_v36 = vperm.slane %v7756_v11, 1  ;;  %v14229_v21 = vld [vmem:[#allocation4 + $0x2f4] sm:$0xf0] }
 0x9d6   :  { %10187 = vmatpush.bf16.msra.mxu0 %v14708_v12  ;;  %v7816_v37 = vpop.f32.mrf.mxu1  ;;  %v14428_v12 = vor.u32 %v16122_v61, %v14425_v62  ;;  %v16115_v2 = vld [vmem:[#allocation4 + $0x42c] sm:$0xf]  ;;  %v16157_v11 = vld [vmem:[#allocation4 + $0x57c] sm:$0xf]  ;;  %v16028_v61 = vld [vmem:[#allocation4 + $0x170] sm:$0xf0] }
 0x9d7   :  { %v21194_v33 = vpack.c.bf16 %v7870_v29, %v7870_v29  ;;  %v7848_v16 = vmul.f32 %v7841_v44, %v20981_v20  ;;  %v7844_v13 = vperm.slane %v7816_v37, 0  ;;  %10064 = vmatmul.bf16.vlgmr.msrb.gmra.mxu3 %v21192_v28  ;;  %v7858_v55 = vperm.slane %v7816_v37, 1  ;;  %v16227_v44 = vld [vmem:[#allocation4 + $0x7ac] sm:$0xf]  ;;  %v16052_v62 = vld [vmem:[#allocation4 + $0x234] sm:$0xf] }
 0x9d8   :  { %10173 = vmatpush.bf16.msrb.mxu3 %v14512_v19  ;;  %v14652_v20 = vor.u32 %v16178_v34, %v14649_v25  ;;  %v14565_v19 = vld [vmem:[#allocation4 + $0x594] sm:$0xf0]  ;;  %v14232_v37 = vor.u32 %v16073_v46, %v14229_v21  ;;  %v14201_v34 = vld [vmem:[#allocation4 + $0x2bc] sm:$0xf0]  ;;  %v14848_v32 = vor.u32 %v16227_v44, %v14845_v54  ;;  %v14316_v21 = vor.u32 %v16094_v23, %v14313_v39  ;;  %v14515_v44 = vld [vmem:[#allocation4 + $0x510] sm:$0xf] }
 0x9d9   :  { %v7862_v43 = vadd.f32 %v7855_v36, %v7848_v16  ;;  %v7851_v41 = vmul.f32 %v7844_v13, %v21129_v5  ;;  %10103 = vmatmul.bf16.vlgmr.msra.gmra.mxu2 %v21194_v33  ;;  %v16080_v5 = vld [vmem:[#allocation4 + $0x314] sm:$0xf]  ;;  %v14369_v13 = vld [vmem:[#allocation4 + $0x40c] sm:$0xf0]  ;;  %v14568_v1 = vor.u32 %v16157_v11, %v14565_v19  ;;  %v14011_v46 = vld [vmem:[#allocation4 + $0x120] sm:$0xf] }
 0x9da   :  { %10188 = vmatpush.bf16.msra.mxu0 %v14680_v6  ;;  %10199 = vmatpush.bf16.msra.mxu2 %v14960_v30  ;;  %v14260_v17 = vor.u32 %v16080_v5, %v14257_v58  ;;  %v14400_v6 = vor.u32 %v16115_v2, %v14397_v4  ;;  %v16066_v30 = vld [vmem:[#allocation4 + $0x2a4] sm:$0xf]  ;;  %v16108_v36 = vld [vmem:[#allocation4 + $0x3f4] sm:$0xf]  ;;  %v14789_v5 = vld [vmem:[#allocation4 + $0x754] sm:$0xf0] }
 0x9db   :  { %v7869_v53 = vmax.f32 %v7862_v43, 0.0  ;;  %v7865_v52 = vadd.f32 %v7858_v55, %v7851_v41  ;;  %v16220_v41 = vld [vmem:[#allocation4 + $0x774] sm:$0xf]  ;;  %v14817_v55 = vld [vmem:[#allocation4 + $0x78c] sm:$0xf0]  ;;  %v14204_v48 = vor.u32 %v16066_v30, %v14201_v34  ;;  %v14372_v49 = vor.u32 %v16108_v36, %v14369_v13 }
 0x9dc   :  { %10174 = vmatpush.bf16.msrb.mxu3 %v14484_v35  ;;  %v7796_v51 = vpop.f32.mrf.mxu2  ;;  %v16150_v35 = vld [vmem:[#allocation4 + $0x544] sm:$0xf]  ;;  %v14820_v26 = vor.u32 %v16220_v41, %v14817_v55  ;;  %v16021_v2 = vld [vmem:[#allocation4 + $0x138] sm:$0xf0]  ;;  %v14291_v4 = vld [vmem:[#allocation4 + $0x350] sm:$0xf] }
 0x9dd   :  { %v21200_v59 = vpack.c.bf16 %v7869_v53, %v7869_v53  ;;  %v7872_v18 = vmax.f32 %v7865_v52, 0.0  ;;  %v7843_v42 = vperm.slane %v7796_v51, 0  ;;  %v7857_v38 = vperm.slane %v7796_v51, 1  ;;  %v14173_v53 = vld [vmem:[#allocation4 + $0x284] sm:$0xf0] }
 0x9de   :  { %10189 = vmatpush.bf16.msra.mxu0 %v14652_v20  ;;  %10200 = vmatpush.bf16.msra.mxu2 %v14932_v50  ;;  %v14067_v20 = vld [vmem:[#allocation4 + $0x190] sm:$0xf]  ;;  %v16035_v50 = vld [vmem:[#allocation4 + $0x1a8] sm:$0xf0]  ;;  %v16101_v52 = vld [vmem:[#allocation4 + $0x3bc] sm:$0xf]  ;;  %v14176_v58 = vor.u32 %v16059_v56, %v14173_v53 }
 0x9df   :  { %v21202_v10 = vpack.c.bf16 %v7872_v18, %v7872_v18  ;;  %v7850_v27 = vmul.f32 %v7843_v42, %v21093_v45  ;;  %10090 = vmatmul.bf16.vlgmr.msra.gmra.mxu1 %v21200_v59  ;;  %v14876_v45 = vor.u32 %v16234_v9, %v14873_v47  ;;  %v14344_v18 = vor.u32 %v16101_v52, %v14341_v3  ;;  %v14039_v42 = vld [vmem:[#allocation4 + $0x158] sm:$0xf]  ;;  %v15209_v9 = vld [vmem:[#allocation4 + $0xa9c] sm:$0xf0]  ;;  %v16045_v11 = vld [vmem:[#allocation4 + $0x1fc] sm:$0xf] }
 0x9e0   :  { %10160 = vmatpush.bf16.msra.mxu1 %v14288_v15  ;;  %10175 = vmatpush.bf16.msrb.mxu3 %v14456_v24  ;;  %v14068_v15 = vor.u32 %v16035_v50, %v14067_v20  ;;  %v16213_v24 = vld [vmem:[#allocation4 + $0x73c] sm:$0xf]  ;;  %v14040_v47 = vor.u32 %v16028_v61, %v14039_v42  ;;  %v14117_v19 = vld [vmem:[#allocation4 + $0x214] sm:$0xf0]  ;;  %v16147_v54 = vld [vmem:[#allocation4 + $0x528] sm:$0xf0] }
 0x9e1   :  { %v7864_v57 = vadd.f32 %v7857_v38, %v7850_v27  ;;  %10129 = vmatmul.bf16.vlgmr.msrb.gmra.mxu0 %v21202_v10  ;;  %v14792_v27 = vor.u32 %v16213_v24, %v14789_v5  ;;  %v16318_v38 = vld [vmem:[#allocation4 + $0xa84] sm:$0xf]  ;;  %v14120_v30 = vor.u32 %v16045_v11, %v14117_v19  ;;  %v16084_v36 = vld [vmem:[#allocation4 + $0x330] sm:$0xf0]  ;;  %v14516_v13 = vor.u32 %v16147_v54, %v14515_v44  ;;  %v16007_v20 = vld [vmem:[#allocation4 + $0xc8] sm:$0xf0] }
 0x9e2   :  { %10190 = vmatpush.bf16.msra.mxu0 %v14624_v22  ;;  %10201 = vmatpush.bf16.msra.mxu2 %v14904_v0  ;;  %v14145_v0 = vld [vmem:[#allocation4 + $0x24c] sm:$0xf0]  ;;  %v16014_v34 = vld [vmem:[#allocation4 + $0x100] sm:$0xf0]  ;;  %v14235_v50 = vld [vmem:[#allocation4 + $0x2e0] sm:$0xf] }
 0x9e3   :  { %v7871_v29 = vmax.f32 %v7864_v57, 0.0  ;;  %v14148_v57 = vor.u32 %v16052_v62, %v14145_v0  ;;  %v16077_v56 = vld [vmem:[#allocation4 + $0x2f8] sm:$0xf0]  ;;  %v14459_v52 = vld [vmem:[#allocation4 + $0x4a0] sm:$0xf] }
 0x9e4   :  { %10161 = vmatpush.bf16.msra.mxu1 %v14260_v17  ;;  %10176 = vmatpush.bf16.msrb.mxu3 %v14428_v12  ;;  %v7836_v40 = vpop.f32.mrf.mxu2  ;;  %v16206_v17 = vld [vmem:[#allocation4 + $0x704] sm:$0xf]  ;;  %v14761_v12 = vld [vmem:[#allocation4 + $0x71c] sm:$0xf0]  ;;  %v16133_v3 = vld [vmem:[#allocation4 + $0x4b8] sm:$0xf0] }
 0x9e5   :  { %v21207_v25 = vpack.c.bf16 %v7871_v29, %v7871_v29  ;;  %v7845_v16 = vperm.slane %v7836_v40, 0  ;;  %v7859_v43 = vperm.slane %v7836_v40, 1  ;;  %v14764_v29 = vor.u32 %v16206_v17, %v14761_v12  ;;  %v13927_v24 = vld [vmem:[#allocation4 + $0x78] sm:$0xf]  ;;  %v16000_v5 = vld [vmem:[#allocation4 + $0x90] sm:$0xf0] }
 0x9e6   :  { %10191 = vmatpush.bf16.msra.mxu0 %v14596_v14  ;;  %10202 = vmatpush.bf16.msra.mxu2 %v14876_v45  ;;  %v16091_v14 = vld [vmem:[#allocation4 + $0x368] sm:$0xf0]  ;;  %v15212_v45 = vor.u32 %v16318_v38, %v15209_v9  ;;  %v14012_v40 = vor.u32 %v16021_v2, %v14011_v46  ;;  %v14460_v42 = vor.u32 %v16133_v3, %v14459_v52  ;;  %v14431_v62 = vld [vmem:[#allocation4 + $0x468] sm:$0xf]  ;;  %v16126_v0 = vld [vmem:[#allocation4 + $0x480] sm:$0xf0] }
 0x9e7   :  { %v7852_v8 = vmul.f32 %v7845_v16, %v21136_v60  ;;  %10116 = vmatmul.bf16.vlgmr.msra.gmra.mxu3 %v21207_v25  ;;  %v14540_v60 = vor.u32 %v16150_v35, %v14537_v7  ;;  %v14263_v16 = vld [vmem:[#allocation4 + $0x318] sm:$0xf]  ;;  %v16140_v7 = vld [vmem:[#allocation4 + $0x4f0] sm:$0xf0]  ;;  %v16297_v23 = vld [vmem:[#allocation4 + $0x9dc] sm:$0xf]  ;;  %v14432_v46 = vor.u32 %v16126_v0, %v14431_v62 }
 0x9e8   :  { %10162 = vmatpush.bf16.msra.mxu1 %v14232_v37  ;;  %10177 = vmatpush.bf16.msrb.mxu3 %v14400_v6  ;;  %v14292_v37 = vor.u32 %v16091_v14, %v14291_v4  ;;  %v13983_v6 = vld [vmem:[#allocation4 + $0xe8] sm:$0xf]  ;;  %v14487_v35 = vld [vmem:[#allocation4 + $0x4d8] sm:$0xf]  ;;  %v14264_v55 = vor.u32 %v16084_v36, %v14263_v16  ;;  %v13899_v9 = vld [vmem:[#allocation4 + $0x40] sm:$0xf] }
 0x9e9   :  { %v7866_v31 = vadd.f32 %v7859_v43, %v7852_v8  ;;  %10155 = vmatmul.bf16.vlgmr.msrb.gmra.mxu2 %v21192_v28  ;;  %v16311_v8 = vld [vmem:[#allocation4 + $0xa4c] sm:$0xf]  ;;  %v15181_v43 = vld [vmem:[#allocation4 + $0xa64] sm:$0xf0]  ;;  %v13984_v41 = vor.u32 %v16014_v34, %v13983_v6  ;;  %v15125_v39 = vld [vmem:[#allocation4 + $0x9f4] sm:$0xf0] }
 0x9ea   :  { %10192 = vmatpush.bf16.msra.mxu0 %v14568_v1  ;;  %10203 = vmatpush.bf16.msra.mxu2 %v14848_v32  ;;  %v16038_v1 = vld [vmem:[#allocation4 + $0x1c4] sm:$0xf]  ;;  %v14089_v32 = vld [vmem:[#allocation4 + $0x1dc] sm:$0xf0]  ;;  %v15184_v53 = vor.u32 %v16311_v8, %v15181_v43  ;;  %v14179_v17 = vld [vmem:[#allocation4 + $0x270] sm:$0xf] }
 0x9eb   :  { %v7873_v51 = vmax.f32 %v7866_v31, 0.0  ;;  %v14488_v31 = vor.u32 %v16140_v7, %v14487_v35  ;;  %v16063_v12 = vld [vmem:[#allocation4 + $0x288] sm:$0xf0]  ;;  %v16290_v4 = vld [vmem:[#allocation4 + $0x9a4] sm:$0xf] }
 0x9ec   :  { %10163 = vmatpush.bf16.msra.mxu1 %v14204_v48  ;;  %10178 = vmatpush.bf16.msrb.mxu3 %v14372_v49  ;;  %v13955_v48 = vld [vmem:[#allocation4 + $0xb0] sm:$0xf]  ;;  %v14092_v49 = vor.u32 %v16038_v1, %v14089_v32  ;;  %v16119_v2 = vld [vmem:[#allocation4 + $0x448] sm:$0xf0]  ;;  %v15097_v14 = vld [vmem:[#allocation4 + $0x9bc] sm:$0xf0]  ;;  %v14180_v11 = vor.u32 %v16063_v12, %v14179_v17 }
 0x9ed   :  { %v21212_v22 = vpack.c.bf16 %v7873_v51, %v7873_v51  ;;  %v13956_v51 = vor.u32 %v16007_v20, %v13955_v48  ;;  %v13871_v19 = vld [vmem:[#allocation4 + $0x8] sm:$0xf]  ;;  %v14151_v44 = vld [vmem:[#allocation4 + $0x238] sm:$0xf]  ;;  %v16056_v54 = vld [vmem:[#allocation4 + $0x250] sm:$0xf0] }
 0x9ee   :  { %10193 = vmatpush.bf16.msra.mxu0 %v14540_v60  ;;  %10204 = vmatpush.bf16.msra.mxu2 %v14820_v26  ;;  %v16304_v60 = vld [vmem:[#allocation4 + $0xa14] sm:$0xf]  ;;  %v15153_v26 = vld [vmem:[#allocation4 + $0xa2c] sm:$0xf0]  ;;  %v14375_v6 = vld [vmem:[#allocation4 + $0x3f8] sm:$0xf]  ;;  %v14152_v32 = vor.u32 %v16056_v54, %v14151_v44 }
 0x9ef   :  { %15233 = vmatmul.msk.bf16.vlgmr.msrb.gmra.mxu1 %vm2287_vm0, %v21212_v22  ;;  %v15156_v61 = vor.u32 %v16304_v60, %v15153_v26  ;;  %v16259_v34 = vld [vmem:[#allocation4 + $0x8a8] sm:$0xf0]  ;;  %v16112_v16 = vld [vmem:[#allocation4 + $0x410] sm:$0xf0]  ;;  %v14123_v7 = vld [vmem:[#allocation4 + $0x200] sm:$0xf] }
 0x9f0   :  { %10164 = vmatpush.bf16.msra.mxu1 %v14176_v58  ;;  %10179 = vmatpush.bf16.msrb.mxu3 %v14344_v18  ;;  %v14207_v58 = vld [vmem:[#allocation4 + $0x2a8] sm:$0xf]  ;;  %v16070_v18 = vld [vmem:[#allocation4 + $0x2c0] sm:$0xf0]  ;;  %v16283_v36 = vld [vmem:[#allocation4 + $0x96c] sm:$0xf]  ;;  %v14376_v43 = vor.u32 %v16112_v16, %v14375_v6 }
 0x9f1   :  { %10194 = vmatmul.bf16.vlgmr.msra.gmra.mxu0 %v21194_v33  ;;  %v14208_v38 = vor.u32 %v16070_v18, %v14207_v58  ;;  %v16049_v8 = vld [vmem:[#allocation4 + $0x218] sm:$0xf0]  ;;  %v14935_v48 = vld [vmem:[#allocation4 + $0x858] sm:$0xf]  ;;  %v16042_v3 = vld [vmem:[#allocation4 + $0x1e0] sm:$0xf0] }
 0x9f2   :  { %10238 = vmatpush.bf16.msrb.mxu0 %v14068_v15  ;;  %10205 = vmatpush.bf16.msra.mxu2 %v14792_v27  ;;  %v14236_v15 = vor.u32 %v16077_v56, %v14235_v50  ;;  %v13928_v27 = vor.u32 %v16000_v5, %v13927_v24  ;;  %v16105_v20 = vld [vmem:[#allocation4 + $0x3d8] sm:$0xf0]  ;;  %v16276_v50 = vld [vmem:[#allocation4 + $0x934] sm:$0xf]  ;;  %v15041_v56 = vld [vmem:[#allocation4 + $0x94c] sm:$0xf0] }
 0x9f3   :  { %v14319_v60 = vld [vmem:[#allocation4 + $0x388] sm:$0xf]  ;;  %v14907_v26 = vld [vmem:[#allocation4 + $0x820] sm:$0xf]  ;;  %v16245_v24 = vld [vmem:[#allocation4 + $0x838] sm:$0xf0] }
 0x9f4   :  { %10165 = vmatpush.bf16.msra.mxu1 %v14148_v57  ;;  %10180 = vmatpush.bf16.msrb.mxu3 %v14316_v21  ;;  %v15128_v57 = vor.u32 %v16297_v23, %v15125_v39  ;;  %v14403_v21 = vld [vmem:[#allocation4 + $0x430] sm:$0xf]  ;;  %v16315_v58 = vld [vmem:[#allocation4 + $0xa68] sm:$0xf0]  ;;  %v16098_v18 = vld [vmem:[#allocation4 + $0x3a0] sm:$0xf0]  ;;  %v14908_v39 = vor.u32 %v16245_v24, %v14907_v26 }
 0x9f5   :  { %v15187_v5 = vld [vmem:[#allocation4 + $0xa50] sm:$0xf]  ;;  %v15215_v0 = vld [vmem:[#allocation4 + $0xa88] sm:$0xf]  ;;  %v16322_v23 = vld [vmem:[#allocation4 + $0xaa0] sm:$0xf0] }
 0x9f6   :  { %10239 = vmatpush.bf16.msrb.mxu0 %v14040_v47  ;;  %10206 = vmatpush.bf16.msra.mxu2 %v14764_v29  ;;  %v15993_v47 = vld [vmem:[#allocation4 + $0x58] sm:$0xf0]  ;;  %v15986_v29 = vld [vmem:[#allocation4 + $0x20] sm:$0xf0]  ;;  %v15159_v12 = vld [vmem:[#allocation4 + $0xa18] sm:$0xf] }
 0x9f7   :  { %10181 = vmatmul.bf16.vlgmr.msrb.gmra.mxu3 %v21200_v59  ;;  %v13872_v1 = vor.u32 %v15986_v29, %v13871_v19  ;;  %v16238_v17 = vld [vmem:[#allocation4 + $0x800] sm:$0xf0]  ;;  %v16203_v19 = vld [vmem:[#allocation4 + $0x6e8] sm:$0xf0]  ;;  %v14851_v54 = vld [vmem:[#allocation4 + $0x7b0] sm:$0xf] }
 0x9f8   :  { %10232 = vmatpush.bf16.msra.mxu3 %v15212_v45  ;;  %10166 = vmatpush.bf16.msra.mxu1 %v14120_v30  ;;  %v13900_v45 = vor.u32 %v15993_v47, %v13899_v9  ;;  %v14963_v30 = vld [vmem:[#allocation4 + $0x890] sm:$0xf]  ;;  %v14879_v47 = vld [vmem:[#allocation4 + $0x7e8] sm:$0xf]  ;;  %v15131_v6 = vld [vmem:[#allocation4 + $0x9e0] sm:$0xf] }
 0x9f9   :  { %10207 = vmatmul.bf16.vlgmr.msra.gmra.mxu2 %v21207_v25  ;;  %v14964_v35 = vor.u32 %v16259_v34, %v14963_v30  ;;  %v16301_v30 = vld [vmem:[#allocation4 + $0x9f8] sm:$0xf0]  ;;  %v15075_v26 = vld [vmem:[#allocation4 + $0x970] sm:$0xf]  ;;  %v16067_v24 = vld [vmem:[#allocation4 + $0x2ac] sm:$0xf] }
 0x9fa   :  { %10240 = vmatpush.bf16.msrb.mxu0 %v14012_v40  ;;  %10251 = vmatpush.bf16.msrb.mxu2 %v14292_v37  ;;  %v14404_v40 = vor.u32 %v16119_v2, %v14403_v21  ;;  %v15100_v37 = vor.u32 %v16290_v4, %v15097_v14  ;;  %v16088_v21 = vld [vmem:[#allocation4 + $0x354] sm:$0xf]  ;;  %v14293_v2 = vld [vmem:[#allocation4 + $0x36c] sm:$0xf0]  ;;  %v16262_v4 = vld [vmem:[#allocation4 + $0x8c4] sm:$0xf] }
 0x9fb   :  { %v14985_v14 = vld [vmem:[#allocation4 + $0x8dc] sm:$0xf0]  ;;  %v14296_v44 = vor.u32 %v16088_v21, %v14293_v2  ;;  %v16081_v16 = vld [vmem:[#allocation4 + $0x31c] sm:$0xf]  ;;  %v16175_v21 = vld [vmem:[#allocation4 + $0x608] sm:$0xf0] }
 0x9fc   :  { %10264 = vmatpush.bf16.msrb.mxu3 %v14516_v13  ;;  %10167 = vmatpush.bf16.msra.mxu1 %v14092_v49  ;;  %v15069_v13 = vld [vmem:[#allocation4 + $0x984] sm:$0xf0]  ;;  %v16252_v49 = vld [vmem:[#allocation4 + $0x870] sm:$0xf0] }
 0x9fd   :  { %v14936_v52 = vor.u32 %v16252_v49, %v14935_v48  ;;  %v16074_v49 = vld [vmem:[#allocation4 + $0x2e4] sm:$0xf] }
 0x9fe   :  { %10241 = vmatpush.bf16.msrb.mxu0 %v13984_v41  ;;  %10252 = vmatpush.bf16.msrb.mxu2 %v14264_v55  ;;  %v15072_v41 = vor.u32 %v16283_v36, %v15069_v13  ;;  %v14347_v55 = vld [vmem:[#allocation4 + $0x3c0] sm:$0xf]  ;;  %v14265_v36 = vld [vmem:[#allocation4 + $0x334] sm:$0xf0] }
 0x9ff   :  { %10168 = vmatmul.bf16.vlgmr.msra.gmra.mxu1 %v21187_v63 }
 0xa00   :  { %10265 = vmatpush.bf16.msrb.mxu3 %v14488_v31  ;;  %10212 = vmatpush.bf16.msrb.mxu1 %v15184_v53  ;;  %v14124_v31 = vor.u32 %v16049_v8, %v14123_v7  ;;  %v14095_v53 = vld [vmem:[#allocation4 + $0x1c8] sm:$0xf]  ;;  %v14823_v7 = vld [vmem:[#allocation4 + $0x778] sm:$0xf]  ;;  %v16224_v8 = vld [vmem:[#allocation4 + $0x790] sm:$0xf0] }
 0xa01   :  { %v14096_v62 = vor.u32 %v16042_v3, %v14095_v53  ;;  %v16217_v3 = vld [vmem:[#allocation4 + $0x758] sm:$0xf0] }
 0xa02   :  { %10242 = vmatpush.bf16.msrb.mxu0 %v13956_v51  ;;  %10253 = vmatpush.bf16.msrb.mxu2 %v14236_v15  ;;  %v14348_v51 = vor.u32 %v16105_v20, %v14347_v55  ;;  %v15044_v15 = vor.u32 %v16276_v50, %v15041_v56  ;;  %v16294_v55 = vld [vmem:[#allocation4 + $0x9c0] sm:$0xf0]  ;;  %v14237_v20 = vld [vmem:[#allocation4 + $0x2fc] sm:$0xf0]  ;;  %v14824_v50 = vor.u32 %v16224_v8, %v14823_v7 }
 0xa03   :  { %v14683_v56 = vld [vmem:[#allocation4 + $0x660] sm:$0xf] }
 0xa04   :  { %10266 = vmatpush.bf16.msrb.mxu3 %v14460_v42  ;;  %10213 = vmatpush.bf16.msrb.mxu1 %v15156_v61  ;;  %v16269_v42 = vld [vmem:[#allocation4 + $0x8fc] sm:$0xf]  ;;  %v15013_v61 = vld [vmem:[#allocation4 + $0x914] sm:$0xf0]  ;;  %v14125_v8 = vld [vmem:[#allocation4 + $0x21c] sm:$0xf0] }
 0xa05   :  { %v15016_v9 = vor.u32 %v16269_v42, %v15013_v61  ;;  %v16182_v42 = vld [vmem:[#allocation4 + $0x640] sm:$0xf0] }
 0xa06   :  { %10243 = vmatpush.bf16.msrb.mxu0 %v13928_v27  ;;  %10254 = vmatpush.bf16.msrb.mxu2 %v14208_v38  ;;  %v15188_v27 = vor.u32 %v16315_v58, %v15187_v5  ;;  %v14320_v38 = vor.u32 %v16098_v18, %v14319_v60  ;;  %v14240_v60 = vor.u32 %v16074_v49, %v14237_v20  ;;  %v14209_v5 = vld [vmem:[#allocation4 + $0x2c4] sm:$0xf0] }
 0xa07   :  { %15234 = vmatmul.msk.bf16.vlgmr.msra.gmra.mxu3 %vm2287_vm0, %v21212_v22  ;;  %v14655_v18 = vld [vmem:[#allocation4 + $0x628] sm:$0xf] }
 0xa08   :  { %10267 = vmatpush.bf16.msrb.mxu3 %v14432_v46  ;;  %10214 = vmatpush.bf16.msrb.mxu1 %v15128_v57  ;;  %v15216_v46 = vor.u32 %v16322_v23, %v15215_v0  ;;  %v16308_v57 = vld [vmem:[#allocation4 + $0xa30] sm:$0xf0]  ;;  %v16210_v0 = vld [vmem:[#allocation4 + $0x720] sm:$0xf0]  ;;  %v15047_v23 = vld [vmem:[#allocation4 + $0x938] sm:$0xf] }
 0xa09   :  { %v15160_v29 = vor.u32 %v16308_v57, %v15159_v12  ;;  %v14181_v12 = vld [vmem:[#allocation4 + $0x28c] sm:$0xf0] }
 0xa0a   :  { %10244 = vmatpush.bf16.msrb.mxu0 %v13900_v45  ;;  %10255 = vmatpush.bf16.msrb.mxu2 %v14180_v11  ;;  %v14880_v45 = vor.u32 %v16238_v17, %v14879_v47  ;;  %v14739_v11 = vld [vmem:[#allocation4 + $0x6d0] sm:$0xf]  ;;  %v14656_v47 = vor.u32 %v16182_v42, %v14655_v18  ;;  %v16060_v17 = vld [vmem:[#allocation4 + $0x274] sm:$0xf] }
 0xa0b   :  { %v14740_v34 = vor.u32 %v16203_v19, %v14739_v11  ;;  %v14627_v57 = vld [vmem:[#allocation4 + $0x5f0] sm:$0xf]  ;;  %v16273_v11 = vld [vmem:[#allocation4 + $0x918] sm:$0xf0]  ;;  %v16032_v42 = vld [vmem:[#allocation4 + $0x194] sm:$0xf] }
 0xa0c   :  { %10268 = vmatpush.bf16.msrb.mxu3 %v14404_v40  ;;  %10215 = vmatpush.bf16.msrb.mxu1 %v15100_v37  ;;  %v16231_v40 = vld [vmem:[#allocation4 + $0x7c8] sm:$0xf0]  ;;  %v14988_v37 = vor.u32 %v16262_v4, %v14985_v14  ;;  %v15019_v14 = vld [vmem:[#allocation4 + $0x900] sm:$0xf]  ;;  %v16137_v19 = vld [vmem:[#allocation4 + $0x4dc] sm:$0xf] }
 0xa0d   :  { %v14852_v13 = vor.u32 %v16231_v40, %v14851_v54  ;;  %v16053_v54 = vld [vmem:[#allocation4 + $0x23c] sm:$0xf]  ;;  %v14153_v40 = vld [vmem:[#allocation4 + $0x254] sm:$0xf0] }
 0xa0e   :  { %10245 = vmatpush.bf16.msrb.mxu0 %v13872_v1  ;;  %10256 = vmatpush.bf16.msrb.mxu2 %v14152_v32  ;;  %v14711_v1 = vld [vmem:[#allocation4 + $0x698] sm:$0xf]  ;;  %v16196_v32 = vld [vmem:[#allocation4 + $0x6b0] sm:$0xf0] }
 0xa0f   :  { %v14712_v48 = vor.u32 %v16196_v32, %v14711_v1  ;;  %v16046_v1 = vld [vmem:[#allocation4 + $0x204] sm:$0xf] }
 0xa10   :  { %10269 = vmatpush.bf16.msrb.mxu3 %v14376_v43  ;;  %10216 = vmatpush.bf16.msrb.mxu1 %v15072_v41  ;;  %v14268_v43 = vor.u32 %v16081_v16, %v14265_v36  ;;  %v15103_v41 = vld [vmem:[#allocation4 + $0x9a8] sm:$0xf]  ;;  %v16266_v36 = vld [vmem:[#allocation4 + $0x8e0] sm:$0xf0] }
 0xa11   :  { %10246 = vmatmul.bf16.vlgmr.msrb.gmra.mxu0 %v21192_v28  ;;  %v15104_v53 = vor.u32 %v16294_v55, %v15103_v41  ;;  %v14991_v16 = vld [vmem:[#allocation4 + $0x8c8] sm:$0xf]  ;;  %v16130_v32 = vld [vmem:[#allocation4 + $0x4a4] sm:$0xf]  ;;  %v14741_v41 = vld [vmem:[#allocation4 + $0x6ec] sm:$0xf0] }
 0xa12   :  { %10290 = vmatpush.bf16.msra.mxu0 %v14964_v35  ;;  %10257 = vmatpush.bf16.msrb.mxu2 %v14124_v31  ;;  %v15132_v35 = vor.u32 %v16301_v30, %v15131_v6  ;;  %v16189_v31 = vld [vmem:[#allocation4 + $0x678] sm:$0xf0]  ;;  %v16168_v6 = vld [vmem:[#allocation4 + $0x5d0] sm:$0xf0]  ;;  %v15020_v30 = vor.u32 %v16273_v11, %v15019_v14  ;;  %v14571_v55 = vld [vmem:[#allocation4 + $0x580] sm:$0xf]  ;;  %v14992_v49 = vor.u32 %v16266_v36, %v14991_v16 }
 0xa13   :  { %v16109_v14 = vld [vmem:[#allocation4 + $0x3fc] sm:$0xf]  ;;  %v16102_v16 = vld [vmem:[#allocation4 + $0x3c4] sm:$0xf]  ;;  %v14349_v36 = vld [vmem:[#allocation4 + $0x3dc] sm:$0xf0] }
 0xa14   :  { %10270 = vmatpush.bf16.msrb.mxu3 %v14348_v51  ;;  %10217 = vmatpush.bf16.msrb.mxu1 %v15044_v15  ;;  %v16287_v51 = vld [vmem:[#allocation4 + $0x988] sm:$0xf0]  ;;  %v14684_v15 = vor.u32 %v16189_v31, %v14683_v56  ;;  %v14128_v56 = vor.u32 %v16046_v1, %v14125_v8  ;;  %v16172_v1 = vld [vmem:[#allocation4 + $0x5f4] sm:$0xf]  ;;  %v15105_v8 = vld [vmem:[#allocation4 + $0x9c4] sm:$0xf0] }
 0xa15   :  { %v15076_v61 = vor.u32 %v16287_v51, %v15075_v26  ;;  %v16193_v26 = vld [vmem:[#allocation4 + $0x69c] sm:$0xf]  ;;  %v14713_v51 = vld [vmem:[#allocation4 + $0x6b4] sm:$0xf0] }
 0xa16   :  { %10291 = vmatpush.bf16.msra.mxu0 %v14936_v52  ;;  %10258 = vmatpush.bf16.msrb.mxu2 %v14096_v62  ;;  %v14795_v52 = vld [vmem:[#allocation4 + $0x740] sm:$0xf]  ;;  %v14767_v62 = vld [vmem:[#allocation4 + $0x708] sm:$0xf] }
 0xa17   :  { %v14796_v58 = vor.u32 %v16217_v3, %v14795_v52  ;;  %v16123_v52 = vld [vmem:[#allocation4 + $0x46c] sm:$0xf]  ;;  %v14433_v3 = vld [vmem:[#allocation4 + $0x484] sm:$0xf0] }
 0xa18   :  { %10271 = vmatpush.bf16.msrb.mxu3 %v14320_v38  ;;  %10218 = vmatpush.bf16.msrb.mxu1 %v15016_v9  ;;  %v16144_v38 = vld [vmem:[#allocation4 + $0x514] sm:$0xf]  ;;  %v14517_v9 = vld [vmem:[#allocation4 + $0x52c] sm:$0xf0]  ;;  %v14436_v18 = vor.u32 %v16123_v52, %v14433_v3  ;;  %v15217_v52 = vld [vmem:[#allocation4 + $0xaa4] sm:$0xf0] }
 0xa19   :  { %10259 = vmatmul.bf16.vlgmr.msrb.gmra.mxu2 %v21187_v63  ;;  %v14520_v4 = vor.u32 %v16144_v38, %v14517_v9  ;;  %v16186_v9 = vld [vmem:[#allocation4 + $0x664] sm:$0xf] }
 0xa1a   :  { %10292 = vmatpush.bf16.msra.mxu0 %v14908_v39  ;;  %10303 = vmatpush.bf16.msra.mxu2 %v15188_v27  ;;  %v14212_v39 = vor.u32 %v16067_v24, %v14209_v5  ;;  %v16280_v27 = vld [vmem:[#allocation4 + $0x950] sm:$0xf0]  ;;  %v15189_v24 = vld [vmem:[#allocation4 + $0xa6c] sm:$0xf0]  ;;  %v14543_v5 = vld [vmem:[#allocation4 + $0x548] sm:$0xf] }
 0xa1b   :  { %10272 = vmatmul.bf16.vlgmr.msrb.gmra.mxu3 %v21200_v59  ;;  %v15048_v2 = vor.u32 %v16280_v27, %v15047_v23  ;;  %v16116_v23 = vld [vmem:[#allocation4 + $0x434] sm:$0xf] }
 0xa1c   :  { %10323 = vmatpush.bf16.msra.mxu3 %v15216_v46  ;;  %10219 = vmatpush.bf16.msrb.mxu1 %v14988_v37  ;;  %v14768_v46 = vor.u32 %v16210_v0, %v14767_v62  ;;  %v14599_v37 = vld [vmem:[#allocation4 + $0x5b8] sm:$0xf]  ;;  %v14716_v0 = vor.u32 %v16193_v26, %v14713_v51  ;;  %v15077_v26 = vld [vmem:[#allocation4 + $0x98c] sm:$0xf0] }
 0xa1d   :  { %v14600_v7 = vor.u32 %v16168_v6, %v14599_v37  ;;  %v16018_v6 = vld [vmem:[#allocation4 + $0x124] sm:$0xf] }
 0xa1e   :  { %10293 = vmatpush.bf16.msra.mxu0 %v14880_v45  ;;  %10304 = vmatpush.bf16.msra.mxu2 %v15160_v29  ;;  %v14184_v45 = vor.u32 %v16060_v17, %v14181_v12  ;;  %v14489_v29 = vld [vmem:[#allocation4 + $0x4f4] sm:$0xf0]  ;;  %v16305_v12 = vld [vmem:[#allocation4 + $0xa1c] sm:$0xf] }
 0xa1f   :  { %10220 = vmatmul.bf16.vlgmr.msrb.gmra.mxu1 %v21202_v10 }
 0xa20   :  { %10342 = vmatpush.bf16.msrb.mxu3 %v14296_v44  ;;  %10277 = vmatpush.bf16.msra.mxu1 %v14740_v34  ;;  %v14628_v44 = vor.u32 %v16175_v21, %v14627_v57  ;;  %v14492_v34 = vor.u32 %v16137_v19, %v14489_v29  ;;  %v16025_v21 = vld [vmem:[#allocation4 + $0x15c] sm:$0xf]  ;;  %v16179_v19 = vld [vmem:[#allocation4 + $0x62c] sm:$0xf]  ;;  %v14657_v29 = vld [vmem:[#allocation4 + $0x644] sm:$0xf0] }
 0xa22   :  { %10294 = vmatpush.bf16.msra.mxu0 %v14852_v13  ;;  %10305 = vmatpush.bf16.msra.mxu2 %v15132_v35  ;;  %v14156_v13 = vor.u32 %v16053_v54, %v14153_v40  ;;  %v14461_v35 = vld [vmem:[#allocation4 + $0x4bc] sm:$0xf0]  ;;  %v16298_v54 = vld [vmem:[#allocation4 + $0x9e4] sm:$0xf] }
 0xa23   :  { %v14464_v20 = vor.u32 %v16130_v32, %v14461_v35  ;;  %v15133_v40 = vld [vmem:[#allocation4 + $0x9fc] sm:$0xf0]  ;;  %v14629_v32 = vld [vmem:[#allocation4 + $0x60c] sm:$0xf0] }
 0xa24   :  { %10343 = vmatpush.bf16.msrb.mxu3 %v14268_v43  ;;  %10278 = vmatpush.bf16.msra.mxu1 %v14712_v48  ;;  %v16200_v43 = vld [vmem:[#allocation4 + $0x6d4] sm:$0xf]  ;;  %v16161_v48 = vld [vmem:[#allocation4 + $0x598] sm:$0xf0] }
 0xa25   :  { %v14744_v31 = vor.u32 %v16200_v43, %v14741_v41  ;;  %v14352_v43 = vor.u32 %v16102_v16, %v14349_v36  ;;  %v16011_v41 = vld [vmem:[#allocation4 + $0xec] sm:$0xf]  ;;  %v14993_v36 = vld [vmem:[#allocation4 + $0x8e4] sm:$0xf0] }
 0xa26   :  { %10295 = vmatpush.bf16.msra.mxu0 %v14824_v50  ;;  %10306 = vmatpush.bf16.msra.mxu2 %v15104_v53  ;;  %v16039_v50 = vld [vmem:[#allocation4 + $0x1cc] sm:$0xf]  ;;  %v14097_v53 = vld [vmem:[#allocation4 + $0x1e4] sm:$0xf0] }
 0xa27   :  { %v14100_v62 = vor.u32 %v16039_v50, %v14097_v53  ;;  %v16165_v50 = vld [vmem:[#allocation4 + $0x5bc] sm:$0xf]  ;;  %v16319_v53 = vld [vmem:[#allocation4 + $0xa8c] sm:$0xf] }
 0xa28   :  { %10344 = vmatpush.bf16.msrb.mxu3 %v14240_v60  ;;  %10279 = vmatpush.bf16.msra.mxu1 %v14684_v15  ;;  %v14572_v60 = vor.u32 %v16161_v48, %v14571_v55  ;;  %v16312_v15 = vld [vmem:[#allocation4 + $0xa54] sm:$0xf]  ;;  %v13985_v55 = vld [vmem:[#allocation4 + $0x104] sm:$0xf0]  ;;  %v14632_v48 = vor.u32 %v16172_v1, %v14629_v32  ;;  %v16263_v16 = vld [vmem:[#allocation4 + $0x8cc] sm:$0xf] }
 0xa29   :  { %v15192_v27 = vor.u32 %v16312_v15, %v15189_v24  ;;  %v13988_v3 = vor.u32 %v16011_v41, %v13985_v55  ;;  %v16004_v15 = vld [vmem:[#allocation4 + $0xb4] sm:$0xf]  ;;  %v13957_v24 = vld [vmem:[#allocation4 + $0xcc] sm:$0xf0]  ;;  %v16029_v32 = vld [vmem:[#allocation4 + $0x178] sm:$0xf0] }
 0xa2a   :  { %10296 = vmatpush.bf16.msra.mxu0 %v14796_v58  ;;  %10307 = vmatpush.bf16.msra.mxu2 %v15076_v61  ;;  %v16154_v58 = vld [vmem:[#allocation4 + $0x560] sm:$0xf0]  ;;  %v14069_v61 = vld [vmem:[#allocation4 + $0x1ac] sm:$0xf0]  ;;  %v13873_v41 = vld [vmem:[#allocation4 + $0x24] sm:$0xf0] }
 0xa2b   :  { %15235 = vmatmul.msk.bf16.vlgmr.msra.gmra.mxu3 %vm2287_vm0, %v21212_v22  ;;  %v14544_v38 = vor.u32 %v16154_v58, %v14543_v5  ;;  %v14072_v17 = vor.u32 %v16032_v42, %v14069_v61  ;;  %v15220_v58 = vor.u32 %v16319_v53, %v15217_v52  ;;  %v16092_v42 = vld [vmem:[#allocation4 + $0x370] sm:$0xf0] }
 0xa2c   :  { %10345 = vmatpush.bf16.msrb.mxu3 %v14212_v39  ;;  %10280 = vmatpush.bf16.msra.mxu1 %v14656_v47  ;;  %v14405_v39 = vld [vmem:[#allocation4 + $0x44c] sm:$0xf0]  ;;  %v14685_v47 = vld [vmem:[#allocation4 + $0x67c] sm:$0xf0]  ;;  %v16256_v55 = vld [vmem:[#allocation4 + $0x894] sm:$0xf] }
 0xa2d   :  { %v14408_v57 = vor.u32 %v16116_v23, %v14405_v39  ;;  %v13960_v23 = vor.u32 %v16004_v15, %v13957_v24  ;;  %v16277_v39 = vld [vmem:[#allocation4 + $0x93c] sm:$0xf]  ;;  %v14719_v15 = vld [vmem:[#allocation4 + $0x6a0] sm:$0xf] }
 0xa2e   :  { %10297 = vmatpush.bf16.msra.mxu0 %v14768_v46  ;;  %10308 = vmatpush.bf16.msra.mxu2 %v15048_v2  ;;  %v15161_v46 = vld [vmem:[#allocation4 + $0xa34] sm:$0xf0]  ;;  %v16197_v24 = vld [vmem:[#allocation4 + $0x6b8] sm:$0xf0] }
 0xa2f   :  { %v14041_v2 = vld [vmem:[#allocation4 + $0x174] sm:$0xf0]  ;;  %v15164_v11 = vor.u32 %v16305_v12, %v15161_v46  ;;  %v14271_v12 = vld [vmem:[#allocation4 + $0x320] sm:$0xf]  ;;  %v16085_v46 = vld [vmem:[#allocation4 + $0x338] sm:$0xf0] }
 0xa30   :  { %10346 = vmatpush.bf16.msrb.mxu3 %v14184_v45  ;;  %10281 = vmatpush.bf16.msra.mxu1 %v14628_v44  ;;  %v14377_v45 = vld [vmem:[#allocation4 + $0x414] sm:$0xf0]  ;;  %v14044_v44 = vor.u32 %v16025_v21, %v14041_v2  ;;  %v16151_v21 = vld [vmem:[#allocation4 + $0x54c] sm:$0xf]  ;;  %v14545_v2 = vld [vmem:[#allocation4 + $0x564] sm:$0xf0] }
 0xa31   :  { %10298 = vmatmul.bf16.vlgmr.msra.gmra.mxu0 %v21207_v25  ;;  %v14380_v37 = vor.u32 %v16109_v14, %v14377_v45  ;;  %v15021_v45 = vld [vmem:[#allocation4 + $0x91c] sm:$0xf0] }
 0xa32   :  { %10355 = vmatpush.bf16.msrb.mxu0 %v14520_v4  ;;  %10309 = vmatpush.bf16.msra.mxu2 %v15020_v30  ;;  %v14688_v4 = vor.u32 %v16186_v9, %v14685_v47  ;;  %v14013_v30 = vld [vmem:[#allocation4 + $0x13c] sm:$0xf0]  ;;  %v15997_v9 = vld [vmem:[#allocation4 + $0x7c] sm:$0xf]  ;;  %v13929_v47 = vld [vmem:[#allocation4 + $0x94] sm:$0xf0] }
 0xa33   :  { %v14016_v35 = vor.u32 %v16018_v6, %v14013_v30  ;;  %v13932_v14 = vor.u32 %v15997_v9, %v13929_v47  ;;  %v16078_v6 = vld [vmem:[#allocation4 + $0x300] sm:$0xf0]  ;;  %v14691_v9 = vld [vmem:[#allocation4 + $0x668] sm:$0xf] }
 0xa34   :  { %10347 = vmatpush.bf16.msrb.mxu3 %v14156_v13  ;;  %10282 = vmatpush.bf16.msra.mxu1 %v14600_v7  ;;  %v15136_v13 = vor.u32 %v16298_v54, %v15133_v40  ;;  %v16291_v7 = vld [vmem:[#allocation4 + $0x9ac] sm:$0xf]  ;;  %v13901_v54 = vld [vmem:[#allocation4 + $0x5c] sm:$0xf0]  ;;  %v14548_v40 = vor.u32 %v16151_v21, %v14545_v2  ;;  %v16190_v47 = vld [vmem:[#allocation4 + $0x680] sm:$0xf0] }
 0xa35   :  { %v16057_v21 = vld [vmem:[#allocation4 + $0x258] sm:$0xf0] }
 0xa36   :  { %10356 = vmatpush.bf16.msrb.mxu0 %v14492_v34  ;;  %10310 = vmatpush.bf16.msra.mxu2 %v14992_v49  ;;  %v14660_v34 = vor.u32 %v16179_v19, %v14657_v29  ;;  %v16095_v49 = vld [vmem:[#allocation4 + $0x38c] sm:$0xf]  ;;  %v16036_v19 = vld [vmem:[#allocation4 + $0x1b0] sm:$0xf0]  ;;  %v14272_v29 = vor.u32 %v16085_v46, %v14271_v12  ;;  %v14909_v46 = vld [vmem:[#allocation4 + $0x83c] sm:$0xf0] }
 0xa38   :  { %10348 = vmatpush.bf16.msrb.mxu3 %v14128_v56  ;;  %10283 = vmatpush.bf16.msra.mxu1 %v14572_v60  ;;  %v15108_v56 = vor.u32 %v16291_v7, %v15105_v8  ;;  %v16284_v60 = vld [vmem:[#allocation4 + $0x974] sm:$0xf] }
 0xa39   :  { %10311 = vmatmul.bf16.vlgmr.msra.gmra.mxu2 %v21202_v10  ;;  %v15080_v61 = vor.u32 %v16284_v60, %v15077_v26  ;;  %v16204_v7 = vld [vmem:[#allocation4 + $0x6f0] sm:$0xf0]  ;;  %v16022_v60 = vld [vmem:[#allocation4 + $0x140] sm:$0xf0] }
 0xa3a   :  { %10357 = vmatpush.bf16.msrb.mxu0 %v14464_v20  ;;  %10368 = vmatpush.bf16.msrb.mxu2 %v14744_v31  ;;  %v14321_v20 = vld [vmem:[#allocation4 + $0x3a4] sm:$0xf0]  ;;  %v14601_v31 = vld [vmem:[#allocation4 + $0x5d4] sm:$0xf0] }
 0xa3b   :  { %v14324_v51 = vor.u32 %v16095_v49, %v14321_v20  ;;  %v14604_v5 = vor.u32 %v16165_v50, %v14601_v31  ;;  %v14965_v49 = vld [vmem:[#allocation4 + $0x8ac] sm:$0xf0]  ;;  %v16071_v50 = vld [vmem:[#allocation4 + $0x2c8] sm:$0xf0] }
 0xa3c   :  { %10349 = vmatpush.bf16.msrb.mxu3 %v14100_v62  ;;  %10284 = vmatpush.bf16.msra.mxu1 %v14544_v38  ;;  %v16158_v62 = vld [vmem:[#allocation4 + $0x584] sm:$0xf]  ;;  %v14215_v20 = vld [vmem:[#allocation4 + $0x2b0] sm:$0xf]  ;;  %v14968_v26 = vor.u32 %v16256_v55, %v14965_v49  ;;  %v14635_v55 = vld [vmem:[#allocation4 + $0x5f8] sm:$0xf] }
 0xa3d   :  { %v16176_v49 = vld [vmem:[#allocation4 + $0x610] sm:$0xf0] }
 0xa3e   :  { %10358 = vmatpush.bf16.msrb.mxu0 %v14436_v18  ;;  %10369 = vmatpush.bf16.msrb.mxu2 %v14716_v0  ;;  %v14299_v18 = vld [vmem:[#allocation4 + $0x358] sm:$0xf]  ;;  %v14573_v0 = vld [vmem:[#allocation4 + $0x59c] sm:$0xf0] }
 0xa3f   :  { %10350 = vmatmul.bf16.vlgmr.msrb.gmra.mxu3 %v21187_v63  ;;  %10285 = vmatmul.bf16.vlgmr.msra.gmra.mxu1 %v21194_v33  ;;  %v14300_v38 = vor.u32 %v16092_v42, %v14299_v18  ;;  %v14187_v18 = vld [vmem:[#allocation4 + $0x278] sm:$0xf]  ;;  %v16064_v42 = vld [vmem:[#allocation4 + $0x290] sm:$0xf0] }
 0xa40   :  { %10394 = vmatpush.bf16.msra.mxu3 %v15192_v27  ;;  %10329 = vmatpush.bf16.msrb.mxu1 %v14072_v17  ;;  %v15049_v27 = vld [vmem:[#allocation4 + $0x954] sm:$0xf0]  ;;  %v14576_v17 = vor.u32 %v16158_v62, %v14573_v0  ;;  %v14720_v62 = vor.u32 %v16197_v24, %v14719_v15  ;;  %v13991_v0 = vld [vmem:[#allocation4 + $0xf0] sm:$0xf]  ;;  %v13907_v15 = vld [vmem:[#allocation4 + $0x48] sm:$0xf] }
 0xa42   :  { %10359 = vmatpush.bf16.msrb.mxu0 %v14408_v57  ;;  %10370 = vmatpush.bf16.msrb.mxu2 %v14688_v4  ;;  %v15052_v57 = vor.u32 %v16277_v39, %v15049_v27  ;;  %v16270_v4 = vld [vmem:[#allocation4 + $0x904] sm:$0xf]  ;;  %v21239_v39 = vld [vmem:[%s21428_s20] sm:$0x7f] }
 0xa43   :  { %v15024_v30 = vor.u32 %v16270_v4, %v15021_v45  ;;  %v8275_v4 = vperm.slane %v21239_v39, 0  ;;  %v13963_v45 = vld [vmem:[#allocation4 + $0xb8] sm:$0xf] }
 0xa44   :  { %10395 = vmatpush.bf16.msra.mxu3 %v15164_v11  ;;  %10330 = vmatpush.bf16.msrb.mxu1 %v14044_v44  ;;  %v14075_v11 = vld [vmem:[#allocation4 + $0x198] sm:$0xf]  ;;  %v15990_v44 = vld [vmem:[#allocation4 + $0x44] sm:$0xf] }
 0xa45   :  { %v13904_v1 = vor.u32 %v15990_v44, %v13901_v54  ;;  %v14663_v44 = vld [vmem:[#allocation4 + $0x630] sm:$0xf]  ;;  %v16183_v54 = vld [vmem:[#allocation4 + $0x648] sm:$0xf0] }
 0xa46   :  { %10360 = vmatpush.bf16.msrb.mxu0 %v14380_v37  ;;  %10371 = vmatpush.bf16.msrb.mxu2 %v14660_v34  ;;  %v14243_v37 = vld [vmem:[#allocation4 + $0x2e8] sm:$0xf]  ;;  %v14076_v34 = vor.u32 %v16036_v19, %v14075_v11  ;;  %v16008_v11 = vld [vmem:[#allocation4 + $0xd0] sm:$0xf0] }
 0xa47   :  { %v14244_v8 = vor.u32 %v16078_v6, %v14243_v37  ;;  %v14881_v6 = vld [vmem:[#allocation4 + $0x804] sm:$0xf0] }
 0xa48   :  { %10396 = vmatpush.bf16.msra.mxu3 %v15136_v13  ;;  %10331 = vmatpush.bf16.msrb.mxu1 %v14016_v35  ;;  %v14047_v13 = vld [vmem:[#allocation4 + $0x160] sm:$0xf]  ;;  %v14747_v35 = vld [vmem:[#allocation4 + $0x6d8] sm:$0xf] }
 0xa49   :  { %v14048_v31 = vor.u32 %v16029_v32, %v14047_v13  ;;  %v14748_v53 = vor.u32 %v16204_v7, %v14747_v35  ;;  %v14664_v32 = vor.u32 %v16183_v54, %v14663_v44  ;;  %v13935_v35 = vld [vmem:[#allocation4 + $0x80] sm:$0xf]  ;;  %v16001_v7 = vld [vmem:[#allocation4 + $0x98] sm:$0xf0] }
 0xa4a   :  { %10361 = vmatpush.bf16.msrb.mxu0 %v14352_v43  ;;  %10372 = vmatpush.bf16.msrb.mxu2 %v14632_v48  ;;  %v15983_v43 = vld [vmem:[#allocation4 + $0xc] sm:$0xf]  ;;  %v14797_v44 = vld [vmem:[#allocation4 + $0x75c] sm:$0xf0] }
 0xa4b   :  { %v13876_v52 = vor.u32 %v15983_v43, %v13873_v41 }
 0xa4c   :  { %10397 = vmatpush.bf16.msra.mxu3 %v15108_v56  ;;  %10332 = vmatpush.bf16.msrb.mxu1 %v13988_v3  ;;  %v14996_v56 = vor.u32 %v16263_v16, %v14993_v36  ;;  %v14019_v3 = vld [vmem:[#allocation4 + $0x128] sm:$0xf]  ;;  %v13964_v36 = vor.u32 %v16008_v11, %v13963_v45  ;;  %v16260_v45 = vld [vmem:[#allocation4 + $0x8b0] sm:$0xf0] }
 0xa4e   :  { %10362 = vmatpush.bf16.msrb.mxu0 %v14324_v51  ;;  %10373 = vmatpush.bf16.msrb.mxu2 %v14604_v5  ;;  %v21233_v48 = vpop.f32.mrf.mxu0  ;;  %v14216_v51 = vor.u32 %v16071_v50, %v14215_v20  ;;  %v16249_v5 = vld [vmem:[#allocation4 + $0x85c] sm:$0xf]  ;;  %v16228_v20 = vld [vmem:[#allocation4 + $0x7b4] sm:$0xf] }
 0xa50   :  { %10398 = vmatpush.bf16.msra.mxu3 %v15080_v61  ;;  %10333 = vmatpush.bf16.msrb.mxu1 %v13960_v23  ;;  %v14020_v61 = vor.u32 %v16022_v60, %v14019_v3  ;;  %v16015_v23 = vld [vmem:[#allocation4 + $0x108] sm:$0xf0]  ;;  %v13936_v3 = vor.u32 %v16001_v7, %v13935_v35  ;;  %v15195_v60 = vld [vmem:[#allocation4 + $0xa58] sm:$0xf] }
 0xa51   :  { %10363 = vmatmul.bf16.vlgmr.msrb.gmra.mxu0 %v21200_v59  ;;  %v13992_v2 = vor.u32 %v16015_v23, %v13991_v0  ;;  %v16221_v0 = vld [vmem:[#allocation4 + $0x77c] sm:$0xf]  ;;  %v14825_v23 = vld [vmem:[#allocation4 + $0x794] sm:$0xf0] }
 0xa52   :  { %10414 = vmatpush.bf16.msra.mxu0 %v15220_v58  ;;  %10374 = vmatpush.bf16.msrb.mxu2 %v14576_v17  ;;  %v14937_v58 = vld [vmem:[#allocation4 + $0x874] sm:$0xf0]  ;;  %v16242_v17 = vld [vmem:[#allocation4 + $0x824] sm:$0xf] }
 0xa53   :  { %v14940_v27 = vor.u32 %v16249_v5, %v14937_v58  ;;  %v14912_v19 = vor.u32 %v16242_v17, %v14909_v46  ;;  %v13879_v46 = vld [vmem:[#allocation4 + $0x10] sm:$0xf]  ;;  %v14077_v35 = vld [vmem:[#allocation4 + $0x1b4] sm:$0xf0] }
 0xa54   :  { %10399 = vmatpush.bf16.msra.mxu3 %v15052_v57  ;;  %10334 = vmatpush.bf16.msrb.mxu1 %v13932_v14  ;;  %v14159_v57 = vld [vmem:[#allocation4 + $0x240] sm:$0xf]  ;;  %v14692_v14 = vor.u32 %v16190_v47, %v14691_v9  ;;  %v16309_v9 = vld [vmem:[#allocation4 + $0xa38] sm:$0xf0] }
 0xa56   :  { %10433 = vmatpush.bf16.msrb.mxu0 %v14300_v38  ;;  %10375 = vmatpush.bf16.msrb.mxu2 %v14548_v40  ;;  %v14188_v38 = vor.u32 %v16064_v42, %v14187_v18  ;;  %v10080_v12 = vpop.f32.mrf.mxu0  ;;  %v16235_v40 = vld [vmem:[#allocation4 + $0x7ec] sm:$0xf]  ;;  %v14607_v18 = vld [vmem:[#allocation4 + $0x5c0] sm:$0xf]  ;;  %v16169_v42 = vld [vmem:[#allocation4 + $0x5d8] sm:$0xf0] }
 0xa57   :  { %v14884_v43 = vor.u32 %v16235_v40, %v14881_v6  ;;  %v14608_v12 = vor.u32 %v16169_v42, %v14607_v18  ;;  %v15139_v40 = vld [vmem:[#allocation4 + $0x9e8] sm:$0xf]  ;;  %v16026_v42 = vld [vmem:[#allocation4 + $0x164] sm:$0xf] }
 0xa58   :  { %10400 = vmatpush.bf16.msra.mxu3 %v15024_v30  ;;  %10335 = vmatpush.bf16.msrb.mxu1 %v13904_v1  ;;  %v14131_v30 = vld [vmem:[#allocation4 + $0x208] sm:$0xf] }
 0xa59   :  { %10376 = vmatmul.bf16.vlgmr.msrb.gmra.mxu2 %v21194_v33 }
 0xa5a   :  { %10434 = vmatpush.bf16.msrb.mxu0 %v14272_v29  ;;  %10420 = vmatpush.bf16.msra.mxu2 %v14076_v34  ;;  %v14160_v29 = vor.u32 %v16057_v21, %v14159_v57  ;;  %v10065_v37 = vpop.f32.mrf.mxu3  ;;  %v16050_v34 = vld [vmem:[#allocation4 + $0x220] sm:$0xf0]  ;;  %v15987_v57 = vld [vmem:[#allocation4 + $0x28] sm:$0xf0]  ;;  %v14579_v21 = vld [vmem:[#allocation4 + $0x588] sm:$0xf] }
 0xa5b   :  { %v10066_v16 = vadd.f32 %v10065_v37, %v8275_v4  ;;  %v14132_v41 = vor.u32 %v16050_v34, %v14131_v30  ;;  %v16162_v4 = vld [vmem:[#allocation4 + $0x5a0] sm:$0xf0]  ;;  %v13880_v54 = vor.u32 %v15987_v57, %v13879_v46  ;;  %v14551_v34 = vld [vmem:[#allocation4 + $0x550] sm:$0xf] }
 0xa5c   :  { %10401 = vmatpush.bf16.msra.mxu3 %v14996_v56  ;;  %10336 = vmatpush.bf16.msrb.mxu1 %v13876_v52  ;;  %v10091_v13 = vpop.f32.mrf.mxu1  ;;  %v10104_v1 = vpop.f32.mrf.mxu2  ;;  %v14853_v56 = vld [vmem:[#allocation4 + $0x7cc] sm:$0xf0]  ;;  %v16302_v37 = vld [vmem:[#allocation4 + $0xa00] sm:$0xf0]  ;;  %v14580_v6 = vor.u32 %v16162_v4, %v14579_v21  ;;  %v16019_v21 = vld [vmem:[#allocation4 + $0x12c] sm:$0xf] }
 0xa5d   :  { %v14856_v5 = vor.u32 %v16228_v20, %v14853_v56  ;;  %v16148_v20 = vld [vmem:[#allocation4 + $0x530] sm:$0xf0]  ;;  %v15111_v56 = vld [vmem:[#allocation4 + $0x9b0] sm:$0xf]  ;;  %v14467_v4 = vld [vmem:[#allocation4 + $0x4a8] sm:$0xf] }
 0xa5e   :  { %10435 = vmatpush.bf16.msrb.mxu0 %v14244_v8  ;;  %10421 = vmatpush.bf16.msra.mxu2 %v14048_v31  ;;  %v10079_v8 = vadd.f32 %v21233_v48, %v10066_v16  ;;  %v21247_v50 = vpop.f32.mrf.mxu0  ;;  %v14103_v31 = vld [vmem:[#allocation4 + $0x1d0] sm:$0xf]  ;;  %v15994_v48 = vld [vmem:[#allocation4 + $0x60] sm:$0xf0]  ;;  %v16155_v16 = vld [vmem:[#allocation4 + $0x568] sm:$0xf0] }
 0xa5f   :  { %10402 = vmatmul.bf16.vlgmr.msra.gmra.mxu3 %v21202_v10  ;;  %10337 = vmatmul.bf16.vlgmr.msrb.gmra.mxu1 %v21192_v28 }
 0xa60   :  { %10459 = vmatpush.bf16.msrb.mxu3 %v14748_v53  ;;  %10381 = vmatpush.bf16.msra.mxu1 %v14968_v26  ;;  %v16043_v53 = vld [vmem:[#allocation4 + $0x1e8] sm:$0xf0]  ;;  %v10092_v52 = vadd.f32 %v10091_v13, %v10079_v8  ;;  %v16316_v26 = vld [vmem:[#allocation4 + $0xa70] sm:$0xf0]  ;;  %v15140_v8 = vor.u32 %v16302_v37, %v15139_v40  ;;  %v14859_v40 = vld [vmem:[#allocation4 + $0x7b8] sm:$0xf] }
 0xa61   :  { %15236 = vmatmul.msk.bf16.vlgmr.msra.gmra.mxu0 %vm2287_vm0, %v21212_v22  ;;  %v14104_v58 = vor.u32 %v16043_v53, %v14103_v31  ;;  %v16295_v31 = vld [vmem:[#allocation4 + $0x9c8] sm:$0xf0]  ;;  %v16232_v37 = vld [vmem:[#allocation4 + $0x7d0] sm:$0xf0] }
 0xa62   :  { %10436 = vmatpush.bf16.msrb.mxu0 %v14216_v51  ;;  %10422 = vmatpush.bf16.msra.mxu2 %v14020_v61  ;;  %v14636_v51 = vor.u32 %v16176_v49, %v14635_v55  ;;  %v10105_v24 = vadd.f32 %v10104_v1, %v10092_v52  ;;  %v10067_v61 = vpop.f32.mrf.mxu3  ;;  %v16253_v1 = vld [vmem:[#allocation4 + $0x878] sm:$0xf0]  ;;  %v14523_v55 = vld [vmem:[#allocation4 + $0x518] sm:$0xf]  ;;  %v15112_v18 = vor.u32 %v16295_v31, %v15111_v56 }
 0xa63   :  { %v14049_v61 = vld [vmem:[#allocation4 + $0x17c] sm:$0xf0]  ;;  %v16005_v56 = vld [vmem:[#allocation4 + $0xbc] sm:$0xf]  ;;  %v13965_v31 = vld [vmem:[#allocation4 + $0xd4] sm:$0xf0] }
 0xa64   :  { %10460 = vmatpush.bf16.msrb.mxu3 %v14720_v62  ;;  %10382 = vmatpush.bf16.msra.mxu1 %v14940_v27  ;;  %v15196_v62 = vor.u32 %v16316_v26, %v15195_v60  ;;  %v13908_v27 = vor.u32 %v15994_v48, %v13907_v15  ;;  %v10093_v47 = vpop.f32.mrf.mxu1  ;;  %v10106_v17 = vpop.f32.mrf.mxu2  ;;  %v14915_v48 = vld [vmem:[#allocation4 + $0x828] sm:$0xf] }
 0xa65   :  { %v14887_v47 = vld [vmem:[#allocation4 + $0x7f0] sm:$0xf]  ;;  %v16239_v17 = vld [vmem:[#allocation4 + $0x808] sm:$0xf0] }
 0xa66   :  { %10437 = vmatpush.bf16.msrb.mxu0 %v14188_v38  ;;  %10423 = vmatpush.bf16.msra.mxu2 %v13992_v2  ;;  %v15167_v38 = vld [vmem:[#allocation4 + $0xa20] sm:$0xf]  ;;  %v14828_v2 = vor.u32 %v16221_v0, %v14825_v23  ;;  %v10132_v11 = vpop.f32.mrf.mxu0  ;;  %v16141_v23 = vld [vmem:[#allocation4 + $0x4f8] sm:$0xf0] }
 0xa67   :  { %v16281_v11 = vld [vmem:[#allocation4 + $0x958] sm:$0xf0] }
 0xa68   :  { %10461 = vmatpush.bf16.msrb.mxu3 %v14692_v14  ;;  %10383 = vmatpush.bf16.msra.mxu1 %v14912_v19  ;;  %v14971_v14 = vld [vmem:[#allocation4 + $0x898] sm:$0xf]  ;;  %v15168_v19 = vor.u32 %v16309_v9, %v15167_v38  ;;  %v16288_v38 = vld [vmem:[#allocation4 + $0x990] sm:$0xf0]  ;;  %v14052_v9 = vor.u32 %v16026_v42, %v14049_v61  ;;  %v13968_v61 = vor.u32 %v16005_v56, %v13965_v31 }
 0xa69   :  { %v14972_v30 = vor.u32 %v16260_v45, %v14971_v14  ;;  %v16134_v14 = vld [vmem:[#allocation4 + $0x4c0] sm:$0xf0]  ;;  %v15055_v45 = vld [vmem:[#allocation4 + $0x940] sm:$0xf]  ;;  %v14973_v56 = vld [vmem:[#allocation4 + $0x8b4] sm:$0xf0] }
 0xa6a   :  { %10438 = vmatpush.bf16.msrb.mxu0 %v14160_v29  ;;  %10424 = vmatpush.bf16.msra.mxu2 %v13964_v36  ;;  %v16214_v29 = vld [vmem:[#allocation4 + $0x744] sm:$0xf]  ;;  %v14943_v36 = vld [vmem:[#allocation4 + $0x860] sm:$0xf]  ;;  %v10117_v7 = vpop.f32.mrf.mxu3 }
 0xa6b   :  { %v14800_v13 = vor.u32 %v16214_v29, %v14797_v44  ;;  %v10118_v49 = vadd.f32 %v10117_v7, %v10105_v24  ;;  %v14944_v60 = vor.u32 %v16253_v1, %v14943_v36  ;;  %v14888_v44 = vor.u32 %v16239_v17, %v14887_v47  ;;  %v13993_v36 = vld [vmem:[#allocation4 + $0x10c] sm:$0xf0]  ;;  %v16127_v1 = vld [vmem:[#allocation4 + $0x488] sm:$0xf0]  ;;  %v13937_v47 = vld [vmem:[#allocation4 + $0x9c] sm:$0xf0] }
 0xa6c   :  { %10462 = vmatpush.bf16.msrb.mxu3 %v14664_v32  ;;  %10384 = vmatpush.bf16.msra.mxu1 %v14884_v43  ;;  %v16033_v32 = vld [vmem:[#allocation4 + $0x19c] sm:$0xf]  ;;  %v16207_v43 = vld [vmem:[#allocation4 + $0x70c] sm:$0xf]  ;;  %v10143_v53 = vpop.f32.mrf.mxu1  ;;  %v21250_v52 = vpop.f32.mrf.mxu2  ;;  %v8276_v7 = vperm.slane %v21239_v39, 1 }
 0xa6d   :  { %v10131_v26 = vadd.f32 %v21247_v50, %v10118_v49 }
 0xa6e   :  { %10439 = vmatpush.bf16.msrb.mxu0 %v14132_v41  ;;  %10425 = vmatpush.bf16.msra.mxu2 %v13936_v3  ;;  %v14769_v41 = vld [vmem:[#allocation4 + $0x724] sm:$0xf0]  ;;  %v14552_v3 = vor.u32 %v16155_v16, %v14551_v34  ;;  %v21254_v24 = vpop.f32.mrf.mxu0  ;;  %v15056_v34 = vor.u32 %v16281_v11, %v15055_v45  ;;  %v16012_v16 = vld [vmem:[#allocation4 + $0xf4] sm:$0xf]  ;;  %v16211_v45 = vld [vmem:[#allocation4 + $0x728] sm:$0xf0] }
 0xa6f   :  { %v14772_v15 = vor.u32 %v16207_v43, %v14769_v41  ;;  %v21256_v0 = vadd.f32 %v10143_v53, %v10131_v26  ;;  %v13996_v43 = vor.u32 %v16012_v16, %v13993_v36  ;;  %v14831_v41 = vld [vmem:[#allocation4 + $0x780] sm:$0xf]  ;;  %v14411_v53 = vld [vmem:[#allocation4 + $0x438] sm:$0xf]  ;;  %v14999_v26 = vld [vmem:[#allocation4 + $0x8d0] sm:$0xf] }
 0xa70   :  { %10463 = vmatpush.bf16.msrb.mxu3 %v14636_v51  ;;  %10385 = vmatpush.bf16.msra.mxu1 %v14856_v5  ;;  %v14080_v51 = vor.u32 %v16033_v32, %v14077_v35  ;;  %v16246_v5 = vld [vmem:[#allocation4 + $0x840] sm:$0xf0]  ;;  %v15027_v32 = vld [vmem:[#allocation4 + $0x908] sm:$0xf]  ;;  %v15991_v11 = vld [vmem:[#allocation4 + $0x4c] sm:$0xf] }
 0xa71   :  { %v14916_v50 = vor.u32 %v16246_v5, %v14915_v48  ;;  %v16274_v35 = vld [vmem:[#allocation4 + $0x920] sm:$0xf0] }
 0xa72   :  { %10440 = vmatpush.bf16.msrb.mxu0 %v14104_v58  ;;  %10426 = vmatpush.bf16.msra.mxu2 %v13908_v27  ;;  %v14524_v58 = vor.u32 %v16148_v20, %v14523_v55  ;;  %v15083_v27 = vld [vmem:[#allocation4 + $0x978] sm:$0xf]  ;;  %v16225_v55 = vld [vmem:[#allocation4 + $0x798] sm:$0xf0]  ;;  %v15028_v20 = vor.u32 %v16274_v35, %v15027_v32  ;;  %v14693_v32 = vld [vmem:[#allocation4 + $0x684] sm:$0xf0] }
 0xa73   :  { %v15084_v57 = vor.u32 %v16288_v38, %v15083_v27  ;;  %v14832_v5 = vor.u32 %v16225_v55, %v14831_v41  ;;  %v16138_v41 = vld [vmem:[#allocation4 + $0x4e4] sm:$0xf] }
 0xa74   :  { %10464 = vmatpush.bf16.msrb.mxu3 %v14608_v12  ;;  %10386 = vmatpush.bf16.msra.mxu1 %v14828_v2  ;;  %v10119_v12 = vpop.f32.mrf.mxu3  ;;  %v14021_v2 = vld [vmem:[#allocation4 + $0x144] sm:$0xf0]  ;;  %v10158_v29 = vpop.f32.mrf.mxu2 }
 0xa75   :  { %10441 = vmatmul.bf16.vlgmr.msrb.gmra.mxu0 %v21187_v63  ;;  %v14383_v12 = vld [vmem:[#allocation4 + $0x400] sm:$0xf] }
 0xa76   :  { %10485 = vmatpush.bf16.msra.mxu0 %v15196_v62  ;;  %10427 = vmatpush.bf16.msra.mxu2 %v13880_v54  ;;  %v14495_v62 = vld [vmem:[#allocation4 + $0x4e0] sm:$0xf]  ;;  %v14024_v54 = vor.u32 %v16019_v21, %v14021_v2  ;;  %v16194_v21 = vld [vmem:[#allocation4 + $0x6a4] sm:$0xf] }
 0xa77   :  { %v14496_v46 = vor.u32 %v16141_v23, %v14495_v62  ;;  %v14803_v62 = vld [vmem:[#allocation4 + $0x748] sm:$0xf]  ;;  %v16218_v23 = vld [vmem:[#allocation4 + $0x760] sm:$0xf0]  ;;  %v14721_v2 = vld [vmem:[#allocation4 + $0x6bc] sm:$0xf0] }
 0xa78   :  { %10465 = vmatpush.bf16.msrb.mxu3 %v14580_v6  ;;  %10387 = vmatpush.bf16.msra.mxu1 %v14800_v13  ;;  %v10197_v6 = vpop.f32.mrf.mxu0  ;;  %v14439_v13 = vld [vmem:[#allocation4 + $0x470] sm:$0xf] }
 0xa79   :  { %10428 = vmatmul.bf16.vlgmr.msra.gmra.mxu2 %v21192_v28  ;;  %v14440_v49 = vor.u32 %v16127_v1, %v14439_v13  ;;  %v14724_v6 = vor.u32 %v16194_v21, %v14721_v2  ;;  %v16187_v1 = vld [vmem:[#allocation4 + $0x66c] sm:$0xf] }
 0xa7a   :  { %10486 = vmatpush.bf16.msra.mxu0 %v15168_v19  ;;  %10472 = vmatpush.bf16.msrb.mxu2 %v14972_v30  ;;  %v10145_v19 = vpop.f32.mrf.mxu1  ;;  %v14468_v30 = vor.u32 %v16134_v14, %v14467_v4  ;;  %v14775_v14 = vld [vmem:[#allocation4 + $0x710] sm:$0xf]  ;;  %v14696_v31 = vor.u32 %v16187_v1, %v14693_v32 }
 0xa7b   :  { %v14776_v13 = vor.u32 %v16211_v45, %v14775_v14  ;;  %v14441_v14 = vld [vmem:[#allocation4 + $0x48c] sm:$0xf0]  ;;  %v16243_v45 = vld [vmem:[#allocation4 + $0x82c] sm:$0xf] }
 0xa7c   :  { %10466 = vmatpush.bf16.msrb.mxu3 %v14552_v3  ;;  %10388 = vmatpush.bf16.msra.mxu1 %v14772_v15  ;;  %v10182_v3 = vpop.f32.mrf.mxu3  ;;  %v10157_v15 = vadd.f32 %v21250_v52, %v8276_v7  ;;  %v10208_v48 = vpop.f32.mrf.mxu2  ;;  %v16113_v52 = vld [vmem:[#allocation4 + $0x418] sm:$0xf0] }
 0xa7d   :  { %v14384_v29 = vor.u32 %v16113_v52, %v14383_v12  ;;  %v15240_v12 = vmul.f32 -1.442695, %v21256_v0  ;;  %v16173_v52 = vld [vmem:[#allocation4 + $0x5fc] sm:$0xf]  ;;  %v16166_v0 = vld [vmem:[#allocation4 + $0x5c4] sm:$0xf] }
 0xa7e   :  { %10487 = vmatpush.bf16.msra.mxu0 %v15140_v8  ;;  %10473 = vmatpush.bf16.msrb.mxu2 %v14944_v60  ;;  %v14860_v8 = vor.u32 %v16232_v37, %v14859_v40  ;;  %v16120_v60 = vld [vmem:[#allocation4 + $0x450] sm:$0xf0]  ;;  %v14525_v40 = vld [vmem:[#allocation4 + $0x534] sm:$0xf0] }
 0xa7f   :  { %10467 = vmatmul.bf16.vlgmr.msrb.gmra.mxu3 %v21194_v33  ;;  %10389 = vmatmul.bf16.vlgmr.msra.gmra.mxu1 %v21207_v25  ;;  %v14412_v38 = vor.u32 %v16120_v60, %v14411_v53  ;;  %v14327_v53 = vld [vmem:[#allocation4 + $0x390] sm:$0xf]  ;;  %v16180_v60 = vld [vmem:[#allocation4 + $0x634] sm:$0xf]  ;;  %16346 = vpow2.f32 %v15240_v12  ;;  %v14357_v12 = vld [vmem:[#allocation4 + $0x3e4] sm:$0xf0] }
 0xa80   :  { %10511 = vmatpush.bf16.msra.mxu3 %v14080_v51  ;;  %10446 = vmatpush.bf16.msrb.mxu1 %v14524_v58  ;;  %v16267_v51 = vld [vmem:[#allocation4 + $0x8e8] sm:$0xf0]  ;;  %v16201_v58 = vld [vmem:[#allocation4 + $0x6dc] sm:$0xf] }
 0xa82   :  { %10488 = vmatpush.bf16.msra.mxu0 %v15112_v18  ;;  %10474 = vmatpush.bf16.msrb.mxu2 %v14916_v50  ;;  %v14749_v18 = vld [vmem:[#allocation4 + $0x6f4] sm:$0xf0]  ;;  %v10169_v42 = vpop.f32.mrf.mxu1  ;;  %v15000_v50 = vor.u32 %v16267_v51, %v14999_v26  ;;  %v14665_v26 = vld [vmem:[#allocation4 + $0x64c] sm:$0xf0] }
 0xa83   :  { %v10170_v27 = vadd.f32 %v10169_v42, %v10157_v15  ;;  %v14752_v17 = vor.u32 %v16201_v58, %v14749_v18  ;;  %v15223_v51 = vld [vmem:[#allocation4 + $0xa90] sm:$0xf]  ;;  %v16323_v15 = vld [vmem:[#allocation4 + $0xaa8] sm:$0xf0] }
 0xa84   :  { %10512 = vmatpush.bf16.msra.mxu3 %v14052_v9  ;;  %10447 = vmatpush.bf16.msrb.mxu1 %v14496_v46  ;;  %v15998_v9 = vld [vmem:[#allocation4 + $0x84] sm:$0xf]  ;;  %v10184_v37 = vpop.f32.mrf.mxu3  ;;  %v10210_v36 = vpop.f32.mrf.mxu2  ;;  %v16131_v42 = vld [vmem:[#allocation4 + $0x4ac] sm:$0xf] }
 0xa85   :  { %v10183_v46 = vadd.f32 %v10182_v3, %v10170_v27  ;;  %v13940_v4 = vor.u32 %v15998_v9, %v13937_v47  ;;  %v16099_v3 = vld [vmem:[#allocation4 + $0x3a8] sm:$0xf0]  ;;  %v14945_v9 = vld [vmem:[#allocation4 + $0x87c] sm:$0xf0]  ;;  %v16089_v47 = vld [vmem:[#allocation4 + $0x35c] sm:$0xf] }
 0xa86   :  { %10489 = vmatpush.bf16.msra.mxu0 %v15084_v57  ;;  %10475 = vmatpush.bf16.msrb.mxu2 %v14888_v44  ;;  %v14804_v57 = vor.u32 %v16218_v23, %v14803_v62  ;;  %v13909_v44 = vld [vmem:[#allocation4 + $0x64] sm:$0xf0]  ;;  %v14328_v18 = vor.u32 %v16099_v3, %v14327_v53  ;;  %v16250_v62 = vld [vmem:[#allocation4 + $0x864] sm:$0xf]  ;;  %v16236_v36 = vld [vmem:[#allocation4 + $0x7f4] sm:$0xf] }
 0xa87   :  { %v10196_v19 = vadd.f32 %v21254_v24, %v10183_v46  ;;  %v13912_v35 = vor.u32 %v15991_v11, %v13909_v44  ;;  %v14637_v46 = vld [vmem:[#allocation4 + $0x614] sm:$0xf0]  ;;  %v14948_v21 = vor.u32 %v16250_v62, %v14945_v9  ;;  %v14273_v44 = vld [vmem:[#allocation4 + $0x33c] sm:$0xf0]  ;;  %v16229_v3 = vld [vmem:[#allocation4 + $0x7bc] sm:$0xf] }
 0xa88   :  { %10513 = vmatpush.bf16.msra.mxu3 %v14024_v54  ;;  %10448 = vmatpush.bf16.msrb.mxu1 %v14468_v30  ;;  %v16145_v54 = vld [vmem:[#allocation4 + $0x51c] sm:$0xf]  ;;  %v14355_v30 = vld [vmem:[#allocation4 + $0x3c8] sm:$0xf]  ;;  %v14640_v11 = vor.u32 %v16173_v52, %v14637_v46  ;;  %v14385_v53 = vld [vmem:[#allocation4 + $0x41c] sm:$0xf0] }
 0xa89   :  { %v21263_v16 = vadd.f32 %v10208_v48, %v10196_v19  ;;  %v14528_v7 = vor.u32 %v16145_v54, %v14525_v40  ;;  %v14917_v19 = vld [vmem:[#allocation4 + $0x844] sm:$0xf0]  ;;  %v14609_v54 = vld [vmem:[#allocation4 + $0x5dc] sm:$0xf0]  ;;  %v16037_v62 = vld [vmem:[#allocation4 + $0x1b8] sm:$0xf0] }
 0xa8a   :  { %10490 = vmatpush.bf16.msra.mxu0 %v15056_v34  ;;  %10476 = vmatpush.bf16.msrb.mxu2 %v14860_v8  ;;  %v16106_v34 = vld [vmem:[#allocation4 + $0x3e0] sm:$0xf0]  ;;  %v10171_v24 = vpop.f32.mrf.mxu1  ;;  %v15984_v8 = vld [vmem:[#allocation4 + $0x14] sm:$0xf]  ;;  %v14920_v37 = vor.u32 %v16243_v45, %v14917_v19  ;;  %v14612_v32 = vor.u32 %v16166_v0, %v14609_v54 }
 0xa8b   :  { %v14356_v55 = vor.u32 %v16106_v34, %v14355_v30  ;;  %v16117_v30 = vld [vmem:[#allocation4 + $0x43c] sm:$0xf]  ;;  %v14413_v34 = vld [vmem:[#allocation4 + $0x454] sm:$0xf0]  ;;  %v14889_v24 = vld [vmem:[#allocation4 + $0x80c] sm:$0xf0] }
 0xa8c   :  { %10514 = vmatpush.bf16.msra.mxu3 %v13996_v43  ;;  %10449 = vmatpush.bf16.msrb.mxu1 %v14440_v49  ;;  %v13881_v43 = vld [vmem:[#allocation4 + $0x2c] sm:$0xf0]  ;;  %v14497_v49 = vld [vmem:[#allocation4 + $0x4fc] sm:$0xf0]  ;;  %v21267_v23 = vpop.f32.mrf.mxu3  ;;  %v16222_v52 = vld [vmem:[#allocation4 + $0x784] sm:$0xf] }
 0xa8d   :  { %v13884_v48 = vor.u32 %v15984_v8, %v13881_v43  ;;  %v8277_v8 = vperm.slane %v21239_v39, 2  ;;  %v16159_v43 = vld [vmem:[#allocation4 + $0x58c] sm:$0xf]  ;;  %v16152_v39 = vld [vmem:[#allocation4 + $0x554] sm:$0xf] }
 0xa8e   :  { %10491 = vmatpush.bf16.msra.mxu0 %v15028_v20  ;;  %10477 = vmatpush.bf16.msrb.mxu2 %v14832_v5  ;;  %v16257_v20 = vld [vmem:[#allocation4 + $0x89c] sm:$0xf]  ;;  %v14500_v5 = vor.u32 %v16138_v41, %v14497_v49  ;;  %v21269_v27 = vpop.f32.mrf.mxu0  ;;  %v14581_v41 = vld [vmem:[#allocation4 + $0x5a4] sm:$0xf0]  ;;  %v16347_v49 = vpop.eup %16346  ;;  %v16030_v0 = vld [vmem:[#allocation4 + $0x180] sm:$0xf0] }
 0xa8f   :  { %v14976_v58 = vor.u32 %v16257_v20, %v14973_v56  ;;  %v14892_v20 = vor.u32 %v16236_v36, %v14889_v24  ;;  %v14161_v36 = vld [vmem:[#allocation4 + $0x25c] sm:$0xf0] }
 0xa90   :  { %10515 = vmatpush.bf16.msra.mxu3 %v13968_v61  ;;  %10450 = vmatpush.bf16.msrb.mxu1 %v14412_v38  ;;  %v14469_v61 = vld [vmem:[#allocation4 + $0x4c4] sm:$0xf0]  ;;  %v14668_v38 = vor.u32 %v16180_v60, %v14665_v26  ;;  %v14584_v60 = vor.u32 %v16159_v43, %v14581_v41  ;;  %v14861_v26 = vld [vmem:[#allocation4 + $0x7d4] sm:$0xf0] }
 0xa91   :  { %v14864_v9 = vor.u32 %v16229_v3, %v14861_v26  ;;  %v16047_v3 = vld [vmem:[#allocation4 + $0x20c] sm:$0xf] }
 0xa92   :  { %10492 = vmatpush.bf16.msra.mxu0 %v15000_v50  ;;  %10478 = vmatpush.bf16.msrb.mxu2 %v14804_v57  ;;  %v15224_v50 = vor.u32 %v16323_v15, %v15223_v51  ;;  %v14472_v57 = vor.u32 %v16131_v42, %v14469_v61  ;;  %v16068_v51 = vld [vmem:[#allocation4 + $0x2b4] sm:$0xf]  ;;  %v14217_v15 = vld [vmem:[#allocation4 + $0x2cc] sm:$0xf0]  ;;  %v14083_v61 = vld [vmem:[#allocation4 + $0x1a0] sm:$0xf] }
 0xa93   :  { %v14084_v45 = vor.u32 %v16037_v62, %v14083_v61  ;;  %v14279_v62 = vld [vmem:[#allocation4 + $0x328] sm:$0xf] }
 0xa94   :  { %10516 = vmatpush.bf16.msra.mxu3 %v13940_v4  ;;  %10451 = vmatpush.bf16.msrb.mxu1 %v14384_v29  ;;  %v16124_v4 = vld [vmem:[#allocation4 + $0x474] sm:$0xf]  ;;  %v16082_v29 = vld [vmem:[#allocation4 + $0x324] sm:$0xf] }
 0xa95   :  { %10493 = vmatmul.bf16.vlgmr.msra.gmra.mxu0 %v21202_v10  ;;  %v14444_v40 = vor.u32 %v16124_v4, %v14441_v14  ;;  %v14189_v4 = vld [vmem:[#allocation4 + $0x294] sm:$0xf0] }
 0xa96   :  { %10550 = vmatpush.bf16.msrb.mxu0 %v14752_v17  ;;  %10479 = vmatpush.bf16.msrb.mxu2 %v14776_v13  ;;  %v14301_v17 = vld [vmem:[#allocation4 + $0x374] sm:$0xf0]  ;;  %v10236_v13 = vpop.f32.mrf.mxu3  ;;  %v10249_v1 = vpop.f32.mrf.mxu0 }
 0xa97   :  { %v14304_v2 = vor.u32 %v16089_v47, %v14301_v17  ;;  %v14220_v47 = vor.u32 %v16068_v51, %v14217_v15  ;;  %v16103_v17 = vld [vmem:[#allocation4 + $0x3cc] sm:$0xf]  ;;  %v16320_v13 = vld [vmem:[#allocation4 + $0xa94] sm:$0xf]  ;;  %v15225_v1 = vld [vmem:[#allocation4 + $0xaac] sm:$0xf0] }
 0xa98   :  { %10517 = vmatpush.bf16.msra.mxu3 %v13912_v35  ;;  %10452 = vmatpush.bf16.msrb.mxu1 %v14356_v55  ;;  %v16075_v35 = vld [vmem:[#allocation4 + $0x2ec] sm:$0xf]  ;;  %v14416_v55 = vor.u32 %v16117_v30, %v14413_v34  ;;  %v14360_v19 = vor.u32 %v16103_v17, %v14357_v12  ;;  %v16054_v34 = vld [vmem:[#allocation4 + $0x244] sm:$0xf]  ;;  %v14531_v15 = vld [vmem:[#allocation4 + $0x520] sm:$0xf] }
 0xa99   :  { %10480 = vmatmul.bf16.vlgmr.msrb.gmra.mxu2 %v21207_v25  ;;  %v14164_v41 = vor.u32 %v16054_v34, %v14161_v36  ;;  %v14105_v12 = vld [vmem:[#allocation4 + $0x1ec] sm:$0xf0]  ;;  %v16135_v34 = vld [vmem:[#allocation4 + $0x4c8] sm:$0xf0]  ;;  %v16306_v36 = vld [vmem:[#allocation4 + $0xa24] sm:$0xf] }
 0xa9a   :  { %10551 = vmatpush.bf16.msrb.mxu0 %v14724_v6  ;;  %10537 = vmatpush.bf16.msra.mxu2 %v14528_v7  ;;  %v14276_v6 = vor.u32 %v16082_v29, %v14273_v44  ;;  %v14245_v7 = vld [vmem:[#allocation4 + $0x304] sm:$0xf0]  ;;  %v16096_v29 = vld [vmem:[#allocation4 + $0x394] sm:$0xf] }
 0xa9b   :  { %v14248_v56 = vor.u32 %v16075_v35, %v14245_v7  ;;  %v14055_v44 = vld [vmem:[#allocation4 + $0x168] sm:$0xf]  ;;  %v14027_v35 = vld [vmem:[#allocation4 + $0x130] sm:$0xf]  ;;  %v16023_v7 = vld [vmem:[#allocation4 + $0x148] sm:$0xf0] }
 0xa9c   :  { %10518 = vmatpush.bf16.msra.mxu3 %v13884_v48  ;;  %10453 = vmatpush.bf16.msrb.mxu1 %v14328_v18  ;;  %v10248_v48 = vadd.f32 %v21269_v27, %v8277_v8  ;;  %v10260_v18 = vpop.f32.mrf.mxu2  ;;  %v14028_v51 = vor.u32 %v16023_v7, %v14027_v35  ;;  %v16072_v35 = vld [vmem:[#allocation4 + $0x2d0] sm:$0xf0] }
 0xa9e   :  { %10552 = vmatpush.bf16.msrb.mxu0 %v14696_v31  ;;  %10538 = vmatpush.bf16.msra.mxu2 %v14500_v5  ;;  %v16110_v31 = vld [vmem:[#allocation4 + $0x404] sm:$0xf]  ;;  %v14553_v5 = vld [vmem:[#allocation4 + $0x56c] sm:$0xf0]  ;;  %v10273_v46 = vpop.f32.mrf.mxu3 }
 0xa9f   :  { %10519 = vmatmul.bf16.vlgmr.msra.gmra.mxu3 %v21192_v28  ;;  %10454 = vmatmul.bf16.vlgmr.msrb.gmra.mxu1 %v21200_v59  ;;  %v14388_v42 = vor.u32 %v16110_v31, %v14385_v53  ;;  %v15228_v31 = vor.u32 %v16320_v13, %v15225_v1  ;;  %v14777_v53 = vld [vmem:[#allocation4 + $0x72c] sm:$0xf0]  ;;  %v13943_v1 = vld [vmem:[#allocation4 + $0x88] sm:$0xf] }
 0xaa0   :  { %10563 = vmatpush.bf16.msrb.mxu3 %v14976_v58  ;;  %10505 = vmatpush.bf16.msra.mxu1 %v15224_v50  ;;  %v21276_v58 = vadd.f32 1.0, %v16347_v49  ;;  %v10261_v50 = vadd.f32 %v10260_v18, %v10248_v48  ;;  %v14307_v49 = vld [vmem:[#allocation4 + $0x360] sm:$0xf]  ;;  %v16149_v48 = vld [vmem:[#allocation4 + $0x538] sm:$0xf0] }
 0xaa1   :  { %v16016_v18 = vld [vmem:[#allocation4 + $0x110] sm:$0xf0]  ;;  %v14532_v17 = vor.u32 %v16149_v48, %v14531_v15  ;;  %v13915_v48 = vld [vmem:[#allocation4 + $0x50] sm:$0xf] }
 0xaa2   :  { %10553 = vmatpush.bf16.msrb.mxu0 %v14668_v38  ;;  %10539 = vmatpush.bf16.msra.mxu2 %v14472_v57  ;;  %v10221_v38 = vpop.f32.mrf.mxu1  ;;  %v14556_v57 = vor.u32 %v16152_v39, %v14553_v5  ;;  %v21279_v14 = vadd.f32 %v10273_v46, %v10261_v50  ;;  %16348 = vrcp.f32 %v21276_v58  ;;  %v13999_v5 = vld [vmem:[#allocation4 + $0xf8] sm:$0xf]  ;;  %v16040_v50 = vld [vmem:[#allocation4 + $0x1d4] sm:$0xf]  ;;  %v10732_v7 = vand.u32 2147483648, %v21276_v58 }
 0xaa3   :  { %v10222_v27 = vadd.f32 %v10221_v38, %v21263_v16  ;;  %v16086_v38 = vld [vmem:[#allocation4 + $0x340] sm:$0xf0]  ;;  %vm10726_vm9 = vweird.f32 %v21276_v58 }
 0xaa4   :  { %10564 = vmatpush.bf16.msrb.mxu3 %v14948_v21  ;;  %10524 = vmatpush.bf16.msrb.mxu1 %v14304_v2  ;;  %v14833_v21 = vld [vmem:[#allocation4 + $0x79c] sm:$0xf0]  ;;  %v16061_v2 = vld [vmem:[#allocation4 + $0x27c] sm:$0xf] }
 0xaa5   :  { %v14836_v16 = vor.u32 %v16222_v52, %v14833_v21  ;;  %v14192_v54 = vor.u32 %v16061_v2, %v14189_v4  ;;  %v14503_v52 = vld [vmem:[#allocation4 + $0x4e8] sm:$0xf]  ;;  %v14000_v21 = vor.u32 %v16016_v18, %v13999_v5  ;;  %v16313_v2 = vld [vmem:[#allocation4 + $0xa5c] sm:$0xf]  ;;  %v15197_v4 = vld [vmem:[#allocation4 + $0xa74] sm:$0xf0] }
 0xaa6   :  { %10554 = vmatpush.bf16.msrb.mxu0 %v14640_v11  ;;  %10540 = vmatpush.bf16.msra.mxu2 %v14444_v40  ;;  %v10235_v11 = vadd.f32 %v21267_v23, %v10222_v27  ;;  %v14329_v40 = vld [vmem:[#allocation4 + $0x3ac] sm:$0xf0]  ;;  %v14056_v23 = vor.u32 %v16030_v0, %v14055_v44  ;;  %v16142_v27 = vld [vmem:[#allocation4 + $0x500] sm:$0xf0]  ;;  %v16079_v0 = vld [vmem:[#allocation4 + $0x308] sm:$0xf0] }
 0xaa7   :  { %v14332_v24 = vor.u32 %v16096_v29, %v14329_v40  ;;  %v14108_v29 = vor.u32 %v16040_v50, %v14105_v12  ;;  %v14251_v44 = vld [vmem:[#allocation4 + $0x2f0] sm:$0xf]  ;;  %v14504_v40 = vor.u32 %v16142_v27, %v14503_v52  ;;  %v14195_v5 = vld [vmem:[#allocation4 + $0x280] sm:$0xf]  ;;  %v16065_v18 = vld [vmem:[#allocation4 + $0x298] sm:$0xf0] }
 0xaa8   :  { %10565 = vmatpush.bf16.msrb.mxu3 %v14920_v37  ;;  %10525 = vmatpush.bf16.msrb.mxu1 %v14276_v6  ;;  %v16215_v37 = vld [vmem:[#allocation4 + $0x74c] sm:$0xf]  ;;  %v14805_v6 = vld [vmem:[#allocation4 + $0x764] sm:$0xf0]  ;;  %v15241_v30 = vmul.f32 -1.442695, %v10235_v11  ;;  %v21286_v26 = vpop.eup %16348  ;;  %v14252_v13 = vor.u32 %v16079_v0, %v14251_v44 }
 0xaa9   :  { %v14808_v43 = vor.u32 %v16215_v37, %v14805_v6  ;;  %v13971_v11 = vld [vmem:[#allocation4 + $0xc0] sm:$0xf]  ;;  %v15200_v37 = vor.u32 %v16313_v2, %v15197_v4  ;;  %v14475_v6 = vld [vmem:[#allocation4 + $0x4b0] sm:$0xf]  ;;  %vm10727_vm2 = vweird.f32 %v21286_v26  ;;  %v13887_v2 = vld [vmem:[#allocation4 + $0x18] sm:$0xf] }
 0xaaa   :  { %10555 = vmatpush.bf16.msrb.mxu0 %v14612_v32  ;;  %10541 = vmatpush.bf16.msra.mxu2 %v14416_v55  ;;  %16350 = vpow2.f32 %v15241_v30  ;;  %v10262_v32 = vpop.f32.mrf.mxu2  ;;  %v10223_v8 = vpop.f32.mrf.mxu1  ;;  %v16208_v55 = vld [vmem:[#allocation4 + $0x714] sm:$0xf]  ;;  %v16058_v44 = vld [vmem:[#allocation4 + $0x260] sm:$0xf0]  ;;  %v14979_v0 = vld [vmem:[#allocation4 + $0x8a0] sm:$0xf] }
 0xaab   :  { %v16002_v32 = vld [vmem:[#allocation4 + $0xa0] sm:$0xf0]  ;;  %v14476_v8 = vor.u32 %v16135_v34, %v14475_v6  ;;  %vm21318_vm10 = vmor %vm10726_vm9, %vm10727_vm2  ;;  %vm10839_vm9 = vcmask 1045508  }
 0xaac   :  { %10566 = vmatpush.bf16.msrb.mxu3 %v14892_v20  ;;  %10526 = vmatpush.bf16.msrb.mxu1 %v14248_v56  ;;  %v16093_v20 = vld [vmem:[#allocation4 + $0x378] sm:$0xf0]  ;;  %v10275_v56 = vpop.f32.mrf.mxu3 }
 0xaad   :  { %v14308_v39 = vor.u32 %v16093_v20, %v14307_v49  ;;  %v13944_v56 = vor.u32 %v16002_v32, %v13943_v1 }
 0xaae   :  { %10556 = vmatpush.bf16.msrb.mxu0 %v14584_v60  ;;  %10542 = vmatpush.bf16.msra.mxu2 %v14388_v42  ;;  %v14133_v60 = vld [vmem:[#allocation4 + $0x224] sm:$0xf0]  ;;  %v14780_v42 = vor.u32 %v16208_v55, %v14777_v53  ;;  %v16299_v53 = vld [vmem:[#allocation4 + $0x9ec] sm:$0xf] }
 0xaaf   :  { %15237 = vmatmul.msk.bf16.vlgmr.msra.gmra.mxu1 %vm2287_vm0, %v21212_v22  ;;  %v14136_v61 = vor.u32 %v16047_v3, %v14133_v60  ;;  %v15141_v3 = vld [vmem:[#allocation4 + $0xa04] sm:$0xf0]  ;;  %v10730_v60 = vand.u32 2147483647, %v21276_v58 }
 0xab0   :  { %10567 = vmatpush.bf16.msrb.mxu3 %v14864_v9  ;;  %10527 = vmatpush.bf16.msrb.mxu1 %v14220_v47  ;;  %v16351_v9 = vpop.eup %16350  ;;  %v10722_v47 = vmul.f32 %v21286_v26, %v21276_v58 }
 0xab1   :  { %v21290_v46 = vadd.f32 1.0, %v16351_v9  ;;  %v15144_v9 = vor.u32 %v16299_v53, %v15141_v3  ;;  %vm10731_vm14 = vcmp.eq.f32.partialorder %v10730_v60, 8.507059e+37 }
 0xab2   :  { %10557 = vmatpush.bf16.msrb.mxu0 %v14556_v57  ;;  %10543 = vmatpush.bf16.msra.mxu2 %v14360_v19  ;;  %v21293_v57 = vpop.f32.mrf.mxu0  ;;  %v16009_v19 = vld [vmem:[#allocation4 + $0xd8] sm:$0xf0] }
 0xab3   :  { %16352 = vrcp.f32 %v21290_v46  ;;  %v13972_v30 = vor.u32 %v16009_v19, %v13971_v11  ;;  %v10747_v52 = vand.u32 2147483648, %v21290_v46  ;;  %v14196_v11 = vor.u32 %v16065_v18, %v14195_v5  ;;  %v15988_v19 = vld [vmem:[#allocation4 + $0x30] sm:$0xf0]  ;;  %v16107_v5 = vld [vmem:[#allocation4 + $0x3e8] sm:$0xf0] }
 0xab4   :  { %10568 = vmatpush.bf16.msrb.mxu3 %v14836_v16  ;;  %10528 = vmatpush.bf16.msrb.mxu1 %v14192_v54  ;;  %v10723_v16 = vsub.f32 1.0, %v10722_v47  ;;  %v21296_v54 = vpop.f32.mrf.mxu3  ;;  %v16121_v47 = vld [vmem:[#allocation4 + $0x458] sm:$0xf0]  ;;  %vm10741_vm11 = vweird.f32 %v21290_v46  ;;  %v15057_v18 = vld [vmem:[#allocation4 + $0x95c] sm:$0xf0] }
 0xab5   :  { %10558 = vmatmul.bf16.vlgmr.msrb.gmra.mxu0 %v21194_v33  ;;  %v10748_v32 = vor.u32 1.1754944e-38, %v10747_v52 }
 0xab6   :  { %10602 = vmatpush.bf16.msra.mxu0 %v14084_v45  ;;  %10544 = vmatpush.bf16.msra.mxu2 %v14332_v24  ;;  %v14280_v45 = vor.u32 %v16086_v38, %v14279_v62  ;;  %v14223_v24 = vld [vmem:[#allocation4 + $0x2b8] sm:$0xf]  ;;  %v10724_v49 = vmul.f32 %v21286_v26, %v10723_v16  ;;  %v16261_v16 = vld [vmem:[#allocation4 + $0x8b8] sm:$0xf0] }
 0xab7   :  { %v14224_v15 = vor.u32 %v16072_v35, %v14223_v24  ;;  %v16285_v35 = vld [vmem:[#allocation4 + $0x97c] sm:$0xf] }
 0xab8   :  { %10569 = vmatpush.bf16.msrb.mxu3 %v14808_v43  ;;  %10529 = vmatpush.bf16.msrb.mxu1 %v14164_v41  ;;  %v14447_v41 = vld [vmem:[#allocation4 + $0x478] sm:$0xf]  ;;  %v10725_v12 = vadd.f32 %v21286_v26, %v10724_v49 }
 0xab9   :  { %10545 = vmatmul.bf16.vlgmr.msra.gmra.mxu2 %v21200_v59  ;;  %v21300_v55 = vpop.eup %16352 }
 0xaba   :  { %10603 = vmatpush.bf16.msra.mxu0 %v14056_v23  ;;  %10596 = vmatpush.bf16.msrb.mxu2 %v15228_v31  ;;  %v15169_v23 = vld [vmem:[#allocation4 + $0xa3c] sm:$0xf0]  ;;  %v10301_v20 = vpop.f32.mrf.mxu0  ;;  %v16128_v31 = vld [vmem:[#allocation4 + $0x490] sm:$0xf0]  ;;  %vm10742_vm7 = vweird.f32 %v21300_v55  ;;  %v10729_v1 = vsel %vm21318_vm10, %v21286_v26, %v10725_v12  ;;  %v14139_v26 = vld [vmem:[#allocation4 + $0x210] sm:$0xf] }
 0xabb   :  { %v15172_v43 = vor.u32 %v16306_v36, %v15169_v23  ;;  %v14448_v50 = vor.u32 %v16128_v31, %v14447_v41  ;;  %v14391_v23 = vld [vmem:[#allocation4 + $0x408] sm:$0xf]  ;;  %vm10743_vm12 = vmor %vm10741_vm11, %vm10742_vm7  ;;  %v14980_v41 = vor.u32 %v16261_v16, %v14979_v0  ;;  %v14895_v16 = vld [vmem:[#allocation4 + $0x7f8] sm:$0xf] }
 0xabc   :  { %10570 = vmatpush.bf16.msrb.mxu3 %v14780_v42  ;;  %10530 = vmatpush.bf16.msrb.mxu1 %v14136_v61  ;;  %v14419_v42 = vld [vmem:[#allocation4 + $0x440] sm:$0xf]  ;;  %v21307_v61 = vor.u32 1.1754944e-38, %v10732_v7  ;;  %v10327_v38 = vpop.f32.mrf.mxu3  ;;  %v10286_v6 = vpop.f32.mrf.mxu1  ;;  %v15085_v7 = vld [vmem:[#allocation4 + $0x994] sm:$0xf0] }
 0xabd   :  { %v14420_v34 = vor.u32 %v16121_v47, %v14419_v42  ;;  %v10287_v24 = vadd.f32 %v10286_v6, %v21279_v14  ;;  %v14951_v31 = vld [vmem:[#allocation4 + $0x868] sm:$0xf]  ;;  %v16254_v14 = vld [vmem:[#allocation4 + $0x880] sm:$0xf0] }
 0xabe   :  { %10604 = vmatpush.bf16.msra.mxu0 %v14028_v51  ;;  %10615 = vmatpush.bf16.msra.mxu2 %v14308_v39  ;;  %v10737_v51 = vmul.f32 %v21300_v55, %v21290_v46  ;;  %v15995_v39 = vld [vmem:[#allocation4 + $0x68] sm:$0xf0]  ;;  %v14952_v60 = vor.u32 %v16254_v14, %v14951_v31  ;;  %v16198_v31 = vld [vmem:[#allocation4 + $0x6c0] sm:$0xf0] }
 0xabf   :  { %10571 = vmatmul.bf16.vlgmr.msrb.gmra.mxu3 %v21207_v25  ;;  %v13916_v27 = vor.u32 %v15995_v39, %v13915_v48  ;;  %v10300_v20 = vadd.f32 %v21293_v57, %v10287_v24  ;;  %v16278_v57 = vld [vmem:[#allocation4 + $0x944] sm:$0xf]  ;;  %v14755_v24 = vld [vmem:[#allocation4 + $0x6e0] sm:$0xf] }
 0xac0   :  { %10628 = vmatpush.bf16.msra.mxu3 %v14532_v17  ;;  %10531 = vmatpush.bf16.msrb.mxu1 %v14108_v29  ;;  %v10738_v62 = vsub.f32 1.0, %v10737_v51  ;;  %v16292_v17 = vld [vmem:[#allocation4 + $0x9b4] sm:$0xf]  ;;  %v14167_v29 = vld [vmem:[#allocation4 + $0x248] sm:$0xf]  ;;  %v15088_v51 = vor.u32 %v16285_v35, %v15085_v7  ;;  %v15060_v52 = vor.u32 %v16278_v57, %v15057_v18 }
 0xac1   :  { %v14867_v7 = vld [vmem:[#allocation4 + $0x7c0] sm:$0xf]  ;;  %v16191_v57 = vld [vmem:[#allocation4 + $0x688] sm:$0xf0] }
 0xac2   :  { %10605 = vmatpush.bf16.msra.mxu0 %v14000_v21  ;;  %10616 = vmatpush.bf16.msra.mxu2 %v14280_v45  ;;  %v15113_v21 = vld [vmem:[#allocation4 + $0x9cc] sm:$0xf0]  ;;  %v10739_v4 = vmul.f32 %v21300_v55, %v10738_v62  ;;  %v10745_v45 = vand.u32 2147483647, %v21290_v46  ;;  %v13888_v46 = vor.u32 %v15988_v19, %v13887_v2  ;;  %v14111_v62 = vld [vmem:[#allocation4 + $0x1d8] sm:$0xf] }
 0xac3   :  { %10532 = vmatmul.bf16.vlgmr.msrb.gmra.mxu1 %v21187_v63  ;;  %v15116_v36 = vor.u32 %v16292_v17, %v15113_v21  ;;  %v15203_v21 = vld [vmem:[#allocation4 + $0xa60] sm:$0xf]  ;;  %v16317_v2 = vld [vmem:[#allocation4 + $0xa78] sm:$0xf0] }
 0xac4   :  { %10629 = vmatpush.bf16.msra.mxu3 %v14504_v40  ;;  %10576 = vmatpush.bf16.msra.mxu1 %v15200_v37  ;;  %v10740_v37 = vadd.f32 %v21300_v55, %v10739_v4  ;;  %vm10746_vm13 = vcmp.eq.f32.partialorder %v10745_v45, 8.507059e+37  ;;  %v21337_v39 = vpop.f32.mrf.mxu3  ;;  %v10288_v47 = vpop.f32.mrf.mxu1  ;;  %v16100_v4 = vld [vmem:[#allocation4 + $0x3b0] sm:$0xf0]  ;;  %v16271_v45 = vld [vmem:[#allocation4 + $0x90c] sm:$0xf]  ;;  %v15204_v0 = vor.u32 %v16317_v2, %v15203_v21 }
 0xac5   :  { %v16240_v40 = vld [vmem:[#allocation4 + $0x810] sm:$0xf0]  ;;  %v16282_v21 = vld [vmem:[#allocation4 + $0x960] sm:$0xf0] }
 0xac6   :  { %10606 = vmatpush.bf16.msra.mxu0 %v13972_v30  ;;  %10617 = vmatpush.bf16.msra.mxu2 %v14252_v13  ;;  %v10312_v30 = vpop.f32.mrf.mxu2  ;;  %v16114_v13 = vld [vmem:[#allocation4 + $0x420] sm:$0xf0]  ;;  %v16184_v47 = vld [vmem:[#allocation4 + $0x650] sm:$0xf0] }
 0xac7   :  { %v14392_v3 = vor.u32 %v16114_v13, %v14391_v23  ;;  %v10313_v48 = vadd.f32 %v10312_v30, %v10300_v20  ;;  %v15175_v30 = vld [vmem:[#allocation4 + $0xa28] sm:$0xf]  ;;  %v15001_v23 = vld [vmem:[#allocation4 + $0x8ec] sm:$0xf0] }
 0xac8   :  { %10630 = vmatpush.bf16.msra.mxu3 %v14476_v8  ;;  %10577 = vmatpush.bf16.msra.mxu1 %v15172_v43  ;;  %v10744_v8 = vsel %vm10743_vm12, %v21300_v55, %v10740_v37  ;;  %v14168_v43 = vor.u32 %v16058_v44, %v14167_v29  ;;  %v14363_v55 = vld [vmem:[#allocation4 + $0x3d0] sm:$0xf]  ;;  %v15231_v29 = vld [vmem:[#allocation4 + $0xa98] sm:$0xf]  ;;  %v16324_v44 = vld [vmem:[#allocation4 + $0xab0] sm:$0xf0] }
 0xac9   :  { %15238 = vmatmul.msk.bf16.vlgmr.msrb.gmra.mxu2 %vm2287_vm0, %v21212_v22  ;;  %v10749_v49 = vsel %vm10746_vm13, %v10748_v32, %v10744_v8  ;;  %v21343_v38 = vadd.f32 %v21296_v54, %v10313_v48  ;;  %v14364_v12 = vor.u32 %v16107_v5, %v14363_v55  ;;  %v15232_v13 = vor.u32 %v16324_v44, %v15231_v29  ;;  %v16233_v8 = vld [vmem:[#allocation4 + $0x7d8] sm:$0xf0]  ;;  %v16296_v55 = vld [vmem:[#allocation4 + $0x9d0] sm:$0xf0]  ;;  %v14699_v5 = vld [vmem:[#allocation4 + $0x670] sm:$0xf] }
 0xaca   :  { %10607 = vmatpush.bf16.msra.mxu0 %v13944_v56  ;;  %10618 = vmatpush.bf16.msra.mxu2 %v14224_v15  ;;  %v16051_v56 = vld [vmem:[#allocation4 + $0x228] sm:$0xf0]  ;;  %v10833_v53 = vrot.slane %v10749_v49, 6  ;;  %v10734_v15 = vsel %vm10731_vm14, %v21307_v61, %v10729_v1  ;;  %v14923_v61 = vld [vmem:[#allocation4 + $0x830] sm:$0xf]  ;;  %v14896_v32 = vor.u32 %v16240_v40, %v14895_v16  ;;  %v14868_v20 = vor.u32 %v16233_v8, %v14867_v7 }
 0xacb   :  { %v14140_v58 = vor.u32 %v16051_v56, %v14139_v26  ;;  %v16303_v26 = vld [vmem:[#allocation4 + $0xa08] sm:$0xf0]  ;;  %v14727_v56 = vld [vmem:[#allocation4 + $0x6a8] sm:$0xf]  ;;  %v16177_v29 = vld [vmem:[#allocation4 + $0x618] sm:$0xf0] }
 0xacc   :  { %10631 = vmatpush.bf16.msra.mxu3 %v14448_v50  ;;  %10578 = vmatpush.bf16.msra.mxu1 %v15144_v9  ;;  %v21340_v42 = vsel %vm2928_vm1, %v10734_v15, %v10833_v53  ;;  %v16044_v50 = vld [vmem:[#allocation4 + $0x1f0] sm:$0xf0]  ;;  %v16247_v9 = vld [vmem:[#allocation4 + $0x848] sm:$0xf0]  ;;  %v14839_v53 = vld [vmem:[#allocation4 + $0x788] sm:$0xf]  ;;  %v14728_v15 = vor.u32 %v16198_v31, %v14727_v56 }
 0xacd   :  { %v14112_v54 = vor.u32 %v16044_v50, %v14111_v62  ;;  %v14924_v19 = vor.u32 %v16247_v9, %v14923_v61  ;;  %v16289_v62 = vld [vmem:[#allocation4 + $0x998] sm:$0xf0]  ;;  %v14700_v50 = vor.u32 %v16191_v57, %v14699_v5  ;;  %v14671_v9 = vld [vmem:[#allocation4 + $0x638] sm:$0xf]  ;;  %v16275_v16 = vld [vmem:[#allocation4 + $0x928] sm:$0xf0] }
 0xace   :  { %10608 = vmatpush.bf16.msra.mxu0 %v13916_v27  ;;  %10619 = vmatpush.bf16.msra.mxu2 %v14196_v11  ;;  %v10314_v17 = vpop.f32.mrf.mxu2  ;;  %v14335_v27 = vld [vmem:[#allocation4 + $0x398] sm:$0xf]  ;;  %v15029_v11 = vld [vmem:[#allocation4 + $0x924] sm:$0xf0]  ;;  %v21346_v1 = vpop.f32.mrf.mxu0  ;;  %v21357_v8 = vld [vmem:[%s21428_s20] sm:$0x7f] }
 0xacf   :  { %v14336_v37 = vor.u32 %v16100_v4, %v14335_v27  ;;  %v15032_v6 = vor.u32 %v16271_v45, %v15029_v11  ;;  %v15063_v27 = vld [vmem:[#allocation4 + $0x948] sm:$0xf]  ;;  %v14672_v45 = vor.u32 %v16184_v47, %v14671_v9 }
 0xad0   :  { %10632 = vmatpush.bf16.msra.mxu3 %v14420_v34  ;;  %10579 = vmatpush.bf16.msra.mxu1 %v15116_v36  ;;  %v16310_v34 = vld [vmem:[#allocation4 + $0xa40] sm:$0xf0]  ;;  %v10353_v36 = vpop.f32.mrf.mxu3  ;;  %v15064_v44 = vor.u32 %v16282_v21, %v15063_v27 }
 0xad1   :  { %v15176_v35 = vor.u32 %v16310_v34, %v15175_v30  ;;  %v16170_v30 = vld [vmem:[#allocation4 + $0x5e0] sm:$0xf0]  ;;  %v15007_v36 = vld [vmem:[#allocation4 + $0x8d8] sm:$0xf] }
 0xad2   :  { %10609 = vmatpush.bf16.msra.mxu0 %v13888_v46  ;;  %10620 = vmatpush.bf16.msra.mxu2 %v14168_v43  ;;  %v16205_v46 = vld [vmem:[#allocation4 + $0x6f8] sm:$0xf0] }
 0xad3   :  { %v14756_v49 = vor.u32 %v16205_v46, %v14755_v24  ;;  %v14587_v46 = vld [vmem:[#allocation4 + $0x590] sm:$0xf] }
 0xad4   :  { %10633 = vmatpush.bf16.msra.mxu3 %v14392_v3  ;;  %10580 = vmatpush.bf16.msra.mxu1 %v15088_v51  ;;  %v16226_v3 = vld [vmem:[#allocation4 + $0x7a0] sm:$0xf0]  ;;  %v15119_v51 = vld [vmem:[#allocation4 + $0x9b8] sm:$0xf] }
 0xad5   :  { %10610 = vmatmul.bf16.vlgmr.msra.gmra.mxu0 %v21192_v28  ;;  %v16264_v28 = vld [vmem:[#allocation4 + $0x8d4] sm:$0xf]  ;;  %v15120_v18 = vor.u32 %v16296_v55, %v15119_v51  ;;  %v8279_v55 = vperm.slane %v21357_v8, 4 }
 0xad6   :  { %10654 = vmatpush.bf16.msrb.mxu0 %v14980_v41  ;;  %10621 = vmatpush.bf16.msra.mxu2 %v14140_v58  ;;  %v15004_v43 = vor.u32 %v16264_v28, %v15001_v23  ;;  %v15147_v41 = vld [vmem:[#allocation4 + $0x9f0] sm:$0xf]  ;;  %v10366_v48 = vpop.f32.mrf.mxu0  ;;  %v16268_v28 = vld [vmem:[#allocation4 + $0x8f0] sm:$0xf0] }
 0xad7   :  { %v15148_v14 = vor.u32 %v16303_v26, %v15147_v41  ;;  %v14811_v58 = vld [vmem:[#allocation4 + $0x750] sm:$0xf]  ;;  %v15008_v7 = vor.u32 %v16268_v28, %v15007_v36  ;;  %v14559_v26 = vld [vmem:[#allocation4 + $0x558] sm:$0xf] }
 0xad8   :  { %10634 = vmatpush.bf16.msra.mxu3 %v14364_v12  ;;  %10581 = vmatpush.bf16.msra.mxu1 %v15060_v52  ;;  %v14783_v12 = vld [vmem:[#allocation4 + $0x718] sm:$0xf]  ;;  %v16212_v52 = vld [vmem:[#allocation4 + $0x730] sm:$0xf0] }
 0xada   :  { %10655 = vmatpush.bf16.msrb.mxu0 %v14952_v60  ;;  %10622 = vmatpush.bf16.msra.mxu2 %v14112_v54  ;;  %v15091_v60 = vld [vmem:[#allocation4 + $0x980] sm:$0xf]  ;;  %v14784_v54 = vor.u32 %v16212_v52, %v14783_v12 }
 0xadb   :  { %v15092_v17 = vor.u32 %v16289_v62, %v15091_v60 }
 0xadc   :  { %10635 = vmatpush.bf16.msra.mxu3 %v14336_v37  ;;  %10582 = vmatpush.bf16.msra.mxu1 %v15032_v6  ;;  %v10338_v2 = vpop.f32.mrf.mxu1  ;;  %v10377_v4 = vpop.f32.mrf.mxu2  ;;  %v14615_v6 = vld [vmem:[#allocation4 + $0x5c8] sm:$0xf] }
 0xadd   :  { %10623 = vmatmul.bf16.vlgmr.msra.gmra.mxu2 %v21187_v63  ;;  %v14840_v63 = vor.u32 %v16226_v3, %v14839_v53 }
 0xade   :  { %10656 = vmatpush.bf16.msrb.mxu0 %v14924_v19  ;;  %10667 = vmatpush.bf16.msrb.mxu2 %v15204_v0  ;;  %v10416_v11 = vpop.f32.mrf.mxu0  ;;  %v14643_v19 = vld [vmem:[#allocation4 + $0x600] sm:$0xf]  ;;  %v15035_v0 = vld [vmem:[#allocation4 + $0x910] sm:$0xf] }
 0xadf   :  { %10636 = vmatmul.bf16.vlgmr.msra.gmra.mxu3 %v21200_v59  ;;  %v16219_v59 = vld [vmem:[#allocation4 + $0x768] sm:$0xf0]  ;;  %v14644_v40 = vor.u32 %v16177_v29, %v14643_v19  ;;  %v15036_v34 = vor.u32 %v16275_v16, %v15035_v0 }
 0xae0   :  { %10687 = vmatpush.bf16.msrb.mxu3 %v15232_v13  ;;  %10583 = vmatpush.bf16.msra.mxu1 %v15004_v43  ;;  %v14812_v61 = vor.u32 %v16219_v59, %v14811_v58 }
 0xae2   :  { %10657 = vmatpush.bf16.msrb.mxu0 %v14896_v32  ;;  %10668 = vmatpush.bf16.msrb.mxu2 %v15176_v35  ;;  %v10403_v37 = vpop.f32.mrf.mxu3  ;;  %v14616_v32 = vor.u32 %v16170_v30, %v14615_v6  ;;  %v16163_v35 = vld [vmem:[#allocation4 + $0x5a8] sm:$0xf0] }
 0xae3   :  { %10584 = vmatmul.bf16.vlgmr.msra.gmra.mxu1 %v21202_v10  ;;  %v14588_v43 = vor.u32 %v16163_v35, %v14587_v46 }
 0xae4   :  { %10641 = vmatpush.bf16.msrb.mxu1 %v14756_v49  ;;  %v10340_v23 = vpop.f32.mrf.mxu1  ;;  %v10379_v13 = vpop.f32.mrf.mxu2  ;;  %v16156_v49 = vld [vmem:[#allocation4 + $0x570] sm:$0xf0] }
 0xae5   :  { %v14560_v56 = vor.u32 %v16156_v49, %v14559_v26 }
 0xae6   :  { %10658 = vmatpush.bf16.msrb.mxu0 %v14868_v20  ;;  %10669 = vmatpush.bf16.msrb.mxu2 %v15148_v14  ;;  %v10418_v24 = vpop.f32.mrf.mxu0 }
 0xae8   :  { %10642 = vmatpush.bf16.msrb.mxu1 %v14728_v15 }
 0xaea   :  { %10659 = vmatpush.bf16.msrb.mxu0 %v14840_v63  ;;  %10670 = vmatpush.bf16.msrb.mxu2 %v15120_v18  ;;  %v10405_v41 = vpop.f32.mrf.mxu3 }
 0xaec   :  { %10643 = vmatpush.bf16.msrb.mxu1 %v14700_v50 }
 0xaee   :  { %10660 = vmatpush.bf16.msrb.mxu0 %v14812_v61  ;;  %10671 = vmatpush.bf16.msrb.mxu2 %v15092_v17 }
 0xaef   :  { %15239 = vmatmul.msk.bf16.vlgmr.msrb.gmra.mxu3 %vm2287_vm0, %v21212_v22  ;;  %v8278_v22 = vperm.slane %v21357_v8, 3 }
 0xaf0   :  { %10644 = vmatpush.bf16.msrb.mxu1 %v14672_v45 }
 0xaf1   :  { %v10339_v20 = vadd.f32 %v10338_v2, %v8278_v22 }
 0xaf2   :  { %10661 = vmatpush.bf16.msrb.mxu0 %v14784_v54  ;;  %10672 = vmatpush.bf16.msrb.mxu2 %v15064_v44  ;;  %v10442_v31 = vpop.f32.mrf.mxu0 }
 0xaf3   :  { %v10352_v14 = vadd.f32 %v21337_v39, %v10339_v20 }
 0xaf4   :  { %10645 = vmatpush.bf16.msrb.mxu1 %v14644_v40 }
 0xaf5   :  { %10662 = vmatmul.bf16.vlgmr.msrb.gmra.mxu0 %v21207_v25  ;;  %v15242_v25 = vmul.f32 -1.442695, %v21343_v38  ;;  %v10365_v53 = vadd.f32 %v21346_v1, %v10352_v14  ;;  %v8280_v14 = vperm.slane %v21357_v8, 5 }
 0xaf6   :  { %10673 = vmatpush.bf16.msrb.mxu2 %v15036_v34 }
 0xaf7   :  { %16354 = vpow2.f32 %v15242_v25  ;;  %v10378_v15 = vadd.f32 %v10377_v4, %v10365_v53 }
 0xaf8   :  { %10646 = vmatpush.bf16.msrb.mxu1 %v14616_v32 }
 0xafa   :  { %10674 = vmatpush.bf16.msrb.mxu2 %v15008_v7  ;;  %v10444_v3 = vpop.f32.mrf.mxu0 }
 0xafc   :  { %10647 = vmatpush.bf16.msrb.mxu1 %v14588_v43  ;;  %v10390_v48 = vpop.f32.mrf.mxu1  ;;  %v10429_v63 = vpop.f32.mrf.mxu2 }
 0xafd   :  { %10675 = vmatmul.bf16.vlgmr.msrb.gmra.mxu2 %v21202_v10  ;;  %v16355_v51 = vpop.eup %16354  ;;  %v10391_v5 = vadd.f32 %v10390_v48, %v10378_v15  ;;  %v10430_v57 = vadd.f32 %v10429_v63, %v8279_v55 }
 0xafe   :  { %v10716_v38 = vadd.f32 1.0, %v16355_v51 }
 0xaff   :  { %v10404_v10 = vadd.f32 %v10403_v37, %v10391_v5  ;;  %v10443_v18 = vadd.f32 %v10442_v31, %v10430_v57 }
 0xb00   :  { %10648 = vmatpush.bf16.msrb.mxu1 %v14560_v56  ;;  %16356 = vrcp.f32 %v10716_v38  ;;  %v10762_v4 = vand.u32 2147483648, %v10716_v38  ;;  %vm10756_vm15 = vweird.f32 %v10716_v38  ;;  %v10760_v45 = vand.u32 2147483647, %v10716_v38 }
 0xb01   :  { %v10417_v58 = vadd.f32 %v10416_v11, %v10404_v10 }
 0xb02   :  { %v10468_v39 = vpop.f32.mrf.mxu3  ;;  %v10763_v40 = vor.u32 1.1754944e-38, %v10762_v4  ;;  %vm10761_vm5 = vcmp.eq.f32.partialorder %v10760_v45, 8.507059e+37 }
 0xb03   :  { %10649 = vmatmul.bf16.vlgmr.msrb.gmra.mxu1 %v21194_v33  ;;  %v15243_v59 = vmul.f32 -1.442695, %v10417_v58 }
 0xb04   :  { %v10392_v60 = vpop.f32.mrf.mxu1  ;;  %v10431_v33 = vpop.f32.mrf.mxu2 }
 0xb05   :  { %16358 = vpow2.f32 %v15243_v59 }
 0xb06   :  { %v16357_v1 = vpop.eup %16356 }
 0xb07   :  { %v10752_v62 = vmul.f32 %v16357_v1, %v10716_v38  ;;  %vm10757_vm0 = vweird.f32 %v16357_v1 }
 0xb08   :  { %vm10758_vm4 = vmor %vm10756_vm15, %vm10757_vm0 }
 0xb09   :  { %v10753_v47 = vsub.f32 1.0, %v10752_v62 }
 0xb0a   :  { %v10470_v50 = vpop.f32.mrf.mxu3 }
 0xb0b   :  { %v16359_v61 = vpop.eup %16358  ;;  %v10754_v12 = vmul.f32 %v16357_v1, %v10753_v47 }
 0xb0c   :  { %v10717_v9 = vadd.f32 1.0, %v16359_v61 }
 0xb0d   :  { %v10755_v27 = vadd.f32 %v16357_v1, %v10754_v12 }
 0xb0e   :  { %16360 = vrcp.f32 %v10717_v9  ;;  %v10777_v54 = vand.u32 2147483648, %v10717_v9  ;;  %v10775_v44 = vand.u32 2147483647, %v10717_v9  ;;  %vm10771_vm6 = vweird.f32 %v10717_v9 }
 0xb0f   :  { %v10759_v19 = vsel %vm10758_vm4, %v16357_v1, %v10755_v27 }
 0xb10   :  { %v10764_v30 = vsel %vm10761_vm5, %v10763_v40, %v10759_v19  ;;  %v10778_v34 = vor.u32 1.1754944e-38, %v10777_v54  ;;  %vm10776_vm7 = vcmp.eq.f32.partialorder %v10775_v44, 8.507059e+37 }
 0xb11   :  { %v10834_v24 = vrot.slane %v10764_v30, 4 }
 0xb12   :  { %v10494_v17 = vpop.f32.mrf.mxu0 }
 0xb14   :  { %v16361_v52 = vpop.eup %16360 }
 0xb15   :  { %v10767_v21 = vmul.f32 %v16361_v52, %v10717_v9  ;;  %vm10772_vm3 = vweird.f32 %v16361_v52 }
 0xb16   :  { %vm10773_vm2 = vmor %vm10771_vm6, %vm10772_vm3  ;;  %vm10847_vm3 = vcmask 1043458  }
 0xb17   :  { %v10768_v11 = vsub.f32 1.0, %v10767_v21 }
 0xb19   :  { %v10769_v29 = vmul.f32 %v16361_v52, %v10768_v11  ;;  %v8281_v11 = vperm.slane %v21357_v8, 6 }
 0xb1a   :  { %v10496_v2 = vpop.f32.mrf.mxu0 }
 0xb1b   :  { %v10770_v6 = vadd.f32 %v16361_v52, %v10769_v29 }
 0xb1c   :  { %v10455_v0 = vpop.f32.mrf.mxu1  ;;  %v10481_v16 = vpop.f32.mrf.mxu2 }
 0xb1d   :  { %v10456_v37 = vadd.f32 %v10455_v0, %v10443_v18  ;;  %v10774_v28 = vsel %vm10773_vm2, %v16361_v52, %v10770_v6  ;;  %vm10848_vm2 = vmor %vm10847_vm3, %vm2928_vm1 }
 0xb1e   :  { %v10779_v23 = vsel %vm10776_vm7, %v10778_v34, %v10774_v28 }
 0xb1f   :  { %v10469_v36 = vadd.f32 %v10468_v39, %v10456_v37  ;;  %v10835_v46 = vrot.slane %v10779_v23, 2 }
 0xb21   :  { %v10482_v13 = vadd.f32 %v10481_v16, %v10469_v36  ;;  %v10840_v7 = vsel %vm10839_vm9, %v10834_v24, %v10835_v46  ;;  %vm10849_vm9 = vcmask 128004  }
 0xb22   :  { %v10520_v32 = vpop.f32.mrf.mxu3  ;;  %v10841_v41 = vsel %vm3348_vm8, %v21340_v42, %v10840_v7 }
 0xb23   :  { %v10495_v35 = vadd.f32 %v10494_v17, %v10482_v13  ;;  %10846 = vst [vmem:[%s21406_s21] sm:$0xff] %v10841_v41  ;;  %v10521_v3 = vadd.f32 %v10520_v32, %v8280_v14 }
 0xb24   :  { %v10457_v22 = vpop.f32.mrf.mxu1  ;;  %v10483_v43 = vpop.f32.mrf.mxu2 }
 0xb2a   :  { %v10522_v26 = vpop.f32.mrf.mxu3 }
 0xb2c   :  { %v10507_v49 = vpop.f32.mrf.mxu1 }
 0xb2d   :  { %v10508_v25 = vadd.f32 %v10507_v49, %v10495_v35 }
 0xb2f   :  { %v15244_v18 = vmul.f32 -1.442695, %v10508_v25 }
 0xb31   :  { %16362 = vpow2.f32 %v15244_v18 }
 0xb32   :  { %v10559_v20 = vpop.f32.mrf.mxu0 }
 0xb34   :  { %v10509_v56 = vpop.f32.mrf.mxu1 }
 0xb37   :  { %v16363_v59 = vpop.eup %16362 }
 0xb38   :  { %v10718_v50 = vadd.f32 1.0, %v16363_v59 }
 0xb3a   :  { %v10561_v31 = vpop.f32.mrf.mxu0  ;;  %16364 = vrcp.f32 %v10718_v50  ;;  %vm10786_vm12 = vweird.f32 %v10718_v50  ;;  %v10792_v13 = vand.u32 2147483648, %v10718_v50  ;;  %v10790_v24 = vand.u32 2147483647, %v10718_v50 }
 0xb3c   :  { %v10546_v53 = vpop.f32.mrf.mxu2  ;;  %v10793_v49 = vor.u32 1.1754944e-38, %v10792_v13  ;;  %vm10791_vm4 = vcmp.eq.f32.partialorder %v10790_v24, 8.507059e+37 }
 0xb40   :  { %v10533_v51 = vpop.f32.mrf.mxu1  ;;  %v16365_v27 = vpop.eup %16364 }
 0xb41   :  { %v10534_v55 = vadd.f32 %v10533_v51, %v10521_v3  ;;  %v10782_v45 = vmul.f32 %v16365_v27, %v10718_v50  ;;  %vm10787_vm10 = vweird.f32 %v16365_v27 }
 0xb42   :  { %v10572_v15 = vpop.f32.mrf.mxu3  ;;  %vm21373_vm13 = vmor %vm10786_vm12, %vm10787_vm10 }
 0xb43   :  { %v10547_v38 = vadd.f32 %v10546_v53, %v10534_v55  ;;  %v10783_v19 = vsub.f32 1.0, %v10782_v45 }
 0xb44   :  { %v10548_v42 = vpop.f32.mrf.mxu2 }
 0xb45   :  { %v10560_v48 = vadd.f32 %v10559_v20, %v10547_v38  ;;  %v10784_v16 = vmul.f32 %v16365_v27, %v10783_v19 }
 0xb47   :  { %v10573_v60 = vadd.f32 %v10572_v15, %v10560_v48  ;;  %v10785_v36 = vadd.f32 %v16365_v27, %v10784_v16 }
 0xb48   :  { %v10535_v63 = vpop.f32.mrf.mxu1 }
 0xb49   :  { %v10789_v41 = vsel %vm21373_vm13, %v16365_v27, %v10785_v36 }
 0xb4a   :  { %v10574_v5 = vpop.f32.mrf.mxu3  ;;  %v10794_v31 = vsel %vm10791_vm4, %v10793_v49, %v10789_v41 }
 0xb4c   :  { %v10598_v57 = vpop.f32.mrf.mxu2 }
 0xb52   :  { %v10611_v10 = vpop.f32.mrf.mxu0 }
 0xb53   :  { %v10612_v44 = vadd.f32 %v10611_v10, %v8281_v11 }
 0xb54   :  { %v10600_v58 = vpop.f32.mrf.mxu2 }
 0xb5a   :  { %v10613_v39 = vpop.f32.mrf.mxu0 }
 0xb60   :  { %v10585_v33 = vpop.f32.mrf.mxu1  ;;  %v10624_v1 = vpop.f32.mrf.mxu2 }
 0xb61   :  { %v10586_v62 = vadd.f32 %v10585_v33, %v10573_v60  ;;  %v10625_v37 = vadd.f32 %v10624_v1, %v10612_v44 }
 0xb62   :  { %v10637_v61 = vpop.f32.mrf.mxu3 }
 0xb63   :  { %v10599_v9 = vadd.f32 %v10598_v57, %v10586_v62  ;;  %v10638_v32 = vadd.f32 %v10637_v61, %v10625_v37 }
 0xb65   :  { %v15245_v47 = vmul.f32 -1.442695, %v10599_v9 }
 0xb67   :  { %16366 = vpow2.f32 %v15245_v47 }
 0xb68   :  { %v10587_v17 = vpop.f32.mrf.mxu1  ;;  %v10626_v12 = vpop.f32.mrf.mxu2 }
 0xb6a   :  { %v10639_v52 = vpop.f32.mrf.mxu3 }
 0xb6d   :  { %v16367_v21 = vpop.eup %16366 }
 0xb6e   :  { %v10719_v2 = vadd.f32 1.0, %v16367_v21 }
 0xb70   :  { %16368 = vrcp.f32 %v10719_v2  ;;  %v10807_v30 = vand.u32 2147483648, %v10719_v2  ;;  %v10805_v23 = vand.u32 2147483647, %v10719_v2  ;;  %vm10801_vm14 = vweird.f32 %v10719_v2 }
 0xb72   :  { %v10663_v4 = vpop.f32.mrf.mxu0  ;;  %v10689_v54 = vpop.f32.mrf.mxu3  ;;  %v10808_v22 = vor.u32 1.1754944e-38, %v10807_v30  ;;  %vm10806_vm15 = vcmp.eq.f32.partialorder %v10805_v23, 8.507059e+37 }
 0xb76   :  { %v16369_v29 = vpop.eup %16368 }
 0xb77   :  { %v10797_v40 = vmul.f32 %v16369_v29, %v10719_v2  ;;  %vm10802_vm11 = vweird.f32 %v16369_v29 }
 0xb78   :  { %vm10803_vm0 = vmor %vm10801_vm14, %vm10802_vm11 }
 0xb79   :  { %v10798_v6 = vsub.f32 1.0, %v10797_v40  ;;  %vm10850_vm11 = vmor %vm10849_vm9, %vm10848_vm2 }
 0xb7a   :  { %v10665_v0 = vpop.f32.mrf.mxu0  ;;  %v10691_v34 = vpop.f32.mrf.mxu3 }
 0xb7b   :  { %v10799_v28 = vmul.f32 %v16369_v29, %v10798_v6 }
 0xb7d   :  { %v10800_v46 = vadd.f32 %v16369_v29, %v10799_v28 }
 0xb7f   :  { %v10804_v26 = vsel %vm10803_vm0, %v16369_v29, %v10800_v46 }
 0xb80   :  { %v10650_v35 = vpop.f32.mrf.mxu1  ;;  %v10676_v7 = vpop.f32.mrf.mxu2  ;;  %v10809_v25 = vsel %vm10806_vm15, %v10808_v22, %v10804_v26 }
 0xb81   :  { %v10651_v43 = vadd.f32 %v10650_v35, %v10638_v32  ;;  %v10836_v56 = vrot.slane %v10809_v25, 6 }
 0xb83   :  { %v10664_v20 = vadd.f32 %v10663_v4, %v10651_v43  ;;  %v10842_v53 = vsel %vm2928_vm1, %v10794_v31, %v10836_v56 }
 0xb85   :  { %v10677_v14 = vadd.f32 %v10676_v7, %v10664_v20 }
 0xb87   :  { %v10690_v3 = vadd.f32 %v10689_v54, %v10677_v14 }
 0xb88   :  { %v10652_v51 = vpop.f32.mrf.mxu1  ;;  %v10678_v55 = vpop.f32.mrf.mxu2 }
 0xb89   :  { %v15246_v15 = vmul.f32 -1.442695, %v10690_v3 }
 0xb8b   :  { %16370 = vpow2.f32 %v15246_v15 }
 0xb91   :  { %v16371_v38 = vpop.eup %16370 }
 0xb92   :  { %v10720_v48 = vadd.f32 1.0, %v16371_v38 }
 0xb94   :  { %16372 = vrcp.f32 %v10720_v48  ;;  %v10822_v57 = vand.u32 2147483648, %v10720_v48  ;;  %v10820_v18 = vand.u32 2147483647, %v10720_v48  ;;  %vm10816_vm6 = vweird.f32 %v10720_v48 }
 0xb96   :  { %v10823_v39 = vor.u32 1.1754944e-38, %v10822_v57  ;;  %vm10821_vm10 = vcmp.eq.f32.partialorder %v10820_v18, 8.507059e+37 }
 0xb9a   :  { %v16373_v42 = vpop.eup %16372 }
 0xb9b   :  { %v10812_v63 = vmul.f32 %v16373_v42, %v10720_v48  ;;  %vm10817_vm5 = vweird.f32 %v16373_v42 }
 0xb9c   :  { %vm10818_vm7 = vmor %vm10816_vm6, %vm10817_vm5 }
 0xb9d   :  { %v10813_v5 = vsub.f32 1.0, %v10812_v63 }
 0xb9f   :  { %v10814_v10 = vmul.f32 %v16373_v42, %v10813_v5 }
 0xba1   :  { %v10815_v58 = vadd.f32 %v16373_v42, %v10814_v10 }
 0xba3   :  { %v10819_v59 = vsel %vm10818_vm7, %v16373_v42, %v10815_v58 }
 0xba4   :  { %v10824_v60 = vsel %vm10821_vm10, %v10823_v39, %v10819_v59 }
 0xba5   :  { %v10837_v33 = vrot.slane %v10824_v60, 4 }
 0xba7   :  { %v10843_v1 = vsel %vm3348_vm8, %v10842_v53, %v10837_v33 }
 0xba8   :  { %10851 = vst.msk [vmem:[%s21406_s21 + $0x8] sm:$0x3f] %vm10850_vm11, %v10843_v1 }
 0xba9   :  { %10860 = vsyncpa [#allocation3], 1 }
 0xbaa   :  { %10861 = vsyncpa [#allocation5], 1 }

</bundles_post_ra>
